<compile_context>
chip_gen: v7x
topology: tpu7x:2x2x1
jax: 0.10.0
libtpu: 0.0.40
codegen_flags: <defaults>
</compile_context>

<pallas_src>
import jax
import jax.numpy as jnp
from jax.experimental import pallas as pl
from jax.experimental.pallas import tpu as pltpu

BN_EPS = 1e-5
COUT = 32                                              # all three convs output 32 channels
LAYER_DIMS = ((32, 32, 3), (16, 16, 32), (8, 8, 32))    # (H, W, Cin) of each conv's input
WOC_MAX = 16 * COUT                                     # largest Wo*Cout (layer 1) = 512

VMEM_SPEC = pl.BlockSpec(memory_space=pltpu.MemorySpace.VMEM)


# ---------------------------------------------------------------------------
# The single fused kernel
# ---------------------------------------------------------------------------
def basic_cnn_ir_kernel(x_ref, m1_ref, m2_ref, m3_ref, p_ref, pt_ref, bn_ref,
                        fcw_ref, fcb_ref,
                        logits_ref, ir1_ref, ir2_ref, ir3_ref):
    batch = x_ref.shape[1]
    f32 = jnp.float32

    def conv_bn_relu(a, layer, m_ref):
        """a: (H, B, W*Cin) f32 activation.  Returns (Ho*B, Wo*COUT) f32, rows (ho, b)."""
        h, w, cin = LAYER_DIMS[layer]
        ho, wo = h // 2, w // 2
        wc_in = w * cin
        woc = wo * COUT

        # Zero-pad the height dim (width padding is already folded into the M matrices),
        # then split H into (half-index, parity) so stride-2 row selection is a plain slice.
        zrow = jnp.zeros((1, batch, wc_in), f32)
        ap = jnp.concatenate([zrow, a, zrow], axis=0)           # (H+2, B, W*Cin)
        apr = ap.reshape((h + 2) // 2, 2, batch, wc_in)         # leading-dim split only

        z = jnp.zeros((ho * batch, woc), f32)
        for kh in range(3):
            ak, pk = divmod(kh, 2)          # padded row rp = 2*ho + kh = 2*(ho + ak) + pk
            rows = apr[ak:ak + ho, pk]                          # (Ho, B, W*Cin)
            lhs = rows.reshape(ho * batch, wc_in)               # rows ordered (ho, b)
            # single-pass MXU matmul: bf16 operands, f32 accumulation
            z = z + jnp.dot(lhs.astype(jnp.bfloat16), m_ref[kh],
                            preferred_element_type=f32)

        # ---- fused training-mode BatchNorm + affine + ReLU (one FMA pass over z) ----
        p = p_ref[layer, :woc, :]            # (woc, COUT) 0/1: fold the (w, c) lane axis -> c
        pt = pt_ref[layer, :, :woc]          # (COUT, woc): broadcast per-channel back to lanes
        hp = jax.lax.Precision.HIGHEST       # tiny 1-row dots; keeps channel stats exact
        n = float(ho * batch * wo)
        s1 = jnp.sum(z, axis=0, keepdims=True)                  # (1, woc)
        s2 = jnp.sum(z * z, axis=0, keepdims=True)              # (1, woc)
        ch_sum = jnp.dot(s1, p, precision=hp)                   # (1, COUT)
        ch_sq = jnp.dot(s2, p, precision=hp)                    # (1, COUT)
        mean = ch_sum / n
        var = ch_sq / n - mean * mean
        gamma = bn_ref[layer, 0:1, :]                           # (1, COUT)
        beta = bn_ref[layer, 1:2, :]                            # (1, COUT)
        scale = gamma * jax.lax.rsqrt(var + BN_EPS)
        shift = beta - mean * scale
        scale_row = jnp.dot(scale, pt, precision=hp)            # (1, woc)
        shift_row = jnp.dot(shift, pt, precision=hp)            # (1, woc)
        return jnp.maximum(z * scale_row + shift_row, 0.0)      # (Ho*B, Wo*COUT)

    y1 = conv_bn_relu(x_ref[...], 0, m1_ref)                    # (16*B, 16*32)
    ir1_ref[...] = y1
    y2 = conv_bn_relu(y1.reshape(16, batch, 16 * COUT), 1, m2_ref)   # (8*B, 8*32)
    ir2_ref[...] = y2
    y3 = conv_bn_relu(y2.reshape(8, batch, 8 * COUT), 2, m3_ref)     # (4*B, 4*32)
    ir3_ref[...] = y3

    # fc1: logits[b, o] = sum_h  y3[(h, b), (w, c)] @ fcw[h, (w, c), o]   (+ bias)
    a3 = y3.reshape(4, batch, 4 * COUT)
    acc = jnp.zeros((batch, 10), f32)
    for hh in range(4):
        acc = acc + jnp.dot(a3[hh].astype(jnp.bfloat16), fcw_ref[hh],
                            preferred_element_type=f32)
    logits_ref[...] = acc + fcb_ref[...]


# ---------------------------------------------------------------------------
# One-time weight preparation (kept out of the per-forward activation path)
# ---------------------------------------------------------------------------
def expand_conv_weight(w_oihw, w_in):
    """OIHW (COUT, Cin, 3, 3) -> (3, W*Cin, Wo*COUT): per-kh matmul weights that fold in the
    kw taps, the stride-2 column selection and the width zero-padding of the conv."""
    cout, cin, kh, kw = w_oihw.shape
    wo = w_in // 2
    col = jnp.arange(w_in)[:, None, None]                                    # input column
    src = 2 * jnp.arange(wo)[None, :, None] - 1 + jnp.arange(kw)[None, None, :]
    onehot = (col == src).astype(w_oihw.dtype)                               # (W, Wo, KW)
    m = jnp.einsum("abk,oihk->haibo", onehot, w_oihw)                        # (KH, W, Cin, Wo, COUT)
    return m.reshape(kh, w_in * cin, wo * cout)


def channel_fold_matrices():
    """0/1 matrices mapping the fused (w, c) lane axis -> channel axis (and back)."""
    p_list, pt_list = [], []
    for (_h, w, _cin) in LAYER_DIMS:
        woc = (w // 2) * COUT
        p = (jnp.arange(woc)[:, None] % COUT == jnp.arange(COUT)[None, :]).astype(jnp.float32)
        p_list.append(jnp.pad(p, ((0, WOC_MAX - woc), (0, 0))))
        pt_list.append(jnp.pad(p.T, ((0, 0), (0, WOC_MAX - woc))))
    return jnp.stack(p_list), jnp.stack(pt_list)                             # (3,512,32),(3,32,512)


def prepare_params(params):
    convs = params["convs"]
    ms = [expand_conv_weight(w, dims[1]).astype(jnp.bfloat16)
          for (w, _b, _g, _bt), dims in zip(convs, LAYER_DIMS)]
    p_all, pt_all = channel_fold_matrices()
    # NOTE: the conv bias is intentionally dropped from the kernel inputs: training-mode BN
    # subtracts the batch mean immediately after the conv, so the bias cancels exactly.
    bn = jnp.stack([jnp.stack([g, bt]) for (_w, _b, g, bt) in convs])        # (3, 2, 32)
    fcw = (params["fc_w"].reshape(10, COUT, 4, 4).transpose(2, 3, 1, 0)
           .reshape(4, 4 * COUT, 10).astype(jnp.bfloat16))                   # (4, 128, 10)
    fcb = params["fc_b"].reshape(1, 10)
    return dict(m1=ms[0], m2=ms[1], m3=ms[2], p=p_all, pt=pt_all, bn=bn,
                fcw=fcw, fcb=fcb)


# ---------------------------------------------------------------------------
# Forward wrapper (single pallas_call; only tiny layout glue outside)
# ---------------------------------------------------------------------------
def basic_cnn_ir_forward(x_nchw, prep):
    b = x_nchw.shape[0]
    # NCHW -> (H, B, W*Cin) with lanes ordered (w, cin); the only activation-side XLA glue.
    x_lay = jnp.transpose(x_nchw, (2, 0, 3, 1)).reshape(32, b, 32 * 3)
    out_shape = (
        jax.ShapeDtypeStruct((b, 10), jnp.float32),
        jax.ShapeDtypeStruct((16 * b, 16 * COUT), jnp.float32),
        jax.ShapeDtypeStruct((8 * b, 8 * COUT), jnp.float32),
        jax.ShapeDtypeStruct((4 * b, 4 * COUT), jnp.float32),
    )
    logits, ir1, ir2, ir3 = pl.pallas_call(
        basic_cnn_ir_kernel,
        out_shape=out_shape,
        in_specs=[VMEM_SPEC] * 9,
        out_specs=(VMEM_SPEC,) * 4,
    )(x_lay, prep["m1"], prep["m2"], prep["m3"], prep["p"], prep["pt"],
      prep["bn"], prep["fcw"], prep["fcb"])

    def to_nchw(ir2d, ho):                       # kernel IR: rows (ho, b), lanes (wo, c)
        return ir2d.reshape(ho, b, ho, COUT).transpose(1, 3, 0, 2)[:10]

    return logits, (to_nchw(ir1, 16), to_nchw(ir2, 8), to_nchw(ir3, 4))


# ---------------------------------------------------------------------------
# Pure-XLA reference (same single-pass bf16-operand MXU policy as the kernel)
# ---------------------------------------------------------------------------
def reference_forward(x_nchw, params):
    bf16 = jnp.bfloat16
    x = x_nchw
    irs = []
    for (w, cb, gamma, beta) in params["convs"]:
        z = jax.lax.conv_general_dilated(
            x.astype(bf16), w.astype(bf16), window_strides=(2, 2),
            padding=((1, 1), (1, 1)), dimension_numbers=("NCHW", "OIHW", "NCHW"),
            preferred_element_type=jnp.float32)
        z = z + cb[None, :, None, None]           # reference keeps the bias (BN cancels it)
        mean = jnp.mean(z, axis=(0, 2, 3), keepdims=True)
        var = jnp.mean((z - mean) ** 2, axis=(0, 2, 3), keepdims=True)
        z = (z - mean) * jax.lax.rsqrt(var + BN_EPS)
        z = z * gamma[None, :, None, None] + beta[None, :, None, None]
        x = jnp.maximum(z, 0.0)
        irs.append(x[:10])
    xf = x.reshape(x.shape[0], -1)
    logits = jnp.dot(xf.astype(bf16), params["fc_w"].T.astype(bf16),
                     preferred_element_type=jnp.float32) + params["fc_b"]
    return logits, irs


# ---------------------------------------------------------------------------
# Main
# ---------------------------------------------------------------------------
def make_params(key):
    ks = jax.random.split(key, 8)

    def conv_params(k, cin, cout):
        k1, k2 = jax.random.split(k)
        w = jax.random.normal(k1, (cout, cin, 3, 3), jnp.float32) * 0.1     # OIHW
        b = jax.random.normal(k2, (cout,), jnp.float32) * 0.1
        gamma = jnp.ones((cout,), jnp.float32)
        beta = jnp.zeros((cout,), jnp.float32)
        return (w, b, gamma, beta)

    convs = [conv_params(ks[0], 3, 32), conv_params(ks[1], 32, 32), conv_params(ks[2], 32, 32)]
    fc_w = jax.random.normal(ks[3], (10, 32 * 4 * 4), jnp.float32) * 0.05
    fc_b = jax.random.normal(ks[4], (10,), jnp.float32) * 0.05
    return {"convs": convs, "fc_w": fc_w, "fc_b": fc_b}


if __name__ == "__main__":
    key = jax.random.PRNGKey(0)
    kx, kp = jax.random.split(key)

    batch = 8    # multiple of 8 keeps every in-kernel reshape exactly sublane-aligned
    x = jax.random.normal(kx, (batch, 3, 32, 32), jnp.float32)   # NCHW, CIFAR-sized
    params = make_params(kp)
    prep = prepare_params(params)

    fwd = jax.jit(basic_cnn_ir_forward)
    logits, irs = fwd(x, prep)
    logits = jax.block_until_ready(logits)
    for t in irs:
        jax.block_until_ready(t)

    ref_logits, ref_irs = reference_forward(x, params)
    ref_logits = jax.block_until_ready(ref_logits)

    assert logits.shape == (batch, 10), logits.shape
    for got, want in zip(irs, ref_irs):
        assert got.shape == want.shape, (got.shape, want.shape)
        assert jnp.allclose(got, want, rtol=5e-3, atol=5e-3), float(jnp.max(jnp.abs(got - want)))
    assert jnp.allclose(logits, ref_logits, rtol=5e-3, atol=5e-3), float(
        jnp.max(jnp.abs(logits - ref_logits)))

    print("KERNEL_OK")
</pallas_src>

<mosaic_0001>
module attributes {stable_mosaic.version = 11 : i64} {
  func.func @basic_cnn_ir_kernel(%arg0: memref<32x8x96xf32, #tpu.memory_space<vmem>>, %arg1: memref<3x96x512xbf16, #tpu.memory_space<vmem>>, %arg2: memref<3x512x256xbf16, #tpu.memory_space<vmem>>, %arg3: memref<3x256x128xbf16, #tpu.memory_space<vmem>>, %arg4: memref<3x512x32xf32, #tpu.memory_space<vmem>>, %arg5: memref<3x32x512xf32, #tpu.memory_space<vmem>>, %arg6: memref<3x2x32xf32, #tpu.memory_space<vmem>>, %arg7: memref<4x128x10xbf16, #tpu.memory_space<vmem>>, %arg8: memref<1x10xf32, #tpu.memory_space<vmem>>, %arg9: memref<8x10xf32, #tpu.memory_space<vmem>>, %arg10: memref<128x512xf32, #tpu.memory_space<vmem>>, %arg11: memref<64x256xf32, #tpu.memory_space<vmem>>, %arg12: memref<32x128xf32, #tpu.memory_space<vmem>>) attributes {dimension_semantics = [], scalar_prefetch = 0 : i64, scratch_operands = 0 : i64, tpu.core_type = #tpu.core_type<tc>} {
    %c0 = arith.constant 0 : index
    %c0_0 = arith.constant 0 : index
    %c0_1 = arith.constant 0 : index
    %0 = vector.load %arg0[%c0, %c0_0, %c0_1] : memref<32x8x96xf32, #tpu.memory_space<vmem>>, vector<32x8x96xf32>
    %cst = arith.constant 0.000000e+00 : f32
    %1 = vector.broadcast %cst : f32 to vector<1x8x96xf32>
    %2 = tpu.concatenate %1, %0, %1 in 0 : vector<1x8x96xf32>, vector<32x8x96xf32>, vector<1x8x96xf32> -> vector<34x8x96xf32>
    %3 = vector.shape_cast %2 : vector<34x8x96xf32> to vector<17x2x8x96xf32>
    %cst_2 = arith.constant 0.000000e+00 : f32
    %4 = vector.broadcast %cst_2 : f32 to vector<128x512xf32>
    %5 = vector.extract_strided_slice %3 {offsets = [0, 0, 0, 0], sizes = [16, 1, 8, 96], strides = [1, 1, 1, 1]} : vector<17x2x8x96xf32> to vector<16x1x8x96xf32>
    %6 = vector.shape_cast %5 : vector<16x1x8x96xf32> to vector<16x8x96xf32>
    %7 = vector.shape_cast %6 : vector<16x8x96xf32> to vector<128x96xf32>
    %8 = arith.truncf %7 : vector<128x96xf32> to vector<128x96xbf16>
    %c0_3 = arith.constant 0 : index
    %c0_4 = arith.constant 0 : index
    %c0_5 = arith.constant 0 : index
    %9 = vector.load %arg1[%c0_3, %c0_4, %c0_5] : memref<3x96x512xbf16, #tpu.memory_space<vmem>>, vector<1x96x512xbf16>
    %10 = vector.shape_cast %9 : vector<1x96x512xbf16> to vector<96x512xbf16>
    %cst_6 = arith.constant dense<0.000000e+00> : vector<128x512xf32>
    %11 = tpu.matmul %8, %10, %cst_6 {dimension_numbers = #tpu.dot_dimension_numbers<[1], [0], [0], [1], [0, 0, 1, 1], [], []>} : vector<128x96xbf16>, vector<96x512xbf16>, vector<128x512xf32> -> vector<128x512xf32>
    %12 = arith.addf %4, %11 : vector<128x512xf32>
    %13 = vector.extract_strided_slice %3 {offsets = [0, 1, 0, 0], sizes = [16, 1, 8, 96], strides = [1, 1, 1, 1]} : vector<17x2x8x96xf32> to vector<16x1x8x96xf32>
    %14 = vector.shape_cast %13 : vector<16x1x8x96xf32> to vector<16x8x96xf32>
    %15 = vector.shape_cast %14 : vector<16x8x96xf32> to vector<128x96xf32>
    %16 = arith.truncf %15 : vector<128x96xf32> to vector<128x96xbf16>
    %c1 = arith.constant 1 : index
    %c0_7 = arith.constant 0 : index
    %c0_8 = arith.constant 0 : index
    %17 = vector.load %arg1[%c1, %c0_7, %c0_8] : memref<3x96x512xbf16, #tpu.memory_space<vmem>>, vector<1x96x512xbf16>
    %18 = vector.shape_cast %17 : vector<1x96x512xbf16> to vector<96x512xbf16>
    %cst_9 = arith.constant dense<0.000000e+00> : vector<128x512xf32>
    %19 = tpu.matmul %16, %18, %cst_9 {dimension_numbers = #tpu.dot_dimension_numbers<[1], [0], [0], [1], [0, 0, 1, 1], [], []>} : vector<128x96xbf16>, vector<96x512xbf16>, vector<128x512xf32> -> vector<128x512xf32>
    %20 = arith.addf %12, %19 : vector<128x512xf32>
    %21 = vector.extract_strided_slice %3 {offsets = [1, 0, 0, 0], sizes = [16, 1, 8, 96], strides = [1, 1, 1, 1]} : vector<17x2x8x96xf32> to vector<16x1x8x96xf32>
    %22 = vector.shape_cast %21 : vector<16x1x8x96xf32> to vector<16x8x96xf32>
    %23 = vector.shape_cast %22 : vector<16x8x96xf32> to vector<128x96xf32>
    %24 = arith.truncf %23 : vector<128x96xf32> to vector<128x96xbf16>
    %c2 = arith.constant 2 : index
    %c0_10 = arith.constant 0 : index
    %c0_11 = arith.constant 0 : index
    %25 = vector.load %arg1[%c2, %c0_10, %c0_11] : memref<3x96x512xbf16, #tpu.memory_space<vmem>>, vector<1x96x512xbf16>
    %26 = vector.shape_cast %25 : vector<1x96x512xbf16> to vector<96x512xbf16>
    %cst_12 = arith.constant dense<0.000000e+00> : vector<128x512xf32>
    %27 = tpu.matmul %24, %26, %cst_12 {dimension_numbers = #tpu.dot_dimension_numbers<[1], [0], [0], [1], [0, 0, 1, 1], [], []>} : vector<128x96xbf16>, vector<96x512xbf16>, vector<128x512xf32> -> vector<128x512xf32>
    %28 = arith.addf %20, %27 : vector<128x512xf32>
    %c0_13 = arith.constant 0 : index
    %c0_14 = arith.constant 0 : index
    %c0_15 = arith.constant 0 : index
    %29 = vector.load %arg4[%c0_13, %c0_14, %c0_15] : memref<3x512x32xf32, #tpu.memory_space<vmem>>, vector<1x512x32xf32>
    %30 = vector.shape_cast %29 : vector<1x512x32xf32> to vector<512x32xf32>
    %c0_16 = arith.constant 0 : index
    %c0_17 = arith.constant 0 : index
    %c0_18 = arith.constant 0 : index
    %31 = vector.load %arg5[%c0_16, %c0_17, %c0_18] : memref<3x32x512xf32, #tpu.memory_space<vmem>>, vector<1x32x512xf32>
    %32 = vector.shape_cast %31 : vector<1x32x512xf32> to vector<32x512xf32>
    %cst_19 = arith.constant dense<0.000000e+00> : vector<512xf32>
    %33 = vector.multi_reduction <add>, %28, %cst_19 [0] : vector<128x512xf32> to vector<512xf32>
    %34 = vector.shape_cast %33 : vector<512xf32> to vector<1x512xf32>
    %35 = arith.mulf %28, %28 : vector<128x512xf32>
    %cst_20 = arith.constant dense<0.000000e+00> : vector<512xf32>
    %36 = vector.multi_reduction <add>, %35, %cst_20 [0] : vector<128x512xf32> to vector<512xf32>
    %37 = vector.shape_cast %36 : vector<512xf32> to vector<1x512xf32>
    %cst_21 = arith.constant dense<0.000000e+00> : vector<1x32xf32>
    %38 = tpu.matmul %34, %30, %cst_21 {dimension_numbers = #tpu.dot_dimension_numbers<[1], [0], [0], [1], [0, 0, 1, 1], [], []>, precision = #tpu.contract_precision<fp32>} : vector<1x512xf32>, vector<512x32xf32>, vector<1x32xf32> -> vector<1x32xf32>
    %cst_22 = arith.constant dense<0.000000e+00> : vector<1x32xf32>
    %39 = tpu.matmul %37, %30, %cst_22 {dimension_numbers = #tpu.dot_dimension_numbers<[1], [0], [0], [1], [0, 0, 1, 1], [], []>, precision = #tpu.contract_precision<fp32>} : vector<1x512xf32>, vector<512x32xf32>, vector<1x32xf32> -> vector<1x32xf32>
    %cst_23 = arith.constant 2.048000e+03 : f32
    %40 = vector.broadcast %cst_23 : f32 to vector<1x32xf32>
    %41 = arith.divf %38, %40 : vector<1x32xf32>
    %cst_24 = arith.constant 2.048000e+03 : f32
    %42 = vector.broadcast %cst_24 : f32 to vector<1x32xf32>
    %43 = arith.divf %39, %42 : vector<1x32xf32>
    %44 = arith.mulf %41, %41 : vector<1x32xf32>
    %45 = arith.subf %43, %44 : vector<1x32xf32>
    %c0_25 = arith.constant 0 : index
    %c0_26 = arith.constant 0 : index
    %c0_27 = arith.constant 0 : index
    %46 = vector.load %arg6[%c0_25, %c0_26, %c0_27] : memref<3x2x32xf32, #tpu.memory_space<vmem>>, vector<1x1x32xf32>
    %47 = vector.shape_cast %46 : vector<1x1x32xf32> to vector<1x32xf32>
    %c0_28 = arith.constant 0 : index
    %c1_29 = arith.constant 1 : index
    %c0_30 = arith.constant 0 : index
    %48 = vector.load %arg6[%c0_28, %c1_29, %c0_30] : memref<3x2x32xf32, #tpu.memory_space<vmem>>, vector<1x1x32xf32>
    %49 = vector.shape_cast %48 : vector<1x1x32xf32> to vector<1x32xf32>
    %cst_31 = arith.constant 9.99999974E-6 : f32
    %50 = vector.broadcast %cst_31 : f32 to vector<1x32xf32>
    %51 = arith.addf %45, %50 : vector<1x32xf32>
    %52 = math.rsqrt %51 : vector<1x32xf32>
    %53 = arith.mulf %47, %52 : vector<1x32xf32>
    %54 = arith.mulf %41, %53 : vector<1x32xf32>
    %55 = arith.subf %49, %54 : vector<1x32xf32>
    %cst_32 = arith.constant dense<0.000000e+00> : vector<1x512xf32>
    %56 = tpu.matmul %53, %32, %cst_32 {dimension_numbers = #tpu.dot_dimension_numbers<[1], [0], [0], [1], [0, 0, 1, 1], [], []>, precision = #tpu.contract_precision<fp32>} : vector<1x32xf32>, vector<32x512xf32>, vector<1x512xf32> -> vector<1x512xf32>
    %cst_33 = arith.constant dense<0.000000e+00> : vector<1x512xf32>
    %57 = tpu.matmul %55, %32, %cst_33 {dimension_numbers = #tpu.dot_dimension_numbers<[1], [0], [0], [1], [0, 0, 1, 1], [], []>, precision = #tpu.contract_precision<fp32>} : vector<1x32xf32>, vector<32x512xf32>, vector<1x512xf32> -> vector<1x512xf32>
    %58 = vector.broadcast %56 : vector<1x512xf32> to vector<128x512xf32>
    %59 = arith.mulf %28, %58 : vector<128x512xf32>
    %60 = vector.broadcast %57 : vector<1x512xf32> to vector<128x512xf32>
    %61 = arith.addf %59, %60 : vector<128x512xf32>
    %cst_34 = arith.constant 0.000000e+00 : f32
    %62 = vector.broadcast %cst_34 : f32 to vector<128x512xf32>
    %63 = arith.maximumf %61, %62 : vector<128x512xf32>
    %c0_35 = arith.constant 0 : index
    %c0_36 = arith.constant 0 : index
    %64 = vector.load %arg10[%c0_35, %c0_36] : memref<128x512xf32, #tpu.memory_space<vmem>>, vector<128x512xf32>
    tpu.vector_store %arg10[%c0_35, %c0_36], %63 {strides = array<i32>} : memref<128x512xf32, #tpu.memory_space<vmem>>, vector<128x512xf32>,
    %65 = vector.shape_cast %63 : vector<128x512xf32> to vector<16x8x512xf32>
    %cst_37 = arith.constant 0.000000e+00 : f32
    %66 = vector.broadcast %cst_37 : f32 to vector<1x8x512xf32>
    %67 = tpu.concatenate %66, %65, %66 in 0 : vector<1x8x512xf32>, vector<16x8x512xf32>, vector<1x8x512xf32> -> vector<18x8x512xf32>
    %68 = vector.shape_cast %67 : vector<18x8x512xf32> to vector<9x2x8x512xf32>
    %cst_38 = arith.constant 0.000000e+00 : f32
    %69 = vector.broadcast %cst_38 : f32 to vector<64x256xf32>
    %70 = vector.extract_strided_slice %68 {offsets = [0, 0, 0, 0], sizes = [8, 1, 8, 512], strides = [1, 1, 1, 1]} : vector<9x2x8x512xf32> to vector<8x1x8x512xf32>
    %71 = vector.shape_cast %70 : vector<8x1x8x512xf32> to vector<8x8x512xf32>
    %72 = vector.shape_cast %71 : vector<8x8x512xf32> to vector<64x512xf32>
    %73 = arith.truncf %72 : vector<64x512xf32> to vector<64x512xbf16>
    %c0_39 = arith.constant 0 : index
    %c0_40 = arith.constant 0 : index
    %c0_41 = arith.constant 0 : index
    %74 = vector.load %arg2[%c0_39, %c0_40, %c0_41] : memref<3x512x256xbf16, #tpu.memory_space<vmem>>, vector<1x512x256xbf16>
    %75 = vector.shape_cast %74 : vector<1x512x256xbf16> to vector<512x256xbf16>
    %cst_42 = arith.constant dense<0.000000e+00> : vector<64x256xf32>
    %76 = tpu.matmul %73, %75, %cst_42 {dimension_numbers = #tpu.dot_dimension_numbers<[1], [0], [0], [1], [0, 0, 1, 1], [], []>} : vector<64x512xbf16>, vector<512x256xbf16>, vector<64x256xf32> -> vector<64x256xf32>
    %77 = arith.addf %69, %76 : vector<64x256xf32>
    %78 = vector.extract_strided_slice %68 {offsets = [0, 1, 0, 0], sizes = [8, 1, 8, 512], strides = [1, 1, 1, 1]} : vector<9x2x8x512xf32> to vector<8x1x8x512xf32>
    %79 = vector.shape_cast %78 : vector<8x1x8x512xf32> to vector<8x8x512xf32>
    %80 = vector.shape_cast %79 : vector<8x8x512xf32> to vector<64x512xf32>
    %81 = arith.truncf %80 : vector<64x512xf32> to vector<64x512xbf16>
    %c1_43 = arith.constant 1 : index
    %c0_44 = arith.constant 0 : index
    %c0_45 = arith.constant 0 : index
    %82 = vector.load %arg2[%c1_43, %c0_44, %c0_45] : memref<3x512x256xbf16, #tpu.memory_space<vmem>>, vector<1x512x256xbf16>
    %83 = vector.shape_cast %82 : vector<1x512x256xbf16> to vector<512x256xbf16>
    %cst_46 = arith.constant dense<0.000000e+00> : vector<64x256xf32>
    %84 = tpu.matmul %81, %83, %cst_46 {dimension_numbers = #tpu.dot_dimension_numbers<[1], [0], [0], [1], [0, 0, 1, 1], [], []>} : vector<64x512xbf16>, vector<512x256xbf16>, vector<64x256xf32> -> vector<64x256xf32>
    %85 = arith.addf %77, %84 : vector<64x256xf32>
    %86 = vector.extract_strided_slice %68 {offsets = [1, 0, 0, 0], sizes = [8, 1, 8, 512], strides = [1, 1, 1, 1]} : vector<9x2x8x512xf32> to vector<8x1x8x512xf32>
    %87 = vector.shape_cast %86 : vector<8x1x8x512xf32> to vector<8x8x512xf32>
    %88 = vector.shape_cast %87 : vector<8x8x512xf32> to vector<64x512xf32>
    %89 = arith.truncf %88 : vector<64x512xf32> to vector<64x512xbf16>
    %c2_47 = arith.constant 2 : index
    %c0_48 = arith.constant 0 : index
    %c0_49 = arith.constant 0 : index
    %90 = vector.load %arg2[%c2_47, %c0_48, %c0_49] : memref<3x512x256xbf16, #tpu.memory_space<vmem>>, vector<1x512x256xbf16>
    %91 = vector.shape_cast %90 : vector<1x512x256xbf16> to vector<512x256xbf16>
    %cst_50 = arith.constant dense<0.000000e+00> : vector<64x256xf32>
    %92 = tpu.matmul %89, %91, %cst_50 {dimension_numbers = #tpu.dot_dimension_numbers<[1], [0], [0], [1], [0, 0, 1, 1], [], []>} : vector<64x512xbf16>, vector<512x256xbf16>, vector<64x256xf32> -> vector<64x256xf32>
    %93 = arith.addf %85, %92 : vector<64x256xf32>
    %c1_51 = arith.constant 1 : index
    %c0_52 = arith.constant 0 : index
    %c0_53 = arith.constant 0 : index
    %94 = vector.load %arg4[%c1_51, %c0_52, %c0_53] : memref<3x512x32xf32, #tpu.memory_space<vmem>>, vector<1x256x32xf32>
    %95 = vector.shape_cast %94 : vector<1x256x32xf32> to vector<256x32xf32>
    %c1_54 = arith.constant 1 : index
    %c0_55 = arith.constant 0 : index
    %c0_56 = arith.constant 0 : index
    %96 = vector.load %arg5[%c1_54, %c0_55, %c0_56] : memref<3x32x512xf32, #tpu.memory_space<vmem>>, vector<1x32x256xf32>
    %97 = vector.shape_cast %96 : vector<1x32x256xf32> to vector<32x256xf32>
    %cst_57 = arith.constant dense<0.000000e+00> : vector<256xf32>
    %98 = vector.multi_reduction <add>, %93, %cst_57 [0] : vector<64x256xf32> to vector<256xf32>
    %99 = vector.shape_cast %98 : vector<256xf32> to vector<1x256xf32>
    %100 = arith.mulf %93, %93 : vector<64x256xf32>
    %cst_58 = arith.constant dense<0.000000e+00> : vector<256xf32>
    %101 = vector.multi_reduction <add>, %100, %cst_58 [0] : vector<64x256xf32> to vector<256xf32>
    %102 = vector.shape_cast %101 : vector<256xf32> to vector<1x256xf32>
    %cst_59 = arith.constant dense<0.000000e+00> : vector<1x32xf32>
    %103 = tpu.matmul %99, %95, %cst_59 {dimension_numbers = #tpu.dot_dimension_numbers<[1], [0], [0], [1], [0, 0, 1, 1], [], []>, precision = #tpu.contract_precision<fp32>} : vector<1x256xf32>, vector<256x32xf32>, vector<1x32xf32> -> vector<1x32xf32>
    %cst_60 = arith.constant dense<0.000000e+00> : vector<1x32xf32>
    %104 = tpu.matmul %102, %95, %cst_60 {dimension_numbers = #tpu.dot_dimension_numbers<[1], [0], [0], [1], [0, 0, 1, 1], [], []>, precision = #tpu.contract_precision<fp32>} : vector<1x256xf32>, vector<256x32xf32>, vector<1x32xf32> -> vector<1x32xf32>
    %cst_61 = arith.constant 5.120000e+02 : f32
    %105 = vector.broadcast %cst_61 : f32 to vector<1x32xf32>
    %106 = arith.divf %103, %105 : vector<1x32xf32>
    %cst_62 = arith.constant 5.120000e+02 : f32
    %107 = vector.broadcast %cst_62 : f32 to vector<1x32xf32>
    %108 = arith.divf %104, %107 : vector<1x32xf32>
    %109 = arith.mulf %106, %106 : vector<1x32xf32>
    %110 = arith.subf %108, %109 : vector<1x32xf32>
    %c1_63 = arith.constant 1 : index
    %c0_64 = arith.constant 0 : index
    %c0_65 = arith.constant 0 : index
    %111 = vector.load %arg6[%c1_63, %c0_64, %c0_65] : memref<3x2x32xf32, #tpu.memory_space<vmem>>, vector<1x1x32xf32>
    %112 = vector.shape_cast %111 : vector<1x1x32xf32> to vector<1x32xf32>
    %c1_66 = arith.constant 1 : index
    %c1_67 = arith.constant 1 : index
    %c0_68 = arith.constant 0 : index
    %113 = vector.load %arg6[%c1_66, %c1_67, %c0_68] : memref<3x2x32xf32, #tpu.memory_space<vmem>>, vector<1x1x32xf32>
    %114 = vector.shape_cast %113 : vector<1x1x32xf32> to vector<1x32xf32>
    %cst_69 = arith.constant 9.99999974E-6 : f32
    %115 = vector.broadcast %cst_69 : f32 to vector<1x32xf32>
    %116 = arith.addf %110, %115 : vector<1x32xf32>
    %117 = math.rsqrt %116 : vector<1x32xf32>
    %118 = arith.mulf %112, %117 : vector<1x32xf32>
    %119 = arith.mulf %106, %118 : vector<1x32xf32>
    %120 = arith.subf %114, %119 : vector<1x32xf32>
    %cst_70 = arith.constant dense<0.000000e+00> : vector<1x256xf32>
    %121 = tpu.matmul %118, %97, %cst_70 {dimension_numbers = #tpu.dot_dimension_numbers<[1], [0], [0], [1], [0, 0, 1, 1], [], []>, precision = #tpu.contract_precision<fp32>} : vector<1x32xf32>, vector<32x256xf32>, vector<1x256xf32> -> vector<1x256xf32>
    %cst_71 = arith.constant dense<0.000000e+00> : vector<1x256xf32>
    %122 = tpu.matmul %120, %97, %cst_71 {dimension_numbers = #tpu.dot_dimension_numbers<[1], [0], [0], [1], [0, 0, 1, 1], [], []>, precision = #tpu.contract_precision<fp32>} : vector<1x32xf32>, vector<32x256xf32>, vector<1x256xf32> -> vector<1x256xf32>
    %123 = vector.broadcast %121 : vector<1x256xf32> to vector<64x256xf32>
    %124 = arith.mulf %93, %123 : vector<64x256xf32>
    %125 = vector.broadcast %122 : vector<1x256xf32> to vector<64x256xf32>
    %126 = arith.addf %124, %125 : vector<64x256xf32>
    %cst_72 = arith.constant 0.000000e+00 : f32
    %127 = vector.broadcast %cst_72 : f32 to vector<64x256xf32>
    %128 = arith.maximumf %126, %127 : vector<64x256xf32>
    %c0_73 = arith.constant 0 : index
    %c0_74 = arith.constant 0 : index
    %129 = vector.load %arg11[%c0_73, %c0_74] : memref<64x256xf32, #tpu.memory_space<vmem>>, vector<64x256xf32>
    tpu.vector_store %arg11[%c0_73, %c0_74], %128 {strides = array<i32>} : memref<64x256xf32, #tpu.memory_space<vmem>>, vector<64x256xf32>,
    %130 = vector.shape_cast %128 : vector<64x256xf32> to vector<8x8x256xf32>
    %cst_75 = arith.constant 0.000000e+00 : f32
    %131 = vector.broadcast %cst_75 : f32 to vector<1x8x256xf32>
    %132 = tpu.concatenate %131, %130, %131 in 0 : vector<1x8x256xf32>, vector<8x8x256xf32>, vector<1x8x256xf32> -> vector<10x8x256xf32>
    %133 = vector.shape_cast %132 : vector<10x8x256xf32> to vector<5x2x8x256xf32>
    %cst_76 = arith.constant 0.000000e+00 : f32
    %134 = vector.broadcast %cst_76 : f32 to vector<32x128xf32>
    %135 = vector.extract_strided_slice %133 {offsets = [0, 0, 0, 0], sizes = [4, 1, 8, 256], strides = [1, 1, 1, 1]} : vector<5x2x8x256xf32> to vector<4x1x8x256xf32>
    %136 = vector.shape_cast %135 : vector<4x1x8x256xf32> to vector<4x8x256xf32>
    %137 = vector.shape_cast %136 : vector<4x8x256xf32> to vector<32x256xf32>
    %138 = arith.truncf %137 : vector<32x256xf32> to vector<32x256xbf16>
    %c0_77 = arith.constant 0 : index
    %c0_78 = arith.constant 0 : index
    %c0_79 = arith.constant 0 : index
    %139 = vector.load %arg3[%c0_77, %c0_78, %c0_79] : memref<3x256x128xbf16, #tpu.memory_space<vmem>>, vector<1x256x128xbf16>
    %140 = vector.shape_cast %139 : vector<1x256x128xbf16> to vector<256x128xbf16>
    %cst_80 = arith.constant dense<0.000000e+00> : vector<32x128xf32>
    %141 = tpu.matmul %138, %140, %cst_80 {dimension_numbers = #tpu.dot_dimension_numbers<[1], [0], [0], [1], [0, 0, 1, 1], [], []>} : vector<32x256xbf16>, vector<256x128xbf16>, vector<32x128xf32> -> vector<32x128xf32>
    %142 = arith.addf %134, %141 : vector<32x128xf32>
    %143 = vector.extract_strided_slice %133 {offsets = [0, 1, 0, 0], sizes = [4, 1, 8, 256], strides = [1, 1, 1, 1]} : vector<5x2x8x256xf32> to vector<4x1x8x256xf32>
    %144 = vector.shape_cast %143 : vector<4x1x8x256xf32> to vector<4x8x256xf32>
    %145 = vector.shape_cast %144 : vector<4x8x256xf32> to vector<32x256xf32>
    %146 = arith.truncf %145 : vector<32x256xf32> to vector<32x256xbf16>
    %c1_81 = arith.constant 1 : index
    %c0_82 = arith.constant 0 : index
    %c0_83 = arith.constant 0 : index
    %147 = vector.load %arg3[%c1_81, %c0_82, %c0_83] : memref<3x256x128xbf16, #tpu.memory_space<vmem>>, vector<1x256x128xbf16>
    %148 = vector.shape_cast %147 : vector<1x256x128xbf16> to vector<256x128xbf16>
    %cst_84 = arith.constant dense<0.000000e+00> : vector<32x128xf32>
    %149 = tpu.matmul %146, %148, %cst_84 {dimension_numbers = #tpu.dot_dimension_numbers<[1], [0], [0], [1], [0, 0, 1, 1], [], []>} : vector<32x256xbf16>, vector<256x128xbf16>, vector<32x128xf32> -> vector<32x128xf32>
    %150 = arith.addf %142, %149 : vector<32x128xf32>
    %151 = vector.extract_strided_slice %133 {offsets = [1, 0, 0, 0], sizes = [4, 1, 8, 256], strides = [1, 1, 1, 1]} : vector<5x2x8x256xf32> to vector<4x1x8x256xf32>
    %152 = vector.shape_cast %151 : vector<4x1x8x256xf32> to vector<4x8x256xf32>
    %153 = vector.shape_cast %152 : vector<4x8x256xf32> to vector<32x256xf32>
    %154 = arith.truncf %153 : vector<32x256xf32> to vector<32x256xbf16>
    %c2_85 = arith.constant 2 : index
    %c0_86 = arith.constant 0 : index
    %c0_87 = arith.constant 0 : index
    %155 = vector.load %arg3[%c2_85, %c0_86, %c0_87] : memref<3x256x128xbf16, #tpu.memory_space<vmem>>, vector<1x256x128xbf16>
    %156 = vector.shape_cast %155 : vector<1x256x128xbf16> to vector<256x128xbf16>
    %cst_88 = arith.constant dense<0.000000e+00> : vector<32x128xf32>
    %157 = tpu.matmul %154, %156, %cst_88 {dimension_numbers = #tpu.dot_dimension_numbers<[1], [0], [0], [1], [0, 0, 1, 1], [], []>} : vector<32x256xbf16>, vector<256x128xbf16>, vector<32x128xf32> -> vector<32x128xf32>
    %158 = arith.addf %150, %157 : vector<32x128xf32>
    %c2_89 = arith.constant 2 : index
    %c0_90 = arith.constant 0 : index
    %c0_91 = arith.constant 0 : index
    %159 = vector.load %arg4[%c2_89, %c0_90, %c0_91] : memref<3x512x32xf32, #tpu.memory_space<vmem>>, vector<1x128x32xf32>
    %160 = vector.shape_cast %159 : vector<1x128x32xf32> to vector<128x32xf32>
    %c2_92 = arith.constant 2 : index
    %c0_93 = arith.constant 0 : index
    %c0_94 = arith.constant 0 : index
    %161 = vector.load %arg5[%c2_92, %c0_93, %c0_94] : memref<3x32x512xf32, #tpu.memory_space<vmem>>, vector<1x32x128xf32>
    %162 = vector.shape_cast %161 : vector<1x32x128xf32> to vector<32x128xf32>
    %cst_95 = arith.constant dense<0.000000e+00> : vector<128xf32>
    %163 = vector.multi_reduction <add>, %158, %cst_95 [0] : vector<32x128xf32> to vector<128xf32>
    %164 = vector.shape_cast %163 : vector<128xf32> to vector<1x128xf32>
    %165 = arith.mulf %158, %158 : vector<32x128xf32>
    %cst_96 = arith.constant dense<0.000000e+00> : vector<128xf32>
    %166 = vector.multi_reduction <add>, %165, %cst_96 [0] : vector<32x128xf32> to vector<128xf32>
    %167 = vector.shape_cast %166 : vector<128xf32> to vector<1x128xf32>
    %cst_97 = arith.constant dense<0.000000e+00> : vector<1x32xf32>
    %168 = tpu.matmul %164, %160, %cst_97 {dimension_numbers = #tpu.dot_dimension_numbers<[1], [0], [0], [1], [0, 0, 1, 1], [], []>, precision = #tpu.contract_precision<fp32>} : vector<1x128xf32>, vector<128x32xf32>, vector<1x32xf32> -> vector<1x32xf32>
    %cst_98 = arith.constant dense<0.000000e+00> : vector<1x32xf32>
    %169 = tpu.matmul %167, %160, %cst_98 {dimension_numbers = #tpu.dot_dimension_numbers<[1], [0], [0], [1], [0, 0, 1, 1], [], []>, precision = #tpu.contract_precision<fp32>} : vector<1x128xf32>, vector<128x32xf32>, vector<1x32xf32> -> vector<1x32xf32>
    %cst_99 = arith.constant 1.280000e+02 : f32
    %170 = vector.broadcast %cst_99 : f32 to vector<1x32xf32>
    %171 = arith.divf %168, %170 : vector<1x32xf32>
    %cst_100 = arith.constant 1.280000e+02 : f32
    %172 = vector.broadcast %cst_100 : f32 to vector<1x32xf32>
    %173 = arith.divf %169, %172 : vector<1x32xf32>
    %174 = arith.mulf %171, %171 : vector<1x32xf32>
    %175 = arith.subf %173, %174 : vector<1x32xf32>
    %c2_101 = arith.constant 2 : index
    %c0_102 = arith.constant 0 : index
    %c0_103 = arith.constant 0 : index
    %176 = vector.load %arg6[%c2_101, %c0_102, %c0_103] : memref<3x2x32xf32, #tpu.memory_space<vmem>>, vector<1x1x32xf32>
    %177 = vector.shape_cast %176 : vector<1x1x32xf32> to vector<1x32xf32>
    %c2_104 = arith.constant 2 : index
    %c1_105 = arith.constant 1 : index
    %c0_106 = arith.constant 0 : index
    %178 = vector.load %arg6[%c2_104, %c1_105, %c0_106] : memref<3x2x32xf32, #tpu.memory_space<vmem>>, vector<1x1x32xf32>
    %179 = vector.shape_cast %178 : vector<1x1x32xf32> to vector<1x32xf32>
    %cst_107 = arith.constant 9.99999974E-6 : f32
    %180 = vector.broadcast %cst_107 : f32 to vector<1x32xf32>
    %181 = arith.addf %175, %180 : vector<1x32xf32>
    %182 = math.rsqrt %181 : vector<1x32xf32>
    %183 = arith.mulf %177, %182 : vector<1x32xf32>
    %184 = arith.mulf %171, %183 : vector<1x32xf32>
    %185 = arith.subf %179, %184 : vector<1x32xf32>
    %cst_108 = arith.constant dense<0.000000e+00> : vector<1x128xf32>
    %186 = tpu.matmul %183, %162, %cst_108 {dimension_numbers = #tpu.dot_dimension_numbers<[1], [0], [0], [1], [0, 0, 1, 1], [], []>, precision = #tpu.contract_precision<fp32>} : vector<1x32xf32>, vector<32x128xf32>, vector<1x128xf32> -> vector<1x128xf32>
    %cst_109 = arith.constant dense<0.000000e+00> : vector<1x128xf32>
    %187 = tpu.matmul %185, %162, %cst_109 {dimension_numbers = #tpu.dot_dimension_numbers<[1], [0], [0], [1], [0, 0, 1, 1], [], []>, precision = #tpu.contract_precision<fp32>} : vector<1x32xf32>, vector<32x128xf32>, vector<1x128xf32> -> vector<1x128xf32>
    %188 = vector.broadcast %186 : vector<1x128xf32> to vector<32x128xf32>
    %189 = arith.mulf %158, %188 : vector<32x128xf32>
    %190 = vector.broadcast %187 : vector<1x128xf32> to vector<32x128xf32>
    %191 = arith.addf %189, %190 : vector<32x128xf32>
    %cst_110 = arith.constant 0.000000e+00 : f32
    %192 = vector.broadcast %cst_110 : f32 to vector<32x128xf32>
    %193 = arith.maximumf %191, %192 : vector<32x128xf32>
    %c0_111 = arith.constant 0 : index
    %c0_112 = arith.constant 0 : index
    %194 = vector.load %arg12[%c0_111, %c0_112] : memref<32x128xf32, #tpu.memory_space<vmem>>, vector<32x128xf32>
    tpu.vector_store %arg12[%c0_111, %c0_112], %193 {strides = array<i32>} : memref<32x128xf32, #tpu.memory_space<vmem>>, vector<32x128xf32>,
    %195 = vector.shape_cast %193 : vector<32x128xf32> to vector<4x8x128xf32>
    %cst_113 = arith.constant 0.000000e+00 : f32
    %196 = vector.broadcast %cst_113 : f32 to vector<8x10xf32>
    %197 = vector.extract_strided_slice %195 {offsets = [0, 0, 0], sizes = [1, 8, 128], strides = [1, 1, 1]} : vector<4x8x128xf32> to vector<1x8x128xf32>
    %198 = vector.shape_cast %197 : vector<1x8x128xf32> to vector<8x128xf32>
    %199 = arith.truncf %198 : vector<8x128xf32> to vector<8x128xbf16>
    %c0_114 = arith.constant 0 : index
    %c0_115 = arith.constant 0 : index
    %c0_116 = arith.constant 0 : index
    %200 = vector.load %arg7[%c0_114, %c0_115, %c0_116] : memref<4x128x10xbf16, #tpu.memory_space<vmem>>, vector<1x128x10xbf16>
    %201 = vector.shape_cast %200 : vector<1x128x10xbf16> to vector<128x10xbf16>
    %cst_117 = arith.constant dense<0.000000e+00> : vector<8x10xf32>
    %202 = tpu.matmul %199, %201, %cst_117 {dimension_numbers = #tpu.dot_dimension_numbers<[1], [0], [0], [1], [0, 0, 1, 1], [], []>} : vector<8x128xbf16>, vector<128x10xbf16>, vector<8x10xf32> -> vector<8x10xf32>
    %203 = arith.addf %196, %202 : vector<8x10xf32>
    %204 = vector.extract_strided_slice %195 {offsets = [1, 0, 0], sizes = [1, 8, 128], strides = [1, 1, 1]} : vector<4x8x128xf32> to vector<1x8x128xf32>
    %205 = vector.shape_cast %204 : vector<1x8x128xf32> to vector<8x128xf32>
    %206 = arith.truncf %205 : vector<8x128xf32> to vector<8x128xbf16>
    %c1_118 = arith.constant 1 : index
    %c0_119 = arith.constant 0 : index
    %c0_120 = arith.constant 0 : index
    %207 = vector.load %arg7[%c1_118, %c0_119, %c0_120] : memref<4x128x10xbf16, #tpu.memory_space<vmem>>, vector<1x128x10xbf16>
    %208 = vector.shape_cast %207 : vector<1x128x10xbf16> to vector<128x10xbf16>
    %cst_121 = arith.constant dense<0.000000e+00> : vector<8x10xf32>
    %209 = tpu.matmul %206, %208, %cst_121 {dimension_numbers = #tpu.dot_dimension_numbers<[1], [0], [0], [1], [0, 0, 1, 1], [], []>} : vector<8x128xbf16>, vector<128x10xbf16>, vector<8x10xf32> -> vector<8x10xf32>
    %210 = arith.addf %203, %209 : vector<8x10xf32>
    %211 = vector.extract_strided_slice %195 {offsets = [2, 0, 0], sizes = [1, 8, 128], strides = [1, 1, 1]} : vector<4x8x128xf32> to vector<1x8x128xf32>
    %212 = vector.shape_cast %211 : vector<1x8x128xf32> to vector<8x128xf32>
    %213 = arith.truncf %212 : vector<8x128xf32> to vector<8x128xbf16>
    %c2_122 = arith.constant 2 : index
    %c0_123 = arith.constant 0 : index
    %c0_124 = arith.constant 0 : index
    %214 = vector.load %arg7[%c2_122, %c0_123, %c0_124] : memref<4x128x10xbf16, #tpu.memory_space<vmem>>, vector<1x128x10xbf16>
    %215 = vector.shape_cast %214 : vector<1x128x10xbf16> to vector<128x10xbf16>
    %cst_125 = arith.constant dense<0.000000e+00> : vector<8x10xf32>
    %216 = tpu.matmul %213, %215, %cst_125 {dimension_numbers = #tpu.dot_dimension_numbers<[1], [0], [0], [1], [0, 0, 1, 1], [], []>} : vector<8x128xbf16>, vector<128x10xbf16>, vector<8x10xf32> -> vector<8x10xf32>
    %217 = arith.addf %210, %216 : vector<8x10xf32>
    %218 = vector.extract_strided_slice %195 {offsets = [3, 0, 0], sizes = [1, 8, 128], strides = [1, 1, 1]} : vector<4x8x128xf32> to vector<1x8x128xf32>
    %219 = vector.shape_cast %218 : vector<1x8x128xf32> to vector<8x128xf32>
    %220 = arith.truncf %219 : vector<8x128xf32> to vector<8x128xbf16>
    %c3 = arith.constant 3 : index
    %c0_126 = arith.constant 0 : index
    %c0_127 = arith.constant 0 : index
    %221 = vector.load %arg7[%c3, %c0_126, %c0_127] : memref<4x128x10xbf16, #tpu.memory_space<vmem>>, vector<1x128x10xbf16>
    %222 = vector.shape_cast %221 : vector<1x128x10xbf16> to vector<128x10xbf16>
    %cst_128 = arith.constant dense<0.000000e+00> : vector<8x10xf32>
    %223 = tpu.matmul %220, %222, %cst_128 {dimension_numbers = #tpu.dot_dimension_numbers<[1], [0], [0], [1], [0, 0, 1, 1], [], []>} : vector<8x128xbf16>, vector<128x10xbf16>, vector<8x10xf32> -> vector<8x10xf32>
    %224 = arith.addf %217, %223 : vector<8x10xf32>
    %c0_129 = arith.constant 0 : index
    %c0_130 = arith.constant 0 : index
    %225 = vector.load %arg8[%c0_129, %c0_130] : memref<1x10xf32, #tpu.memory_space<vmem>>, vector<1x10xf32>
    %226 = vector.broadcast %225 : vector<1x10xf32> to vector<8x10xf32>
    %227 = arith.addf %224, %226 : vector<8x10xf32>
    %c0_131 = arith.constant 0 : index
    %c0_132 = arith.constant 0 : index
    %228 = vector.load %arg9[%c0_131, %c0_132] : memref<8x10xf32, #tpu.memory_space<vmem>>, vector<8x10xf32>
    tpu.vector_store %arg9[%c0_131, %c0_132], %227 {strides = array<i32>} : memref<8x10xf32, #tpu.memory_space<vmem>>, vector<8x10xf32>,
    return
  }
}

</mosaic_0001>

<bundles_post_ra>
// kernel: basic_cnn_ir_forward.1
= control target key start
LH: loop header
LB: loop body
LE: loop exit
PB: predicated region body
PF: predicated region fallthrough
CT: control target
= control target key end

     0   :  { %v21246_v2 = vmov 0   ;;  %vm255_vm0 = vcmask 785408   ;;  %s28014_s0 = inlined_call_operand.vmem [shape: f32[32,8,96], index: 0, kind: input, shape index: {}]   ;;  %s28015_s1 = inlined_call_operand.vmem [shape: bf16[3,96,512], index: 1, kind: input, shape index: {}]   ;;  %s28016_s2 = inlined_call_operand.vmem [shape: bf16[3,512,256], index: 2, kind: input, shape index: {}]   ;;  %s28017_s3 = inlined_call_operand.vmem [shape: bf16[3,256,128], index: 3, kind: input, shape index: {}]   ;;  %s28018_s4 = inlined_call_operand.vmem [shape: f32[3,512,32], index: 4, kind: input, shape index: {}]   ;;  %s28019_s5 = inlined_call_operand.vmem [shape: f32[3,32,512], index: 5, kind: input, shape index: {}]   ;;  %s28020_s6 = inlined_call_operand.vmem [shape: f32[3,2,32], index: 6, kind: input, shape index: {}]   ;;  %s28021_s7 = inlined_call_operand.vmem [shape: bf16[4,128,10], index: 7, kind: input, shape index: {}]   ;;  %s28022_s8 = inlined_call_operand.vmem [shape: f32[1,10], index: 8, kind: input, shape index: {}]   ;;  %s28023_s9 = inlined_call_operand.hbm [shape: f32[8,10], index: 9, kind: output, shape index: {0}]   ;;  %s28024_s10 = inlined_call_operand.vmem [shape: f32[128,512], index: 10, kind: output, shape index: {1}]   ;;  %s28025_s11 = inlined_call_operand.vmem [shape: f32[64,256], index: 11, kind: output, shape index: {2}]   ;;  %s28026_s12 = inlined_call_operand.vmem [shape: f32[32,128], index: 12, kind: output, shape index: {3}]  }
   0x1   :  { %v20740_v0 = vld [vmem:[%s28015_s1 + $0xc4] ss:$16 sps:$4 sm:$0xff]   ;;  %v20742_v1 = vld [vmem:[%s28015_s1 + $0xcc] ss:$16 sps:$4 sm:$0xff]   ;;  %312 = vmatprep.mubr.bf16.mxu0 %v21246_v2  ;;  %425 = vmatprep.mubr.bf16.mxu1 %v21246_v2  ;;  %v20744_v3 = vld [vmem:[%s28015_s1 + $0xc0] ss:$16 sps:$4 sm:$0xff]  }
   0x2   :  { %280 = vmatprep.subr.bf16.mxu0 %v20740_v0  ;;  %v20745_v4 = vld [vmem:[%s28015_s1 + $0xc8] ss:$16 sps:$4 sm:$0xff]   ;;  %393 = vmatprep.subr.bf16.mxu1 %v20742_v1  ;;  %v20746_v5 = vld [vmem:[%s28015_s1 + $0xe4] ss:$16 sps:$4 sm:$0xff]   ;;  %v20748_v6 = vld [vmem:[%s28015_s1 + $0xec] ss:$16 sps:$4 sm:$0xff]  }
   0x3   :  { %281 = vmatpush1.bf16.msra.mxu0 %v20744_v3  ;;  %394 = vmatpush1.bf16.msra.mxu1 %v20745_v4  ;;  %v20750_v7 = vld [vmem:[%s28015_s1 + $0xe0] ss:$16 sps:$4 sm:$0xff]   ;;  %v20751_v8 = vld [vmem:[%s28015_s1 + $0xe8] ss:$16 sps:$4 sm:$0xff]   ;;  %v20752_v9 = vld [vmem:[%s28015_s1 + $0x104] ss:$16 sps:$4 sm:$0xff]  }
   0x4   :  { %282 = vmatprep.subr.bf16.mxu0 %v20746_v5  ;;  %395 = vmatprep.subr.bf16.mxu1 %v20748_v6  ;;  %v20754_v10 = vld [vmem:[%s28015_s1 + $0x10c] ss:$16 sps:$4 sm:$0xff]   ;;  %v20756_v11 = vld [vmem:[%s28015_s1 + $0x100] ss:$16 sps:$4 sm:$0xff]   ;;  %v20757_v12 = vld [vmem:[%s28015_s1 + $0x108] ss:$16 sps:$4 sm:$0xff]  }
   0x5   :  { %v20758_v13 = vld [vmem:[%s28015_s1 + $0x124] ss:$16 sps:$4 sm:$0xff]   ;;  %v20760_v14 = vld [vmem:[%s28015_s1 + $0x12c] ss:$16 sps:$4 sm:$0xff]   ;;  %v20762_v15 = vld [vmem:[%s28015_s1 + $0x120] ss:$16 sps:$4 sm:$0xff]  }
   0x6   :  { %v20763_v16 = vld [vmem:[%s28015_s1 + $0x128] ss:$16 sps:$4 sm:$0xff]   ;;  %v20764_v17 = vld [vmem:[%s28015_s1 + $0x144] ss:$16 sps:$4 sm:$0xff]   ;;  %v20766_v18 = vld [vmem:[%s28015_s1 + $0x14c] ss:$16 sps:$4 sm:$0xff]  }
   0x7   :  { %283 = vmatpush1.bf16.msra.mxu0 %v20750_v7  ;;  %396 = vmatpush1.bf16.msra.mxu1 %v20751_v8  ;;  %v20768_v19 = vld [vmem:[%s28015_s1 + $0x140] ss:$16 sps:$4 sm:$0xff]   ;;  %v20769_v20 = vld [vmem:[%s28015_s1 + $0x148] ss:$16 sps:$4 sm:$0xff]   ;;  %v20770_v21 = vld [vmem:[%s28015_s1 + $0x164] ss:$16 sps:$4 sm:$0xff]  }
   0x8   :  { %284 = vmatprep.subr.bf16.mxu0 %v20752_v9  ;;  %397 = vmatprep.subr.bf16.mxu1 %v20754_v10  ;;  %v20772_v22 = vld [vmem:[%s28015_s1 + $0x16c] ss:$16 sps:$4 sm:$0xff]   ;;  %v20774_v23 = vld [vmem:[%s28015_s1 + $0x160] ss:$16 sps:$4 sm:$0xff]   ;;  %v20775_v24 = vld [vmem:[%s28015_s1 + $0x168] ss:$16 sps:$4 sm:$0xff]  }
   0x9   :  { %v38_v25 = vld [vmem:[%s28014_s0] sm:$0xff]  ;;  %v40_v26 = vld [vmem:[%s28014_s0 + $0x10] sm:$0xff]  ;;  %v20790_v32 = vld [vmem:[%s28015_s1 + $0xc] ss:$16 sps:$4 sm:$0xff]  }
   0xa   :  { %v20778_v27 = vld [vmem:[%s28015_s1 + $0x4] ss:$16 sps:$4 sm:$0xff]   ;;  %v102_v28 = vpack.c.bf16 %v40_v26, %v38_v25  ;;  %v20776_v29 = vld [vmem:[%s28015_s1] ss:$16 sps:$4 sm:$0xff]   ;;  %v20788_v34 = vld [vmem:[%s28015_s1 + $0x8] ss:$16 sps:$4 sm:$0xff]  }
   0xb   :  { %285 = vmatpush1.bf16.msra.mxu0 %v20756_v11  ;;  %398 = vmatpush1.bf16.msra.mxu1 %v20757_v12  ;;  %v20781_v30 = vld [vmem:[%s28015_s1 + $0x24] ss:$16 sps:$4 sm:$0xff]   ;;  %v20779_v35 = vld [vmem:[%s28015_s1 + $0x20] ss:$16 sps:$4 sm:$0xff]   ;;  %v20796_v37 = vld [vmem:[%s28015_s1 + $0x2c] ss:$16 sps:$4 sm:$0xff]  }
   0xc   :  { %286 = vmatprep.subr.bf16.mxu0 %v20758_v13  ;;  %399 = vmatprep.subr.bf16.mxu1 %v20760_v14  ;;  %v42_v31 = vld [vmem:[%s28014_s0 + $0x20] sm:$0xff]  ;;  %v44_v33 = vld [vmem:[%s28014_s0 + $0x30] sm:$0xff]  ;;  %v20794_v40 = vld [vmem:[%s28015_s1 + $0x28] ss:$16 sps:$4 sm:$0xff]   ;;  %v28027_v14 = vmov 0.0  }
   0xd   :  { %v20784_v36 = vld [vmem:[%s28015_s1 + $0x44] ss:$16 sps:$4 sm:$0xff]   ;;  %v103_v38 = vpack.c.bf16 %v44_v33, %v42_v31  ;;  %v20782_v39 = vld [vmem:[%s28015_s1 + $0x40] ss:$16 sps:$4 sm:$0xff]   ;;  %v20799_v42 = vld [vmem:[%s28015_s1 + $0x4c] ss:$16 sps:$4 sm:$0xff]  }
   0xe   :  { %v20787_v41 = vld [vmem:[%s28015_s1 + $0x64] ss:$16 sps:$4 sm:$0xff]   ;;  %v20785_v45 = vld [vmem:[%s28015_s1 + $0x60] ss:$16 sps:$4 sm:$0xff]   ;;  %v20797_v46 = vld [vmem:[%s28015_s1 + $0x48] ss:$16 sps:$4 sm:$0xff]  }
   0xf   :  { %287 = vmatpush1.bf16.msra.mxu0 %v20762_v15  ;;  %400 = vmatpush1.bf16.msra.mxu1 %v20763_v16  ;;  %v46_v43 = vld [vmem:[%s28014_s0 + $0x40] sm:$0xff]  ;;  %v48_v44 = vld [vmem:[%s28014_s0 + $0x50] sm:$0xff]  ;;  %v20802_v48 = vld [vmem:[%s28015_s1 + $0x6c] ss:$16 sps:$4 sm:$0xff]  }
  0x10   :  { %288 = vmatprep.subr.bf16.mxu0 %v20764_v17  ;;  %401 = vmatprep.subr.bf16.mxu1 %v20766_v18  ;;  %v20793_v47 = vld [vmem:[%s28015_s1 + $0x84] ss:$16 sps:$4 sm:$0xff]   ;;  %v104_v49 = vpack.c.bf16 %v48_v44, %v46_v43  ;;  %v20791_v50 = vld [vmem:[%s28015_s1 + $0x80] ss:$16 sps:$4 sm:$0xff]   ;;  %v20800_v51 = vld [vmem:[%s28015_s1 + $0x68] ss:$16 sps:$4 sm:$0xff]  }
  0x11   :  { %v20805_v52 = vld [vmem:[%s28015_s1 + $0xa4] ss:$16 sps:$4 sm:$0xff]   ;;  %v20808_v53 = vld [vmem:[%s28015_s1 + $0x8c] ss:$16 sps:$4 sm:$0xff]   ;;  %v20803_v56 = vld [vmem:[%s28015_s1 + $0xa0] ss:$16 sps:$4 sm:$0xff]  }
  0x12   :  { %v50_v54 = vld [vmem:[%s28014_s0 + $0x60] sm:$0xff]  ;;  %v52_v55 = vld [vmem:[%s28014_s0 + $0x70] sm:$0xff]  ;;  %v20806_v57 = vld [vmem:[%s28015_s1 + $0x88] ss:$16 sps:$4 sm:$0xff]  }
  0x13   :  { %289 = vmatpush1.bf16.msra.mxu0 %v20768_v19  ;;  %402 = vmatpush1.bf16.msra.mxu1 %v20769_v20  ;;  %v20811_v58 = vld [vmem:[%s28015_s1 + $0xac] ss:$16 sps:$4 sm:$0xff]   ;;  %v20814_v59 = vld [vmem:[%s28015_s1 + $0x184] ss:$16 sps:$4 sm:$0xff]   ;;  %v105_v60 = vpack.c.bf16 %v52_v55, %v50_v54  ;;  %v20809_v61 = vld [vmem:[%s28015_s1 + $0xa8] ss:$16 sps:$4 sm:$0xff]  }
  0x14   :  { %290 = vmatprep.subr.bf16.mxu0 %v20770_v21  ;;  %403 = vmatprep.subr.bf16.mxu1 %v20772_v22  ;;  %v20826_v62 = vld [vmem:[%s28015_s1 + $0x18c] ss:$16 sps:$4 sm:$0xff]   ;;  %v54_v63 = vld [vmem:[%s28014_s0 + $0x80] sm:$0xff]  ;;  %v56_v0 = vld [vmem:[%s28014_s0 + $0x90] sm:$0xff] }
  0x15   :  { %v106_v1 = vpack.c.bf16 %v56_v0, %v54_v63  ;;  %v58_v3 = vld [vmem:[%s28014_s0 + $0xa0] sm:$0xff]  ;;  %v60_v4 = vld [vmem:[%s28014_s0 + $0xb0] sm:$0xff]  ;;  %v21547_v12 = vld [vmem:[%s28014_s0 + $0x8] sm:$0xff] }
  0x16   :  { %v107_v5 = vpack.c.bf16 %v60_v4, %v58_v3  ;;  %v62_v6 = vld [vmem:[%s28014_s0 + $0xc0] sm:$0xff]  ;;  %v64_v7 = vld [vmem:[%s28014_s0 + $0xd0] sm:$0xff]  ;;  %v70_v15 = vpack.c.bf16 %v21547_v12, %v28027_v14  ;;  %v20824_v17 = vld [vmem:[%s28015_s1 + $0x188] ss:$16 sps:$4 sm:$0xff]  }
  0x17   :  { %291 = vmatpush1.bf16.msra.mxu0 %v20774_v23  ;;  %404 = vmatpush1.bf16.msra.mxu1 %v20775_v24  ;;  %v108_v8 = vpack.c.bf16 %v64_v7, %v62_v6  ;;  %v66_v9 = vld [vmem:[%s28014_s0 + $0xe0] sm:$0xff]  ;;  %v68_v10 = vld [vmem:[%s28014_s0 + $0xf0] sm:$0xff]  ;;  %v20832_v18 = vld [vmem:[%s28015_s1 + $0x1ac] ss:$16 sps:$4 sm:$0xff]  }
  0x18   :  { %650 = vmatprep.subr.bf16.mxu0 %v20778_v27  ;;  %763 = vmatprep.subr.bf16.mxu1 %v20790_v32  ;;  %v109_v11 = vpack.c.bf16 %v68_v10, %v66_v9  ;;  %v20812_v13 = vld [vmem:[%s28015_s1 + $0x180] ss:$16 sps:$4 sm:$0xff]   ;;  %v20817_v16 = vld [vmem:[%s28015_s1 + $0x1a4] ss:$16 sps:$4 sm:$0xff]   ;;  %v21570_v19 = vld [vmem:[%s28014_s0 + $0x18] sm:$0xff] }
  0x19   :  { %v21575_v20 = vld [vmem:[%s28014_s0 + $0x28] sm:$0xff]  ;;  %v20815_v21 = vld [vmem:[%s28015_s1 + $0x1a0] ss:$16 sps:$4 sm:$0xff]   ;;  %v20820_v22 = vld [vmem:[%s28015_s1 + $0x1c4] ss:$16 sps:$4 sm:$0xff]  }
  0x1a   :  { %15654 = vmatmul.mubr.msk.bf16.vlgmr.msra.gmra.mrb[0].mxu0 %vm255_vm0, %v102_v28  ;;  %15662 = vmatmul.mubr.msk.bf16.vlgmr.msra.gmra.mrb[0].mxu1 %vm255_vm0, %v102_v28  ;;  %v20830_v23 = vld [vmem:[%s28015_s1 + $0x1a8] ss:$16 sps:$4 sm:$0xff]   ;;  %v71_v24 = vpack.c.bf16 %v21575_v20, %v21570_v19  ;;  %v20818_v25 = vld [vmem:[%s28015_s1 + $0x1c0] ss:$16 sps:$4 sm:$0xff]   ;;  %v20835_v26 = vld [vmem:[%s28015_s1 + $0x1cc] ss:$16 sps:$4 sm:$0xff]  }
  0x1b   :  { %651 = vmatpush1.bf16.msra.mxu0 %v20776_v29  ;;  %322 = vmatprep.mubr.bf16.mxu0 %v21246_v2  ;;  %v20823_v27 = vld [vmem:[%s28015_s1 + $0x1e4] ss:$16 sps:$4 sm:$0xff]   ;;  %v20833_v28 = vld [vmem:[%s28015_s1 + $0x1c8] ss:$16 sps:$4 sm:$0xff]   ;;  %v20838_v29 = vld [vmem:[%s28015_s1 + $0x1ec] ss:$16 sps:$4 sm:$0xff]  }
  0x1c   :  { %435 = vmatprep.mubr.bf16.mxu1 %v21246_v2  ;;  %652 = vmatprep.subr.bf16.mxu0 %v20781_v30  ;;  %v21610_v30 = vld [vmem:[%s28014_s0 + $0x38] sm:$0xff]  ;;  %v21615_v31 = vld [vmem:[%s28014_s0 + $0x48] sm:$0xff]  ;;  %v20821_v32 = vld [vmem:[%s28015_s1 + $0x1e0] ss:$16 sps:$4 sm:$0xff]  }
  0x1d   :  { %764 = vmatpush1.bf16.msra.mxu1 %v20788_v34  ;;  %v20829_v33 = vld [vmem:[%s28015_s1 + $0x204] ss:$16 sps:$4 sm:$0xff]   ;;  %v20836_v34 = vld [vmem:[%s28015_s1 + $0x1e8] ss:$16 sps:$4 sm:$0xff]   ;;  %v20839_v43 = vld [vmem:[%s28015_s1 + $0x220] ss:$16 sps:$4 sm:$0xff]  }
  0x1e   :  { %765 = vmatprep.subr.bf16.mxu1 %v20796_v37  ;;  %v20844_v37 = vld [vmem:[%s28015_s1 + $0x20c] ss:$16 sps:$4 sm:$0xff]   ;;  %v20845_v44 = vld [vmem:[%s28015_s1 + $0x228] ss:$16 sps:$4 sm:$0xff]  }
  0x1f   :  { %653 = vmatpush1.bf16.msra.mxu0 %v20779_v35  ;;  %v72_v35 = vpack.c.bf16 %v21615_v31, %v21610_v30  ;;  %v65_v55 = vld [vmem:[%s28014_s0 + $0xd8] sm:$0xff] }
  0x20   :  { %654 = vmatprep.subr.bf16.mxu0 %v20784_v36  ;;  %v20827_v36 = vld [vmem:[%s28015_s1 + $0x200] ss:$16 sps:$4 sm:$0xff]  }
  0x21   :  { %766 = vmatpush1.bf16.msra.mxu1 %v20794_v40  ;;  %v20847_v40 = vld [vmem:[%s28015_s1 + $0x22c] ss:$16 sps:$4 sm:$0xff]  }
  0x22   :  { %15655 = vmatmul.mubr.msk.bf16.gmra.mrb[4].mxu0 %vm255_vm0, %v103_v38  ;;  %15663 = vmatmul.mubr.msk.bf16.gmra.mrb[4].mxu1 %vm255_vm0, %v103_v38  ;;  %v20841_v38 = vld [vmem:[%s28015_s1 + $0x224] ss:$16 sps:$4 sm:$0xff]  }
  0x23   :  { %332 = vmatprep.mubr.bf16.mxu0 %v21246_v2  ;;  %445 = vmatprep.mubr.bf16.mxu1 %v21246_v2 }
  0x24   :  { %655 = vmatpush1.bf16.msra.mxu0 %v20782_v39  ;;  %767 = vmatprep.subr.bf16.mxu1 %v20799_v42  ;;  %v20842_v39 = vld [vmem:[%s28015_s1 + $0x208] ss:$16 sps:$4 sm:$0xff]  }
  0x25   :  { %656 = vmatprep.subr.bf16.mxu0 %v20787_v41  ;;  %768 = vmatpush1.bf16.msra.mxu1 %v20797_v46  ;;  %v49_v41 = vld [vmem:[%s28014_s0 + $0x58] sm:$0xff]  ;;  %v21653_v42 = vld [vmem:[%s28014_s0 + $0x68] sm:$0xff] }
  0x26   :  { %769 = vmatprep.subr.bf16.mxu1 %v20802_v48  ;;  %v53_v46 = vld [vmem:[%s28014_s0 + $0x78] sm:$0xff] }
  0x28   :  { %657 = vmatpush1.bf16.msra.mxu0 %v20785_v45  ;;  %v73_v45 = vpack.c.bf16 %v21653_v42, %v49_v41 }
  0x29   :  { %658 = vmatprep.subr.bf16.mxu0 %v20793_v47  ;;  %770 = vmatpush1.bf16.msra.mxu1 %v20800_v51  ;;  %v55_v47 = vld [vmem:[%s28014_s0 + $0x88] sm:$0xff] }
  0x2a   :  { %15656 = vmatmul.mubr.msk.bf16.gmra.mrb[8].mxu0 %vm255_vm0, %v104_v49  ;;  %15664 = vmatmul.mubr.msk.bf16.gmra.mrb[8].mxu1 %vm255_vm0, %v104_v49  ;;  %v74_v48 = vpack.c.bf16 %v55_v47, %v53_v46  ;;  %v57_v49 = vld [vmem:[%s28014_s0 + $0x98] sm:$0xff] }
  0x2b   :  { %342 = vmatprep.mubr.bf16.mxu0 %v21246_v2  ;;  %455 = vmatprep.mubr.bf16.mxu1 %v21246_v2 }
  0x2c   :  { %659 = vmatpush1.bf16.msra.mxu0 %v20791_v50  ;;  %771 = vmatprep.subr.bf16.mxu1 %v20808_v53  ;;  %v59_v50 = vld [vmem:[%s28014_s0 + $0xa8] sm:$0xff] }
  0x2d   :  { %660 = vmatprep.subr.bf16.mxu0 %v20805_v52  ;;  %772 = vmatpush1.bf16.msra.mxu1 %v20806_v57  ;;  %v75_v51 = vpack.c.bf16 %v59_v50, %v57_v49  ;;  %v61_v52 = vld [vmem:[%s28014_s0 + $0xb8] sm:$0xff]  ;;  %v63_v53 = vld [vmem:[%s28014_s0 + $0xc8] sm:$0xff] }
  0x2e   :  { %773 = vmatprep.subr.bf16.mxu1 %v20811_v58  ;;  %v76_v54 = vpack.c.bf16 %v63_v53, %v61_v52  ;;  %v876_v58 = vpack.c.bf16 %v21570_v19, %v21547_v12 }
  0x30   :  { %661 = vmatpush1.bf16.msra.mxu0 %v20803_v56  ;;  %v67_v56 = vld [vmem:[%s28014_s0 + $0xe8] sm:$0xff] }
  0x31   :  { %1053 = vmatprep.subr.bf16.mxu0 %v20814_v59  ;;  %774 = vmatpush1.bf16.msra.mxu1 %v20809_v61  ;;  %v77_v57 = vpack.c.bf16 %v67_v56, %v65_v55  ;;  %v877_v59 = vpack.c.bf16 %v21610_v30, %v21575_v20  ;;  %v879_v61 = vpack.c.bf16 %v53_v46, %v21653_v42 }
  0x32   :  { %15657 = vmatmul.mubr.msk.bf16.gmra.mrb[12].mxu0 %vm255_vm0, %v105_v60  ;;  %15665 = vmatmul.mubr.msk.bf16.gmra.mrb[12].mxu1 %vm255_vm0, %v105_v60  ;;  %v878_v60 = vpack.c.bf16 %v49_v41, %v21615_v31 }
  0x33   :  { %352 = vmatprep.mubr.bf16.mxu0 %v21246_v2  ;;  %465 = vmatprep.mubr.bf16.mxu1 %v21246_v2 }
  0x34   :  { %1166 = vmatprep.subr.bf16.mxu1 %v20826_v62 }
  0x3a   :  { %15658 = vmatmul.mubr.msk.bf16.gmra.mrb[16].mxu0 %vm255_vm0, %v106_v1  ;;  %15666 = vmatmul.mubr.msk.bf16.gmra.mrb[16].mxu1 %vm255_vm0, %v106_v1 }
  0x3b   :  { %362 = vmatprep.mubr.bf16.mxu0 %v21246_v2  ;;  %475 = vmatprep.mubr.bf16.mxu1 %v21246_v2 }
  0x42   :  { %15659 = vmatmul.mubr.msk.bf16.gmra.mrb[20].mxu0 %vm255_vm0, %v107_v5  ;;  %15667 = vmatmul.mubr.msk.bf16.gmra.mrb[20].mxu1 %vm255_vm0, %v107_v5 }
  0x43   :  { %372 = vmatprep.mubr.bf16.mxu0 %v21246_v2  ;;  %485 = vmatprep.mubr.bf16.mxu1 %v21246_v2 }
  0x4a   :  { %15660 = vmatmul.mubr.msk.bf16.gmra.mrb[24].mxu0 %vm255_vm0, %v108_v8  ;;  %15668 = vmatmul.mubr.msk.bf16.gmra.mrb[24].mxu1 %vm255_vm0, %v108_v8 }
  0x4b   :  { %382 = vmatprep.mubr.bf16.mxu0 %v21246_v2  ;;  %495 = vmatprep.mubr.bf16.mxu1 %v21246_v2 }
  0x52   :  { %15661 = vmatmul.mubr.msk.bf16.gmra.mrb[28].mxu0 %vm255_vm0, %v109_v11  ;;  %15669 = vmatmul.mubr.msk.bf16.gmra.mrb[28].mxu1 %vm255_vm0, %v109_v11 }
  0x53   :  { %682 = vmatprep.mubr.bf16.mxu0 %v21246_v2  ;;  %795 = vmatprep.mubr.bf16.mxu1 %v21246_v2 }
  0x5a   :  { %15694 = vmatmul.mubr.msk.bf16.vlgmr.msra.gmra.mrb[0].mxu0 %vm255_vm0, %v70_v15  ;;  %15702 = vmatmul.mubr.msk.bf16.vlgmr.msra.gmra.mrb[0].mxu1 %vm255_vm0, %v70_v15 }
  0x5b   :  { %1054 = vmatpush1.bf16.msra.mxu0 %v20812_v13  ;;  %692 = vmatprep.mubr.bf16.mxu0 %v21246_v2 }
  0x5c   :  { %805 = vmatprep.mubr.bf16.mxu1 %v21246_v2  ;;  %1055 = vmatprep.subr.bf16.mxu0 %v20817_v16 }
  0x5d   :  { %1167 = vmatpush1.bf16.msra.mxu1 %v20824_v17 }
  0x5e   :  { %1168 = vmatprep.subr.bf16.mxu1 %v20832_v18 }
  0x5f   :  { %1056 = vmatpush1.bf16.msra.mxu0 %v20815_v21 }
  0x60   :  { %1057 = vmatprep.subr.bf16.mxu0 %v20820_v22 }
  0x61   :  { %1169 = vmatpush1.bf16.msra.mxu1 %v20830_v23 }
  0x62   :  { %15695 = vmatmul.mubr.msk.bf16.gmra.mrb[4].mxu0 %vm255_vm0, %v71_v24  ;;  %15703 = vmatmul.mubr.msk.bf16.gmra.mrb[4].mxu1 %vm255_vm0, %v71_v24 }
  0x63   :  { %702 = vmatprep.mubr.bf16.mxu0 %v21246_v2  ;;  %815 = vmatprep.mubr.bf16.mxu1 %v21246_v2 }
  0x64   :  { %1058 = vmatpush1.bf16.msra.mxu0 %v20818_v25  ;;  %1170 = vmatprep.subr.bf16.mxu1 %v20835_v26 }
  0x65   :  { %1059 = vmatprep.subr.bf16.mxu0 %v20823_v27  ;;  %1171 = vmatpush1.bf16.msra.mxu1 %v20833_v28 }
  0x66   :  { %1172 = vmatprep.subr.bf16.mxu1 %v20838_v29 }
  0x68   :  { %1060 = vmatpush1.bf16.msra.mxu0 %v20821_v32 }
  0x69   :  { %1061 = vmatprep.subr.bf16.mxu0 %v20829_v33  ;;  %1173 = vmatpush1.bf16.msra.mxu1 %v20836_v34 }
  0x6a   :  { %15696 = vmatmul.mubr.msk.bf16.gmra.mrb[8].mxu0 %vm255_vm0, %v72_v35  ;;  %15704 = vmatmul.mubr.msk.bf16.gmra.mrb[8].mxu1 %vm255_vm0, %v72_v35 }
  0x6b   :  { %712 = vmatprep.mubr.bf16.mxu0 %v21246_v2  ;;  %825 = vmatprep.mubr.bf16.mxu1 %v21246_v2 }
  0x6c   :  { %1062 = vmatpush1.bf16.msra.mxu0 %v20827_v36  ;;  %1174 = vmatprep.subr.bf16.mxu1 %v20844_v37 }
  0x6d   :  { %1063 = vmatprep.subr.bf16.mxu0 %v20841_v38  ;;  %1175 = vmatpush1.bf16.msra.mxu1 %v20842_v39 }
  0x6e   :  { %1176 = vmatprep.subr.bf16.mxu1 %v20847_v40 }
  0x70   :  { %1064 = vmatpush1.bf16.msra.mxu0 %v20839_v43 }
  0x71   :  { %1177 = vmatpush1.bf16.msra.mxu1 %v20845_v44 }
  0x72   :  { %15697 = vmatmul.mubr.msk.bf16.gmra.mrb[12].mxu0 %vm255_vm0, %v73_v45  ;;  %15705 = vmatmul.mubr.msk.bf16.gmra.mrb[12].mxu1 %vm255_vm0, %v73_v45 }
  0x73   :  { %722 = vmatprep.mubr.bf16.mxu0 %v21246_v2  ;;  %835 = vmatprep.mubr.bf16.mxu1 %v21246_v2 }
  0x7a   :  { %15698 = vmatmul.mubr.msk.bf16.gmra.mrb[16].mxu0 %vm255_vm0, %v74_v48  ;;  %15706 = vmatmul.mubr.msk.bf16.gmra.mrb[16].mxu1 %vm255_vm0, %v74_v48 }
  0x7b   :  { %732 = vmatprep.mubr.bf16.mxu0 %v21246_v2  ;;  %845 = vmatprep.mubr.bf16.mxu1 %v21246_v2 }
  0x82   :  { %15699 = vmatmul.mubr.msk.bf16.gmra.mrb[20].mxu0 %vm255_vm0, %v75_v51  ;;  %15707 = vmatmul.mubr.msk.bf16.gmra.mrb[20].mxu1 %vm255_vm0, %v75_v51 }
  0x83   :  { %742 = vmatprep.mubr.bf16.mxu0 %v21246_v2  ;;  %855 = vmatprep.mubr.bf16.mxu1 %v21246_v2 }
  0x8a   :  { %15700 = vmatmul.mubr.msk.bf16.gmra.mrb[24].mxu0 %vm255_vm0, %v76_v54  ;;  %15708 = vmatmul.mubr.msk.bf16.gmra.mrb[24].mxu1 %vm255_vm0, %v76_v54 }
  0x8b   :  { %752 = vmatprep.mubr.bf16.mxu0 %v21246_v2  ;;  %865 = vmatprep.mubr.bf16.mxu1 %v21246_v2 }
  0x92   :  { %15701 = vmatmul.mubr.msk.bf16.gmra.mrb[28].mxu0 %vm255_vm0, %v77_v57  ;;  %15709 = vmatmul.mubr.msk.bf16.gmra.mrb[28].mxu1 %vm255_vm0, %v77_v57 }
  0x93   :  { %1085 = vmatprep.mubr.bf16.mxu0 %v21246_v2  ;;  %1198 = vmatprep.mubr.bf16.mxu1 %v21246_v2 }
  0x9a   :  { %15758 = vmatmul.mubr.msk.bf16.vlgmr.msra.gmra.mrb[0].mxu0 %vm255_vm0, %v876_v58  ;;  %15766 = vmatmul.mubr.msk.bf16.vlgmr.msra.gmra.mrb[0].mxu1 %vm255_vm0, %v876_v58 }
  0x9b   :  { %1095 = vmatprep.mubr.bf16.mxu0 %v21246_v2  ;;  %1208 = vmatprep.mubr.bf16.mxu1 %v21246_v2 }
  0xa2   :  { %15759 = vmatmul.mubr.msk.bf16.gmra.mrb[4].mxu0 %vm255_vm0, %v877_v59  ;;  %15767 = vmatmul.mubr.msk.bf16.gmra.mrb[4].mxu1 %vm255_vm0, %v877_v59 }
  0xa3   :  { %1105 = vmatprep.mubr.bf16.mxu0 %v21246_v2  ;;  %1218 = vmatprep.mubr.bf16.mxu1 %v21246_v2 }
  0xaa   :  { %15760 = vmatmul.mubr.msk.bf16.gmra.mrb[8].mxu0 %vm255_vm0, %v878_v60  ;;  %15768 = vmatmul.mubr.msk.bf16.gmra.mrb[8].mxu1 %vm255_vm0, %v878_v60 }
  0xab   :  { %1115 = vmatprep.mubr.bf16.mxu0 %v21246_v2  ;;  %1228 = vmatprep.mubr.bf16.mxu1 %v21246_v2 }
  0xac   :  { %18 = vsyncpa [#allocation3], 0  ;;  %v880_v62 = vpack.c.bf16 %v57_v49, %v55_v47  ;;  %v881_v63 = vpack.c.bf16 %v61_v52, %v59_v50  ;;  %v882_v0 = vpack.c.bf16 %v65_v55, %v63_v53  ;;  %v69_v1 = vld [vmem:[%s28014_s0 + $0xf8] sm:$0xff]  ;;  %v1359_v4 = vld [vmem:[%s28018_s4 + $0x80] sm:$0xff]  ;;  %vm5115_vm1 = vcmask 261120  }
  0xad   :  { %v883_v3 = vpack.c.bf16 %v69_v1, %v67_v56  ;;  %v1360_v5 = vld [vmem:[%s28018_s4 + $0x88] sm:$0xff]  ;;  %v1704_v6 = vand.u32 4294901760, %v1359_v4  ;;  %v1361_v26 = vld [vmem:[%s28018_s4 + $0x90] sm:$0xff]  ;;  %v1362_v27 = vld [vmem:[%s28018_s4 + $0x98] sm:$0xff]  ;;  %vm21249_vm2 = vmmov 0   ;;  %vm15578_vm3 = vcmask 80896  }
  0xae   :  { %v1707_v7 = vand.u32 4294901760, %v1360_v5  ;;  %v1344_v8 = vld [vmem:[%s28018_s4 + $0x8] sm:$0xff]  ;;  %v1345_v28 = vld [vmem:[%s28018_s4 + $0x10] sm:$0xff]  ;;  %v1710_v32 = vand.u32 4294901760, %v1361_v26  ;;  %v1346_v33 = vld [vmem:[%s28018_s4 + $0x18] sm:$0xff]  ;;  %v1713_v35 = vand.u32 4294901760, %v1362_v27 }
  0xaf   :  { %v1659_v10 = vand.u32 4294901760, %v1344_v8  ;;  %v21763_v12 = vsub.f32 %v1359_v4, %v1704_v6  ;;  %v1662_v36 = vand.u32 4294901760, %v1345_v28  ;;  %v1665_v37 = vand.u32 4294901760, %v1346_v33  ;;  %v1363_v52 = vld [vmem:[%s28018_s4 + $0xa0] sm:$0xff]  ;;  %v1364_v53 = vld [vmem:[%s28018_s4 + $0xa8] sm:$0xff] }
  0xb0   :  { %v21761_v11 = vpack.c.bf16 %v1707_v7, %v1704_v6  ;;  %v21765_v13 = vsub.f32 %v1360_v5, %v1707_v7  ;;  %v21805_v39 = vsub.f32 %v1361_v26, %v1710_v32  ;;  %v21809_v41 = vpack.c.bf16 %v1713_v35, %v1710_v32  ;;  %v1347_v54 = vld [vmem:[%s28018_s4 + $0x20] sm:$0xff]  ;;  %v1348_v59 = vld [vmem:[%s28018_s4 + $0x28] sm:$0xff] }
  0xb1   :  { %v21771_v17 = vsub.f32 %v1344_v8, %v1659_v10  ;;  %v28048_v18 = vand.u32 4294901760, %v21763_v12  ;;  %v21811_v42 = vpack.c.bf16 %v1665_v37, %v1662_v36  ;;  %v21813_v43 = vsub.f32 %v1362_v27, %v1713_v35  ;;  %v1349_v27 = vld [vmem:[%s28018_s4 + $0x30] sm:$0xff] }
  0xb2   :  { %15761 = vmatmul.mubr.msk.bf16.gmra.mrb[12].mxu0 %vm255_vm0, %v879_v61  ;;  %15769 = vmatmul.mubr.msk.bf16.gmra.mrb[12].mxu1 %vm255_vm0, %v879_v61  ;;  %28467 = vst [vmem:[#allocation5_spill] sm:$0xff] %v21761_v11  ;;  %v28047_v19 = vand.u32 4294901760, %v21765_v13  ;;  %28471 = vst [vmem:[#allocation9_spill] sm:$0xff] %v21809_v41  ;;  %v28043_v44 = vand.u32 4294901760, %v21805_v39  ;;  %v21817_v45 = vsub.f32 %v1345_v28, %v1662_v36  ;;  %v1716_v58 = vand.u32 4294901760, %v1363_v52  ;;  %v1350_v28 = vld [vmem:[%s28018_s4 + $0x38] sm:$0xff] }
  0xb3   :  { %1125 = vmatprep.mubr.bf16.mxu0 %v21246_v2  ;;  %1238 = vmatprep.mubr.bf16.mxu1 %v21246_v2  ;;  %v28044_v21 = vand.u32 4294901760, %v21771_v17  ;;  %v1883_v22 = vsub.f32 %v21763_v12, %v28048_v18  ;;  %28472 = vst [vmem:[#allocation10_spill] sm:$0xff] %v21811_v42  ;;  %v21819_v46 = vsub.f32 %v1346_v33, %v1665_v37  ;;  %v28042_v47 = vand.u32 4294901760, %v21813_v43 }
  0xb4   :  { %18628 = vmatprep.subr.bf16.mxu0 %v21761_v11  ;;  %v1890_v23 = vsub.f32 %v21765_v13, %v28047_v19  ;;  %v1897_v48 = vsub.f32 %v21805_v39, %v28043_v44  ;;  %v28041_v49 = vand.u32 4294901760, %v21817_v45  ;;  %v1719_v61 = vand.u32 4294901760, %v1364_v53  ;;  %v22041_v44 = vld [vmem:[%s28018_s4 + $0x60] sm:$0xff] }
  0xb5   :  { %v1778_v25 = vsub.f32 %v21771_v17, %v28044_v21  ;;  %v1884_v29 = vand.u32 4294901760, %v1883_v22  ;;  %v28040_v50 = vand.u32 4294901760, %v21819_v46  ;;  %v1904_v51 = vsub.f32 %v21813_v43, %v28042_v47  ;;  %v1365_v22 = vld [vmem:[%s28018_s4 + $0xb0] sm:$0xff] }
  0xb6   :  { %v1891_v30 = vand.u32 4294901760, %v1890_v23  ;;  %v1898_v55 = vand.u32 4294901760, %v1897_v48  ;;  %v1785_v56 = vsub.f32 %v21817_v45, %v28041_v49  ;;  %v21855_v5 = vpack.c.bf16 %v1719_v61, %v1716_v58  ;;  %v1366_v23 = vld [vmem:[%s28018_s4 + $0xb8] sm:$0xff] }
  0xb7   :  { %v1779_v34 = vand.u32 4294901760, %v1778_v25  ;;  %v1792_v57 = vsub.f32 %v21819_v46, %v28040_v50  ;;  %v1905_v60 = vand.u32 4294901760, %v1904_v51  ;;  %v21859_v6 = vsub.f32 %v1364_v53, %v1719_v61  ;;  %v1367_v53 = vld [vmem:[%s28018_s4 + $0xc0] sm:$0xff]  ;;  %v22027_v50 = vld [vmem:[%s28018_s4 + $0xe8] sm:$0xff] }
  0xb8   :  { %v21803_v38 = vpack.c.bf16 %v1891_v30, %v1884_v29  ;;  %28474 = vst [vmem:[#allocation12_spill] sm:$0xff] %v21855_v5  ;;  %v1722_v25 = vand.u32 4294901760, %v1365_v22  ;;  %v1725_v26 = vand.u32 4294901760, %v1366_v23  ;;  %v1674_v32 = vand.u32 4294901760, %v1349_v27 }
  0xb9   :  { %v1793_v1 = vand.u32 4294901760, %v1792_v57  ;;  %v21853_v4 = vpack.c.bf16 %v1905_v60, %v1898_v55  ;;  %v1677_v35 = vand.u32 4294901760, %v1350_v28 }
  0xba   :  { %15762 = vmatmul.mubr.msk.bf16.gmra.mrb[16].mxu0 %vm255_vm0, %v880_v62  ;;  %15770 = vmatmul.mubr.msk.bf16.gmra.mrb[16].mxu1 %vm255_vm0, %v880_v62  ;;  %28469 = vst [vmem:[#allocation7_spill] sm:$0xff] %v21803_v38  ;;  %v1668_v62 = vand.u32 4294901760, %v1347_v54  ;;  %v21895_v36 = vsub.f32 %v1365_v22, %v1722_v25  ;;  %v21912_v57 = vsub.f32 %v1349_v27, %v1674_v32 }
  0xbb   :  { %1135 = vmatprep.mubr.bf16.mxu0 %v21246_v2  ;;  %1248 = vmatprep.mubr.bf16.mxu1 %v21246_v2  ;;  %28473 = vst [vmem:[#allocation11_spill] sm:$0xff] %v21853_v4  ;;  %v21909_v55 = vpack.c.bf16 %v1677_v35, %v1674_v32 }
  0xbc   :  { %18660 = vmatprep.subr.bf16.mxu1 %v21803_v38  ;;  %28480 = vst [vmem:[#allocation18_spill] sm:$0xff] %v21895_v36  ;;  %28483 = vst [vmem:[#allocation21_spill] sm:$0xff] %v21912_v57 }
  0xbd   :  { %28482 = vst [vmem:[#allocation20_spill] sm:$0xff] %v21909_v55 }
  0xc2   :  { %15763 = vmatmul.mubr.msk.bf16.gmra.mrb[20].mxu0 %vm255_vm0, %v881_v63  ;;  %15771 = vmatmul.mubr.msk.bf16.gmra.mrb[20].mxu1 %vm255_vm0, %v881_v63  ;;  %v1671_v63 = vand.u32 4294901760, %v1348_v59 }
  0xc3   :  { %1145 = vmatprep.mubr.bf16.mxu0 %v21246_v2  ;;  %1258 = vmatprep.mubr.bf16.mxu1 %v21246_v2 }
  0xca   :  { %15764 = vmatmul.mubr.msk.bf16.gmra.mrb[24].mxu0 %vm255_vm0, %v882_v0  ;;  %15772 = vmatmul.mubr.msk.bf16.gmra.mrb[24].mxu1 %vm255_vm0, %v882_v0  ;;  %v1786_v0 = vand.u32 4294901760, %v1785_v56  ;;  %v28032_v56 = vand.u32 4294901760, %v21895_v36 }
  0xcb   :  { %1155 = vmatprep.mubr.bf16.mxu0 %v21246_v2  ;;  %1268 = vmatprep.mubr.bf16.mxu1 %v21246_v2  ;;  %v1343_v2 = vld [vmem:[%s28018_s4] sm:$0xff] }
  0xcc   :  { %v1656_v9 = vand.u32 4294901760, %v1343_v2  ;;  %v21861_v7 = vpack.c.bf16 %v1793_v1, %v1786_v0  ;;  %v1352_v0 = vld [vmem:[%s28018_s4 + $0x48] sm:$0xff]  ;;  %v1925_v22 = vsub.f32 %v21895_v36, %v28032_v56 }
  0xce   :  { %v21767_v15 = vsub.f32 %v1343_v2, %v1656_v9  ;;  %v21769_v16 = vpack.c.bf16 %v1659_v10, %v1656_v9  ;;  %v21857_v2 = vpack.c.bf16 %v1671_v63, %v1668_v62  ;;  %28476 = vst [vmem:[#allocation14_spill] sm:$0xff] %v21861_v7  ;;  %v21864_v9 = vsub.f32 %v1347_v54, %v1668_v62 }
  0xcf   :  { %v21866_v10 = vsub.f32 %v1348_v59, %v1671_v63  ;;  %v21918_v62 = vsub.f32 %v1350_v28, %v1677_v35  ;;  %v1351_v63 = vld [vmem:[%s28018_s4 + $0x40] sm:$0xff]  ;;  %v1926_v32 = vand.u32 4294901760, %v1925_v22  ;;  %v21959_v22 = vld [vmem:[%s28018_s4 + $0xd8] sm:$0xff] }
  0xd0   :  { %28468 = vst [vmem:[#allocation6_spill] sm:$0xff] %v21769_v16  ;;  %v28045_v20 = vand.u32 4294901760, %v21767_v15  ;;  %18630 = vmatpush3.bf16.msra.mxu0 %v21769_v16  ;;  %28475 = vst [vmem:[#allocation13_spill] sm:$0xff] %v21857_v2  ;;  %v28034_v30 = vand.u32 4294901760, %v21864_v9  ;;  %v1680_v35 = vand.u32 4294901760, %v1351_v63 }
  0xd1   :  { %18632 = vmatprep.subr.bf16.mxu0 %v21809_v41  ;;  %28477 = vst [vmem:[#allocation15_spill] sm:$0xff] %v21864_v9  ;;  %28478 = vst [vmem:[#allocation16_spill] sm:$0xff] %v21866_v10  ;;  %v28030_v28 = vand.u32 4294901760, %v21918_v62 }
  0xd2   :  { %15765 = vmatmul.mubr.msk.bf16.gmra.mrb[28].mxu0 %vm255_vm0, %v883_v3  ;;  %15773 = vmatmul.mubr.msk.bf16.gmra.mrb[28].mxu1 %vm255_vm0, %v883_v3  ;;  %v1771_v24 = vsub.f32 %v21767_v15, %v28045_v20  ;;  %v21851_v3 = vsub.f32 %v1363_v52, %v1716_v58  ;;  %v1799_v48 = vsub.f32 %v21864_v9, %v28034_v30  ;;  %v1368_v58 = vld [vmem:[%s28018_s4 + $0xc8] sm:$0xff] }
  0xd3   :  { %v21903_v52 = vsub.f32 %v1366_v23, %v1725_v26  ;;  %28484 = vst [vmem:[#allocation22_spill] sm:$0xff] %v21918_v62  ;;  %v28029_v23 = vand.u32 4294901760, %v21912_v57 }
  0xd4   :  { %v1772_v31 = vand.u32 4294901760, %v1771_v24  ;;  %18634 = vmatpush3.bf16.msra.mxu0 %v21811_v42  ;;  %v28039_v8 = vand.u32 4294901760, %v21851_v3  ;;  %v28037_v24 = vand.u32 4294901760, %v21859_v6  ;;  %v1800_v59 = vand.u32 4294901760, %v1799_v48 }
  0xd5   :  { %18636 = vmatprep.subr.bf16.mxu0 %v21855_v5  ;;  %28481 = vst [vmem:[#allocation19_spill] sm:$0xff] %v21903_v52  ;;  %v28031_v61 = vand.u32 4294901760, %v21903_v52 }
  0xd6   :  { %v21807_v40 = vpack.c.bf16 %v1779_v34, %v1772_v31  ;;  %v1911_v29 = vsub.f32 %v21851_v3, %v28039_v8  ;;  %v28033_v31 = vand.u32 4294901760, %v21866_v10  ;;  %v1918_v33 = vsub.f32 %v21859_v6, %v28037_v24 }
  0xd7   :  { %v21893_v34 = vpack.c.bf16 %v1725_v26, %v1722_v25  ;;  %v1728_v25 = vand.u32 4294901760, %v1367_v53  ;;  %v1932_v27 = vsub.f32 %v21903_v52, %v28031_v61 }
  0xd8   :  { %28470 = vst [vmem:[#allocation8_spill] sm:$0xff] %v21807_v40  ;;  %18662 = vmatpush3.bf16.msra.mxu1 %v21807_v40  ;;  %18638 = vmatpush3.bf16.msra.mxu0 %v21857_v2  ;;  %v1912_v37 = vand.u32 4294901760, %v1911_v29  ;;  %v1806_v51 = vsub.f32 %v21866_v10, %v28033_v31  ;;  %v1919_v54 = vand.u32 4294901760, %v1918_v33  ;;  %v1731_v29 = vand.u32 4294901760, %v1368_v58 }
  0xd9   :  { %18664 = vmatprep.subr.bf16.mxu1 %v21853_v4  ;;  %28479 = vst [vmem:[#allocation17_spill] sm:$0xff] %v21893_v34  ;;  %18640 = vmatprep.subr.bf16.mxu0 %v21893_v34  ;;  %v1813_v33 = vsub.f32 %v21912_v57, %v28029_v23  ;;  %v1933_v48 = vand.u32 4294901760, %v1932_v27 }
  0xda   :  { %v1807_v60 = vand.u32 4294901760, %v1806_v51  ;;  %v21926_v1 = vpack.c.bf16 %v1919_v54, %v1912_v37  ;;  %v1683_v37 = vand.u32 4294901760, %v1352_v0  ;;  %v1820_v51 = vsub.f32 %v21918_v62, %v28030_v28 }
  0xdb   :  { %v21947_v54 = vsub.f32 %v1367_v53, %v1728_v25  ;;  %v1814_v14 = vand.u32 4294901760, %v1813_v33  ;;  %v21961_v27 = vpack.c.bf16 %v1731_v29, %v1728_v25  ;;  %v21965_v28 = vsub.f32 %v1351_v63, %v1680_v35  ;;  %v21970_v53 = vld [vmem:[%s28018_s4 + $0x50] sm:$0xff]  ;;  %v21979_v25 = vld [vmem:[%s28018_s4 + $0x58] sm:$0xff] }
  0xdc   :  { %18666 = vmatpush3.bf16.msra.mxu1 %v21861_v7  ;;  %28485 = vst [vmem:[#allocation23_spill] sm:$0xff] %v21926_v1  ;;  %18642 = vmatpush3.bf16.msra.mxu0 %v21909_v55  ;;  %v21933_v26 = vpack.c.bf16 %v1807_v60, %v1800_v59  ;;  %v21949_v59 = vsub.f32 %v1368_v58, %v1731_v29  ;;  %v21954_v60 = vld [vmem:[%s28018_s4 + $0xd0] sm:$0xff]  ;;  %v1821_v61 = vand.u32 4294901760, %v1820_v51 }
  0xdd   :  { %18668 = vmatprep.subr.bf16.mxu1 %v21926_v1  ;;  %28487 = vst [vmem:[#allocation25_spill] sm:$0xff] %v21947_v54  ;;  %28489 = vst [vmem:[#allocation27_spill] sm:$0xff] %v21961_v27  ;;  %v21963_v23 = vpack.c.bf16 %v1683_v37, %v1680_v35  ;;  %v21972_v58 = vpack.c.bf16 %v1933_v48, %v1926_v32  ;;  %v28035_v56 = vand.u32 4294901760, %v21947_v54  ;;  %18644 = vmatprep.subr.bf16.mxu0 %v21961_v27 }
  0xde   :  { %28486 = vst [vmem:[#allocation24_spill] sm:$0xff] %v21933_v26  ;;  %28488 = vst [vmem:[#allocation26_spill] sm:$0xff] %v21949_v59  ;;  %v28036_v31 = vand.u32 4294901760, %v21949_v59  ;;  %v28038_v63 = vand.u32 4294901760, %v21965_v28  ;;  %v21983_v29 = vsub.f32 %v1352_v0, %v1683_v37  ;;  %v28053_v33 = vand.u32 4294901760, %v21954_v60 }
  0xdf   :  { %28490 = vst [vmem:[#allocation28_spill] sm:$0xff] %v21963_v23  ;;  %28491 = vst [vmem:[#allocation29_spill] sm:$0xff] %v21965_v28  ;;  %v28052_v32 = vand.u32 4294901760, %v21959_v22  ;;  %v21988_v35 = vpack.c.bf16 %v1821_v61, %v1814_v14  ;;  %v1939_v48 = vsub.f32 %v21947_v54, %v28035_v56  ;;  %v28050_v0 = vand.u32 4294901760, %v21970_v53  ;;  %v22011_v56 = vld [vmem:[%s28018_s4 + $0xe0] sm:$0xff] }
  0xe0   :  { %18670 = vmatpush3.bf16.msra.mxu1 %v21933_v26  ;;  %28492 = vst [vmem:[#allocation30_spill] sm:$0xff] %v21972_v58  ;;  %28493 = vst [vmem:[#allocation31_spill] sm:$0xff] %v21983_v29  ;;  %18646 = vmatpush3.bf16.msra.mxu0 %v21963_v23  ;;  %v1946_v51 = vsub.f32 %v21949_v59, %v28036_v31  ;;  %v1827_v37 = vsub.f32 %v21965_v28, %v28038_v63  ;;  %v28046_v30 = vand.u32 4294901760, %v21983_v29 }
  0xe1   :  { %18672 = vmatprep.subr.bf16.mxu1 %v21972_v58  ;;  %28494 = vst [vmem:[#allocation32_spill] sm:$0xff] %v21988_v35  ;;  %v28049_v14 = vand.u32 4294901760, %v21979_v25  ;;  %v22006_v61 = vsub.f32 %v21954_v60, %v28053_v33  ;;  %v1940_v31 = vand.u32 4294901760, %v1939_v48  ;;  %v22017_v63 = vsub.f32 %v21959_v22, %v28052_v32  ;;  %v1373_v33 = vld [vmem:[%s28018_s4 + $0xf0] sm:$0xff] }
  0xe2   :  { %v1947_v24 = vand.u32 4294901760, %v1946_v51  ;;  %v22022_v8 = vsub.f32 %v21970_v53, %v28050_v0  ;;  %v1828_v49 = vand.u32 4294901760, %v1827_v37  ;;  %v1834_v48 = vsub.f32 %v21983_v29, %v28046_v30 }
  0xe3   :  { %28495 = vst [vmem:[#allocation33_spill] sm:$0xff] %v22006_v61  ;;  %28496 = vst [vmem:[#allocation34_spill] sm:$0xff] %v22017_v63  ;;  %v28051_v51 = vand.u32 4294901760, %v22006_v61  ;;  %v22036_v47 = vsub.f32 %v21979_v25, %v28049_v14  ;;  %v28056_v37 = vand.u32 4294901760, %v22017_v63  ;;  %v1740_v30 = vand.u32 4294901760, %v22011_v56 }
  0xe4   :  { %18674 = vmatpush3.bf16.msra.mxu1 %v21988_v35  ;;  %28497 = vst [vmem:[#allocation35_spill] sm:$0xff] %v22022_v8  ;;  %v22043_v21 = vpack.c.bf16 %v1947_v24, %v1940_v31  ;;  %v28058_v20 = vand.u32 4294901760, %v22022_v8  ;;  %v1835_v19 = vand.u32 4294901760, %v1834_v48  ;;  %v1743_v0 = vand.u32 4294901760, %v22027_v50  ;;  %v1356_v24 = vld [vmem:[%s28018_s4 + $0x68] sm:$0xff] }
  0xe5   :  { %28498 = vst [vmem:[#allocation36_spill] sm:$0xff] %v22036_v47  ;;  %v1953_v18 = vsub.f32 %v22006_v61, %v28051_v51  ;;  %v1960_v31 = vsub.f32 %v22017_v63, %v28056_v37  ;;  %v22064_v51 = vsub.f32 %v22011_v56, %v1740_v30  ;;  %v1692_v32 = vand.u32 4294901760, %v22041_v44  ;;  %v1374_v56 = vld [vmem:[%s28018_s4 + $0xf8] sm:$0xff] }
  0xe6   :  { %28499 = vst [vmem:[#allocation37_spill] sm:$0xff] %v22043_v21  ;;  %18676 = vmatprep.subr.bf16.mxu1 %v22043_v21  ;;  %v1841_v48 = vsub.f32 %v22022_v8, %v28058_v20  ;;  %v22070_v14 = vpack.c.bf16 %v1835_v19, %v1828_v49  ;;  %v28502_v35 = vand.u32 4294901760, %v22036_v47  ;;  %v22076_v58 = vsub.f32 %v22027_v50, %v1743_v0  ;;  %v1357_v50 = vld [vmem:[%s28018_s4 + $0x70] sm:$0xff] }
  0xe7   :  { %28500 = vst [vmem:[#allocation38_spill] sm:$0xff] %v22064_v51  ;;  %v1954_v21 = vand.u32 4294901760, %v1953_v18  ;;  %v1961_v20 = vand.u32 4294901760, %v1960_v31  ;;  %v28066_v1 = vand.u32 4294901760, %v22064_v51  ;;  %v1695_v7 = vand.u32 4294901760, %v1356_v24 }
  0xe8   :  { %28501 = vst [vmem:[#allocation39_spill] sm:$0xff] %v22070_v14  ;;  %v1848_v37 = vsub.f32 %v22036_v47, %v28502_v35  ;;  %28503 = vst [vmem:[#allocation40_spill] sm:$0xff] %v22076_v58  ;;  %v1842_v26 = vand.u32 4294901760, %v1841_v48  ;;  %18678 = vmatpush3.bf16.msra.mxu1 %v22070_v14  ;;  %v28067_v18 = vand.u32 4294901760, %v22076_v58  ;;  %v22085_v49 = vsub.f32 %v22041_v44, %v1692_v32 }
  0xe9   :  { %v1746_v35 = vand.u32 4294901760, %v1373_v33  ;;  %v22090_v4 = vpack.c.bf16 %v1961_v20, %v1954_v21  ;;  %v1967_v31 = vsub.f32 %v22064_v51, %v28066_v1  ;;  %v22095_v48 = vsub.f32 %v1356_v24, %v1695_v7  ;;  %v1358_v20 = vld [vmem:[%s28018_s4 + $0x78] sm:$0xff] }
  0xea   :  { %v1849_v19 = vand.u32 4294901760, %v1848_v37  ;;  %28504 = vst [vmem:[#allocation41_spill] sm:$0xff] %v22085_v49  ;;  %v1749_v14 = vand.u32 4294901760, %v1374_v56  ;;  %v1974_v44 = vsub.f32 %v22076_v58, %v28067_v18  ;;  %v28073_v40 = vand.u32 4294901760, %v22085_v49 }
  0xeb   :  { %28505 = vst [vmem:[#allocation42_spill] sm:$0xff] %v22090_v4  ;;  %28506 = vst [vmem:[#allocation43_spill] sm:$0xff] %v22095_v48  ;;  %v22103_v38 = vsub.f32 %v1373_v33, %v1746_v35  ;;  %18680 = vmatprep.subr.bf16.mxu1 %v22090_v4  ;;  %v1968_v21 = vand.u32 4294901760, %v1967_v31  ;;  %v28511_v18 = vand.u32 4294901760, %v21959_v22  ;;  %v28513_v24 = vand.u32 4294901760, %v21970_v53 }
  0xec   :  { %v22097_v37 = vpack.c.bf16 %v1849_v19, %v1842_v26  ;;  %v22110_v1 = vsub.f32 %v1374_v56, %v1749_v14  ;;  %v1698_v26 = vand.u32 4294901760, %v1357_v50  ;;  %v28510_v19 = vand.u32 4294901760, %v21954_v60 }
  0xed   :  { %28508 = vst [vmem:[#allocation45_spill] sm:$0xff] %v22103_v38  ;;  %v1975_v33 = vand.u32 4294901760, %v1974_v44  ;;  %v1855_v27 = vsub.f32 %v22085_v49, %v28073_v40  ;;  %v28078_v31 = vand.u32 4294901760, %v22103_v38  ;;  %v28514_v56 = vand.u32 4294901760, %v21979_v25 }
  0xee   :  { %28507 = vst [vmem:[#allocation44_spill] sm:$0xff] %v22097_v37  ;;  %28509 = vst [vmem:[#allocation46_spill] sm:$0xff] %v22110_v1  ;;  %v22116_v23 = vpack.c.bf16 %v28511_v18, %v28510_v19  ;;  %18682 = vmatpush3.bf16.msra.mxu1 %v22097_v37  ;;  %v28516_v60 = vand.u32 4294901760, %v22095_v48  ;;  %v28077_v18 = vand.u32 4294901760, %v22110_v1  ;;  %v1701_v19 = vand.u32 4294901760, %v1358_v20 }
  0xef   :  { %v22127_v4 = vpack.c.bf16 %v28514_v56, %v28513_v24  ;;  %v22134_v44 = vpack.c.bf16 %v1975_v33, %v1968_v21  ;;  %v1856_v40 = vand.u32 4294901760, %v1855_v27  ;;  %v1981_v53 = vsub.f32 %v22103_v38, %v28078_v31 }
  0xf0   :  { %28512 = vst [vmem:[#allocation47_spill] sm:$0xff] %v22116_v23  ;;  %v1862_v22 = vsub.f32 %v22095_v48, %v28516_v60  ;;  %18648 = vmatprep.subr.bf16.mxu0 %v22116_v23  ;;  %v22139_v37 = vsub.f32 %v1357_v50, %v1698_v26  ;;  %v22142_v25 = vpack.c.bf16 %v1743_v0, %v1740_v30 }
  0xf1   :  { %28515 = vst [vmem:[#allocation48_spill] sm:$0xff] %v22127_v4  ;;  %28517 = vst [vmem:[#allocation49_spill] sm:$0xff] %v22134_v44  ;;  %18650 = vmatpush3.bf16.msra.mxu0 %v22127_v4  ;;  %v22144_v56 = vpack.c.bf16 %v1695_v7, %v1692_v32  ;;  %v22146_v60 = vpack.c.bf16 %v1749_v14, %v1746_v35  ;;  %18684 = vmatprep.subr.bf16.mxu1 %v22134_v44  ;;  %v1982_v21 = vand.u32 4294901760, %v1981_v53 }
  0xf2   :  { %28518 = vst [vmem:[#allocation50_spill] sm:$0xff] %v22139_v37  ;;  %28519 = vst [vmem:[#allocation51_spill] sm:$0xff] %v22142_v25  ;;  %v1863_v24 = vand.u32 4294901760, %v1862_v22  ;;  %v1988_v27 = vsub.f32 %v22110_v1, %v28077_v18  ;;  %v28076_v33 = vand.u32 4294901760, %v22139_v37  ;;  %v22153_v50 = vsub.f32 %v1358_v20, %v1701_v19  ;;  %18652 = vmatprep.subr.bf16.mxu0 %v22142_v25 }
  0xf3   :  { %28520 = vst [vmem:[#allocation52_spill] sm:$0xff] %v22144_v56  ;;  %28521 = vst [vmem:[#allocation53_spill] sm:$0xff] %v22146_v60  ;;  %v22164_v14 = vpack.c.bf16 %v1701_v19, %v1698_v26  ;;  %v22178_v26 = vpack.c.bf16 %v21765_v13, %v21763_v12  ;;  %v22182_v19 = vpack.c.bf16 %v21771_v17, %v21767_v15 }
  0xf4   :  { %28522 = vst [vmem:[#allocation54_spill] sm:$0xff] %v22153_v50  ;;  %v22156_v30 = vpack.c.bf16 %v1863_v24, %v1856_v40  ;;  %v1989_v0 = vand.u32 4294901760, %v1988_v27  ;;  %v1869_v7 = vsub.f32 %v22139_v37, %v28076_v33  ;;  %v28075_v32 = vand.u32 4294901760, %v22153_v50 }
  0xf5   :  { %18654 = vmatpush3.bf16.msra.mxu0 %v22144_v56  ;;  %28524 = vst [vmem:[#allocation56_spill] sm:$0xff] %v22164_v14  ;;  %28527 = vst [vmem:[#allocation59_spill] sm:$0xff] %v22178_v26  ;;  %v22189_v24 = vpack.c.bf16 %v21813_v43, %v21805_v39  ;;  %v22197_v27 = vpack.c.bf16 %v21859_v6, %v21851_v3  ;;  %v22225_v33 = vpack.c.bf16 %v22036_v47, %v22022_v8 }
  0xf6   :  { %28523 = vst [vmem:[#allocation55_spill] sm:$0xff] %v22156_v30  ;;  %18686 = vmatpush3.bf16.msra.mxu1 %v22156_v30  ;;  %v22166_v35 = vpack.c.bf16 %v1989_v0, %v1982_v21  ;;  %v1870_v20 = vand.u32 4294901760, %v1869_v7  ;;  %v1876_v40 = vsub.f32 %v22153_v50, %v28075_v32  ;;  %18656 = vmatprep.subr.bf16.mxu0 %v22146_v60  ;;  %28528 = vst [vmem:[#allocation60_spill] sm:$0xff] %v22182_v19 }
  0xf7   :  { %28529 = vst [vmem:[#allocation61_spill] sm:$0xff] %v22189_v24  ;;  %v22193_v21 = vpack.c.bf16 %v21819_v46, %v21817_v45  ;;  %28531 = vst [vmem:[#allocation63_spill] sm:$0xff] %v22197_v27  ;;  %v22201_v0 = vpack.c.bf16 %v21866_v10, %v21864_v9  ;;  %v22205_v7 = vpack.c.bf16 %v21903_v52, %v21895_v36 }
  0xf8   :  { %28525 = vst [vmem:[#allocation57_spill] sm:$0xff] %v22166_v35  ;;  %18688 = vmatprep.subr.bf16.mxu1 %v22166_v35  ;;  %v1877_v22 = vand.u32 4294901760, %v1876_v40  ;;  %v22213_v40 = vpack.c.bf16 %v21949_v59, %v21947_v54  ;;  %v22221_v32 = vpack.c.bf16 %v22017_v63, %v22006_v61  ;;  %28538 = vst [vmem:[#allocation70_spill] sm:$0xff] %v22225_v33 }
  0xf9   :  { %18658 = vmatpush3.bf16.msra.mxu0 %v22164_v14  ;;  %28530 = vst [vmem:[#allocation62_spill] sm:$0xff] %v22193_v21  ;;  %28532 = vst [vmem:[#allocation64_spill] sm:$0xff] %v22201_v0  ;;  %v22229_v18 = vpack.c.bf16 %v22076_v58, %v22064_v51  ;;  %v22233_v31 = vpack.c.bf16 %v22095_v48, %v22085_v49 }
  0xfa   :  { %v22174_v53 = vpack.c.bf16 %v1877_v22, %v1870_v20  ;;  %18692 = vmatprep.subr.bf16.mxu0 %v22178_v26  ;;  %28533 = vst [vmem:[#allocation65_spill] sm:$0xff] %v22205_v7  ;;  %v22209_v20 = vpack.c.bf16 %v21918_v62, %v21912_v57  ;;  %28535 = vst [vmem:[#allocation67_spill] sm:$0xff] %v22213_v40  ;;  %v22217_v22 = vpack.c.bf16 %v21983_v29, %v21965_v28 }
  0xfb   :  { %28537 = vst [vmem:[#allocation69_spill] sm:$0xff] %v22221_v32  ;;  %28539 = vst [vmem:[#allocation71_spill] sm:$0xff] %v22229_v18  ;;  %v22237_v26 = vpack.c.bf16 %v22110_v1, %v22103_v38 }
  0xfc   :  { %28526 = vst [vmem:[#allocation58_spill] sm:$0xff] %v22174_v53  ;;  %18690 = vmatpush3.bf16.msra.mxu1 %v22174_v53  ;;  %28534 = vst [vmem:[#allocation66_spill] sm:$0xff] %v22209_v20  ;;  %v22241_v53 = vpack.c.bf16 %v22153_v50, %v22139_v37 }
  0xfd   :  { %18724 = vmatprep.subr.bf16.mxu1 %v21761_v11  ;;  %28536 = vst [vmem:[#allocation68_spill] sm:$0xff] %v22217_v22  ;;  %28540 = vst [vmem:[#allocation72_spill] sm:$0xff] %v22233_v31 }
  0xfe   :  { %28541 = vst [vmem:[#allocation73_spill] sm:$0xff] %v22237_v26  ;;  %28542 = vst [vmem:[#allocation74_spill] sm:$0xff] %v22241_v53 }
 0x16d   :  { %v22243_v35 = vpop.f32.mrb[0].mxu0  ;;  %v22245_v30 = vpop.f32.mrb[0].mxu1 }
 0x16e   :  { %28543 = vst [vmem:[#allocation75_spill] sm:$0xff] %v22243_v35  ;;  %28544 = vst [vmem:[#allocation76_spill] sm:$0xff] %v22245_v30  ;;  %v22247_v44 = vpop.f32.mrb[1].mxu0  ;;  %v22249_v58 = vpop.f32.mrb[1].mxu1  ;;  %v1507_v48 = vmul.f32 %v22243_v35, %v22243_v35  ;;  %v1509_v49 = vmul.f32 %v22245_v30, %v22245_v30 }
 0x16f   :  { %28545 = vst [vmem:[#allocation77_spill] sm:$0xff] %v22247_v44  ;;  %28546 = vst [vmem:[#allocation78_spill] sm:$0xff] %v22249_v58  ;;  %v1508_v1 = vmul.f32 %v22247_v44, %v22247_v44  ;;  %v1510_v50 = vmul.f32 %v22249_v58, %v22249_v58  ;;  %v22259_v37 = vpop.f32.mrb[2].mxu0  ;;  %v22261_v38 = vpop.f32.mrb[2].mxu1 }
 0x170   :  { %28547 = vst [vmem:[#allocation79_spill] sm:$0xff] %v22259_v37  ;;  %28548 = vst [vmem:[#allocation80_spill] sm:$0xff] %v22261_v38  ;;  %v1423_v51 = vadd.f32 %v22259_v37, %v22243_v35  ;;  %v1511_v47 = vmul.f32 %v22259_v37, %v22259_v37  ;;  %v1465_v8 = vadd.f32 %v22261_v38, %v22245_v30  ;;  %v22271_v61 = vpop.f32.mrb[3].mxu0  ;;  %v22273_v29 = vpop.f32.mrb[3].mxu1 }
 0x171   :  { %v1513_v63 = vmul.f32 %v22261_v38, %v22261_v38  ;;  %28549 = vst [vmem:[#allocation81_spill] sm:$0xff] %v22271_v61  ;;  %28550 = vst [vmem:[#allocation82_spill] sm:$0xff] %v22273_v29  ;;  %v1444_v28 = vadd.f32 %v22271_v61, %v22247_v44  ;;  %v1512_v59 = vmul.f32 %v22271_v61, %v22271_v61 }
 0x172   :  { %v1486_v35 = vadd.f32 %v22273_v29, %v22249_v58  ;;  %v1514_v37 = vmul.f32 %v22273_v29, %v22273_v29  ;;  %v1571_v30 = vadd.f32 %v1511_v47, %v1507_v48 }
 0x173   :  { %v1613_v54 = vadd.f32 %v1513_v63, %v1509_v49  ;;  %v1592_v62 = vadd.f32 %v1512_v59, %v1508_v1 }
 0x174   :  { %v1634_v38 = vadd.f32 %v1514_v37, %v1510_v50 }
 0x175   :  { %v22283_v57 = vpop.f32.mrb[4].mxu0  ;;  %v22285_v52 = vpop.f32.mrb[4].mxu1 }
 0x176   :  { %28551 = vst [vmem:[#allocation83_spill] sm:$0xff] %v22283_v57  ;;  %28552 = vst [vmem:[#allocation84_spill] sm:$0xff] %v22285_v52  ;;  %v1424_v36 = vadd.f32 %v1423_v51, %v22283_v57  ;;  %v1515_v44 = vmul.f32 %v22283_v57, %v22283_v57  ;;  %v1466_v61 = vadd.f32 %v1465_v8, %v22285_v52  ;;  %v22293_v10 = vpop.f32.mrb[5].mxu0  ;;  %v22295_v47 = vpop.f32.mrb[5].mxu1 }
 0x177   :  { %v1517_v58 = vmul.f32 %v22285_v52, %v22285_v52  ;;  %28553 = vst [vmem:[#allocation85_spill] sm:$0xff] %v22293_v10  ;;  %28554 = vst [vmem:[#allocation86_spill] sm:$0xff] %v22295_v47  ;;  %v1445_v1 = vadd.f32 %v1444_v28, %v22293_v10  ;;  %v1516_v59 = vmul.f32 %v22293_v10, %v22293_v10  ;;  %v22303_v49 = vpop.f32.mrb[6].mxu0  ;;  %v22305_v8 = vpop.f32.mrb[6].mxu1 }
 0x178   :  { %v1487_v63 = vadd.f32 %v1486_v35, %v22295_v47  ;;  %v1518_v51 = vmul.f32 %v22295_v47, %v22295_v47  ;;  %28555 = vst [vmem:[#allocation87_spill] sm:$0xff] %v22303_v49  ;;  %28556 = vst [vmem:[#allocation88_spill] sm:$0xff] %v22305_v8  ;;  %v1572_v48 = vadd.f32 %v1571_v30, %v1515_v44  ;;  %v22310_v28 = vpop.f32.mrb[7].mxu0  ;;  %v22312_v52 = vpop.f32.mrb[7].mxu1 }
 0x179   :  { %v1614_v37 = vadd.f32 %v1613_v54, %v1517_v58  ;;  %v1425_v50 = vadd.f32 %v1424_v36, %v22303_v49  ;;  %v1519_v29 = vmul.f32 %v22303_v49, %v22303_v49  ;;  %28557 = vst [vmem:[#allocation89_spill] sm:$0xff] %v22310_v28  ;;  %28558 = vst [vmem:[#allocation90_spill] sm:$0xff] %v22312_v52 }
 0x17a   :  { %v1593_v10 = vadd.f32 %v1592_v62, %v1516_v59  ;;  %v1635_v35 = vadd.f32 %v1634_v38, %v1518_v51  ;;  %v1467_v57 = vadd.f32 %v1466_v61, %v22305_v8  ;;  %v1521_v47 = vmul.f32 %v22305_v8, %v22305_v8 }
 0x17b   :  { %v1573_v9 = vadd.f32 %v1572_v48, %v1519_v29  ;;  %v1446_v44 = vadd.f32 %v1445_v1, %v22310_v28  ;;  %v1520_v36 = vmul.f32 %v22310_v28, %v22310_v28  ;;  %v1488_v54 = vadd.f32 %v1487_v63, %v22312_v52 }
 0x17c   :  { %v1615_v58 = vadd.f32 %v1614_v37, %v1521_v47  ;;  %v1522_v30 = vmul.f32 %v22312_v52, %v22312_v52 }
 0x17d   :  { %v1594_v49 = vadd.f32 %v1593_v10, %v1520_v36  ;;  %v22323_v38 = vpop.f32.mrb[8].mxu0  ;;  %v22325_v61 = vpop.f32.mrb[8].mxu1 }
 0x17e   :  { %v1636_v62 = vadd.f32 %v1635_v35, %v1522_v30  ;;  %28559 = vst [vmem:[#allocation91_spill] sm:$0xff] %v22323_v38  ;;  %28560 = vst [vmem:[#allocation92_spill] sm:$0xff] %v22325_v61  ;;  %v1426_v59 = vadd.f32 %v1425_v50, %v22323_v38  ;;  %v1523_v29 = vmul.f32 %v22323_v38, %v22323_v38  ;;  %v22333_v47 = vpop.f32.mrb[9].mxu0  ;;  %v22335_v51 = vpop.f32.mrb[9].mxu1 }
 0x17f   :  { %v1468_v1 = vadd.f32 %v1467_v57, %v22325_v61  ;;  %v1525_v63 = vmul.f32 %v22325_v61, %v22325_v61  ;;  %28561 = vst [vmem:[#allocation93_spill] sm:$0xff] %v22333_v47  ;;  %28562 = vst [vmem:[#allocation94_spill] sm:$0xff] %v22335_v51  ;;  %v1447_v10 = vadd.f32 %v1446_v44, %v22333_v47  ;;  %v22343_v35 = vpop.f32.mrb[10].mxu0  ;;  %v22345_v57 = vpop.f32.mrb[10].mxu1 }
 0x180   :  { %v1524_v48 = vmul.f32 %v22333_v47, %v22333_v47  ;;  %v1489_v37 = vadd.f32 %v1488_v54, %v22335_v51  ;;  %v1526_v50 = vmul.f32 %v22335_v51, %v22335_v51  ;;  %28563 = vst [vmem:[#allocation95_spill] sm:$0xff] %v22343_v35  ;;  %28564 = vst [vmem:[#allocation96_spill] sm:$0xff] %v22345_v57  ;;  %v22350_v44 = vpop.f32.mrb[11].mxu0  ;;  %v22352_v28 = vpop.f32.mrb[11].mxu1 }
 0x181   :  { %v1574_v36 = vadd.f32 %v1573_v9, %v1523_v29  ;;  %v1616_v30 = vadd.f32 %v1615_v58, %v1525_v63  ;;  %v1427_v8 = vadd.f32 %v1426_v59, %v22343_v35  ;;  %v1527_v52 = vmul.f32 %v22343_v35, %v22343_v35  ;;  %28565 = vst [vmem:[#allocation97_spill] sm:$0xff] %v22350_v44 }
 0x182   :  { %28566 = vst [vmem:[#allocation98_spill] sm:$0xff] %v22352_v28  ;;  %v1595_v61 = vadd.f32 %v1594_v49, %v1524_v48  ;;  %v1637_v54 = vadd.f32 %v1636_v62, %v1526_v50  ;;  %v1469_v47 = vadd.f32 %v1468_v1, %v22345_v57  ;;  %v1529_v51 = vmul.f32 %v22345_v57, %v22345_v57 }
 0x183   :  { %v1575_v38 = vadd.f32 %v1574_v36, %v1527_v52  ;;  %v1448_v9 = vadd.f32 %v1447_v10, %v22350_v44  ;;  %v1528_v58 = vmul.f32 %v22350_v44, %v22350_v44  ;;  %v1490_v59 = vadd.f32 %v1489_v37, %v22352_v28 }
 0x184   :  { %v1617_v29 = vadd.f32 %v1616_v30, %v1529_v51  ;;  %v1530_v63 = vmul.f32 %v22352_v28, %v22352_v28 }
 0x185   :  { %v1596_v35 = vadd.f32 %v1595_v61, %v1528_v58  ;;  %v22363_v62 = vpop.f32.mrb[12].mxu0  ;;  %v22365_v1 = vpop.f32.mrb[12].mxu1 }
 0x186   :  { %v1638_v49 = vadd.f32 %v1637_v54, %v1530_v63  ;;  %28567 = vst [vmem:[#allocation99_spill] sm:$0xff] %v22363_v62  ;;  %28568 = vst [vmem:[#allocation100_spill] sm:$0xff] %v22365_v1  ;;  %v1428_v48 = vadd.f32 %v1427_v8, %v22363_v62  ;;  %v1531_v52 = vmul.f32 %v22363_v62, %v22363_v62  ;;  %v22373_v51 = vpop.f32.mrb[13].mxu0  ;;  %v22375_v50 = vpop.f32.mrb[13].mxu1 }
 0x187   :  { %v1470_v10 = vadd.f32 %v1469_v47, %v22365_v1  ;;  %v1533_v37 = vmul.f32 %v22365_v1, %v22365_v1  ;;  %28569 = vst [vmem:[#allocation101_spill] sm:$0xff] %v22373_v51  ;;  %28570 = vst [vmem:[#allocation102_spill] sm:$0xff] %v22375_v50  ;;  %v1449_v61 = vadd.f32 %v1448_v9, %v22373_v51  ;;  %v22383_v54 = vpop.f32.mrb[14].mxu0  ;;  %v22385_v47 = vpop.f32.mrb[14].mxu1 }
 0x188   :  { %v1532_v36 = vmul.f32 %v22373_v51, %v22373_v51  ;;  %v1491_v30 = vadd.f32 %v1490_v59, %v22375_v50  ;;  %v1534_v8 = vmul.f32 %v22375_v50, %v22375_v50  ;;  %28571 = vst [vmem:[#allocation103_spill] sm:$0xff] %v22383_v54  ;;  %28572 = vst [vmem:[#allocation104_spill] sm:$0xff] %v22385_v47  ;;  %v22390_v9 = vpop.f32.mrb[15].mxu0  ;;  %v22392_v44 = vpop.f32.mrb[15].mxu1 }
 0x189   :  { %v1576_v58 = vadd.f32 %v1575_v38, %v1531_v52  ;;  %v1618_v63 = vadd.f32 %v1617_v29, %v1533_v37  ;;  %v1429_v57 = vadd.f32 %v1428_v48, %v22383_v54  ;;  %v1535_v28 = vmul.f32 %v22383_v54, %v22383_v54  ;;  %28573 = vst [vmem:[#allocation105_spill] sm:$0xff] %v22390_v9 }
 0x18a   :  { %28574 = vst [vmem:[#allocation106_spill] sm:$0xff] %v22392_v44  ;;  %v1597_v1 = vadd.f32 %v1596_v35, %v1532_v36  ;;  %v1639_v59 = vadd.f32 %v1638_v49, %v1534_v8  ;;  %v1471_v51 = vadd.f32 %v1470_v10, %v22385_v47  ;;  %v1537_v50 = vmul.f32 %v22385_v47, %v22385_v47 }
 0x18b   :  { %v1577_v62 = vadd.f32 %v1576_v58, %v1535_v28  ;;  %v1450_v38 = vadd.f32 %v1449_v61, %v22390_v9  ;;  %v1536_v29 = vmul.f32 %v22390_v9, %v22390_v9  ;;  %v1492_v48 = vadd.f32 %v1491_v30, %v22392_v44 }
 0x18c   :  { %v1619_v52 = vadd.f32 %v1618_v63, %v1537_v50  ;;  %v1538_v37 = vmul.f32 %v22392_v44, %v22392_v44 }
 0x18d   :  { %v1598_v54 = vadd.f32 %v1597_v1, %v1536_v29  ;;  %v22403_v49 = vpop.f32.mrb[16].mxu0  ;;  %v22405_v10 = vpop.f32.mrb[16].mxu1 }
 0x18e   :  { %v1640_v35 = vadd.f32 %v1639_v59, %v1538_v37  ;;  %28575 = vst [vmem:[#allocation107_spill] sm:$0xff] %v22403_v49  ;;  %28576 = vst [vmem:[#allocation108_spill] sm:$0xff] %v22405_v10  ;;  %v1430_v36 = vadd.f32 %v1429_v57, %v22403_v49  ;;  %v1539_v28 = vmul.f32 %v22403_v49, %v22403_v49  ;;  %v22413_v50 = vpop.f32.mrb[17].mxu0  ;;  %v22415_v8 = vpop.f32.mrb[17].mxu1 }
 0x18f   :  { %v1472_v61 = vadd.f32 %v1471_v51, %v22405_v10  ;;  %v1541_v30 = vmul.f32 %v22405_v10, %v22405_v10  ;;  %28577 = vst [vmem:[#allocation109_spill] sm:$0xff] %v22413_v50  ;;  %28578 = vst [vmem:[#allocation110_spill] sm:$0xff] %v22415_v8  ;;  %v1451_v1 = vadd.f32 %v1450_v38, %v22413_v50  ;;  %v22423_v59 = vpop.f32.mrb[18].mxu0  ;;  %v22425_v51 = vpop.f32.mrb[18].mxu1 }
 0x190   :  { %v1540_v58 = vmul.f32 %v22413_v50, %v22413_v50  ;;  %v1493_v63 = vadd.f32 %v1492_v48, %v22415_v8  ;;  %v1542_v57 = vmul.f32 %v22415_v8, %v22415_v8  ;;  %28579 = vst [vmem:[#allocation111_spill] sm:$0xff] %v22423_v59  ;;  %28580 = vst [vmem:[#allocation112_spill] sm:$0xff] %v22425_v51  ;;  %v22430_v38 = vpop.f32.mrb[19].mxu0  ;;  %v22432_v9 = vpop.f32.mrb[19].mxu1 }
 0x191   :  { %v1578_v29 = vadd.f32 %v1577_v62, %v1539_v28  ;;  %v1620_v37 = vadd.f32 %v1619_v52, %v1541_v30  ;;  %v1431_v47 = vadd.f32 %v1430_v36, %v22423_v59  ;;  %v1543_v44 = vmul.f32 %v22423_v59, %v22423_v59  ;;  %28581 = vst [vmem:[#allocation113_spill] sm:$0xff] %v22430_v38 }
 0x192   :  { %28582 = vst [vmem:[#allocation114_spill] sm:$0xff] %v22432_v9  ;;  %v1599_v10 = vadd.f32 %v1598_v54, %v1540_v58  ;;  %v1641_v48 = vadd.f32 %v1640_v35, %v1542_v57  ;;  %v1473_v49 = vadd.f32 %v1472_v61, %v22425_v51  ;;  %v1545_v8 = vmul.f32 %v22425_v51, %v22425_v51 }
 0x193   :  { %v1579_v50 = vadd.f32 %v1578_v29, %v1543_v44  ;;  %v1452_v62 = vadd.f32 %v1451_v1, %v22430_v38  ;;  %v1544_v52 = vmul.f32 %v22430_v38, %v22430_v38  ;;  %v1494_v36 = vadd.f32 %v1493_v63, %v22432_v9 }
 0x194   :  { %v1621_v28 = vadd.f32 %v1620_v37, %v1545_v8  ;;  %v1546_v30 = vmul.f32 %v22432_v9, %v22432_v9 }
 0x195   :  { %v1600_v59 = vadd.f32 %v1599_v10, %v1544_v52  ;;  %v22443_v35 = vpop.f32.mrb[20].mxu0  ;;  %v22445_v61 = vpop.f32.mrb[20].mxu1 }
 0x196   :  { %v1642_v54 = vadd.f32 %v1641_v48, %v1546_v30  ;;  %28583 = vst [vmem:[#allocation115_spill] sm:$0xff] %v22443_v35  ;;  %28584 = vst [vmem:[#allocation116_spill] sm:$0xff] %v22445_v61  ;;  %v1432_v58 = vadd.f32 %v1431_v47, %v22443_v35  ;;  %v1547_v44 = vmul.f32 %v22443_v35, %v22443_v35  ;;  %v22453_v8 = vpop.f32.mrb[21].mxu0  ;;  %v22455_v57 = vpop.f32.mrb[21].mxu1 }
 0x197   :  { %v1474_v1 = vadd.f32 %v1473_v49, %v22445_v61  ;;  %v1549_v63 = vmul.f32 %v22445_v61, %v22445_v61  ;;  %28585 = vst [vmem:[#allocation117_spill] sm:$0xff] %v22453_v8  ;;  %28586 = vst [vmem:[#allocation118_spill] sm:$0xff] %v22455_v57  ;;  %v1453_v10 = vadd.f32 %v1452_v62, %v22453_v8  ;;  %v22463_v48 = vpop.f32.mrb[22].mxu0  ;;  %v22465_v49 = vpop.f32.mrb[22].mxu1 }
 0x198   :  { %v1548_v29 = vmul.f32 %v22453_v8, %v22453_v8  ;;  %v1495_v37 = vadd.f32 %v1494_v36, %v22455_v57  ;;  %v1550_v47 = vmul.f32 %v22455_v57, %v22455_v57  ;;  %28587 = vst [vmem:[#allocation119_spill] sm:$0xff] %v22463_v48  ;;  %28588 = vst [vmem:[#allocation120_spill] sm:$0xff] %v22465_v49  ;;  %v22470_v62 = vpop.f32.mrb[23].mxu0  ;;  %v22472_v38 = vpop.f32.mrb[23].mxu1 }
 0x199   :  { %v1580_v52 = vadd.f32 %v1579_v50, %v1547_v44  ;;  %v1622_v30 = vadd.f32 %v1621_v28, %v1549_v63  ;;  %v1433_v51 = vadd.f32 %v1432_v58, %v22463_v48  ;;  %v1551_v9 = vmul.f32 %v22463_v48, %v22463_v48  ;;  %28589 = vst [vmem:[#allocation121_spill] sm:$0xff] %v22470_v62 }
 0x19a   :  { %28590 = vst [vmem:[#allocation122_spill] sm:$0xff] %v22472_v38  ;;  %v1601_v61 = vadd.f32 %v1600_v59, %v1548_v29  ;;  %v1643_v36 = vadd.f32 %v1642_v54, %v1550_v47  ;;  %v1475_v35 = vadd.f32 %v1474_v1, %v22465_v49  ;;  %v1553_v57 = vmul.f32 %v22465_v49, %v22465_v49 }
 0x19b   :  { %v1581_v8 = vadd.f32 %v1580_v52, %v1551_v9  ;;  %v1454_v50 = vadd.f32 %v1453_v10, %v22470_v62  ;;  %v1552_v28 = vmul.f32 %v22470_v62, %v22470_v62  ;;  %v1496_v58 = vadd.f32 %v1495_v37, %v22472_v38 }
 0x19c   :  { %v1623_v44 = vadd.f32 %v1622_v30, %v1553_v57  ;;  %v1554_v63 = vmul.f32 %v22472_v38, %v22472_v38 }
 0x19d   :  { %v1602_v48 = vadd.f32 %v1601_v61, %v1552_v28  ;;  %v22483_v54 = vpop.f32.mrb[24].mxu0  ;;  %v22485_v1 = vpop.f32.mrb[24].mxu1 }
 0x19e   :  { %v1644_v59 = vadd.f32 %v1643_v36, %v1554_v63  ;;  %28591 = vst [vmem:[#allocation123_spill] sm:$0xff] %v22483_v54  ;;  %28592 = vst [vmem:[#allocation124_spill] sm:$0xff] %v22485_v1  ;;  %v1434_v29 = vadd.f32 %v1433_v51, %v22483_v54  ;;  %v1555_v9 = vmul.f32 %v22483_v54, %v22483_v54  ;;  %v22493_v57 = vpop.f32.mrb[25].mxu0  ;;  %v22495_v47 = vpop.f32.mrb[25].mxu1 }
 0x19f   :  { %v1476_v10 = vadd.f32 %v1475_v35, %v22485_v1  ;;  %v1557_v37 = vmul.f32 %v22485_v1, %v22485_v1  ;;  %28593 = vst [vmem:[#allocation125_spill] sm:$0xff] %v22493_v57  ;;  %28594 = vst [vmem:[#allocation126_spill] sm:$0xff] %v22495_v47  ;;  %v1455_v61 = vadd.f32 %v1454_v50, %v22493_v57  ;;  %v22503_v36 = vpop.f32.mrb[26].mxu0  ;;  %v22505_v35 = vpop.f32.mrb[26].mxu1 }
 0x1a0   :  { %v1556_v52 = vmul.f32 %v22493_v57, %v22493_v57  ;;  %v1497_v30 = vadd.f32 %v1496_v58, %v22495_v47  ;;  %v1558_v51 = vmul.f32 %v22495_v47, %v22495_v47  ;;  %28595 = vst [vmem:[#allocation127_spill] sm:$0xff] %v22503_v36  ;;  %28596 = vst [vmem:[#allocation128_spill] sm:$0xff] %v22505_v35  ;;  %v22510_v50 = vpop.f32.mrb[27].mxu0  ;;  %v22512_v62 = vpop.f32.mrb[27].mxu1 }
 0x1a1   :  { %v1582_v28 = vadd.f32 %v1581_v8, %v1555_v9  ;;  %v1624_v63 = vadd.f32 %v1623_v44, %v1557_v37  ;;  %v1435_v49 = vadd.f32 %v1434_v29, %v22503_v36  ;;  %v1559_v38 = vmul.f32 %v22503_v36, %v22503_v36  ;;  %28597 = vst [vmem:[#allocation129_spill] sm:$0xff] %v22510_v50 }
 0x1a2   :  { %28598 = vst [vmem:[#allocation130_spill] sm:$0xff] %v22512_v62  ;;  %v1603_v1 = vadd.f32 %v1602_v48, %v1556_v52  ;;  %v1645_v58 = vadd.f32 %v1644_v59, %v1558_v51  ;;  %v1477_v54 = vadd.f32 %v1476_v10, %v22505_v35  ;;  %v1561_v47 = vmul.f32 %v22505_v35, %v22505_v35 }
 0x1a3   :  { %v1583_v57 = vadd.f32 %v1582_v28, %v1559_v38  ;;  %v1456_v8 = vadd.f32 %v1455_v61, %v22510_v50  ;;  %v1560_v44 = vmul.f32 %v22510_v50, %v22510_v50  ;;  %v1498_v29 = vadd.f32 %v1497_v30, %v22512_v62 }
 0x1a4   :  { %v1625_v9 = vadd.f32 %v1624_v63, %v1561_v47  ;;  %v1562_v37 = vmul.f32 %v22512_v62, %v22512_v62 }
 0x1a5   :  { %v1604_v36 = vadd.f32 %v1603_v1, %v1560_v44  ;;  %v22523_v59 = vpop.f32.mrb[28].mxu0  ;;  %v22525_v10 = vpop.f32.mrb[28].mxu1 }
 0x1a6   :  { %v1646_v48 = vadd.f32 %v1645_v58, %v1562_v37  ;;  %28599 = vst [vmem:[#allocation131_spill] sm:$0xff] %v22523_v59  ;;  %28600 = vst [vmem:[#allocation132_spill] sm:$0xff] %v22525_v10  ;;  %v1436_v52 = vadd.f32 %v1435_v49, %v22523_v59  ;;  %v1563_v38 = vmul.f32 %v22523_v59, %v22523_v59  ;;  %v22533_v47 = vpop.f32.mrb[29].mxu0  ;;  %v22535_v51 = vpop.f32.mrb[29].mxu1 }
 0x1a7   :  { %v1478_v61 = vadd.f32 %v1477_v54, %v22525_v10  ;;  %v1565_v30 = vmul.f32 %v22525_v10, %v22525_v10  ;;  %28601 = vst [vmem:[#allocation133_spill] sm:$0xff] %v22533_v47  ;;  %28602 = vst [vmem:[#allocation134_spill] sm:$0xff] %v22535_v51  ;;  %v1457_v1 = vadd.f32 %v1456_v8, %v22533_v47  ;;  %v22543_v58 = vpop.f32.mrb[30].mxu0  ;;  %v22545_v54 = vpop.f32.mrb[30].mxu1 }
 0x1a8   :  { %v1564_v28 = vmul.f32 %v22533_v47, %v22533_v47  ;;  %v1499_v63 = vadd.f32 %v1498_v29, %v22535_v51  ;;  %v1566_v49 = vmul.f32 %v22535_v51, %v22535_v51  ;;  %28603 = vst [vmem:[#allocation135_spill] sm:$0xff] %v22543_v58  ;;  %28604 = vst [vmem:[#allocation136_spill] sm:$0xff] %v22545_v54  ;;  %v22550_v8 = vpop.f32.mrb[31].mxu0  ;;  %v22552_v50 = vpop.f32.mrb[31].mxu1 }
 0x1a9   :  { %v1584_v44 = vadd.f32 %v1583_v57, %v1563_v38  ;;  %v1626_v37 = vadd.f32 %v1625_v9, %v1565_v30  ;;  %v1437_v35 = vadd.f32 %v1436_v52, %v22543_v58  ;;  %v1567_v62 = vmul.f32 %v22543_v58, %v22543_v58  ;;  %28605 = vst [vmem:[#allocation137_spill] sm:$0xff] %v22550_v8 }
 0x1aa   :  { %28606 = vst [vmem:[#allocation138_spill] sm:$0xff] %v22552_v50  ;;  %v1605_v10 = vadd.f32 %v1604_v36, %v1564_v28  ;;  %v1647_v29 = vadd.f32 %v1646_v48, %v1566_v49  ;;  %v22555_v59 = vadd.f32 %v1478_v61, %v22545_v54  ;;  %v1569_v51 = vmul.f32 %v22545_v54, %v22545_v54 }
 0x1ab   :  { %v1438_v47 = vrot.slane %v1437_v35, 4  ;;  %v22559_v57 = vadd.f32 %v1584_v44, %v1567_v62  ;;  %v1458_v9 = vadd.f32 %v1457_v1, %v22550_v8  ;;  %v1568_v52 = vmul.f32 %v22550_v8, %v22550_v8 }
 0x1ac   :  { %28607 = vst [vmem:[#allocation139_spill] sm:$0xff] %v22555_v59  ;;  %v22564_v38 = vadd.f32 %v1626_v37, %v1569_v51  ;;  %v22567_v30 = vadd.f32 %v1499_v63, %v22552_v50  ;;  %v1570_v36 = vmul.f32 %v22552_v50, %v22552_v50  ;;  %v22672_v50 = vld [vmem:[%s28018_s4 + $0x188] sm:$0xff] }
 0x1ad   :  { %28608 = vst [vmem:[#allocation140_spill] sm:$0xff] %v22559_v57  ;;  %v1439_v48 = vadd.f32 %v1438_v47, %v1437_v35  ;;  %v1459_v61 = vrot.slane %v1458_v9, 4  ;;  %v22571_v28 = vadd.f32 %v1605_v10, %v1568_v52  ;;  %v28613_v52 = vld [vmem:[#allocation27_spill] sm:$0xff]  ;;  %28633 = vst [vmem:[#allocation157_spill] sm:$0xff] %v22672_v50 }
 0x1ae   :  { %28609 = vst [vmem:[#allocation141_spill] sm:$0xff] %v22564_v38  ;;  %v22573_v49 = vadd.f32 %v1647_v29, %v1570_v36  ;;  %v1501_v36 = vrot.slane %v22567_v30, 4 }
 0x1af   :  { %28610 = vst [vmem:[#allocation142_spill] sm:$0xff] %v22571_v28  ;;  %v1440_v62 = vrot.slane %v1439_v48, 2  ;;  %v1460_v44 = vadd.f32 %v1459_v61, %v1458_v9  ;;  %v22610_v61 = vld [vmem:[%s28018_s4 + $0x118] sm:$0xff]  ;;  %v22812_v28 = vld [vmem:[%s28018_s4 + $0x140] sm:$0xff] }
 0x1b0   :  { %28611 = vst [vmem:[#allocation143_spill] sm:$0xff] %v22573_v49  ;;  %28615 = vst [vmem:[#allocation146_spill] sm:$0xff] %v22610_v61  ;;  %v22693_v49 = vld [vmem:[%s28018_s4 + $0x130] sm:$0xff] }
 0x1b1   :  { %v1441_v1 = vadd.f32 %v1440_v62, %v1439_v48  ;;  %v1461_v54 = vrot.slane %v1460_v44, 2  ;;  %v22605_v48 = vld [vmem:[%s28018_s4 + $0x110] sm:$0xff]  ;;  %v22615_v62 = vld [vmem:[%s28018_s4 + $0x1a0] sm:$0xff]  ;;  %28634 = vst [vmem:[#allocation158_spill] sm:$0xff] %v22693_v49  ;;  %28659 = vst [vmem:[#allocation168_spill] sm:$0xff] %v22812_v28 }
 0x1b2   :  { %28614 = vst [vmem:[#allocation145_spill] sm:$0xff] %v22605_v48  ;;  %28616 = vst [vmem:[#allocation147_spill] sm:$0xff] %v22615_v62 }
 0x1b3   :  { %v1442_v58 = vrot.slane %v1441_v1, 1  ;;  %v1462_v8 = vadd.f32 %v1461_v54, %v1460_v44  ;;  %v22620_v44 = vld [vmem:[%s28018_s4 + $0x1a8] sm:$0xff] }
 0x1b4   :  { %28617 = vst [vmem:[#allocation148_spill] sm:$0xff] %v22620_v44 }
 0x1b5   :  { %v1443_v51 = vadd.f32 %v1442_v58, %v1441_v1  ;;  %v1463_v37 = vrot.slane %v1462_v8, 1  ;;  %v22625_v1 = vld [vmem:[%s28018_s4 + $0x120] sm:$0xff] }
 0x1b6   :  { %28618 = vst [vmem:[#allocation149_spill] sm:$0xff] %v22625_v1 }
 0x1b7   :  { %v22575_v38 = vand.u32 4294901760, %v1443_v51  ;;  %v1464_v63 = vadd.f32 %v1463_v37, %v1462_v8  ;;  %v28620_v37 = vand.u32 4294901760, %v21763_v12  ;;  %v28626_v12 = vand.u32 4294901760, %v21767_v15  ;;  %v22677_v15 = vld [vmem:[%s28018_s4 + $0x100] sm:$0xff] }
 0x1b9   :  { %28612 = vst [vmem:[#allocation144_spill] sm:$0xff] %v22575_v38  ;;  %v22578_v57 = vsub.f32 %v1443_v51, %v22575_v38  ;;  %v22580_v35 = vand.u32 4294901760, %v1464_v63  ;;  %v28619_v51 = vld [vmem:[#allocation28_spill] sm:$0xff] }
 0x1bb   :  { %1992 = vmatprep.mubr.f32.mxu1 %v22580_v35  ;;  %v1752_v10 = vsub.f32 %v1464_v63, %v22580_v35  ;;  %v28171_v47 = vand.u32 4294901760, %v22578_v57  ;;  %v28621_v63 = vand.u32 4294901760, %v21765_v13  ;;  %v28627_v13 = vand.u32 4294901760, %v21771_v17 }
 0x1bc   :  { %1994 = vmatmul.mubr.f32.vlgmr.msra.gmra.mrb[32].mxu1 %v22575_v38  ;;  %v28647_v17 = vand.u32 4294901760, %v22615_v62 }
 0x1bd   :  { %18726 = vmatpush3.bf16.msra.mxu1 %v21769_v16  ;;  %v1753_v58 = vand.u32 4294901760, %v1752_v10  ;;  %v1760_v54 = vsub.f32 %v22578_v57, %v28171_v47  ;;  %v22667_v47 = vld [vmem:[%s28018_s4 + $0x180] sm:$0xff] }
 0x1be   :  { %18728 = vmatprep.subr.bf16.mxu1 %v21809_v41  ;;  %28632 = vst [vmem:[#allocation156_spill] sm:$0xff] %v22667_v47 }
 0x1bf   :  { %2236 = vmatprep.mubr.f32.mxu1 %v1753_v58  ;;  %v1754_v8 = vsub.f32 %v1752_v10, %v1753_v58  ;;  %v1761_v9 = vand.u32 4294901760, %v1760_v54  ;;  %v22638_v58 = vld [vmem:[%s28018_s4 + $0x128] sm:$0xff]  ;;  %v22643_v54 = vld [vmem:[%s28018_s4 + $0x1b0] sm:$0xff] }
 0x1c0   :  { %28623 = vst [vmem:[#allocation151_spill] sm:$0xff] %v22638_v58  ;;  %28624 = vst [vmem:[#allocation152_spill] sm:$0xff] %v22643_v54 }
 0x1c1   :  { %18730 = vmatpush3.bf16.msra.mxu1 %v21811_v42  ;;  %v1755_v29 = vand.u32 4294901760, %v1754_v8  ;;  %v22648_v8 = vld [vmem:[%s28018_s4 + $0x1b8] sm:$0xff] }
 0x1c2   :  { %18732 = vmatprep.subr.bf16.mxu1 %v21855_v5  ;;  %28625 = vst [vmem:[#allocation153_spill] sm:$0xff] %v22648_v8 }
 0x1c3   :  { %1756 = vmatprep.mubr.f32.mxu0 %v1755_v29  ;;  %v22656_v29 = vpack.c.bf16 %v28627_v13, %v28626_v12  ;;  %v22685_v12 = vld [vmem:[%s28018_s4 + $0x108] sm:$0xff]  ;;  %v22747_v13 = vld [vmem:[%s28018_s4 + $0x1c0] sm:$0xff] }
 0x1c4   :  { %1762 = vmatmul.mubr.f32.vlgmr.msra.gmra.mrb[32].mxu0 %v1761_v9  ;;  %v28629_v9 = vand.u32 4294901760, %v21805_v39  ;;  %v28635_v39 = vand.u32 4294901760, %v21817_v45  ;;  %28646 = vst [vmem:[#allocation164_spill] sm:$0xff] %v22747_v13 }
 0x1c5   :  { %18694 = vmatpush3.bf16.msra.mxu0 %v22182_v19  ;;  %18734 = vmatpush3.bf16.msra.mxu1 %v21857_v2  ;;  %28628 = vst [vmem:[#allocation154_spill] sm:$0xff] %v22656_v29  ;;  %v28655_v19 = vand.u32 4294901760, %v22648_v8 }
 0x1c6   :  { %2129 = vmatprep.mubr.f32.mxu0 %v1752_v10  ;;  %18696 = vmatprep.subr.bf16.mxu0 %v22189_v24  ;;  %v22633_v10 = vpack.c.bf16 %v28621_v63, %v28620_v37  ;;  %v28630_v37 = vand.u32 4294901760, %v21813_v43  ;;  %v1502_v43 = vadd.f32 %v1501_v36, %v22567_v30  ;;  %v28636_v30 = vand.u32 4294901760, %v21819_v46 }
 0x1c7   :  { %18736 = vmatprep.subr.bf16.mxu1 %v21893_v34  ;;  %v28644_v46 = vand.u32 4294901760, %v22610_v61  ;;  %v28654_v24 = vand.u32 4294901760, %v22643_v54 }
 0x1c8   :  { %28622 = vst [vmem:[#allocation150_spill] sm:$0xff] %v22633_v10  ;;  %v22662_v63 = vpack.c.bf16 %v28630_v37, %v28629_v9  ;;  %v22699_v36 = vpack.c.bf16 %v28636_v30, %v28635_v39  ;;  %v28638_v37 = vand.u32 4294901760, %v21851_v3  ;;  %v28639_v9 = vand.u32 4294901760, %v21859_v6  ;;  %v22718_v30 = vld [vmem:[%s28018_s4 + $0x138] sm:$0xff]  ;;  %v22726_v6 = vld [vmem:[%s28018_s4 + $0x190] sm:$0xff] }
 0x1c9   :  { %18698 = vmatpush3.bf16.msra.mxu0 %v22193_v21  ;;  %18738 = vmatpush3.bf16.msra.mxu1 %v21909_v55  ;;  %28641 = vst [vmem:[#allocation161_spill] sm:$0xff] %v22718_v30  ;;  %v22741_v45 = vsub.f32 %v22610_v61, %v28644_v46  ;;  %v28650_v46 = vand.u32 4294901760, %v22625_v1  ;;  %v22837_v61 = vld [vmem:[%s28018_s4 + $0x150] sm:$0xff] }
 0x1ca   :  { %18700 = vmatprep.subr.bf16.mxu0 %v22197_v27  ;;  %18740 = vmatprep.subr.bf16.mxu1 %v28613_v52  ;;  %28631 = vst [vmem:[#allocation155_spill] sm:$0xff] %v22662_v63  ;;  %28637 = vst [vmem:[#allocation159_spill] sm:$0xff] %v22699_v36  ;;  %v28652_v27 = vand.u32 4294901760, %v22638_v58 }
 0x1cb   :  { %28645 = vst [vmem:[#allocation163_spill] sm:$0xff] %v22741_v45  ;;  %v22762_v3 = vsub.f32 %v22625_v1, %v28650_v46  ;;  %v28656_v46 = vand.u32 4294901760, %v22667_v47  ;;  %v28658_v1 = vand.u32 4294901760, %v22693_v49 }
 0x1cc   :  { %v22767_v21 = vsub.f32 %v22638_v58, %v28652_v27  ;;  %v22865_v58 = vld [vmem:[%s28018_s4 + $0x160] sm:$0xff] }
 0x1cd   :  { %18702 = vmatpush3.bf16.msra.mxu0 %v22201_v0  ;;  %18742 = vmatpush3.bf16.msra.mxu1 %v28619_v51  ;;  %v22710_v0 = vpack.c.bf16 %v28639_v9, %v28638_v37  ;;  %v22731_v9 = vld [vmem:[%s28018_s4 + $0x198] sm:$0xff]  ;;  %v28642_v37 = vand.u32 4294901760, %v22605_v48  ;;  %28651 = vst [vmem:[#allocation166_spill] sm:$0xff] %v22762_v3  ;;  %v22785_v27 = vsub.f32 %v22667_v47, %v28656_v46  ;;  %v22901_v47 = vld [vmem:[%s28018_s4 + $0x170] sm:$0xff] }
 0x1ce   :  { %18704 = vmatprep.subr.bf16.mxu0 %v22205_v7  ;;  %18744 = vmatprep.subr.bf16.mxu1 %v22116_v23  ;;  %v1503_v7 = vrot.slane %v1502_v43, 2  ;;  %28653 = vst [vmem:[#allocation167_spill] sm:$0xff] %v22767_v21  ;;  %28668 = vst [vmem:[#allocation175_spill] sm:$0xff] %v22901_v47 }
 0x1cf   :  { %28640 = vst [vmem:[#allocation160_spill] sm:$0xff] %v22710_v0  ;;  %v22736_v39 = vsub.f32 %v22605_v48, %v28642_v37  ;;  %v28648_v37 = vand.u32 4294901760, %v22620_v44 }
 0x1d1   :  { %18706 = vmatpush3.bf16.msra.mxu0 %v22209_v20  ;;  %18746 = vmatpush3.bf16.msra.mxu1 %v22127_v4  ;;  %28643 = vst [vmem:[#allocation162_spill] sm:$0xff] %v22736_v39  ;;  %v22757_v20 = vsub.f32 %v22620_v44, %v28648_v37  ;;  %v22777_v37 = vsub.f32 %v22648_v8, %v28655_v19  ;;  %v22792_v19 = vld [vmem:[%s28018_s4 + $0x1c8] sm:$0xff]  ;;  %v22855_v44 = vld [vmem:[%s28018_s4 + $0x1e0] sm:$0xff] }
 0x1d2   :  { %18708 = vmatprep.subr.bf16.mxu0 %v22213_v40  ;;  %18748 = vmatprep.subr.bf16.mxu1 %v22142_v25  ;;  %v22752_v40 = vsub.f32 %v22615_v62, %v28647_v17  ;;  %v22772_v17 = vsub.f32 %v22643_v54, %v28654_v24  ;;  %v22807_v8 = vsub.f32 %v22693_v49, %v28658_v1  ;;  %v22832_v54 = vld [vmem:[%s28018_s4 + $0x1d8] sm:$0xff]  ;;  %v28663_v1 = vand.u32 4294901760, %v22718_v30  ;;  %v22860_v62 = vld [vmem:[%s28018_s4 + $0x1e8] sm:$0xff] }
 0x1d3   :  { %28649 = vst [vmem:[#allocation165_spill] sm:$0xff] %v22757_v20  ;;  %v22824_v24 = vadd.f32 %v1503_v7, %v1502_v43  ;;  %28661 = vst [vmem:[#allocation170_spill] sm:$0xff] %v22832_v54  ;;  %v22842_v7 = vld [vmem:[%s28018_s4 + $0x158] sm:$0xff]  ;;  %v28666_v49 = vand.u32 4294901760, %v22747_v13 }
 0x1d4   :  { %28662 = vst [vmem:[#allocation171_spill] sm:$0xff] %v22842_v7  ;;  %v22850_v48 = vsub.f32 %v22718_v30, %v28663_v1  ;;  %28664 = vst [vmem:[#allocation172_spill] sm:$0xff] %v22855_v44  ;;  %v22890_v1 = vld [vmem:[%s28018_s4 + $0x1f8] sm:$0xff] }
 0x1d5   :  { %18710 = vmatpush3.bf16.msra.mxu0 %v22217_v22  ;;  %18750 = vmatpush3.bf16.msra.mxu1 %v22144_v56  ;;  %v28657_v22 = vand.u32 4294901760, %v22672_v50  ;;  %28665 = vst [vmem:[#allocation173_spill] sm:$0xff] %v22860_v62  ;;  %v22873_v43 = vsub.f32 %v22747_v13, %v28666_v49  ;;  %v22910_v49 = vld [vmem:[%s28018_s4 + $0x178] sm:$0xff]  ;;  %v28670_v13 = vand.u32 4294901760, %v22578_v57 }
 0x1d6   :  { %18712 = vmatprep.subr.bf16.mxu0 %v22221_v32  ;;  %18752 = vmatprep.subr.bf16.mxu1 %v22146_v60  ;;  %v22817_v32 = vld [vmem:[%s28018_s4 + $0x148] sm:$0xff]  ;;  %28669 = vst [vmem:[#allocation176_spill] sm:$0xff] %v22910_v49  ;;  %v28672_v60 = vand.u32 4294901760, %v22812_v28 }
 0x1d7   :  { %v22800_v46 = vsub.f32 %v22672_v50, %v28657_v22  ;;  %28660 = vst [vmem:[#allocation169_spill] sm:$0xff] %v22817_v32  ;;  %v22822_v22 = vld [vmem:[%s28018_s4 + $0x1d0] sm:$0xff]  ;;  %v22880_v50 = vld [vmem:[%s28018_s4 + $0x168] sm:$0xff]  ;;  %v28673_v30 = vand.u32 4294901760, %v22817_v32 }
 0x1d8   :  { %28667 = vst [vmem:[#allocation174_spill] sm:$0xff] %v22880_v50  ;;  %v28674_v38 = vand.u32 4294901760, %v22822_v22 }
 0x1d9   :  { %18714 = vmatpush3.bf16.msra.mxu0 %v22225_v33  ;;  %18754 = vmatpush3.bf16.msra.mxu1 %v22164_v14  ;;  %v22885_v33 = vld [vmem:[%s28018_s4 + $0x1f0] sm:$0xff]  ;;  %v22933_v14 = vsub.f32 %v22817_v32, %v28673_v30 }
 0x1da   :  { %18716 = vmatprep.subr.bf16.mxu0 %v22229_v18  ;;  %18788 = vmatprep.subr.bf16.mxu1 %v21761_v11  ;;  %v28671_v11 = vand.u32 4294901760, %v22792_v19 }
 0x1dc   :  { %2240 = vmatmul.mubr.f32.vlgmr.msra.gmra.mrb[34].mxu1 %v28670_v13  ;;  %v22923_v18 = vsub.f32 %v22792_v19, %v28671_v11  ;;  %v22928_v13 = vsub.f32 %v22812_v28, %v28672_v60  ;;  %v22941_v11 = vsub.f32 %v22822_v22, %v28674_v38  ;;  %v28679_v38 = vand.u32 4294901760, %v22855_v44 }
 0x1dd   :  { %18718 = vmatpush3.bf16.msra.mxu0 %v22233_v31  ;;  %18790 = vmatpush3.bf16.msra.mxu1 %v21769_v16  ;;  %v28675_v31 = vand.u32 4294901760, %v22832_v54  ;;  %v28677_v16 = vand.u32 4294901760, %v22837_v61 }
 0x1de   :  { %2510 = vmatprep.mubr.f32.mxu1 %v22580_v35  ;;  %18720 = vmatprep.subr.bf16.mxu0 %v22237_v26  ;;  %v28678_v26 = vand.u32 4294901760, %v22842_v7  ;;  %v22963_v28 = vsub.f32 %v22855_v44, %v28679_v38  ;;  %v28683_v38 = vand.u32 4294901760, %v22885_v33 }
 0x1df   :  { %v22946_v60 = vsub.f32 %v22832_v54, %v28675_v31  ;;  %v22951_v30 = vsub.f32 %v22837_v61, %v28677_v16  ;;  %18792 = vmatprep.subr.bf16.mxu1 %v21809_v41  ;;  %v28680_v31 = vand.u32 4294901760, %v22860_v62  ;;  %v28681_v16 = vand.u32 4294901760, %v22865_v58 }
 0x1e0   :  { %v22958_v32 = vsub.f32 %v22842_v7, %v28678_v26  ;;  %v28682_v26 = vand.u32 4294901760, %v22880_v50  ;;  %v22984_v44 = vsub.f32 %v22885_v33, %v28683_v38 }
 0x1e1   :  { %28676 = vst [vmem:[#allocation177_spill] sm:$0xff] %v22946_v60  ;;  %v22968_v54 = vsub.f32 %v22860_v62, %v28680_v31  ;;  %v22973_v59 = vsub.f32 %v22865_v58, %v28681_v16  ;;  %v28684_v31 = vand.u32 4294901760, %v22890_v1  ;;  %18722 = vmatpush3.bf16.msra.mxu0 %v22241_v53  ;;  %18794 = vmatpush3.bf16.msra.mxu1 %v21811_v42  ;;  %v28686_v16 = vand.u32 4294901760, %v22910_v49 }
 0x1e2   :  { %v22979_v7 = vsub.f32 %v22880_v50, %v28682_v26  ;;  %v28685_v50 = vand.u32 4294901760, %v22901_v47  ;;  %18756 = vmatprep.subr.bf16.mxu0 %v22633_v10  ;;  %18796 = vmatprep.subr.bf16.mxu1 %v21855_v5  ;;  %v28687_v5 = vand.u32 4294901760, %v22736_v39  ;;  %v28693_v42 = vand.u32 4294901760, %v22762_v3 }
 0x1e3   :  { %v22989_v62 = vsub.f32 %v22890_v1, %v28684_v31  ;;  %v23009_v41 = vsub.f32 %v22910_v49, %v28686_v16  ;;  %v28688_v16 = vand.u32 4294901760, %v22741_v45  ;;  %v28691_v31 = vand.u32 4294901760, %v22757_v20 }
 0x1e4   :  { %v22999_v38 = vsub.f32 %v22901_v47, %v28685_v50  ;;  %2132 = vmatmul.mubr.f32.vlgmr.msra.gmra.mrb[34].mxu0 %v22578_v57  ;;  %v28690_v57 = vand.u32 4294901760, %v22752_v40  ;;  %v28694_v53 = vand.u32 4294901760, %v22767_v21 }
 0x1e5   :  { %v23023_v49 = vpack.c.bf16 %v28688_v16, %v28687_v5  ;;  %18758 = vmatpush3.bf16.msra.mxu0 %v22656_v29  ;;  %2406 = vmatprep.mubr.f32.mxu0 %v22580_v35  ;;  %v28696_v5 = vand.u32 4294901760, %v22772_v17  ;;  %v28697_v16 = vand.u32 4294901760, %v22777_v37  ;;  %v28708_v35 = vand.u32 4294901760, %v22941_v11 }
 0x1e6   :  { %v23032_v47 = vpack.c.bf16 %v28691_v31, %v28690_v57  ;;  %v23038_v50 = vpack.c.bf16 %v28694_v53, %v28693_v42  ;;  %18798 = vmatpush3.bf16.msra.mxu1 %v21857_v2  ;;  %18760 = vmatprep.subr.bf16.mxu0 %v22662_v63  ;;  %v28699_v31 = vand.u32 4294901760, %v22807_v8  ;;  %v28700_v57 = vand.u32 4294901760, %v22850_v48 }
 0x1e7   :  { %28689 = vst [vmem:[#allocation178_spill] sm:$0xff] %v23023_v49  ;;  %v23044_v26 = vpack.c.bf16 %v28697_v16, %v28696_v5  ;;  %v28702_v42 = vand.u32 4294901760, %v22873_v43  ;;  %v28703_v53 = vand.u32 4294901760, %v22923_v18  ;;  %v28705_v5 = vand.u32 4294901760, %v22928_v13  ;;  %18800 = vmatprep.subr.bf16.mxu1 %v21893_v34  ;;  %v28772_v49 = vld [vmem:[#allocation36_spill] sm:$0xff] }
 0x1e8   :  { %28692 = vst [vmem:[#allocation179_spill] sm:$0xff] %v23032_v47  ;;  %28695 = vst [vmem:[#allocation180_spill] sm:$0xff] %v23038_v50  ;;  %v23053_v10 = vpack.c.bf16 %v28700_v57, %v28699_v31  ;;  %v28706_v16 = vand.u32 4294901760, %v22933_v14  ;;  %v28709_v63 = vand.u32 4294901760, %v22946_v60  ;;  %v28711_v57 = vand.u32 4294901760, %v22951_v30 }
 0x1e9   :  { %28698 = vst [vmem:[#allocation181_spill] sm:$0xff] %v23044_v26  ;;  %v23059_v29 = vpack.c.bf16 %v28703_v53, %v28702_v42  ;;  %v28714_v53 = vand.u32 4294901760, %v22963_v28  ;;  %v28718_v34 = vand.u32 4294901760, %v22979_v7  ;;  %18762 = vmatpush3.bf16.msra.mxu0 %v22699_v36 }
 0x1ea   :  { %28701 = vst [vmem:[#allocation182_spill] sm:$0xff] %v23053_v10  ;;  %v23065_v2 = vpack.c.bf16 %v28706_v16, %v28705_v5  ;;  %v23072_v31 = vpack.c.bf16 %v28709_v63, %v28708_v35  ;;  %v28712_v10 = vand.u32 4294901760, %v22958_v32  ;;  %v28717_v16 = vand.u32 4294901760, %v22973_v59  ;;  %18802 = vmatpush3.bf16.msra.mxu1 %v21909_v55  ;;  %18764 = vmatprep.subr.bf16.mxu0 %v22710_v0 }
 0x1eb   :  { %28704 = vst [vmem:[#allocation183_spill] sm:$0xff] %v23059_v29  ;;  %v28715_v29 = vand.u32 4294901760, %v22968_v54  ;;  %v28720_v63 = vand.u32 4294901760, %v22984_v44  ;;  %v28721_v35 = vand.u32 4294901760, %v22989_v62  ;;  %18804 = vmatprep.subr.bf16.mxu1 %v28613_v52  ;;  %v28742_v55 = vand.u32 4294901760, %v22731_v9 }
 0x1ec   :  { %28707 = vst [vmem:[#allocation184_spill] sm:$0xff] %v23065_v2  ;;  %28710 = vst [vmem:[#allocation185_spill] sm:$0xff] %v23072_v31  ;;  %v23078_v42 = vpack.c.bf16 %v28712_v10, %v28711_v57  ;;  %v23090_v2 = vpack.c.bf16 %v28718_v34, %v28717_v16  ;;  %v28723_v10 = vand.u32 4294901760, %v22999_v38  ;;  %v28724_v57 = vand.u32 4294901760, %v23009_v41 }
 0x1ed   :  { %v23084_v5 = vpack.c.bf16 %v28715_v29, %v28714_v53  ;;  %v23096_v31 = vpack.c.bf16 %v28721_v35, %v28720_v63  ;;  %v28726_v29 = vld [vmem:[#allocation15_spill] sm:$0xff]  ;;  %v28731_v16 = vand.u32 4294901760, %v22677_v15  ;;  %v28733_v63 = vand.u32 4294901760, %v22685_v12 }
 0x1ee   :  { %28713 = vst [vmem:[#allocation186_spill] sm:$0xff] %v23078_v42  ;;  %28719 = vst [vmem:[#allocation188_spill] sm:$0xff] %v23090_v2  ;;  %v23102_v42 = vpack.c.bf16 %v28724_v57, %v28723_v10  ;;  %v28727_v53 = vand.u32 4294901760, %v28726_v29  ;;  %v1505_v10 = vrot.slane %v22824_v24, 1  ;;  %v28735_v57 = vld [vmem:[#allocation18_spill] sm:$0xff]  ;;  %v23141_v0 = vsub.f32 %v22731_v9, %v28742_v55  ;;  %18806 = vmatpush3.bf16.msra.mxu1 %v28619_v51  ;;  %v28770_v51 = vld [vmem:[#allocation35_spill] sm:$0xff] }
 0x1ef   :  { %28716 = vst [vmem:[#allocation187_spill] sm:$0xff] %v23084_v5  ;;  %28722 = vst [vmem:[#allocation189_spill] sm:$0xff] %v23096_v31  ;;  %v28728_v5 = vld [vmem:[#allocation16_spill] sm:$0xff]  ;;  %v23114_v2 = vsub.f32 %v22677_v15, %v28731_v16  ;;  %v23119_v35 = vsub.f32 %v22685_v12, %v28733_v63  ;;  %v28740_v63 = vand.u32 4294901760, %v22726_v6  ;;  %v28750_v55 = vld [vmem:[#allocation26_spill] sm:$0xff]  ;;  %18808 = vmatprep.subr.bf16.mxu1 %v22116_v23 }
 0x1f0   :  { %28725 = vst [vmem:[#allocation190_spill] sm:$0xff] %v23102_v42  ;;  %v28729_v26 = vand.u32 4294901760, %v28728_v5  ;;  %v28736_v5 = vand.u32 4294901760, %v28735_v57  ;;  %v28743_v57 = vld [vmem:[#allocation21_spill] sm:$0xff]  ;;  %v28751_v50 = vand.u32 4294901760, %v28750_v55  ;;  %v28757_v55 = vld [vmem:[#allocation31_spill] sm:$0xff] }
 0x1f1   :  { %28732 = vst [vmem:[#allocation16_spill] sm:$0xff] %v23114_v2  ;;  %28734 = vst [vmem:[#allocation191_spill] sm:$0xff] %v23119_v35  ;;  %v23136_v42 = vsub.f32 %v22726_v6, %v28740_v63  ;;  %v28748_v63 = vld [vmem:[#allocation25_spill] sm:$0xff] }
 0x1f2   :  { %v23109_v34 = vpack.c.bf16 %v28729_v26, %v28727_v53  ;;  %v28737_v26 = vld [vmem:[#allocation19_spill] sm:$0xff]  ;;  %v28749_v31 = vand.u32 4294901760, %v28748_v63  ;;  %18810 = vmatpush3.bf16.msra.mxu1 %v22127_v4  ;;  %v28762_v63 = vld [vmem:[#allocation33_spill] sm:$0xff]  ;;  %v28769_v4 = vand.u32 4294901760, %v23141_v0 }
 0x1f3   :  { %v28738_v29 = vand.u32 4294901760, %v28737_v26  ;;  %28741 = vst [vmem:[#allocation19_spill] sm:$0xff] %v23136_v42  ;;  %v28745_v26 = vld [vmem:[#allocation22_spill] sm:$0xff]  ;;  %v28763_v36 = vand.u32 4294901760, %v28762_v63  ;;  %18812 = vmatprep.subr.bf16.mxu1 %v22142_v25  ;;  %v28771_v63 = vand.u32 4294901760, %v28770_v51  ;;  %v28781_v51 = vand.u32 4294901760, %v22741_v45 }
 0x1f4   :  { %28730 = vst [vmem:[#allocation15_spill] sm:$0xff] %v23109_v34  ;;  %18766 = vmatpush3.bf16.msra.mxu0 %v23109_v34  ;;  %v23158_v47 = vpack.c.bf16 %v28751_v50, %v28749_v31  ;;  %v28755_v50 = vld [vmem:[#allocation29_spill] sm:$0xff]  ;;  %v28761_v34 = vand.u32 4294901760, %v23119_v35 }
 0x1f5   :  { %v23128_v53 = vpack.c.bf16 %v28738_v29, %v28736_v5  ;;  %v28744_v5 = vand.u32 4294901760, %v28743_v57  ;;  %v28746_v29 = vand.u32 4294901760, %v28745_v26  ;;  %v1506_v57 = vadd.f32 %v1505_v10, %v22824_v24 }
 0x1f6   :  { %28752 = vst [vmem:[#allocation22_spill] sm:$0xff] %v23158_v47  ;;  %v28756_v31 = vand.u32 4294901760, %v28755_v50  ;;  %v28758_v24 = vand.u32 4294901760, %v28757_v55  ;;  %18814 = vmatpush3.bf16.msra.mxu1 %v22144_v56 }
 0x1f7   :  { %28739 = vst [vmem:[#allocation18_spill] sm:$0xff] %v23128_v53  ;;  %v23148_v52 = vpack.c.bf16 %v28746_v29, %v28744_v5  ;;  %18768 = vmatprep.subr.bf16.mxu0 %v23128_v53  ;;  %v28753_v5 = vand.u32 4294901760, %v22785_v27  ;;  %v28754_v29 = vand.u32 4294901760, %v22800_v46  ;;  %v28760_v53 = vand.u32 4294901760, %v23114_v2 }
 0x1f8   :  { %v23175_v10 = vpack.c.bf16 %v28758_v24, %v28756_v31  ;;  %v23191_v31 = vand.u32 4294901760, %v1506_v57  ;;  %v28768_v24 = vand.u32 4294901760, %v23136_v42 }
 0x1f9   :  { %28747 = vst [vmem:[#allocation21_spill] sm:$0xff] %v23148_v52  ;;  %v2745_v26 = vsub.f32 %v22785_v27, %v28753_v5  ;;  %v2752_v16 = vsub.f32 %v22800_v46, %v28754_v29  ;;  %18770 = vmatpush3.bf16.msra.mxu0 %v23148_v52  ;;  %v2633_v5 = vsub.f32 %v23114_v2, %v28760_v53  ;;  %v28764_v52 = vld [vmem:[#allocation34_spill] sm:$0xff]  ;;  %v28777_v2 = vld [vmem:[#allocation40_spill] sm:$0xff] }
 0x1fa   :  { %28759 = vst [vmem:[#allocation25_spill] sm:$0xff] %v23175_v10  ;;  %v2640_v29 = vsub.f32 %v23119_v35, %v28761_v34  ;;  %18772 = vmatprep.subr.bf16.mxu0 %v23158_v47  ;;  %v28765_v50 = vand.u32 4294901760, %v28764_v52  ;;  %28767 = vst [vmem:[#allocation29_spill] sm:$0xff] %v23191_v31  ;;  %v2759_v34 = vsub.f32 %v23136_v42, %v28768_v24  ;;  %v28773_v52 = vand.u32 4294901760, %v28772_v49 }
 0x1fb   :  { %v2746_v55 = vand.u32 4294901760, %v2745_v26  ;;  %v2753_v53 = vand.u32 4294901760, %v2752_v16  ;;  %v2766_v47 = vsub.f32 %v23141_v0, %v28769_v4  ;;  %v28778_v25 = vand.u32 4294901760, %v28777_v2 }
 0x1fc   :  { %v23189_v23 = vpack.c.bf16 %v28765_v50, %v28763_v36  ;;  %v23204_v36 = vpack.c.bf16 %v28773_v52, %v28771_v63  ;;  %v28775_v50 = vld [vmem:[#allocation38_spill] sm:$0xff]  ;;  %v2634_v16 = vand.u32 4294901760, %v2633_v5  ;;  %v2641_v24 = vand.u32 4294901760, %v2640_v29 }
 0x1fd   :  { %v28776_v35 = vand.u32 4294901760, %v28775_v50  ;;  %18774 = vmatpush3.bf16.msra.mxu0 %v23175_v10  ;;  %v28780_v42 = vand.u32 4294901760, %v22736_v39  ;;  %v2654_v49 = vsub.f32 %v22741_v45, %v28781_v51  ;;  %v28782_v2 = vand.u32 4294901760, %v22752_v40  ;;  %v28786_v51 = vld [vmem:[#allocation139_spill] sm:$0xff] }
 0x1fe   :  { %28766 = vst [vmem:[#allocation26_spill] sm:$0xff] %v23189_v23  ;;  %28774 = vst [vmem:[#allocation31_spill] sm:$0xff] %v23204_v36  ;;  %18776 = vmatprep.subr.bf16.mxu0 %v23189_v23  ;;  %v23228_v29 = vsub.f32 %v1506_v57, %v23191_v31  ;;  %v23231_v63 = vpack.c.bf16 %v2753_v53, %v2746_v55  ;;  %v2760_v52 = vand.u32 4294901760, %v2759_v34  ;;  %v2767_v50 = vand.u32 4294901760, %v2766_v47  ;;  %v28787_v23 = vld [vmem:[#allocation41_spill] sm:$0xff]  ;;  %v28789_v45 = vld [vmem:[#allocation43_spill] sm:$0xff] }
 0x1ff   :  { %v23210_v26 = vpack.c.bf16 %v28778_v25, %v28776_v35  ;;  %v2647_v4 = vsub.f32 %v22736_v39, %v28780_v42  ;;  %v2773_v25 = vsub.f32 %v22752_v40, %v28782_v2  ;;  %v28783_v35 = vand.u32 4294901760, %v22757_v20  ;;  %v28784_v42 = vld [vmem:[#allocation53_spill] sm:$0xff]  ;;  %v28795_v34 = vld [vmem:[#allocation56_spill] sm:$0xff] }
 0x200   :  { %18816 = vmatprep.subr.bf16.mxu1 %v28784_v42  ;;  %28785 = vst [vmem:[#allocation34_spill] sm:$0xff] %v23231_v63  ;;  %v1480_v10 = vrot.slane %v28786_v51, 4  ;;  %v28788_v56 = vand.u32 4294901760, %v28787_v23  ;;  %v28790_v39 = vand.u32 4294901760, %v28789_v45  ;;  %v28794_v53 = vand.u32 4294901760, %v22767_v21 }
 0x201   :  { %28779 = vst [vmem:[#allocation33_spill] sm:$0xff] %v23210_v26  ;;  %v2780_v5 = vsub.f32 %v22757_v20, %v28783_v35  ;;  %18778 = vmatpush3.bf16.msra.mxu0 %v23204_v36  ;;  %v23241_v35 = vpack.c.bf16 %v2641_v24, %v2634_v16  ;;  %v2648_v57 = vand.u32 4294901760, %v2647_v4  ;;  %v28793_v20 = vand.u32 4294901760, %v22762_v3  ;;  %18818 = vmatpush3.bf16.msra.mxu1 %v28795_v34  ;;  %v28796_v16 = vld [vmem:[#allocation45_spill] sm:$0xff]  ;;  %v28798_v4 = vld [vmem:[#allocation46_spill] sm:$0xff] }
 0x202   :  { %v23238_v2 = vpack.c.bf16 %v28790_v39, %v28788_v56  ;;  %v2668_v47 = vsub.f32 %v22767_v21, %v28794_v53  ;;  %18780 = vmatprep.subr.bf16.mxu0 %v23210_v26  ;;  %v2655_v23 = vand.u32 4294901760, %v2654_v49  ;;  %v2774_v56 = vand.u32 4294901760, %v2773_v25  ;;  %18852 = vmatprep.subr.bf16.mxu1 %v23231_v63  ;;  %v28804_v39 = vld [vmem:[#allocation156_spill] sm:$0xff]  ;;  %v28806_v26 = vld [vmem:[#allocation157_spill] sm:$0xff] }
 0x203   :  { %28792 = vst [vmem:[#allocation36_spill] sm:$0xff] %v23241_v35  ;;  %v2661_v55 = vsub.f32 %v22762_v3, %v28793_v20  ;;  %v2781_v45 = vand.u32 4294901760, %v2780_v5  ;;  %v28797_v24 = vand.u32 4294901760, %v28796_v16  ;;  %v28799_v36 = vand.u32 4294901760, %v28798_v4  ;;  %v28813_v3 = vld [vmem:[#allocation144_spill] sm:$0xff] }
 0x204   :  { %28791 = vst [vmem:[#allocation35_spill] sm:$0xff] %v23238_v2  ;;  %v23259_v42 = vpack.c.bf16 %v2767_v50, %v2760_v52  ;;  %v28802_v53 = vand.u32 4294901760, %v22772_v17  ;;  %v28803_v49 = vand.u32 4294901760, %v22777_v37  ;;  %v1481_v5 = vadd.f32 %v1480_v10, %v28786_v51  ;;  %v28810_v52 = vld [vmem:[#allocation54_spill] sm:$0xff]  ;;  %2512 = vmatmul.mubr.f32.vlgmr.msra.gmra.mrb[36].mxu1 %v28813_v3 }
 0x205   :  { %v23257_v20 = vpack.c.bf16 %v28799_v36, %v28797_v24  ;;  %v28805_v63 = vand.u32 4294901760, %v28804_v39  ;;  %v28807_v16 = vand.u32 4294901760, %v28806_v26  ;;  %v28808_v36 = vld [vmem:[#allocation50_spill] sm:$0xff]  ;;  %v28811_v50 = vand.u32 4294901760, %v28810_v52  ;;  %18782 = vmatpush3.bf16.msra.mxu0 %v23238_v2  ;;  %18854 = vmatpush3.bf16.msra.mxu1 %v23241_v35 }
 0x206   :  { %28801 = vst [vmem:[#allocation40_spill] sm:$0xff] %v23259_v42  ;;  %v2787_v34 = vsub.f32 %v22772_v17, %v28802_v53  ;;  %v2794_v25 = vsub.f32 %v22777_v37, %v28803_v49  ;;  %v28809_v24 = vand.u32 4294901760, %v28808_v36  ;;  %v2662_v53 = vand.u32 4294901760, %v2661_v55  ;;  %2854 = vmatprep.mubr.f32.mxu1 %v23191_v31  ;;  %18856 = vmatprep.subr.bf16.mxu1 %v23259_v42  ;;  %v28836_v31 = vld [vmem:[#allocation146_spill] sm:$0xff] }
 0x207   :  { %28800 = vst [vmem:[#allocation38_spill] sm:$0xff] %v23257_v20  ;;  %v23272_v21 = vpack.c.bf16 %v28807_v16, %v28805_v63  ;;  %v2669_v49 = vand.u32 4294901760, %v2668_v47  ;;  %v28814_v10 = vand.u32 4294901760, %v22807_v8  ;;  %v28815_v26 = vand.u32 4294901760, %v22850_v48  ;;  %18784 = vmatprep.subr.bf16.mxu0 %v23257_v20 }
 0x208   :  { %v23278_v4 = vpack.c.bf16 %v28811_v50, %v28809_v24  ;;  %v23290_v39 = vpack.c.bf16 %v2655_v23, %v2648_v57  ;;  %v23292_v16 = vpack.c.bf16 %v2781_v45, %v2774_v56  ;;  %v28817_v36 = vand.u32 4294901760, %v23228_v29 }
 0x209   :  { %v2675_v51 = vsub.f32 %v22807_v8, %v28814_v10  ;;  %v2682_v63 = vsub.f32 %v22850_v48, %v28815_v26  ;;  %v2788_v47 = vand.u32 4294901760, %v2787_v34  ;;  %v2795_v24 = vand.u32 4294901760, %v2794_v25 }
 0x20a   :  { %28812 = vst [vmem:[#allocation139_spill] sm:$0xff] %v23278_v4  ;;  %28816 = vst [vmem:[#allocation41_spill] sm:$0xff] %v23290_v39  ;;  %v2616_v55 = vsub.f32 %v23228_v29, %v28817_v36  ;;  %v28818_v52 = vand.u32 4294901760, %v22873_v43  ;;  %v28819_v10 = vand.u32 4294901760, %v22923_v18  ;;  %v1482_v23 = vrot.slane %v1481_v5, 2  ;;  %18786 = vmatpush3.bf16.msra.mxu0 %v23278_v4  ;;  %18858 = vmatpush3.bf16.msra.mxu1 %v23290_v39  ;;  %v28832_v39 = vld [vmem:[#allocation148_spill] sm:$0xff] }
 0x20b   :  { %v28820_v56 = vand.u32 4294901760, %v22726_v6  ;;  %v28821_v45 = vand.u32 4294901760, %v22731_v9  ;;  %v28822_v36 = vand.u32 4294901760, %v22677_v15  ;;  %v28823_v34 = vand.u32 4294901760, %v22685_v12  ;;  %18820 = vmatprep.subr.bf16.mxu0 %v23272_v21  ;;  %18860 = vmatprep.subr.bf16.mxu1 %v23292_v16 }
 0x20c   :  { %v2801_v50 = vsub.f32 %v22873_v43, %v28818_v52  ;;  %v2808_v57 = vsub.f32 %v22923_v18, %v28819_v10  ;;  %v23318_v52 = vpack.c.bf16 %v2669_v49, %v2662_v53  ;;  %v2676_v42 = vand.u32 4294901760, %v2675_v51 }
 0x20d   :  { %v23309_v26 = vpack.c.bf16 %v28821_v45, %v28820_v56  ;;  %v23315_v25 = vpack.c.bf16 %v28823_v34, %v28822_v36  ;;  %v2683_v20 = vand.u32 4294901760, %v2682_v63  ;;  %v28825_v10 = vand.u32 4294901760, %v22928_v13  ;;  %2408 = vmatmul.mubr.f32.vlgmr.msra.gmra.mrb[36].mxu0 %v28813_v3 }
 0x20e   :  { %28824 = vst [vmem:[#allocation43_spill] sm:$0xff] %v23318_v52  ;;  %v28826_v15 = vand.u32 4294901760, %v22933_v14  ;;  %v28827_v9 = vand.u32 4294901760, %v22941_v11  ;;  %v28828_v53 = vand.u32 4294901760, %v22946_v60  ;;  %v2617_v51 = vand.u32 4294901760, %v2616_v55  ;;  %18862 = vmatpush3.bf16.msra.mxu1 %v23318_v52 }
 0x20f   :  { %v2689_v6 = vsub.f32 %v22928_v13, %v28825_v10  ;;  %v23335_v63 = vpack.c.bf16 %v2795_v24, %v2788_v47  ;;  %v2802_v45 = vand.u32 4294901760, %v2801_v50  ;;  %v2809_v36 = vand.u32 4294901760, %v2808_v57  ;;  %v28830_v10 = vld [vmem:[#allocation147_spill] sm:$0xff]  ;;  %18822 = vmatpush3.bf16.msra.mxu0 %v23315_v25 }
 0x210   :  { %v2696_v12 = vsub.f32 %v22933_v14, %v28826_v15  ;;  %v2815_v56 = vsub.f32 %v22941_v11, %v28827_v9  ;;  %v2822_v49 = vsub.f32 %v22946_v60, %v28828_v53  ;;  %v1483_v34 = vadd.f32 %v1482_v23, %v1481_v5  ;;  %v28834_v9 = vld [vmem:[#allocation145_spill] sm:$0xff]  ;;  %2618 = vmatprep.mubr.f32.mxu0 %v2617_v51  ;;  %v28844_v51 = vld [vmem:[#allocation152_spill] sm:$0xff] }
 0x211   :  { %28829 = vst [vmem:[#allocation45_spill] sm:$0xff] %v23335_v63  ;;  %v28831_v15 = vand.u32 4294901760, %v28830_v10  ;;  %v28833_v4 = vand.u32 4294901760, %v28832_v39  ;;  %v28835_v2 = vand.u32 4294901760, %v28834_v9  ;;  %v28837_v53 = vand.u32 4294901760, %v28836_v31  ;;  %18824 = vmatprep.subr.bf16.mxu0 %v23309_v26  ;;  %18864 = vmatprep.subr.bf16.mxu1 %v23335_v63  ;;  %v28871_v63 = vld [vmem:[#allocation169_spill] sm:$0xff] }
 0x212   :  { %v23351_v55 = vpack.c.bf16 %v2683_v20, %v2676_v42  ;;  %v28839_v5 = vand.u32 4294901760, %v22951_v30  ;;  %v28840_v47 = vand.u32 4294901760, %v22958_v32  ;;  %v2690_v31 = vand.u32 4294901760, %v2689_v6 }
 0x213   :  { %v23342_v35 = vpack.c.bf16 %v28833_v4, %v28831_v15  ;;  %v23348_v60 = vpack.c.bf16 %v28837_v53, %v28835_v2  ;;  %v2697_v2 = vand.u32 4294901760, %v2696_v12  ;;  %v2816_v39 = vand.u32 4294901760, %v2815_v56  ;;  %v28846_v15 = vld [vmem:[#allocation153_spill] sm:$0xff] }
 0x214   :  { %28838 = vst [vmem:[#allocation46_spill] sm:$0xff] %v23351_v55  ;;  %v2703_v3 = vsub.f32 %v22951_v30, %v28839_v5  ;;  %v2710_v4 = vsub.f32 %v22958_v32, %v28840_v47  ;;  %v2823_v24 = vand.u32 4294901760, %v2822_v49  ;;  %v23362_v42 = vpack.c.bf16 %v2809_v36, %v2802_v45  ;;  %v28848_v12 = vld [vmem:[#allocation149_spill] sm:$0xff]  ;;  %v28850_v49 = vld [vmem:[#allocation151_spill] sm:$0xff]  ;;  %18866 = vmatpush3.bf16.msra.mxu1 %v23351_v55 }
 0x215   :  { %v28842_v20 = vand.u32 4294901760, %v22963_v28  ;;  %v28843_v57 = vand.u32 4294901760, %v22968_v54  ;;  %v28845_v10 = vand.u32 4294901760, %v28844_v51  ;;  %v28847_v9 = vand.u32 4294901760, %v28846_v15  ;;  %18826 = vmatpush3.bf16.msra.mxu0 %v23348_v60 }
 0x216   :  { %28841 = vst [vmem:[#allocation156_spill] sm:$0xff] %v23362_v42  ;;  %v28849_v56 = vand.u32 4294901760, %v28848_v12  ;;  %v28851_v45 = vand.u32 4294901760, %v28850_v49  ;;  %v2704_v53 = vand.u32 4294901760, %v2703_v3  ;;  %v2711_v5 = vand.u32 4294901760, %v2710_v4  ;;  %18828 = vmatprep.subr.bf16.mxu0 %v23342_v35  ;;  %18868 = vmatprep.subr.bf16.mxu1 %v23362_v42 }
 0x217   :  { %v2829_v50 = vsub.f32 %v22963_v28, %v28842_v20  ;;  %v2836_v23 = vsub.f32 %v22968_v54, %v28843_v57  ;;  %v23374_v6 = vpack.c.bf16 %v28847_v9, %v28845_v10  ;;  %v28852_v47 = vand.u32 4294901760, %v22973_v59 }
 0x218   :  { %v23381_v36 = vpack.c.bf16 %v28851_v45, %v28849_v56  ;;  %v1484_v57 = vrot.slane %v1483_v34, 1  ;;  %v23388_v51 = vpack.c.bf16 %v2697_v2, %v2690_v31  ;;  %v23390_v10 = vpack.c.bf16 %v2823_v24, %v2816_v39  ;;  %v28857_v31 = vld [vmem:[#allocation164_spill] sm:$0xff] }
 0x219   :  { %v2717_v20 = vsub.f32 %v22973_v59, %v28852_v47  ;;  %v28854_v15 = vand.u32 4294901760, %v22979_v7  ;;  %v2830_v3 = vand.u32 4294901760, %v2829_v50  ;;  %v2837_v4 = vand.u32 4294901760, %v2836_v23  ;;  %v28860_v47 = vld [vmem:[#allocation158_spill] sm:$0xff]  ;;  %v28862_v50 = vld [vmem:[#allocation161_spill] sm:$0xff] }
 0x21a   :  { %28853 = vst [vmem:[#allocation157_spill] sm:$0xff] %v23388_v51  ;;  %v28855_v12 = vand.u32 4294901760, %v22984_v44  ;;  %v28856_v49 = vand.u32 4294901760, %v22989_v62  ;;  %v28858_v2 = vand.u32 4294901760, %v28857_v31  ;;  %v28859_v39 = vand.u32 4294901760, %v22792_v19  ;;  %18830 = vmatpush3.bf16.msra.mxu0 %v23381_v36  ;;  %18870 = vmatpush3.bf16.msra.mxu1 %v23388_v51 }
 0x21b   :  { %v2724_v9 = vsub.f32 %v22979_v7, %v28854_v15  ;;  %v28861_v15 = vand.u32 4294901760, %v28860_v47  ;;  %v28863_v23 = vand.u32 4294901760, %v28862_v50  ;;  %v23415_v55 = vpack.c.bf16 %v2711_v5, %v2704_v53  ;;  %18832 = vmatprep.subr.bf16.mxu0 %v23374_v6  ;;  %18872 = vmatprep.subr.bf16.mxu1 %v23390_v10  ;;  %v28867_v50 = vld [vmem:[#allocation170_spill] sm:$0xff] }
 0x21c   :  { %v2843_v56 = vsub.f32 %v22984_v44, %v28855_v12  ;;  %v2850_v45 = vsub.f32 %v22989_v62, %v28856_v49  ;;  %v23406_v24 = vpack.c.bf16 %v28859_v39, %v28858_v2  ;;  %v2718_v12 = vand.u32 4294901760, %v2717_v20 }
 0x21d   :  { %v23413_v42 = vpack.c.bf16 %v28863_v23, %v28861_v15  ;;  %v2725_v49 = vand.u32 4294901760, %v2724_v9  ;;  %v28864_v19 = vand.u32 4294901760, %v22999_v38  ;;  %v28865_v2 = vand.u32 4294901760, %v23009_v41 }
 0x21e   :  { %v1485_v47 = vadd.f32 %v1484_v57, %v1483_v34  ;;  %v23426_v15 = vpack.c.bf16 %v2837_v4, %v2830_v3  ;;  %v2844_v53 = vand.u32 4294901760, %v2843_v56  ;;  %v2851_v5 = vand.u32 4294901760, %v2850_v45  ;;  %18874 = vmatpush3.bf16.msra.mxu1 %v23415_v55  ;;  %v28876_v45 = vld [vmem:[#allocation172_spill] sm:$0xff] }
 0x21f   :  { %v2731_v31 = vsub.f32 %v22999_v38, %v28864_v19  ;;  %v2738_v39 = vsub.f32 %v23009_v41, %v28865_v2  ;;  %v28866_v20 = vand.u32 4294901760, %v22822_v22  ;;  %v28868_v23 = vand.u32 4294901760, %v28867_v50  ;;  %18834 = vmatpush3.bf16.msra.mxu0 %v23413_v42  ;;  %v28869_v19 = vld [vmem:[#allocation168_spill] sm:$0xff] }
 0x220   :  { %v28870_v51 = vand.u32 4294901760, %v28869_v19  ;;  %v28872_v52 = vand.u32 4294901760, %v28871_v63  ;;  %18836 = vmatprep.subr.bf16.mxu0 %v23406_v24  ;;  %v23443_v34 = vpack.c.bf16 %v2725_v49, %v2718_v12  ;;  %v23445_v3 = vand.u32 4294901760, %v1485_v47  ;;  %18876 = vmatprep.subr.bf16.mxu1 %v23426_v15  ;;  %v28878_v12 = vld [vmem:[#allocation173_spill] sm:$0xff] }
 0x221   :  { %v23432_v9 = vpack.c.bf16 %v28868_v23, %v28866_v20  ;;  %v2732_v57 = vand.u32 4294901760, %v2731_v31  ;;  %v2739_v22 = vand.u32 4294901760, %v2738_v39  ;;  %v23448_v4 = vpack.c.bf16 %v2851_v5, %v2844_v53  ;;  %v28881_v5 = vld [vmem:[#allocation174_spill] sm:$0xff] }
 0x222   :  { %v23439_v2 = vpack.c.bf16 %v28872_v52, %v28870_v51  ;;  %v28873_v63 = vand.u32 4294901760, %v22837_v61  ;;  %v28874_v52 = vld [vmem:[#allocation171_spill] sm:$0xff]  ;;  %v28877_v20 = vand.u32 4294901760, %v28876_v45  ;;  %v28879_v49 = vand.u32 4294901760, %v28878_v12  ;;  %18878 = vmatpush3.bf16.msra.mxu1 %v23443_v34  ;;  %v28890_v12 = vld [vmem:[#allocation16_spill] sm:$0xff] }
 0x223   :  { %v28875_v51 = vand.u32 4294901760, %v28874_v52  ;;  %v23465_v39 = vpack.c.bf16 %v2739_v22, %v2732_v57  ;;  %v23468_v53 = vsub.f32 %v1485_v47, %v23445_v3  ;;  %18880 = vmatprep.subr.bf16.mxu1 %v23448_v4  ;;  %v28880_v61 = vand.u32 4294901760, %v22865_v58  ;;  %v28885_v58 = vld [vmem:[#allocation175_spill] sm:$0xff]  ;;  %v28887_v52 = vld [vmem:[#allocation176_spill] sm:$0xff] }
 0x224   :  { %18838 = vmatpush3.bf16.msra.mxu0 %v23439_v2  ;;  %v23461_v31 = vpack.c.bf16 %v28879_v49, %v28877_v20  ;;  %v28882_v50 = vand.u32 4294901760, %v28881_v5  ;;  %v28883_v57 = vand.u32 4294901760, %v22885_v33  ;;  %v28884_v47 = vand.u32 4294901760, %v22890_v1  ;;  %v28891_v49 = vld [vmem:[#allocation191_spill] sm:$0xff] }
 0x225   :  { %v23455_v56 = vpack.c.bf16 %v28875_v51, %v28873_v63  ;;  %18840 = vmatprep.subr.bf16.mxu0 %v23432_v9  ;;  %v2621_v19 = vand.u32 4294901760, %v23468_v53  ;;  %v28886_v63 = vand.u32 4294901760, %v28885_v58  ;;  %v28888_v51 = vand.u32 4294901760, %v28887_v52  ;;  %v28894_v58 = vld [vmem:[#allocation163_spill] sm:$0xff]  ;;  %v28895_v52 = vld [vmem:[#allocation165_spill] sm:$0xff] }
 0x226   :  { %v23476_v23 = vpack.c.bf16 %v28882_v50, %v28880_v61  ;;  %18882 = vmatpush3.bf16.msra.mxu1 %v23465_v39  ;;  %v23485_v22 = vpack.c.bf16 %v28884_v47, %v28883_v57  ;;  %v28889_v33 = vand.u32 4294901760, %v23228_v29  ;;  %v23502_v20 = vpack.c.bf16 %v22800_v46, %v22785_v27  ;;  %v28892_v50 = vld [vmem:[#allocation19_spill] sm:$0xff]  ;;  %v28893_v47 = vld [vmem:[#allocation162_spill] sm:$0xff] }
 0x227   :  { %18916 = vmatprep.subr.bf16.mxu1 %v23272_v21  ;;  %v23494_v45 = vpack.c.bf16 %v28888_v51, %v28886_v63  ;;  %v2622_v1 = vsub.f32 %v23468_v53, %v2621_v19  ;;  %v23509_v61 = vpack.c.bf16 %v28891_v49, %v28890_v12  ;;  %v23515_v57 = vpack.c.bf16 %v23141_v0, %v28892_v50 }
 0x228   :  { %18842 = vmatpush3.bf16.msra.mxu0 %v23455_v56  ;;  %v23522_v63 = vpack.c.bf16 %v28894_v58, %v28893_v47  ;;  %v23528_v51 = vpack.c.bf16 %v28895_v52, %v22752_v40  ;;  %v23546_v40 = vpack.c.bf16 %v22850_v48, %v22807_v8  ;;  %v23552_v47 = vpack.c.bf16 %v22923_v18, %v22873_v43  ;;  %v28898_v48 = vld [vmem:[#allocation177_spill] sm:$0xff] }
 0x229   :  { %18844 = vmatprep.subr.bf16.mxu0 %v23461_v31  ;;  %2856 = vmatmul.mubr.f32.vlgmr.msra.gmra.mrb[38].mxu1 %v23445_v3  ;;  %v2623_v5 = vand.u32 4294901760, %v2622_v1  ;;  %v28897_v1 = vld [vmem:[#allocation167_spill] sm:$0xff]  ;;  %v23564_v8 = vpack.c.bf16 %v28898_v48, %v22941_v11  ;;  %v23570_v18 = vpack.c.bf16 %v22958_v32, %v22951_v30  ;;  %v28903_v32 = vld [vmem:[#allocation142_spill] sm:$0xff]  ;;  %v28919_v58 = vld [vmem:[#allocation181_spill] sm:$0xff] }
 0x22a   :  { %18918 = vmatpush3.bf16.msra.mxu1 %v23315_v25  ;;  %3098 = vmatprep.mubr.f32.mxu1 %v28889_v33  ;;  %v28896_v33 = vld [vmem:[#allocation166_spill] sm:$0xff]  ;;  %v1607_v43 = vrot.slane %v28903_v32, 4 }
 0x22b   :  { %18920 = vmatprep.subr.bf16.mxu1 %v23309_v26  ;;  %28899 = vst [vmem:[#allocation50_spill] sm:$0xff] %v23564_v8  ;;  %28900 = vst [vmem:[#allocation54_spill] sm:$0xff] %v23570_v18 }
 0x22c   :  { %18846 = vmatpush3.bf16.msra.mxu0 %v23476_v23 }
 0x22d   :  { %18848 = vmatprep.subr.bf16.mxu0 %v23485_v22 }
 0x22e   :  { %18922 = vmatpush3.bf16.msra.mxu1 %v23348_v60 }
 0x22f   :  { %18924 = vmatprep.subr.bf16.mxu1 %v23342_v35 }
 0x230   :  { %18850 = vmatpush3.bf16.msra.mxu0 %v23494_v45 }
 0x231   :  { %18884 = vmatprep.subr.bf16.mxu0 %v23502_v20 }
 0x232   :  { %18926 = vmatpush3.bf16.msra.mxu1 %v23381_v36 }
 0x233   :  { %2624 = vmatmul.mubr.f32.vlgmr.msra.gmra.mrb[38].mxu0 %v2623_v5  ;;  %18928 = vmatprep.subr.bf16.mxu1 %v23374_v6  ;;  %v23534_v5 = vpack.c.bf16 %v28897_v1, %v28896_v33  ;;  %v28920_v33 = vld [vmem:[#allocation182_spill] sm:$0xff]  ;;  %v28921_v1 = vld [vmem:[#allocation183_spill] sm:$0xff] }
 0x234   :  { %18886 = vmatpush3.bf16.msra.mxu0 %v23509_v61  ;;  %2991 = vmatprep.mubr.f32.mxu0 %v23228_v29  ;;  %v23540_v29 = vpack.c.bf16 %v22777_v37, %v22772_v17  ;;  %v23558_v17 = vpack.c.bf16 %v22933_v14, %v22928_v13  ;;  %v23576_v14 = vpack.c.bf16 %v22968_v54, %v22963_v28  ;;  %v28908_v13 = vand.u32 4294901760, %v22800_v46 }
 0x235   :  { %18888 = vmatprep.subr.bf16.mxu0 %v23515_v57  ;;  %v23582_v37 = vpack.c.bf16 %v22979_v7, %v22973_v59  ;;  %v23590_v28 = vpack.c.bf16 %v22989_v62, %v22984_v44  ;;  %v23595_v54 = vpack.c.bf16 %v23009_v41, %v22999_v38  ;;  %v28906_v59 = vld [vmem:[#allocation29_spill] sm:$0xff]  ;;  %v28907_v7 = vand.u32 4294901760, %v22785_v27 }
 0x236   :  { %18930 = vmatpush3.bf16.msra.mxu1 %v23413_v42  ;;  %28901 = vst [vmem:[#allocation144_spill] sm:$0xff] %v23576_v14  ;;  %v1608_v62 = vadd.f32 %v1607_v43, %v28903_v32  ;;  %v28910_v41 = vand.u32 4294901760, %v28890_v12  ;;  %v28911_v44 = vand.u32 4294901760, %v28891_v49  ;;  %v28913_v27 = vand.u32 4294901760, %v28892_v50  ;;  %v28916_v49 = vld [vmem:[#allocation178_spill] sm:$0xff]  ;;  %v28918_v50 = vld [vmem:[#allocation180_spill] sm:$0xff] }
 0x237   :  { %18932 = vmatprep.subr.bf16.mxu1 %v23406_v24  ;;  %28902 = vst [vmem:[#allocation147_spill] sm:$0xff] %v23582_v37  ;;  %28904 = vst [vmem:[#allocation148_spill] sm:$0xff] %v23590_v28  ;;  %v23603_v11 = vpack.c.bf16 %v28908_v13, %v28907_v7  ;;  %v28914_v46 = vand.u32 4294901760, %v23141_v0  ;;  %v28917_v0 = vld [vmem:[#allocation179_spill] sm:$0xff]  ;;  %v28922_v32 = vld [vmem:[#allocation184_spill] sm:$0xff] }
 0x238   :  { %18890 = vmatpush3.bf16.msra.mxu0 %v23522_v63  ;;  %28905 = vst [vmem:[#allocation145_spill] sm:$0xff] %v23595_v54  ;;  %v23613_v30 = vpack.c.bf16 %v28911_v44, %v28910_v41  ;;  %v28923_v43 = vld [vmem:[#allocation185_spill] sm:$0xff]  ;;  %v28924_v7 = vld [vmem:[#allocation186_spill] sm:$0xff]  ;;  %v28925_v13 = vld [vmem:[#allocation140_spill] sm:$0xff] }
 0x239   :  { %18892 = vmatprep.subr.bf16.mxu0 %v23528_v51  ;;  %28909 = vst [vmem:[#allocation146_spill] sm:$0xff] %v23603_v11  ;;  %v23621_v38 = vpack.c.bf16 %v28914_v46, %v28913_v27  ;;  %v28926_v41 = vld [vmem:[#allocation187_spill] sm:$0xff]  ;;  %v28928_v46 = vld [vmem:[#allocation188_spill] sm:$0xff] }
 0x23a   :  { %18934 = vmatpush3.bf16.msra.mxu1 %v23439_v2  ;;  %28912 = vst [vmem:[#allocation152_spill] sm:$0xff] %v23613_v30  ;;  %v28927_v44 = vld [vmem:[#allocation7_spill] sm:$0xff] }
 0x23b   :  { %18936 = vmatprep.subr.bf16.mxu1 %v23432_v9  ;;  %28915 = vst [vmem:[#allocation153_spill] sm:$0xff] %v23621_v38 }
 0x23c   :  { %18894 = vmatpush3.bf16.msra.mxu0 %v23534_v5 }
 0x23d   :  { %18896 = vmatprep.subr.bf16.mxu0 %v23540_v29 }
 0x23e   :  { %18938 = vmatpush3.bf16.msra.mxu1 %v23455_v56 }
 0x23f   :  { %18940 = vmatprep.subr.bf16.mxu1 %v23461_v31 }
 0x240   :  { %18898 = vmatpush3.bf16.msra.mxu0 %v23546_v40 }
 0x241   :  { %18900 = vmatprep.subr.bf16.mxu0 %v23552_v47 }
 0x242   :  { %18942 = vmatpush3.bf16.msra.mxu1 %v23476_v23 }
 0x243   :  { %18944 = vmatprep.subr.bf16.mxu1 %v23485_v22 }
 0x244   :  { %18902 = vmatpush3.bf16.msra.mxu0 %v23558_v17 }
 0x245   :  { %18904 = vmatprep.subr.bf16.mxu0 %v23564_v8 }
 0x246   :  { %18946 = vmatpush3.bf16.msra.mxu1 %v23494_v45 }
 0x247   :  { %18980 = vmatprep.subr.bf16.mxu1 %v23272_v21 }
 0x248   :  { %18906 = vmatpush3.bf16.msra.mxu0 %v23570_v18 }
 0x249   :  { %18908 = vmatprep.subr.bf16.mxu0 %v23576_v14  ;;  %3102 = vmatmul.mubr.f32.vlgmr.msra.gmra.mrb[40].mxu1 %v2621_v19  ;;  %v1609_v19 = vrot.slane %v1608_v62, 2 }
 0x24a   :  { %18982 = vmatpush3.bf16.msra.mxu1 %v23315_v25  ;;  %3372 = vmatprep.mubr.f32.mxu1 %v28906_v59 }
 0x24b   :  { %18984 = vmatprep.subr.bf16.mxu1 %v23309_v26  ;;  %v1610_v12 = vadd.f32 %v1609_v19, %v1608_v62  ;;  %v1586_v62 = vrot.slane %v28925_v13, 4 }
 0x24c   :  { %18910 = vmatpush3.bf16.msra.mxu0 %v23582_v37  ;;  %v28969_v37 = vld [vmem:[#allocation66_spill] sm:$0xff] }
 0x24d   :  { %18912 = vmatprep.subr.bf16.mxu0 %v23590_v28  ;;  %v1587_v19 = vadd.f32 %v1586_v62, %v28925_v13  ;;  %v28936_v62 = vld [vmem:[#allocation6_spill] sm:$0xff] }
 0x24e   :  { %18986 = vmatpush3.bf16.msra.mxu1 %v23348_v60  ;;  %v28965_v28 = vld [vmem:[#allocation62_spill] sm:$0xff] }
 0x24f   :  { %18988 = vmatprep.subr.bf16.mxu1 %v23342_v35 }
 0x250   :  { %18914 = vmatpush3.bf16.msra.mxu0 %v23595_v54  ;;  %v28963_v54 = vld [vmem:[#allocation60_spill] sm:$0xff] }
 0x251   :  { %18948 = vmatprep.subr.bf16.mxu0 %v23603_v11  ;;  %v28962_v11 = vld [vmem:[#allocation59_spill] sm:$0xff] }
 0x252   :  { %18990 = vmatpush3.bf16.msra.mxu1 %v23381_v36 }
 0x253   :  { %2994 = vmatmul.mubr.f32.vlgmr.msra.gmra.mrb[40].mxu0 %v23468_v53  ;;  %18992 = vmatprep.subr.bf16.mxu1 %v23374_v6  ;;  %v1611_v53 = vrot.slane %v1610_v12, 1 }
 0x254   :  { %18950 = vmatpush3.bf16.msra.mxu0 %v23613_v30  ;;  %3268 = vmatprep.mubr.f32.mxu0 %v28906_v59 }
 0x255   :  { %18952 = vmatprep.subr.bf16.mxu0 %v23621_v38  ;;  %v1612_v52 = vadd.f32 %v1611_v53, %v1610_v12  ;;  %v28929_v12 = vld [vmem:[#allocation8_spill] sm:$0xff]  ;;  %v28930_v53 = vld [vmem:[#allocation189_spill] sm:$0xff]  ;;  %v28958_v38 = vld [vmem:[#allocation51_spill] sm:$0xff] }
 0x256   :  { %18994 = vmatpush3.bf16.msra.mxu1 %v23413_v42 }
 0x257   :  { %18996 = vmatprep.subr.bf16.mxu1 %v23406_v24  ;;  %v23642_v48 = vand.u32 4294901760, %v1612_v52 }
 0x258   :  { %18954 = vmatpush3.bf16.msra.mxu0 %v28916_v49  ;;  %v28953_v49 = vld [vmem:[#allocation55_spill] sm:$0xff] }
 0x259   :  { %18956 = vmatprep.subr.bf16.mxu0 %v28917_v0  ;;  %v23649_v59 = vsub.f32 %v1612_v52, %v23642_v48  ;;  %v28931_v52 = vld [vmem:[#allocation11_spill] sm:$0xff]  ;;  %v28951_v0 = vld [vmem:[#allocation49_spill] sm:$0xff] }
 0x25a   :  { %18998 = vmatpush3.bf16.msra.mxu1 %v23439_v2 }
 0x25b   :  { %19000 = vmatprep.subr.bf16.mxu1 %v23432_v9  ;;  %v3477_v27 = vand.u32 4294901760, %v23649_v59 }
 0x25c   :  { %18958 = vmatpush3.bf16.msra.mxu0 %v28918_v50  ;;  %v28950_v50 = vld [vmem:[#allocation27_spill] sm:$0xff] }
 0x25d   :  { %18960 = vmatprep.subr.bf16.mxu0 %v28919_v58  ;;  %v28945_v58 = vld [vmem:[#allocation39_spill] sm:$0xff] }
 0x25e   :  { %19002 = vmatpush3.bf16.msra.mxu1 %v23455_v56 }
 0x25f   :  { %19004 = vmatprep.subr.bf16.mxu1 %v23461_v31 }
 0x260   :  { %18962 = vmatpush3.bf16.msra.mxu0 %v28920_v33  ;;  %v28942_v33 = vld [vmem:[#allocation12_spill] sm:$0xff] }
 0x261   :  { %18964 = vmatprep.subr.bf16.mxu0 %v28921_v1  ;;  %v28939_v1 = vld [vmem:[#allocation30_spill] sm:$0xff] }
 0x262   :  { %19006 = vmatpush3.bf16.msra.mxu1 %v23476_v23 }
 0x263   :  { %19008 = vmatprep.subr.bf16.mxu1 %v23485_v22 }
 0x264   :  { %18966 = vmatpush3.bf16.msra.mxu0 %v28922_v32  ;;  %v28934_v32 = vld [vmem:[#allocation5_spill] sm:$0xff] }
 0x265   :  { %18968 = vmatprep.subr.bf16.mxu0 %v28923_v43  ;;  %v28933_v43 = vld [vmem:[#allocation14_spill] sm:$0xff] }
 0x266   :  { %19010 = vmatpush3.bf16.msra.mxu1 %v23494_v45 }
 0x267   :  { %19044 = vmatprep.subr.bf16.mxu1 %v28927_v44  ;;  %v1588_v44 = vrot.slane %v1587_v19, 2 }
 0x268   :  { %18970 = vmatpush3.bf16.msra.mxu0 %v28924_v7  ;;  %v28932_v7 = vld [vmem:[#allocation190_spill] sm:$0xff] }
 0x269   :  { %18972 = vmatprep.subr.bf16.mxu0 %v28926_v41  ;;  %3374 = vmatmul.mubr.f32.vlgmr.msra.gmra.mrb[42].mxu1 %v23445_v3  ;;  %v3478_v41 = vsub.f32 %v23649_v59, %v3477_v27 }
 0x26a   :  { %19046 = vmatpush3.bf16.msra.mxu1 %v28929_v12  ;;  %3716 = vmatprep.mubr.f32.mxu1 %v23642_v48  ;;  %v1589_v12 = vadd.f32 %v1588_v44, %v1587_v19  ;;  %v28946_v19 = vld [vmem:[#allocation17_spill] sm:$0xff]  ;;  %v28947_v44 = vld [vmem:[#allocation42_spill] sm:$0xff] }
 0x26b   :  { %19048 = vmatprep.subr.bf16.mxu1 %v28931_v52  ;;  %v3479_v13 = vand.u32 4294901760, %v3478_v41  ;;  %v28938_v52 = vld [vmem:[#allocation9_spill] sm:$0xff] }
 0x26c   :  { %18974 = vmatpush3.bf16.msra.mxu0 %v28928_v46  ;;  %v28935_v46 = vld [vmem:[#allocation23_spill] sm:$0xff]  ;;  %v28943_v41 = vld [vmem:[#allocation37_spill] sm:$0xff] }
 0x26d   :  { %18976 = vmatprep.subr.bf16.mxu0 %v28930_v53  ;;  %v28937_v53 = vld [vmem:[#allocation24_spill] sm:$0xff] }
 0x26e   :  { %19050 = vmatpush3.bf16.msra.mxu1 %v28933_v43  ;;  %v28941_v43 = vld [vmem:[#allocation32_spill] sm:$0xff] }
 0x26f   :  { %19052 = vmatprep.subr.bf16.mxu1 %v28935_v46  ;;  %v1590_v46 = vrot.slane %v1589_v12, 1 }
 0x270   :  { %18978 = vmatpush3.bf16.msra.mxu0 %v28932_v7  ;;  %v28940_v7 = vld [vmem:[#allocation10_spill] sm:$0xff] }
 0x271   :  { %19012 = vmatprep.subr.bf16.mxu0 %v28934_v32 }
 0x272   :  { %19054 = vmatpush3.bf16.msra.mxu1 %v28937_v53  ;;  %v1591_v53 = vadd.f32 %v1590_v46, %v1589_v12  ;;  %v28955_v46 = vld [vmem:[#allocation57_spill] sm:$0xff] }
 0x273   :  { %3270 = vmatmul.mubr.f32.vlgmr.msra.gmra.mrb[42].mxu0 %v23445_v3  ;;  %19056 = vmatprep.subr.bf16.mxu1 %v28939_v1  ;;  %v28944_v3 = vld [vmem:[#allocation13_spill] sm:$0xff]  ;;  %v28949_v1 = vld [vmem:[#allocation44_spill] sm:$0xff] }
 0x274   :  { %19014 = vmatpush3.bf16.msra.mxu0 %v28936_v62  ;;  %3480 = vmatprep.mubr.f32.mxu0 %v3479_v13  ;;  %v28948_v13 = vld [vmem:[#allocation20_spill] sm:$0xff] }
 0x275   :  { %19016 = vmatprep.subr.bf16.mxu0 %v28938_v52 }
 0x276   :  { %19058 = vmatpush3.bf16.msra.mxu1 %v28941_v43  ;;  %v23685_v43 = vand.u32 4294901760, %v1591_v53 }
 0x277   :  { %19060 = vmatprep.subr.bf16.mxu1 %v28943_v41  ;;  %v28952_v41 = vld [vmem:[#allocation28_spill] sm:$0xff] }
 0x278   :  { %19018 = vmatpush3.bf16.msra.mxu0 %v28940_v7  ;;  %v23692_v12 = vsub.f32 %v1591_v53, %v23685_v43  ;;  %v28960_v53 = vld [vmem:[#allocation53_spill] sm:$0xff] }
 0x279   :  { %19020 = vmatprep.subr.bf16.mxu0 %v28942_v33 }
 0x27a   :  { %19062 = vmatpush3.bf16.msra.mxu1 %v28945_v58  ;;  %v28954_v58 = vld [vmem:[#allocation47_spill] sm:$0xff]  ;;  %v3483_v30 = vand.u32 4294901760, %v23692_v12 }
 0x27b   :  { %19064 = vmatprep.subr.bf16.mxu1 %v28947_v44  ;;  %v28956_v44 = vld [vmem:[#allocation48_spill] sm:$0xff] }
 0x27c   :  { %19022 = vmatpush3.bf16.msra.mxu0 %v28944_v3 }
 0x27d   :  { %19024 = vmatprep.subr.bf16.mxu0 %v28946_v19 }
 0x27e   :  { %19066 = vmatpush3.bf16.msra.mxu1 %v28949_v1  ;;  %v28957_v1 = vld [vmem:[#allocation58_spill] sm:$0xff] }
 0x27f   :  { %19068 = vmatprep.subr.bf16.mxu1 %v28951_v0  ;;  %v3484_v0 = vsub.f32 %v23692_v12, %v3483_v30 }
 0x280   :  { %19026 = vmatpush3.bf16.msra.mxu0 %v28948_v13 }
 0x281   :  { %19028 = vmatprep.subr.bf16.mxu0 %v28950_v50 }
 0x282   :  { %19070 = vmatpush3.bf16.msra.mxu1 %v28953_v49  ;;  %v28959_v49 = vld [vmem:[#allocation52_spill] sm:$0xff] }
 0x283   :  { %19072 = vmatprep.subr.bf16.mxu1 %v28955_v46  ;;  %v28961_v46 = vld [vmem:[#allocation56_spill] sm:$0xff] }
 0x284   :  { %19030 = vmatpush3.bf16.msra.mxu0 %v28952_v41 }
 0x285   :  { %19032 = vmatprep.subr.bf16.mxu0 %v28954_v58 }
 0x286   :  { %19074 = vmatpush3.bf16.msra.mxu1 %v28957_v1  ;;  %v3485_v1 = vand.u32 4294901760, %v3484_v0  ;;  %v28966_v0 = vld [vmem:[#allocation63_spill] sm:$0xff] }
 0x287   :  { %19108 = vmatprep.subr.bf16.mxu1 %v28934_v32 }
 0x288   :  { %19034 = vmatpush3.bf16.msra.mxu0 %v28956_v44 }
 0x289   :  { %19036 = vmatprep.subr.bf16.mxu0 %v28958_v38  ;;  %3718 = vmatmul.mubr.f32.vlgmr.msra.gmra.mrb[44].mxu1 %v23685_v43 }
 0x28a   :  { %19110 = vmatpush3.bf16.msra.mxu1 %v28936_v62  ;;  %3960 = vmatprep.mubr.f32.mxu1 %v3477_v27  ;;  %v28964_v27 = vld [vmem:[#allocation61_spill] sm:$0xff] }
 0x28b   :  { %19112 = vmatprep.subr.bf16.mxu1 %v28938_v52 }
 0x28c   :  { %19038 = vmatpush3.bf16.msra.mxu0 %v28959_v49 }
 0x28d   :  { %19040 = vmatprep.subr.bf16.mxu0 %v28960_v53 }
 0x28e   :  { %19114 = vmatpush3.bf16.msra.mxu1 %v28940_v7 }
 0x28f   :  { %19116 = vmatprep.subr.bf16.mxu1 %v28942_v33 }
 0x290   :  { %19042 = vmatpush3.bf16.msra.mxu0 %v28961_v46 }
 0x291   :  { %19076 = vmatprep.subr.bf16.mxu0 %v28962_v11  ;;  %v28967_v11 = vld [vmem:[#allocation64_spill] sm:$0xff] }
 0x292   :  { %19118 = vmatpush3.bf16.msra.mxu1 %v28944_v3 }
 0x293   :  { %3486 = vmatmul.mubr.f32.vlgmr.msra.gmra.mrb[44].mxu0 %v3485_v1  ;;  %19120 = vmatprep.subr.bf16.mxu1 %v28946_v19 }
 0x294   :  { %19078 = vmatpush3.bf16.msra.mxu0 %v28963_v54  ;;  %3853 = vmatprep.mubr.f32.mxu0 %v23649_v59  ;;  %v28968_v54 = vld [vmem:[#allocation65_spill] sm:$0xff]  ;;  %v16418_v59 = vpop.f32.mrb[32].mxu1 }
 0x295   :  { %19080 = vmatprep.subr.bf16.mxu0 %v28964_v27  ;;  %v16419_v1 = vpop.f32.mrb[33].mxu1 }
 0x296   :  { %19122 = vmatpush3.bf16.msra.mxu1 %v28948_v13  ;;  %v16420_v27 = vadd.f32 %v16419_v1, %v16418_v59  ;;  %v28973_v59 = vld [vmem:[#allocation70_spill] sm:$0xff]  ;;  %v28975_v1 = vld [vmem:[#allocation143_spill] sm:$0xff] }
 0x297   :  { %19124 = vmatprep.subr.bf16.mxu1 %v28950_v50 }
 0x298   :  { %19082 = vmatpush3.bf16.msra.mxu0 %v28965_v28  ;;  %v28970_v28 = vld [vmem:[#allocation67_spill] sm:$0xff] }
 0x299   :  { %19084 = vmatprep.subr.bf16.mxu0 %v28966_v0  ;;  %v28971_v0 = vld [vmem:[#allocation68_spill] sm:$0xff] }
 0x29a   :  { %19126 = vmatpush3.bf16.msra.mxu1 %v28952_v41 }
 0x29b   :  { %19128 = vmatprep.subr.bf16.mxu1 %v28954_v58 }
 0x29c   :  { %19086 = vmatpush3.bf16.msra.mxu0 %v28967_v11  ;;  %v28972_v11 = vld [vmem:[#allocation69_spill] sm:$0xff] }
 0x29d   :  { %19088 = vmatprep.subr.bf16.mxu0 %v28968_v54  ;;  %v16383_v54 = vpop.f32.mrb[32].mxu0 }
 0x29e   :  { %19130 = vmatpush3.bf16.msra.mxu1 %v28956_v44  ;;  %v16384_v14 = vpop.f32.mrb[33].mxu0 }
 0x29f   :  { %19132 = vmatprep.subr.bf16.mxu1 %v28958_v38  ;;  %v16385_v18 = vadd.f32 %v16384_v14, %v16383_v54  ;;  %v28978_v54 = vld [vmem:[#allocation74_spill] sm:$0xff] }
 0x2a0   :  { %19090 = vmatpush3.bf16.msra.mxu0 %v28969_v37  ;;  %v28974_v37 = vld [vmem:[#allocation71_spill] sm:$0xff] }
 0x2a1   :  { %19092 = vmatprep.subr.bf16.mxu0 %v28970_v28  ;;  %v1649_v28 = vrot.slane %v28975_v1, 4  ;;  %v1996_v8 = vadd.f32 %v16420_v27, %v16385_v18  ;;  %v28979_v18 = vld [vmem:[#allocation150_spill] sm:$0xff]  ;;  %v28982_v27 = vld [vmem:[#allocation159_spill] sm:$0xff] }
 0x2a2   :  { %19134 = vmatpush3.bf16.msra.mxu1 %v28959_v49 }
 0x2a3   :  { %19136 = vmatprep.subr.bf16.mxu1 %v28960_v53  ;;  %v1650_v14 = vadd.f32 %v1649_v28, %v28975_v1  ;;  %v28986_v1 = vld [vmem:[#allocation21_spill] sm:$0xff] }
 0x2a4   :  { %19094 = vmatpush3.bf16.msra.mxu0 %v28971_v0  ;;  %v28976_v0 = vld [vmem:[#allocation72_spill] sm:$0xff]  ;;  %v28988_v28 = vld [vmem:[#allocation25_spill] sm:$0xff] }
 0x2a5   :  { %19096 = vmatprep.subr.bf16.mxu0 %v28972_v11  ;;  %v28977_v11 = vld [vmem:[#allocation73_spill] sm:$0xff] }
 0x2a6   :  { %19138 = vmatpush3.bf16.msra.mxu1 %v28961_v46 }
 0x2a7   :  { %19172 = vmatprep.subr.bf16.mxu1 %v28934_v32  ;;  %v1651_v32 = vrot.slane %v1650_v14, 2 }
 0x2a8   :  { %19098 = vmatpush3.bf16.msra.mxu0 %v28973_v59 }
 0x2a9   :  { %19100 = vmatprep.subr.bf16.mxu0 %v28974_v37  ;;  %3964 = vmatmul.mubr.f32.vlgmr.msra.gmra.mrb[46].mxu1 %v3483_v30  ;;  %v28980_v30 = vld [vmem:[#allocation154_spill] sm:$0xff] }
 0x2aa   :  { %19174 = vmatpush3.bf16.msra.mxu1 %v28936_v62  ;;  %4234 = vmatprep.mubr.f32.mxu1 %v23642_v48  ;;  %v28981_v62 = vld [vmem:[#allocation155_spill] sm:$0xff] }
 0x2ab   :  { %19176 = vmatprep.subr.bf16.mxu1 %v28938_v52  ;;  %v1652_v52 = vadd.f32 %v1651_v32, %v1650_v14 }
 0x2ac   :  { %19102 = vmatpush3.bf16.msra.mxu0 %v28976_v0 }
 0x2ad   :  { %19104 = vmatprep.subr.bf16.mxu0 %v28977_v11  ;;  %v28990_v11 = vld [vmem:[#allocation31_spill] sm:$0xff] }
 0x2ae   :  { %19178 = vmatpush3.bf16.msra.mxu1 %v28940_v7  ;;  %v28983_v7 = vld [vmem:[#allocation160_spill] sm:$0xff] }
 0x2af   :  { %19180 = vmatprep.subr.bf16.mxu1 %v28942_v33  ;;  %v1653_v33 = vrot.slane %v1652_v52, 1 }
 0x2b0   :  { %19106 = vmatpush3.bf16.msra.mxu0 %v28978_v54  ;;  %v28991_v54 = vld [vmem:[#allocation141_spill] sm:$0xff] }
 0x2b1   :  { %19140 = vmatprep.subr.bf16.mxu0 %v28979_v18  ;;  %v1654_v59 = vadd.f32 %v1653_v33, %v1652_v52  ;;  %v28992_v18 = vld [vmem:[#allocation33_spill] sm:$0xff]  ;;  %v28998_v33 = vld [vmem:[#allocation139_spill] sm:$0xff] }
 0x2b2   :  { %19182 = vmatpush3.bf16.msra.mxu1 %v28944_v3  ;;  %v16488_v3 = vpop.f32.mrb[34].mxu1 }
 0x2b3   :  { %3856 = vmatmul.mubr.f32.vlgmr.msra.gmra.mrb[46].mxu0 %v23692_v12  ;;  %19184 = vmatprep.subr.bf16.mxu1 %v28946_v19  ;;  %v28984_v12 = vld [vmem:[#allocation15_spill] sm:$0xff]  ;;  %v16489_v19 = vpop.f32.mrb[35].mxu1 }
 0x2b4   :  { %19142 = vmatpush3.bf16.msra.mxu0 %v28980_v30  ;;  %4130 = vmatprep.mubr.f32.mxu0 %v23642_v48  ;;  %v28985_v48 = vld [vmem:[#allocation18_spill] sm:$0xff]  ;;  %v16490_v37 = vadd.f32 %v16489_v19, %v16488_v3  ;;  %v29000_v19 = vld [vmem:[#allocation43_spill] sm:$0xff] }
 0x2b5   :  { %19144 = vmatprep.subr.bf16.mxu0 %v28981_v62 }
 0x2b6   :  { %19186 = vmatpush3.bf16.msra.mxu1 %v28948_v13  ;;  %v28987_v13 = vld [vmem:[#allocation22_spill] sm:$0xff] }
 0x2b7   :  { %19188 = vmatprep.subr.bf16.mxu1 %v28950_v50  ;;  %v23764_v50 = vand.u32 4294901760, %v1654_v59 }
 0x2b8   :  { %19146 = vmatpush3.bf16.msra.mxu0 %v28982_v27  ;;  %v28995_v27 = vld [vmem:[#allocation36_spill] sm:$0xff] }
 0x2b9   :  { %19148 = vmatprep.subr.bf16.mxu0 %v28983_v7  ;;  %v23771_v0 = vsub.f32 %v1654_v59, %v23764_v50  ;;  %v28996_v7 = vld [vmem:[#allocation38_spill] sm:$0xff] }
 0x2ba   :  { %19190 = vmatpush3.bf16.msra.mxu1 %v28952_v41  ;;  %v28989_v41 = vld [vmem:[#allocation26_spill] sm:$0xff] }
 0x2bb   :  { %19192 = vmatprep.subr.bf16.mxu1 %v28954_v58  ;;  %v16453_v58 = vpop.f32.mrb[34].mxu0  ;;  %v4339_v30 = vand.u32 4294901760, %v23771_v0 }
 0x2bc   :  { %19150 = vmatpush3.bf16.msra.mxu0 %v28984_v12  ;;  %v16454_v14 = vpop.f32.mrb[35].mxu0 }
 0x2bd   :  { %19152 = vmatprep.subr.bf16.mxu0 %v28985_v48  ;;  %v28999_v48 = vld [vmem:[#allocation41_spill] sm:$0xff] }
 0x2be   :  { %19194 = vmatpush3.bf16.msra.mxu1 %v28956_v44  ;;  %v16455_v44 = vadd.f32 %v16454_v14, %v16453_v58 }
 0x2bf   :  { %19196 = vmatprep.subr.bf16.mxu1 %v28958_v38  ;;  %v1628_v38 = vrot.slane %v28991_v54, 4 }
 0x2c0   :  { %19154 = vmatpush3.bf16.msra.mxu0 %v28986_v1  ;;  %v2134_v32 = vadd.f32 %v16455_v44, %v1996_v8  ;;  %v4340_v8 = vsub.f32 %v23771_v0, %v4339_v30  ;;  %v29002_v1 = vld [vmem:[#allocation46_spill] sm:$0xff] }
 0x2c1   :  { %19156 = vmatprep.subr.bf16.mxu0 %v28987_v13  ;;  %v1629_v52 = vadd.f32 %v1628_v38, %v28991_v54  ;;  %v29003_v13 = vld [vmem:[#allocation156_spill] sm:$0xff] }
 0x2c2   :  { %19198 = vmatpush3.bf16.msra.mxu1 %v28959_v49  ;;  %v28993_v49 = vld [vmem:[#allocation34_spill] sm:$0xff]  ;;  %v2242_v62 = vadd.f32 %v16490_v37, %v2134_v32  ;;  %v4341_v3 = vand.u32 4294901760, %v4340_v8  ;;  %v29001_v37 = vld [vmem:[#allocation45_spill] sm:$0xff]  ;;  %v29009_v32 = vld [vmem:[#allocation148_spill] sm:$0xff] }
 0x2c3   :  { %19200 = vmatprep.subr.bf16.mxu1 %v28960_v53  ;;  %v28994_v53 = vld [vmem:[#allocation35_spill] sm:$0xff]  ;;  %v1630_v12 = vrot.slane %v1629_v52, 2 }
 0x2c4   :  { %19158 = vmatpush3.bf16.msra.mxu0 %v28988_v28 }
 0x2c5   :  { %19160 = vmatprep.subr.bf16.mxu0 %v28989_v41  ;;  %v1631_v59 = vadd.f32 %v1630_v12, %v1629_v52  ;;  %v29027_v12 = vld [vmem:[#allocation190_spill] sm:$0xff] }
 0x2c6   :  { %19202 = vmatpush3.bf16.msra.mxu1 %v28961_v46  ;;  %v28997_v46 = vld [vmem:[#allocation40_spill] sm:$0xff] }
 0x2c7   :  { %19236 = vmatprep.subr.bf16.mxu1 %v28993_v49  ;;  %v29010_v49 = vld [vmem:[#allocation145_spill] sm:$0xff] }
 0x2c8   :  { %19162 = vmatpush3.bf16.msra.mxu0 %v28990_v11 }
 0x2c9   :  { %19164 = vmatprep.subr.bf16.mxu0 %v28992_v18  ;;  %4236 = vmatmul.mubr.f32.vlgmr.msra.gmra.mrb[48].mxu1 %v23685_v43 }
 0x2ca   :  { %19238 = vmatpush3.bf16.msra.mxu1 %v28995_v27  ;;  %4578 = vmatprep.mubr.f32.mxu1 %v23764_v50 }
 0x2cb   :  { %19240 = vmatprep.subr.bf16.mxu1 %v28997_v46 }
 0x2cc   :  { %19166 = vmatpush3.bf16.msra.mxu0 %v28994_v53  ;;  %v29017_v53 = vld [vmem:[#allocation181_spill] sm:$0xff] }
 0x2cd   :  { %19168 = vmatprep.subr.bf16.mxu0 %v28996_v7  ;;  %v29022_v7 = vld [vmem:[#allocation186_spill] sm:$0xff] }
 0x2ce   :  { %19242 = vmatpush3.bf16.msra.mxu1 %v28999_v48 }
 0x2cf   :  { %19244 = vmatprep.subr.bf16.mxu1 %v23292_v16  ;;  %v1632_v16 = vrot.slane %v1631_v59, 1 }
 0x2d0   :  { %19170 = vmatpush3.bf16.msra.mxu0 %v28998_v33  ;;  %v29026_v33 = vmov 0.0  }
 0x2d1   :  { %19204 = vmatprep.subr.bf16.mxu0 %v23272_v21  ;;  %v1633_v28 = vadd.f32 %v1632_v16, %v1631_v59 }
 0x2d2   :  { %19246 = vmatpush3.bf16.msra.mxu1 %v29000_v19 }
 0x2d3   :  { %4132 = vmatmul.mubr.f32.vlgmr.msra.gmra.mrb[48].mxu0 %v23685_v43  ;;  %19248 = vmatprep.subr.bf16.mxu1 %v29001_v37  ;;  %v29004_v43 = vld [vmem:[#allocation157_spill] sm:$0xff]  ;;  %v23807_v44 = vand.u32 4294901760, %v1633_v28 }
 0x2d4   :  { %19206 = vmatpush3.bf16.msra.mxu0 %v23315_v25  ;;  %4342 = vmatprep.mubr.f32.mxu0 %v4341_v3 }
 0x2d5   :  { %19208 = vmatprep.subr.bf16.mxu0 %v23309_v26 }
 0x2d6   :  { %19250 = vmatpush3.bf16.msra.mxu1 %v29002_v1 }
 0x2d7   :  { %19252 = vmatprep.subr.bf16.mxu1 %v29003_v13  ;;  %v16558_v41 = vpop.f32.mrb[36].mxu1 }
 0x2d8   :  { %19210 = vmatpush3.bf16.msra.mxu0 %v23348_v60  ;;  %v16559_v58 = vpop.f32.mrb[37].mxu1 }
 0x2d9   :  { %19212 = vmatprep.subr.bf16.mxu0 %v23342_v35  ;;  %v16560_v14 = vadd.f32 %v16559_v58, %v16558_v41 }
 0x2da   :  { %19254 = vmatpush3.bf16.msra.mxu1 %v29004_v43 }
 0x2db   :  { %19256 = vmatprep.subr.bf16.mxu1 %v23390_v10  ;;  %v23814_v10 = vsub.f32 %v1633_v28, %v23807_v44 }
 0x2dc   :  { %19214 = vmatpush3.bf16.msra.mxu0 %v23381_v36 }
 0x2dd   :  { %19216 = vmatprep.subr.bf16.mxu0 %v23374_v6 }
 0x2de   :  { %19258 = vmatpush3.bf16.msra.mxu1 %v23415_v55 }
 0x2df   :  { %19260 = vmatprep.subr.bf16.mxu1 %v23426_v15  ;;  %v4345_v15 = vand.u32 4294901760, %v23814_v10 }
 0x2e0   :  { %19218 = vmatpush3.bf16.msra.mxu0 %v23413_v42  ;;  %v16523_v11 = vpop.f32.mrb[36].mxu0 }
 0x2e1   :  { %19220 = vmatprep.subr.bf16.mxu0 %v23406_v24  ;;  %v16524_v54 = vpop.f32.mrb[37].mxu0 }
 0x2e2   :  { %19262 = vmatpush3.bf16.msra.mxu1 %v23443_v34  ;;  %v16525_v55 = vadd.f32 %v16524_v54, %v16523_v11 }
 0x2e3   :  { %19264 = vmatprep.subr.bf16.mxu1 %v23448_v4  ;;  %v4346_v4 = vsub.f32 %v23814_v10, %v4345_v15 }
 0x2e4   :  { %19222 = vmatpush3.bf16.msra.mxu0 %v23439_v2  ;;  %v2410_v38 = vadd.f32 %v16525_v55, %v2242_v62  ;;  %v29018_v62 = vld [vmem:[#allocation182_spill] sm:$0xff] }
 0x2e5   :  { %19224 = vmatprep.subr.bf16.mxu0 %v23432_v9 }
 0x2e6   :  { %19266 = vmatpush3.bf16.msra.mxu1 %v23465_v39  ;;  %v2514_v34 = vadd.f32 %v16560_v14, %v2410_v38  ;;  %v4347_v39 = vand.u32 4294901760, %v4346_v4  ;;  %v1408_v4 = vld [vmem:[%s28019_s5 + $0x8] sm:$0xff] }
 0x2e7   :  { %19300 = vmatprep.subr.bf16.mxu1 %v23272_v21 }
 0x2e8   :  { %19226 = vmatpush3.bf16.msra.mxu0 %v23455_v56 }
 0x2e9   :  { %19228 = vmatprep.subr.bf16.mxu0 %v23461_v31  ;;  %4580 = vmatmul.mubr.f32.vlgmr.msra.gmra.mrb[50].mxu1 %v23807_v44 }
 0x2ea   :  { %19302 = vmatpush3.bf16.msra.mxu1 %v23315_v25  ;;  %4822 = vmatprep.mubr.f32.mxu1 %v4339_v30  ;;  %v29011_v30 = vld [vmem:[#allocation146_spill] sm:$0xff] }
 0x2eb   :  { %19304 = vmatprep.subr.bf16.mxu1 %v23309_v26 }
 0x2ec   :  { %19230 = vmatpush3.bf16.msra.mxu0 %v23476_v23 }
 0x2ed   :  { %19232 = vmatprep.subr.bf16.mxu0 %v23485_v22 }
 0x2ee   :  { %19306 = vmatpush3.bf16.msra.mxu1 %v23348_v60 }
 0x2ef   :  { %19308 = vmatprep.subr.bf16.mxu1 %v23342_v35 }
 0x2f0   :  { %19234 = vmatpush3.bf16.msra.mxu0 %v23494_v45 }
 0x2f1   :  { %19268 = vmatprep.subr.bf16.mxu0 %v23502_v20 }
 0x2f2   :  { %19310 = vmatpush3.bf16.msra.mxu1 %v23381_v36 }
 0x2f3   :  { %4348 = vmatmul.mubr.f32.vlgmr.msra.gmra.mrb[50].mxu0 %v4347_v39  ;;  %19312 = vmatprep.subr.bf16.mxu1 %v23374_v6  ;;  %v1412_v39 = vld [vmem:[%s28019_s5 + $0x28] sm:$0xff] }
 0x2f4   :  { %19270 = vmatpush3.bf16.msra.mxu0 %v23509_v61  ;;  %4715 = vmatprep.mubr.f32.mxu0 %v23771_v0  ;;  %v29006_v0 = vld [vmem:[#allocation54_spill] sm:$0xff] }
 0x2f5   :  { %19272 = vmatprep.subr.bf16.mxu0 %v23515_v57 }
 0x2f6   :  { %19314 = vmatpush3.bf16.msra.mxu1 %v23413_v42 }
 0x2f7   :  { %19316 = vmatprep.subr.bf16.mxu1 %v23406_v24 }
 0x2f8   :  { %19274 = vmatpush3.bf16.msra.mxu0 %v23522_v63  ;;  %v29005_v63 = vld [vmem:[#allocation50_spill] sm:$0xff] }
 0x2f9   :  { %19276 = vmatprep.subr.bf16.mxu0 %v23528_v51 }
 0x2fa   :  { %19318 = vmatpush3.bf16.msra.mxu1 %v23439_v2 }
 0x2fb   :  { %19320 = vmatprep.subr.bf16.mxu1 %v23432_v9 }
 0x2fc   :  { %19278 = vmatpush3.bf16.msra.mxu0 %v23534_v5  ;;  %v16628_v20 = vpop.f32.mrb[38].mxu1 }
 0x2fd   :  { %19280 = vmatprep.subr.bf16.mxu0 %v23540_v29  ;;  %v16629_v61 = vpop.f32.mrb[39].mxu1 }
 0x2fe   :  { %v16630_v57 = vadd.f32 %v16629_v61, %v16628_v20  ;;  %19322 = vmatpush3.bf16.msra.mxu1 %v23455_v56  ;;  %v1410_v20 = vld [vmem:[%s28019_s5 + $0x18] sm:$0xff]  ;;  %v5119_v61 = vand.u32 4294901760, %v1408_v4 }
 0x2ff   :  { %19324 = vmatprep.subr.bf16.mxu1 %v23461_v31 }
 0x300   :  { %19282 = vmatpush3.bf16.msra.mxu0 %v23546_v40  ;;  %v29007_v40 = vld [vmem:[#allocation144_spill] sm:$0xff] }
 0x301   :  { %19284 = vmatprep.subr.bf16.mxu0 %v23552_v47 }
 0x302   :  { %19326 = vmatpush3.bf16.msra.mxu1 %v23476_v23 }
 0x303   :  { %19328 = vmatprep.subr.bf16.mxu1 %v23485_v22 }
 0x304   :  { %19286 = vmatpush3.bf16.msra.mxu0 %v23558_v17  ;;  %v29008_v17 = vld [vmem:[#allocation147_spill] sm:$0xff] }
 0x305   :  { %19288 = vmatprep.subr.bf16.mxu0 %v29005_v63  ;;  %v1414_v63 = vld [vmem:[%s28019_s5 + $0x38] sm:$0xff] }
 0x306   :  { %v16593_v51 = vpop.f32.mrb[38].mxu0  ;;  %19330 = vmatpush3.bf16.msra.mxu1 %v23494_v45 }
 0x307   :  { %v16594_v5 = vpop.f32.mrb[39].mxu0  ;;  %19364 = vmatprep.subr.bf16.mxu1 %v23272_v21  ;;  %v29012_v21 = vld [vmem:[#allocation152_spill] sm:$0xff] }
 0x308   :  { %v16595_v29 = vadd.f32 %v16594_v5, %v16593_v51  ;;  %19290 = vmatpush3.bf16.msra.mxu0 %v29006_v0  ;;  %v5662_v51 = vand.u32 4294901760, %v1410_v20  ;;  %v23917_v5 = vld [vmem:[%s28019_s5] sm:$0xff]  ;;  %v5666_v0 = vand.u32 4294901760, %v1414_v63 }
 0x309   :  { %19292 = vmatprep.subr.bf16.mxu0 %v29007_v40  ;;  %4826 = vmatmul.mubr.f32.vlgmr.msra.gmra.mrb[52].mxu1 %v4345_v15  ;;  %v5121_v40 = vand.u32 4294901760, %v23917_v5 }
 0x30a   :  { %v2626_v47 = vadd.f32 %v16595_v29, %v2514_v34  ;;  %19366 = vmatpush3.bf16.msra.mxu1 %v23315_v25  ;;  %5096 = vmatprep.mubr.f32.mxu1 %v23764_v50  ;;  %v29013_v25 = vld [vmem:[#allocation153_spill] sm:$0xff]  ;;  %v23922_v29 = vld [vmem:[%s28019_s5 + $0x20] sm:$0xff] }
 0x30b   :  { %19368 = vmatprep.subr.bf16.mxu1 %v23309_v26  ;;  %v29014_v26 = vld [vmem:[#allocation178_spill] sm:$0xff] }
 0x30c   :  { %19294 = vmatpush3.bf16.msra.mxu0 %v29008_v17  ;;  %v2858_v18 = vadd.f32 %v16630_v57, %v2626_v47  ;;  %v5123_v57 = vand.u32 4294901760, %v1412_v39  ;;  %v5125_v47 = vand.u32 4294901760, %v23922_v29  ;;  %v23929_v17 = vld [vmem:[%s28019_s5 + $0x10] sm:$0xff] }
 0x30d   :  { %19296 = vmatprep.subr.bf16.mxu0 %v29009_v32  ;;  %v23939_v32 = vld [vmem:[%s28019_s5 + $0x48] sm:$0xff] }
 0x30e   :  { %19370 = vmatpush3.bf16.msra.mxu1 %v23348_v60  ;;  %v29015_v60 = vld [vmem:[#allocation179_spill] sm:$0xff] }
 0x30f   :  { %19372 = vmatprep.subr.bf16.mxu1 %v23342_v35  ;;  %v29016_v35 = vld [vmem:[#allocation180_spill] sm:$0xff] }
 0x310   :  { %19298 = vmatpush3.bf16.msra.mxu0 %v29010_v49  ;;  %v23941_v49 = vpack.c.bf16 %v5123_v57, %v5119_v61 }
 0x311   :  { %19332 = vmatprep.subr.bf16.mxu0 %v29011_v30  ;;  %v5664_v30 = vand.u32 4294901760, %v23929_v17 }
 0x312   :  { %19374 = vmatpush3.bf16.msra.mxu1 %v23381_v36 }
 0x313   :  { %4718 = vmatmul.mubr.f32.vlgmr.msra.gmra.mrb[52].mxu0 %v23814_v10  ;;  %19376 = vmatprep.subr.bf16.mxu1 %v23374_v6 }
 0x314   :  { %19334 = vmatpush3.bf16.msra.mxu0 %v29012_v21  ;;  %4992 = vmatprep.mubr.f32.mxu0 %v23764_v50 }
 0x315   :  { %19336 = vmatprep.subr.bf16.mxu0 %v29013_v25  ;;  %v23948_v25 = vld [vmem:[%s28019_s5 + $0x68] sm:$0xff] }
 0x316   :  { %19378 = vmatpush3.bf16.msra.mxu1 %v23413_v42  ;;  %v29019_v42 = vld [vmem:[#allocation183_spill] sm:$0xff] }
 0x317   :  { %19380 = vmatprep.subr.bf16.mxu1 %v23406_v24  ;;  %v29020_v24 = vld [vmem:[#allocation184_spill] sm:$0xff] }
 0x318   :  { %19338 = vmatpush3.bf16.msra.mxu0 %v29014_v26  ;;  %v5127_v26 = vand.u32 4294901760, %v23939_v32 }
 0x319   :  { %19340 = vmatprep.subr.bf16.mxu0 %v29015_v60  ;;  %v23954_v60 = vld [vmem:[%s28019_s5 + $0x58] sm:$0xff] }
 0x31a   :  { %19382 = vmatpush3.bf16.msra.mxu1 %v23439_v2  ;;  %v29021_v2 = vld [vmem:[#allocation185_spill] sm:$0xff] }
 0x31b   :  { %19384 = vmatprep.subr.bf16.mxu1 %v23432_v9 }
 0x31c   :  { %19342 = vmatpush3.bf16.msra.mxu0 %v29016_v35  ;;  %v16698_v36 = vpop.f32.mrb[40].mxu1  ;;  %v23959_v35 = vld [vmem:[%s28019_s5 + $0x78] sm:$0xff] }
 0x31d   :  { %19344 = vmatprep.subr.bf16.mxu0 %v29017_v53  ;;  %v16699_v50 = vpop.f32.mrb[41].mxu1  ;;  %v23961_v53 = vpack.c.bf16 %v5666_v0, %v5662_v51 }
 0x31e   :  { %v16700_v6 = vadd.f32 %v16699_v50, %v16698_v36  ;;  %19386 = vmatpush3.bf16.msra.mxu1 %v23455_v56  ;;  %v29023_v56 = vld [vmem:[#allocation187_spill] sm:$0xff]  ;;  %v23967_v36 = vpack.c.bf16 %v5125_v47, %v5121_v40  ;;  %v5131_v50 = vand.u32 4294901760, %v23948_v25 }
 0x31f   :  { %19388 = vmatprep.subr.bf16.mxu1 %v23461_v31  ;;  %v29024_v31 = vld [vmem:[#allocation188_spill] sm:$0xff] }
 0x320   :  { %19346 = vmatpush3.bf16.msra.mxu0 %v29018_v62  ;;  %v5670_v62 = vand.u32 4294901760, %v23954_v60 }
 0x321   :  { %19348 = vmatprep.subr.bf16.mxu0 %v29019_v42  ;;  %v23979_v42 = vld [vmem:[%s28019_s5 + $0x60] sm:$0xff] }
 0x322   :  { %19390 = vmatpush3.bf16.msra.mxu1 %v23476_v23  ;;  %v29025_v23 = vld [vmem:[#allocation189_spill] sm:$0xff] }
 0x323   :  { %19392 = vmatprep.subr.bf16.mxu1 %v23485_v22 }
 0x324   :  { %19350 = vmatpush3.bf16.msra.mxu0 %v29020_v24  ;;  %v23984_v24 = vld [vmem:[%s28019_s5 + $0x50] sm:$0xff] }
 0x325   :  { %19352 = vmatprep.subr.bf16.mxu0 %v29021_v2 }
 0x326   :  { %v16663_v52 = vpop.f32.mrb[40].mxu0  ;;  %19394 = vmatpush3.bf16.msra.mxu1 %v23494_v45 }
 0x327   :  { %v16664_v9 = vpop.f32.mrb[41].mxu0  ;;  %19444 = vmatprep.subr.bf16.mxu1 %v23961_v53 }
 0x328   :  { %v16665_v27 = vadd.f32 %v16664_v9, %v16663_v52  ;;  %19354 = vmatpush3.bf16.msra.mxu0 %v29022_v7  ;;  %v5674_v52 = vand.u32 4294901760, %v23959_v35  ;;  %v23995_v7 = vld [vmem:[%s28019_s5 + $0x70] sm:$0xff] }
 0x329   :  { %19356 = vmatprep.subr.bf16.mxu0 %v29023_v56  ;;  %5098 = vmatmul.mubr.f32.vlgmr.msra.gmra.mrb[54].mxu1 %v23807_v44  ;;  %v23999_v56 = vpack.c.bf16 %v5131_v50, %v5127_v26 }
 0x32a   :  { %v2996_v46 = vadd.f32 %v16665_v27, %v2858_v18  ;;  %5734 = vmatprep.mubr.f32.mxu1 %v29026_v33  ;;  %v23934_v18 = vld [vmem:[%s28019_s5 + $0x30] sm:$0xff]  ;;  %v5133_v27 = vand.u32 4294901760, %v23979_v42 }
 0x32b   :  { %v5668_v21 = vand.u32 4294901760, %v23934_v18 }
 0x32c   :  { %19358 = vmatpush3.bf16.msra.mxu0 %v29024_v31  ;;  %v3104_v8 = vadd.f32 %v16700_v6, %v2996_v46  ;;  %v23974_v6 = vld [vmem:[%s28019_s5 + $0x40] sm:$0xff]  ;;  %v5672_v46 = vand.u32 4294901760, %v23984_v24  ;;  %v5676_v31 = vand.u32 4294901760, %v23995_v7 }
 0x32d   :  { %19360 = vmatprep.subr.bf16.mxu0 %v29025_v23  ;;  %v23987_v2 = vpack.c.bf16 %v5668_v21, %v5664_v30  ;;  %v5129_v9 = vand.u32 4294901760, %v23974_v6  ;;  %v24006_v23 = vpack.c.bf16 %v5674_v52, %v5670_v62 }
 0x32f   :  { %19446 = vmatpush1.bf16.msra.mxu1 %v23987_v2 }
 0x330   :  { %19362 = vmatpush3.bf16.msra.mxu0 %v29027_v12  ;;  %v24012_v12 = vpack.c.bf16 %v5133_v27, %v5129_v9  ;;  %19448 = vmatprep.subr.bf16.mxu1 %v24006_v23 }
 0x331   :  { %19396 = vmatprep.subr.bf16.mxu0 %v23941_v49 }
 0x333   :  { %4994 = vmatmul.mubr.f32.vlgmr.msra.gmra.mrb[54].mxu0 %v23807_v44 }
 0x334   :  { %5191 = vmatprep.mubr.f32.mxu0 %v29026_v33  ;;  %19398 = vmatpush1.bf16.msra.mxu0 %v23967_v36 }
 0x335   :  { %19400 = vmatprep.subr.bf16.mxu0 %v23999_v56 }
 0x338   :  { %19402 = vmatpush1.bf16.msra.mxu0 %v24012_v12 }
 0x33c   :  { %v16768_v22 = vpop.f32.mrb[42].mxu1 }
 0x33d   :  { %v16769_v45 = vpop.f32.mrb[43].mxu1 }
 0x33e   :  { %v16770_v48 = vadd.f32 %v16769_v45, %v16768_v22  ;;  %v24014_v22 = vsub.f32 %v1412_v39, %v5123_v57  ;;  %v24016_v45 = vsub.f32 %v1410_v20, %v5662_v51  ;;  %v24063_v51 = vsub.f32 %v23922_v29, %v5125_v47 }
 0x33f   :  { %v24083_v29 = vsub.f32 %v23959_v35, %v5674_v52 }
 0x346   :  { %v16733_v3 = vpop.f32.mrb[42].mxu0 }
 0x347   :  { %v16734_v59 = vpop.f32.mrb[43].mxu0 }
 0x348   :  { %v16735_v19 = vadd.f32 %v16734_v59, %v16733_v3  ;;  %v24026_v59 = vsub.f32 %v1414_v63, %v5666_v0  ;;  %v24058_v63 = vsub.f32 %v23917_v5, %v5121_v40  ;;  %v24066_v0 = vsub.f32 %v23929_v17, %v5664_v30 }
 0x349   :  { %v5223_v40 = vand.u32 4294901760, %v24063_v51 }
 0x34a   :  { %v3272_v37 = vadd.f32 %v16735_v19, %v3104_v8  ;;  %v24003_v8 = vsub.f32 %v1408_v4, %v5119_v61  ;;  %v5217_v19 = vand.u32 4294901760, %v24014_v22  ;;  %v5211_v5 = vand.u32 4294901760, %v24058_v63 }
 0x34b   :  { %v5754_v47 = vand.u32 4294901760, %v24066_v0 }
 0x34c   :  { %v23898_v1 = vadd.f32 %v16770_v48, %v3272_v37  ;;  %v24023_v48 = vpack.c.bf16 %v5676_v31, %v5672_v46  ;;  %v5205_v3 = vand.u32 4294901760, %v24003_v8  ;;  %v5748_v37 = vand.u32 4294901760, %v24016_v45 }
 0x34d   :  { %v5212_v30 = vsub.f32 %v24058_v63, %v5211_v5 }
 0x34e   :  { %19450 = vmatpush1.bf16.msra.mxu1 %v24023_v48 }
 0x34f   :  { %v5213_v52 = vand.u32 4294901760, %v5212_v30 }
 0x35c   :  { %v16838_v16 = vpop.f32.mrb[44].mxu1 }
 0x35d   :  { %v16839_v13 = vpop.f32.mrb[45].mxu1 }
 0x35e   :  { %v16840_v43 = vadd.f32 %v16839_v13, %v16838_v16  ;;  %v5206_v16 = vsub.f32 %v24003_v8, %v5205_v3  ;;  %v5760_v13 = vand.u32 4294901760, %v24026_v59 }
 0x366   :  { %v16803_v28 = vpop.f32.mrb[44].mxu0 }
 0x367   :  { %v16804_v41 = vpop.f32.mrb[45].mxu0 }
 0x368   :  { %v16805_v58 = vadd.f32 %v16804_v41, %v16803_v28  ;;  %v5218_v28 = vsub.f32 %v24014_v22, %v5217_v19  ;;  %v5749_v41 = vsub.f32 %v24016_v45, %v5748_v37 }
 0x36a   :  { %v3720_v14 = vadd.f32 %v16840_v43, %v16805_v58 }
 0x37c   :  { %v16908_v10 = vpop.f32.mrb[46].mxu1 }
 0x37d   :  { %v16909_v44 = vpop.f32.mrb[47].mxu1 }
 0x37e   :  { %v16910_v11 = vadd.f32 %v16909_v44, %v16908_v10  ;;  %v5761_v10 = vsub.f32 %v24026_v59, %v5760_v13 }
 0x386   :  { %v16873_v54 = vpop.f32.mrb[46].mxu0 }
 0x387   :  { %v16874_v55 = vpop.f32.mrb[47].mxu0 }
 0x388   :  { %v16875_v15 = vadd.f32 %v16874_v55, %v16873_v54  ;;  %v5750_v54 = vand.u32 4294901760, %v5749_v41  ;;  %v5762_v55 = vand.u32 4294901760, %v5761_v10 }
 0x38a   :  { %v3858_v38 = vadd.f32 %v16875_v15, %v3720_v14  ;;  %v5207_v14 = vand.u32 4294901760, %v5206_v16  ;;  %v24069_v16 = vsub.f32 %v23934_v18, %v5668_v21  ;;  %v5224_v21 = vsub.f32 %v24063_v51, %v5223_v40 }
 0x38c   :  { %v23900_v34 = vadd.f32 %v16910_v11, %v3858_v38  ;;  %v5219_v11 = vand.u32 4294901760, %v5218_v28  ;;  %v24048_v38 = vpack.c.bf16 %v5762_v55, %v5750_v54  ;;  %v24080_v28 = vsub.f32 %v23954_v60, %v5670_v62 }
 0x38d   :  { %v5766_v17 = vand.u32 4294901760, %v24069_v16  ;;  %v5755_v60 = vsub.f32 %v24066_v0, %v5754_v47  ;;  %v5225_v41 = vand.u32 4294901760, %v5224_v21  ;;  %v5246_v21 = vsub.f32 %v23979_v42, %v5133_v27 }
 0x38e   :  { %v24046_v15 = vpack.c.bf16 %v5219_v11, %v5207_v14  ;;  %19452 = vmatprep.subr.bf16.mxu1 %v24048_v38  ;;  %v24125_v42 = vpack.c.bf16 %v24026_v59, %v24016_v45 }
 0x38f   :  { %v5767_v35 = vsub.f32 %v24069_v16, %v5766_v17  ;;  %v5756_v10 = vand.u32 4294901760, %v5755_v60  ;;  %v24099_v55 = vpack.c.bf16 %v5225_v41, %v5213_v52  ;;  %v5777_v60 = vsub.f32 %v23984_v24, %v5672_v46 }
 0x390   :  { %19404 = vmatprep.subr.bf16.mxu0 %v24046_v15  ;;  %v24129_v24 = vpack.c.bf16 %v24063_v51, %v24058_v63  ;;  %v24133_v41 = vpack.c.bf16 %v24069_v16, %v24066_v0 }
 0x391   :  { %v5778_v52 = vand.u32 4294901760, %v5777_v60 }
 0x39c   :  { %v16978_v43 = vpop.f32.mrb[48].mxu1 }
 0x39d   :  { %v16979_v58 = vpop.f32.mrb[49].mxu1 }
 0x39e   :  { %v16980_v44 = vadd.f32 %v16979_v58, %v16978_v43  ;;  %v24075_v43 = vsub.f32 %v23948_v25, %v5131_v50  ;;  %v5772_v25 = vand.u32 4294901760, %v24080_v28 }
 0x3a0   :  { %v5773_v58 = vsub.f32 %v24080_v28, %v5772_v25 }
 0x3a6   :  { %v16943_v4 = vpop.f32.mrb[48].mxu0 }
 0x3a7   :  { %v16944_v39 = vpop.f32.mrb[49].mxu0 }
 0x3a8   :  { %v16945_v20 = vadd.f32 %v16944_v39, %v16943_v4  ;;  %v5774_v4 = vand.u32 4294901760, %v5773_v58  ;;  %v5779_v58 = vsub.f32 %v5777_v60, %v5778_v52 }
 0x3aa   :  { %v4134_v61 = vadd.f32 %v16945_v20, %v23900_v34  ;;  %v24072_v34 = vsub.f32 %v23939_v32, %v5127_v26  ;;  %v5241_v32 = vand.u32 4294901760, %v24075_v43  ;;  %v5784_v26 = vand.u32 4294901760, %v24083_v29 }
 0x3ab   :  { %v5234_v20 = vsub.f32 %v23974_v6, %v5129_v9  ;;  %v24121_v6 = vpack.c.bf16 %v24014_v22, %v24003_v8  ;;  %v5247_v9 = vand.u32 4294901760, %v5246_v21 }
 0x3ac   :  { %v24053_v57 = vadd.f32 %v16980_v44, %v4134_v61  ;;  %v5229_v18 = vand.u32 4294901760, %v24072_v34  ;;  %v5242_v62 = vsub.f32 %v24075_v43, %v5241_v32  ;;  %v5785_v14 = vsub.f32 %v24083_v29, %v5784_v26 }
 0x3ad   :  { %v5768_v44 = vand.u32 4294901760, %v5767_v35 }
 0x3ae   :  { %v5230_v50 = vsub.f32 %v24072_v34, %v5229_v18  ;;  %v5243_v54 = vand.u32 4294901760, %v5242_v62  ;;  %v5786_v39 = vand.u32 4294901760, %v5785_v14  ;;  %v5789_v62 = vsub.f32 %v23995_v7, %v5676_v31 }
 0x3af   :  { %v24104_v61 = vpack.c.bf16 %v5768_v44, %v5756_v10  ;;  %v24137_v7 = vpack.c.bf16 %v24075_v43, %v24072_v34  ;;  %v5248_v31 = vsub.f32 %v5246_v21, %v5247_v9  ;;  %v24141_v14 = vpack.c.bf16 %v24083_v29, %v24080_v28 }
 0x3b0   :  { %v5231_v11 = vand.u32 4294901760, %v5230_v50  ;;  %v24114_v35 = vpack.c.bf16 %v5786_v39, %v5774_v4  ;;  %v5235_v50 = vand.u32 4294901760, %v5234_v20  ;;  %v5790_v46 = vand.u32 4294901760, %v5789_v62 }
 0x3b1   :  { %v24143_v10 = vpack.c.bf16 %v5246_v21, %v5234_v20  ;;  %v24145_v44 = vpack.c.bf16 %v5789_v62, %v5777_v60  ;;  %v24155_v28 = vpack.c.bf16 %v5217_v19, %v5205_v3  ;;  %v24161_v29 = vpack.c.bf16 %v5760_v13, %v5748_v37 }
 0x3b2   :  { %v24106_v30 = vpack.c.bf16 %v5243_v54, %v5231_v11  ;;  %v5236_v27 = vsub.f32 %v5234_v20, %v5235_v50  ;;  %v5791_v51 = vsub.f32 %v5789_v62, %v5790_v46  ;;  %v5249_v11 = vand.u32 4294901760, %v5248_v31 }
 0x3b3   :  { %v5780_v54 = vand.u32 4294901760, %v5779_v58  ;;  %v24163_v20 = vpack.c.bf16 %v5223_v40, %v5211_v5  ;;  %v24165_v21 = vpack.c.bf16 %v5766_v17, %v5754_v47  ;;  %v24167_v60 = vpack.c.bf16 %v5241_v32, %v5229_v18 }
 0x3b4   :  { %v5237_v63 = vand.u32 4294901760, %v5236_v27  ;;  %v5792_v0 = vand.u32 4294901760, %v5791_v51  ;;  %v24169_v27 = vpack.c.bf16 %v5784_v26, %v5772_v25  ;;  %v24171_v8 = vpack.c.bf16 %v5247_v9, %v5235_v50 }
 0x3b5   :  { %v24173_v19 = vpack.c.bf16 %v5790_v46, %v5778_v52  ;;  %v5104_v52 = vmul.f32 0.00048828125, %v23898_v1 }
 0x3b6   :  { %v24147_v16 = vpack.c.bf16 %v5249_v11, %v5237_v63  ;;  %v24149_v4 = vpack.c.bf16 %v5792_v0, %v5780_v54  ;;  %v5108_v0 = vld [vmem:[%s28020_s6] sm:$0x1] }
 0x3bc   :  { %v17048_v34 = vpop.f32.mrb[50].mxu1 }
 0x3bd   :  { %v17049_v43 = vpop.f32.mrb[51].mxu1 }
 0x3be   :  { %v17050_v39 = vadd.f32 %v17049_v43, %v17048_v34 }
 0x3c6   :  { %v17013_v62 = vpop.f32.mrb[50].mxu0 }
 0x3c7   :  { %v17014_v22 = vpop.f32.mrb[51].mxu0 }
 0x3c8   :  { %v17015_v3 = vadd.f32 %v17014_v22, %v17013_v62 }
 0x3ca   :  { %v4350_v45 = vadd.f32 %v17015_v3, %v24053_v57  ;;  %v5106_v57 = vmul.f32 %v5104_v52, %v5104_v52 }
 0x3cc   :  { %v4582_v59 = vadd.f32 %v17050_v39, %v4350_v45 }
 0x3dc   :  { %v17118_v37 = vpop.f32.mrb[52].mxu1 }
 0x3dd   :  { %v17119_v13 = vpop.f32.mrb[53].mxu1 }
 0x3de   :  { %v17120_v5 = vadd.f32 %v17119_v13, %v17118_v37  ;;  %v5109_v37 = vld [vmem:[%s28020_s6 + $0x1] sm:$0x1] }
 0x3e6   :  { %v17083_v40 = vpop.f32.mrb[52].mxu0 }
 0x3e7   :  { %v17084_v47 = vpop.f32.mrb[53].mxu0 }
 0x3e8   :  { %v17085_v17 = vadd.f32 %v17084_v47, %v17083_v40 }
 0x3ea   :  { %v4720_v18 = vadd.f32 %v17085_v17, %v4582_v59 }
 0x3ec   :  { %v4828_v32 = vadd.f32 %v17120_v5, %v4720_v18 }
 0x3fc   :  { %v17188_v31 = vpop.f32.mrb[54].mxu1 }
 0x3fd   :  { %v17189_v25 = vpop.f32.mrb[55].mxu1 }
 0x3fe   :  { %v17190_v26 = vadd.f32 %v17189_v25, %v17188_v31  ;;  %v20898_v31 = vld [vmem:[%s28016_s2 + $0x304] ss:$8 sps:$4 sm:$0xff]   ;;  %v7294_v25 = vlaneseq }
 0x406   :  { %v17153_v50 = vpop.f32.mrb[54].mxu0 }
 0x407   :  { %v17154_v9 = vpop.f32.mrb[55].mxu0 }
 0x408   :  { %v17155_v58 = vadd.f32 %v17154_v9, %v17153_v50 }
 0x40a   :  { %v4996_v46 = vadd.f32 %v17155_v58, %v4828_v32 }
 0x40c   :  { %v5100_v63 = vadd.f32 %v17190_v26, %v4996_v46  ;;  %v7295_v26 = vshrl.u32 %v7294_v25, 7  ;;  %v29055_v25 = vld [vmem:[#allocation108_spill] sm:$0xff] }
 0x40e   :  { %v5105_v51 = vmul.f32 0.00048828125, %v5100_v63  ;;  %v24410_v50 = vsub.s32 0, %v7295_v26 }
 0x410   :  { %v5107_v11 = vsub.f32 %v5105_v51, %v5106_v57  ;;  %29028 = vst [vmem:[#allocation149_spill] sm:$0xff] %v24410_v50 }
 0x412   :  { %v5110_v54 = vadd.f32 1e-05, %v5107_v11 }
 0x414   :  { %21216 = vrsqrt.f32 %v5110_v54  ;;  %v29029_v54 = vld [vmem:[#allocation75_spill] sm:$0xff] }
 0x41e   :  { %v21217_v34 = vpop.eup %21216 }
 0x41f   :  { %v5112_v43 = vmul.f32 %v21217_v34, %v5108_v0  ;;  %v29030_v34 = vld [vmem:[#allocation83_spill] sm:$0xff] }
 0x421   :  { %v5117_v39 = vsel %vm5115_vm1, %v5112_v43, 0  ;;  %v5113_v62 = vmul.f32 %v5112_v43, %v5104_v52 }
 0x422   :  { %v24181_v22 = vand.u32 4294901760, %v5117_v39 }
 0x423   :  { %v5114_v13 = vsub.f32 %v5109_v37, %v5113_v62 }
 0x424   :  { %v5193_v1 = vsub.f32 %v5117_v39, %v24181_v22  ;;  %v29031_v39 = vld [vmem:[#allocation91_spill] sm:$0xff] }
 0x425   :  { %v6206_v5 = vsel %vm5115_vm1, %v5114_v13, 0  ;;  %v29035_v13 = vld [vmem:[#allocation93_spill] sm:$0xff] }
 0x426   :  { %v5194_v3 = vand.u32 4294901760, %v5193_v1  ;;  %v24230_v40 = vand.u32 4294901760, %v6206_v5 }
 0x428   :  { %v5195_v45 = vsub.f32 %v5193_v1, %v5194_v3  ;;  %v6282_v47 = vsub.f32 %v6206_v5, %v24230_v40 }
 0x42a   :  { %v5196_v59 = vand.u32 4294901760, %v5195_v45  ;;  %v6283_v17 = vand.u32 4294901760, %v6282_v47 }
 0x42c   :  { %5197 = vmatmul.mubr.f32.vlgmr.msra.gmra.mrb[56].mxu0 %v5196_v59  ;;  %5740 = vmatmul.mubr.f32.vlgmr.msra.gmra.mrb[56].mxu1 %v5196_v59  ;;  %v6284_v18 = vsub.f32 %v6282_v47, %v6283_v17  ;;  %v29034_v59 = vld [vmem:[#allocation85_spill] sm:$0xff] }
 0x42d   :  { %19406 = vmatpush1.bf16.msra.mxu0 %v24099_v55  ;;  %19454 = vmatpush1.bf16.msra.mxu1 %v24104_v61 }
 0x42e   :  { %19408 = vmatprep.subr.bf16.mxu0 %v24106_v30  ;;  %19456 = vmatprep.subr.bf16.mxu1 %v24114_v35  ;;  %v6285_v32 = vand.u32 4294901760, %v6284_v18 }
 0x42f   :  { %5307 = vmatprep.mubr.f32.mxu0 %v29026_v33  ;;  %5850 = vmatprep.mubr.f32.mxu1 %v29026_v33 }
 0x431   :  { %19410 = vmatpush1.bf16.msra.mxu0 %v24147_v16  ;;  %19458 = vmatpush1.bf16.msra.mxu1 %v24149_v4 }
 0x432   :  { %19412 = vmatprep.subr.bf16.mxu0 %v24121_v6  ;;  %19460 = vmatprep.subr.bf16.mxu1 %v24125_v42 }
 0x434   :  { %5309 = vmatmul.mubr.f32.vlgmr.msra.gmra.mrb[56].mxu0 %v24181_v22  ;;  %5852 = vmatmul.mubr.f32.vlgmr.msra.gmra.mrb[56].mxu1 %v24181_v22 }
 0x435   :  { %19414 = vmatpush1.bf16.msra.mxu0 %v24129_v24  ;;  %19462 = vmatpush1.bf16.msra.mxu1 %v24133_v41 }
 0x436   :  { %19416 = vmatprep.subr.bf16.mxu0 %v24137_v7  ;;  %19464 = vmatprep.subr.bf16.mxu1 %v24141_v14 }
 0x437   :  { %5395 = vmatprep.mubr.f32.mxu0 %v29026_v33  ;;  %5938 = vmatprep.mubr.f32.mxu1 %v29026_v33 }
 0x439   :  { %19418 = vmatpush1.bf16.msra.mxu0 %v24143_v10  ;;  %19466 = vmatpush1.bf16.msra.mxu1 %v24145_v44 }
 0x43a   :  { %19420 = vmatprep.subr.bf16.mxu0 %v23941_v49  ;;  %19468 = vmatprep.subr.bf16.mxu1 %v23961_v53 }
 0x43c   :  { %5398 = vmatmul.mubr.f32.vlgmr.msra.gmra.mrb[56].mxu0 %v5193_v1  ;;  %5941 = vmatmul.mubr.f32.vlgmr.msra.gmra.mrb[56].mxu1 %v5193_v1 }
 0x43d   :  { %19422 = vmatpush1.bf16.msra.mxu0 %v23967_v36  ;;  %19470 = vmatpush1.bf16.msra.mxu1 %v23987_v2 }
 0x43e   :  { %19424 = vmatprep.subr.bf16.mxu0 %v23999_v56  ;;  %19472 = vmatprep.subr.bf16.mxu1 %v24006_v23 }
 0x43f   :  { %5476 = vmatprep.mubr.f32.mxu0 %v29026_v33  ;;  %6019 = vmatprep.mubr.f32.mxu1 %v29026_v33 }
 0x441   :  { %19426 = vmatpush1.bf16.msra.mxu0 %v24012_v12  ;;  %19474 = vmatpush1.bf16.msra.mxu1 %v24023_v48 }
 0x442   :  { %19428 = vmatprep.subr.bf16.mxu0 %v24155_v28  ;;  %19476 = vmatprep.subr.bf16.mxu1 %v24161_v29 }
 0x444   :  { %5480 = vmatmul.mubr.f32.vlgmr.msra.gmra.mrb[56].mxu0 %v5194_v3  ;;  %6023 = vmatmul.mubr.f32.vlgmr.msra.gmra.mrb[56].mxu1 %v5194_v3  ;;  %v29033_v3 = vld [vmem:[#allocation77_spill] sm:$0xff] }
 0x445   :  { %19430 = vmatpush1.bf16.msra.mxu0 %v24163_v20  ;;  %19478 = vmatpush1.bf16.msra.mxu1 %v24165_v21 }
 0x446   :  { %19432 = vmatprep.subr.bf16.mxu0 %v24167_v60  ;;  %19480 = vmatprep.subr.bf16.mxu1 %v24169_v27 }
 0x447   :  { %5574 = vmatprep.mubr.f32.mxu0 %v29026_v33  ;;  %6117 = vmatprep.mubr.f32.mxu1 %v29026_v33 }
 0x449   :  { %19434 = vmatpush1.bf16.msra.mxu0 %v24171_v8  ;;  %19482 = vmatpush1.bf16.msra.mxu1 %v24173_v19 }
 0x44a   :  { %19436 = vmatprep.subr.bf16.mxu0 %v23941_v49  ;;  %19484 = vmatprep.subr.bf16.mxu1 %v23961_v53 }
 0x44c   :  { %5576 = vmatmul.mubr.f32.vlgmr.msra.gmra.mrb[56].mxu0 %v24181_v22  ;;  %6119 = vmatmul.mubr.f32.vlgmr.msra.gmra.mrb[56].mxu1 %v24181_v22 }
 0x44d   :  { %19438 = vmatpush1.bf16.msra.mxu0 %v23967_v36  ;;  %19486 = vmatpush1.bf16.msra.mxu1 %v23987_v2 }
 0x44e   :  { %19440 = vmatprep.subr.bf16.mxu0 %v23999_v56  ;;  %19488 = vmatprep.subr.bf16.mxu1 %v24006_v23 }
 0x44f   :  { %5654 = vmatprep.mubr.f32.mxu0 %v29026_v33  ;;  %6197 = vmatprep.mubr.f32.mxu1 %v29026_v33 }
 0x451   :  { %19442 = vmatpush1.bf16.msra.mxu0 %v24012_v12  ;;  %19490 = vmatpush1.bf16.msra.mxu1 %v24023_v48 }
 0x452   :  { %19492 = vmatprep.subr.bf16.mxu0 %v23941_v49  ;;  %19540 = vmatprep.subr.bf16.mxu1 %v23961_v53 }
 0x454   :  { %5656 = vmatmul.mubr.f32.vlgmr.msra.gmra.mrb[56].mxu0 %v24181_v22  ;;  %6199 = vmatmul.mubr.f32.vlgmr.msra.gmra.mrb[56].mxu1 %v24181_v22  ;;  %v29032_v22 = vld [vmem:[#allocation99_spill] sm:$0xff] }
 0x455   :  { %19494 = vmatpush1.bf16.msra.mxu0 %v23967_v36  ;;  %19542 = vmatpush1.bf16.msra.mxu1 %v23987_v2 }
 0x456   :  { %19496 = vmatprep.subr.bf16.mxu0 %v23999_v56  ;;  %19544 = vmatprep.subr.bf16.mxu1 %v24006_v23 }
 0x457   :  { %6280 = vmatprep.mubr.f32.mxu0 %v29026_v33  ;;  %6823 = vmatprep.mubr.f32.mxu1 %v29026_v33 }
 0x459   :  { %19498 = vmatpush1.bf16.msra.mxu0 %v24012_v12  ;;  %19546 = vmatpush1.bf16.msra.mxu1 %v24023_v48 }
 0x45a   :  { %19500 = vmatprep.subr.bf16.mxu0 %v24046_v15  ;;  %19548 = vmatprep.subr.bf16.mxu1 %v24048_v38  ;;  %v20850_v15 = vld [vmem:[%s28016_s2 + $0x204] ss:$8 sps:$4 sm:$0xff]   ;;  %v20860_v38 = vld [vmem:[%s28016_s2 + $0x240] ss:$8 sps:$4 sm:$0xff]  }
 0x45c   :  { %6286 = vmatmul.mubr.f32.vlgmr.msra.gmra.mrb[58].mxu0 %v6285_v32  ;;  %6829 = vmatmul.mubr.f32.vlgmr.msra.gmra.mrb[58].mxu1 %v6285_v32  ;;  %v29038_v32 = vld [vmem:[#allocation117_spill] sm:$0xff] }
 0x45d   :  { %19502 = vmatpush1.bf16.msra.mxu0 %v24099_v55  ;;  %19550 = vmatpush1.bf16.msra.mxu1 %v24104_v61  ;;  %v20865_v55 = vld [vmem:[%s28016_s2 + $0x254] ss:$8 sps:$4 sm:$0xff]   ;;  %v20863_v61 = vld [vmem:[%s28016_s2 + $0x250] ss:$8 sps:$4 sm:$0xff]  }
 0x45e   :  { %19504 = vmatprep.subr.bf16.mxu0 %v24106_v30  ;;  %19552 = vmatprep.subr.bf16.mxu1 %v24114_v35  ;;  %v20868_v30 = vld [vmem:[%s28016_s2 + $0x264] ss:$8 sps:$4 sm:$0xff]   ;;  %v20866_v35 = vld [vmem:[%s28016_s2 + $0x260] ss:$8 sps:$4 sm:$0xff]  }
 0x45f   :  { %6396 = vmatprep.mubr.f32.mxu0 %v29026_v33  ;;  %6939 = vmatprep.mubr.f32.mxu1 %v29026_v33 }
 0x461   :  { %19506 = vmatpush1.bf16.msra.mxu0 %v24147_v16  ;;  %19554 = vmatpush1.bf16.msra.mxu1 %v24149_v4  ;;  %v20883_v16 = vld [vmem:[%s28016_s2 + $0x2b4] ss:$8 sps:$4 sm:$0xff]   ;;  %v20881_v4 = vld [vmem:[%s28016_s2 + $0x2b0] ss:$8 sps:$4 sm:$0xff]  }
 0x462   :  { %19508 = vmatprep.subr.bf16.mxu0 %v24121_v6  ;;  %19556 = vmatprep.subr.bf16.mxu1 %v24125_v42  ;;  %v20871_v6 = vld [vmem:[%s28016_s2 + $0x274] ss:$8 sps:$4 sm:$0xff]   ;;  %v20869_v42 = vld [vmem:[%s28016_s2 + $0x270] ss:$8 sps:$4 sm:$0xff]  }
 0x464   :  { %6398 = vmatmul.mubr.f32.vlgmr.msra.gmra.mrb[58].mxu0 %v24230_v40  ;;  %6941 = vmatmul.mubr.f32.vlgmr.msra.gmra.mrb[58].mxu1 %v24230_v40 }
 0x465   :  { %19510 = vmatpush1.bf16.msra.mxu0 %v24129_v24  ;;  %19558 = vmatpush1.bf16.msra.mxu1 %v24133_v41  ;;  %v20874_v24 = vld [vmem:[%s28016_s2 + $0x284] ss:$8 sps:$4 sm:$0xff]   ;;  %v20872_v41 = vld [vmem:[%s28016_s2 + $0x280] ss:$8 sps:$4 sm:$0xff]  }
 0x466   :  { %19512 = vmatprep.subr.bf16.mxu0 %v24137_v7  ;;  %19560 = vmatprep.subr.bf16.mxu1 %v24141_v14  ;;  %v20877_v7 = vld [vmem:[%s28016_s2 + $0x294] ss:$8 sps:$4 sm:$0xff]   ;;  %v20875_v14 = vld [vmem:[%s28016_s2 + $0x290] ss:$8 sps:$4 sm:$0xff]  }
 0x467   :  { %6484 = vmatprep.mubr.f32.mxu0 %v29026_v33  ;;  %7027 = vmatprep.mubr.f32.mxu1 %v29026_v33 }
 0x469   :  { %19514 = vmatpush1.bf16.msra.mxu0 %v24143_v10  ;;  %19562 = vmatpush1.bf16.msra.mxu1 %v24145_v44  ;;  %v20880_v10 = vld [vmem:[%s28016_s2 + $0x2a4] ss:$8 sps:$4 sm:$0xff]   ;;  %v20878_v44 = vld [vmem:[%s28016_s2 + $0x2a0] ss:$8 sps:$4 sm:$0xff]  }
 0x46a   :  { %19516 = vmatprep.subr.bf16.mxu0 %v23941_v49  ;;  %19564 = vmatprep.subr.bf16.mxu1 %v23961_v53 }
 0x46c   :  { %6487 = vmatmul.mubr.f32.vlgmr.msra.gmra.mrb[58].mxu0 %v6282_v47  ;;  %7030 = vmatmul.mubr.f32.vlgmr.msra.gmra.mrb[58].mxu1 %v6282_v47 }
 0x46d   :  { %19518 = vmatpush1.bf16.msra.mxu0 %v23967_v36  ;;  %19566 = vmatpush1.bf16.msra.mxu1 %v23987_v2 }
 0x46e   :  { %19520 = vmatprep.subr.bf16.mxu0 %v23999_v56  ;;  %19568 = vmatprep.subr.bf16.mxu1 %v24006_v23 }
 0x46f   :  { %6565 = vmatprep.mubr.f32.mxu0 %v29026_v33  ;;  %7108 = vmatprep.mubr.f32.mxu1 %v29026_v33 }
 0x471   :  { %19522 = vmatpush1.bf16.msra.mxu0 %v24012_v12  ;;  %19570 = vmatpush1.bf16.msra.mxu1 %v24023_v48 }
 0x472   :  { %19524 = vmatprep.subr.bf16.mxu0 %v24155_v28  ;;  %19572 = vmatprep.subr.bf16.mxu1 %v24161_v29  ;;  %v20886_v28 = vld [vmem:[%s28016_s2 + $0x2c4] ss:$8 sps:$4 sm:$0xff]   ;;  %v20884_v29 = vld [vmem:[%s28016_s2 + $0x2c0] ss:$8 sps:$4 sm:$0xff]  }
 0x474   :  { %6569 = vmatmul.mubr.f32.vlgmr.msra.gmra.mrb[58].mxu0 %v6283_v17  ;;  %7112 = vmatmul.mubr.f32.vlgmr.msra.gmra.mrb[58].mxu1 %v6283_v17  ;;  %v29037_v17 = vld [vmem:[#allocation109_spill] sm:$0xff] }
 0x475   :  { %19526 = vmatpush1.bf16.msra.mxu0 %v24163_v20  ;;  %19574 = vmatpush1.bf16.msra.mxu1 %v24165_v21  ;;  %v20889_v20 = vld [vmem:[%s28016_s2 + $0x2d4] ss:$8 sps:$4 sm:$0xff]   ;;  %v20887_v21 = vld [vmem:[%s28016_s2 + $0x2d0] ss:$8 sps:$4 sm:$0xff]  }
 0x476   :  { %19528 = vmatprep.subr.bf16.mxu0 %v24167_v60  ;;  %19576 = vmatprep.subr.bf16.mxu1 %v24169_v27  ;;  %v20890_v60 = vld [vmem:[%s28016_s2 + $0x2e0] ss:$8 sps:$4 sm:$0xff]   ;;  %v20892_v27 = vld [vmem:[%s28016_s2 + $0x2e4] ss:$8 sps:$4 sm:$0xff]  }
 0x477   :  { %6663 = vmatprep.mubr.f32.mxu0 %v29026_v33  ;;  %7206 = vmatprep.mubr.f32.mxu1 %v29026_v33 }
 0x479   :  { %19530 = vmatpush1.bf16.msra.mxu0 %v24171_v8  ;;  %19578 = vmatpush1.bf16.msra.mxu1 %v24173_v19  ;;  %v20895_v8 = vld [vmem:[%s28016_s2 + $0x2f4] ss:$8 sps:$4 sm:$0xff]   ;;  %v20893_v19 = vld [vmem:[%s28016_s2 + $0x2f0] ss:$8 sps:$4 sm:$0xff]  }
 0x47a   :  { %19532 = vmatprep.subr.bf16.mxu0 %v23941_v49  ;;  %19580 = vmatprep.subr.bf16.mxu1 %v23961_v53  ;;  %v20848_v49 = vld [vmem:[%s28016_s2 + $0x200] ss:$8 sps:$4 sm:$0xff]   ;;  %v20853_v53 = vld [vmem:[%s28016_s2 + $0x214] ss:$8 sps:$4 sm:$0xff]  }
 0x47c   :  { %6665 = vmatmul.mubr.f32.vlgmr.msra.gmra.mrb[58].mxu0 %v24230_v40  ;;  %7208 = vmatmul.mubr.f32.vlgmr.msra.gmra.mrb[58].mxu1 %v24230_v40 }
 0x47d   :  { %19534 = vmatpush1.bf16.msra.mxu0 %v23967_v36  ;;  %19582 = vmatpush1.bf16.msra.mxu1 %v23987_v2  ;;  %v20851_v36 = vld [vmem:[%s28016_s2 + $0x210] ss:$8 sps:$4 sm:$0xff]   ;;  %v20854_v2 = vld [vmem:[%s28016_s2 + $0x220] ss:$8 sps:$4 sm:$0xff]  }
 0x47e   :  { %19536 = vmatprep.subr.bf16.mxu0 %v23999_v56  ;;  %19584 = vmatprep.subr.bf16.mxu1 %v24006_v23  ;;  %v20856_v56 = vld [vmem:[%s28016_s2 + $0x224] ss:$8 sps:$4 sm:$0xff]   ;;  %v20859_v23 = vld [vmem:[%s28016_s2 + $0x234] ss:$8 sps:$4 sm:$0xff]  }
 0x47f   :  { %6743 = vmatprep.mubr.f32.mxu0 %v29026_v33  ;;  %7286 = vmatprep.mubr.f32.mxu1 %v29026_v33  ;;  %v29088_v33 = vld [vmem:[#allocation114_spill] sm:$0xff] }
 0x481   :  { %19538 = vmatpush1.bf16.msra.mxu0 %v24012_v12  ;;  %19586 = vmatpush1.bf16.msra.mxu1 %v24023_v48  ;;  %v20857_v12 = vld [vmem:[%s28016_s2 + $0x230] ss:$8 sps:$4 sm:$0xff]   ;;  %v20862_v48 = vld [vmem:[%s28016_s2 + $0x244] ss:$8 sps:$4 sm:$0xff]  }
 0x482   :  { %8063 = vmatprep.subr.bf16.mxu0 %v20850_v15 }
 0x484   :  { %6745 = vmatmul.mubr.f32.vlgmr.msra.gmra.mrb[58].mxu0 %v24230_v40  ;;  %7288 = vmatmul.mubr.f32.vlgmr.msra.gmra.mrb[58].mxu1 %v24230_v40  ;;  %v29036_v40 = vld [vmem:[#allocation101_spill] sm:$0xff] }
 0x485   :  { %8064 = vmatpush1.bf16.msra.mxu0 %v20848_v49  ;;  %v29039_v49 = vld [vmem:[#allocation107_spill] sm:$0xff] }
 0x486   :  { %8065 = vmatprep.subr.bf16.mxu0 %v20853_v53 }
 0x489   :  { %8066 = vmatpush1.bf16.msra.mxu0 %v20851_v36  ;;  %v29040_v36 = vld [vmem:[#allocation115_spill] sm:$0xff] }
 0x48a   :  { %8067 = vmatprep.subr.bf16.mxu0 %v20856_v56  ;;  %v29041_v56 = vld [vmem:[#allocation125_spill] sm:$0xff] }
 0x48d   :  { %8068 = vmatpush1.bf16.msra.mxu0 %v20854_v2 }
 0x48e   :  { %8069 = vmatprep.subr.bf16.mxu0 %v20859_v23 }
 0x491   :  { %8070 = vmatpush1.bf16.msra.mxu0 %v20857_v12  ;;  %v29042_v12 = vld [vmem:[#allocation133_spill] sm:$0xff] }
 0x492   :  { %8071 = vmatprep.subr.bf16.mxu0 %v20862_v48 }
 0x495   :  { %8072 = vmatpush1.bf16.msra.mxu0 %v20860_v38  ;;  %v29043_v38 = vld [vmem:[#allocation123_spill] sm:$0xff] }
 0x496   :  { %8073 = vmatprep.subr.bf16.mxu0 %v20865_v55 }
 0x499   :  { %8074 = vmatpush1.bf16.msra.mxu0 %v20863_v61  ;;  %v29044_v61 = vld [vmem:[#allocation131_spill] sm:$0xff] }
 0x49a   :  { %8075 = vmatprep.subr.bf16.mxu0 %v20868_v30 }
 0x49d   :  { %8076 = vmatpush1.bf16.msra.mxu0 %v20866_v35  ;;  %v29045_v35 = vld [vmem:[#allocation78_spill] sm:$0xff] }
 0x49e   :  { %8077 = vmatprep.subr.bf16.mxu0 %v20871_v6 }
 0x4a1   :  { %8078 = vmatpush1.bf16.msra.mxu0 %v20869_v42  ;;  %v29046_v42 = vld [vmem:[#allocation86_spill] sm:$0xff] }
 0x4a2   :  { %8079 = vmatprep.subr.bf16.mxu0 %v20874_v24 }
 0x4a5   :  { %8080 = vmatpush1.bf16.msra.mxu0 %v20872_v41  ;;  %v29047_v41 = vld [vmem:[#allocation76_spill] sm:$0xff] }
 0x4a6   :  { %8081 = vmatprep.subr.bf16.mxu0 %v20877_v7 }
 0x4a9   :  { %8082 = vmatpush1.bf16.msra.mxu0 %v20875_v14  ;;  %v29048_v14 = vld [vmem:[#allocation84_spill] sm:$0xff] }
 0x4aa   :  { %8083 = vmatprep.subr.bf16.mxu0 %v20880_v10 }
 0x4ad   :  { %8084 = vmatpush1.bf16.msra.mxu0 %v20878_v44  ;;  %v29049_v44 = vld [vmem:[#allocation94_spill] sm:$0xff] }
 0x4ae   :  { %8085 = vmatprep.subr.bf16.mxu0 %v20883_v16 }
 0x4b1   :  { %8086 = vmatpush1.bf16.msra.mxu0 %v20881_v4  ;;  %v29050_v4 = vld [vmem:[#allocation102_spill] sm:$0xff] }
 0x4b2   :  { %8087 = vmatprep.subr.bf16.mxu0 %v20886_v28 }
 0x4b5   :  { %8088 = vmatpush1.bf16.msra.mxu0 %v20884_v29  ;;  %v29051_v29 = vld [vmem:[#allocation92_spill] sm:$0xff] }
 0x4b6   :  { %8089 = vmatprep.subr.bf16.mxu0 %v20889_v20 }
 0x4b9   :  { %8090 = vmatpush1.bf16.msra.mxu0 %v20887_v21  ;;  %v29052_v21 = vld [vmem:[#allocation100_spill] sm:$0xff] }
 0x4ba   :  { %8091 = vmatprep.subr.bf16.mxu0 %v20892_v27  ;;  %v29053_v27 = vld [vmem:[#allocation110_spill] sm:$0xff] }
 0x4bd   :  { %8092 = vmatpush1.bf16.msra.mxu0 %v20890_v60 }
 0x4be   :  { %8093 = vmatprep.subr.bf16.mxu0 %v20895_v8 }
 0x4c1   :  { %8094 = vmatpush1.bf16.msra.mxu0 %v20893_v19  ;;  %v29054_v19 = vld [vmem:[#allocation118_spill] sm:$0xff] }
 0x4c2   :  { %8136 = vmatprep.subr.bf16.mxu0 %v20898_v31 }
 0x527   :  { %v5657_v9 = vpop.f32.mrb[56].mxu0  ;;  %v6200_v58 = vpop.f32.mrb[56].mxu1 }
 0x528   :  { %v24413_v52 = vrot.slane %v5657_v9, %v24410_v50  ;;  %v5659_v46 = vpop.f32.mrb[57].mxu0  ;;  %v6202_v63 = vpop.f32.mrb[57].mxu1  ;;  %v24416_v57 = vrot.slane %v6200_v58, %v24410_v50  ;;  %v29056_v9 = vld [vmem:[#allocation116_spill] sm:$0xff] }
 0x529   :  { %v7301_v51 = vrot.slane %v5659_v46, %v24410_v50  ;;  %v24420_v11 = vrot.slane %v6202_v63, %v24410_v50  ;;  %v29057_v46 = vld [vmem:[#allocation126_spill] sm:$0xff] }
 0x52a   :  { %v24424_v0 = vmul.f32 %v24413_v52, %v29029_v54  ;;  %v24428_v43 = vmul.f32 %v24413_v52, %v29030_v34  ;;  %v24432_v62 = vmul.f32 %v24413_v52, %v29031_v39  ;;  %v24436_v1 = vmul.f32 %v24413_v52, %v29032_v22  ;;  %v29058_v54 = vld [vmem:[#allocation134_spill] sm:$0xff]  ;;  %v29059_v39 = vld [vmem:[#allocation124_spill] sm:$0xff] }
 0x52b   :  { %v24439_v45 = vmul.f32 %v7301_v51, %v29033_v3  ;;  %v24442_v37 = vmul.f32 %v7301_v51, %v29034_v59  ;;  %v24445_v5 = vmul.f32 %v7301_v51, %v29035_v13  ;;  %v24448_v47 = vmul.f32 %v7301_v51, %v29036_v40  ;;  %v29060_v3 = vld [vmem:[#allocation132_spill] sm:$0xff]  ;;  %v29061_v13 = vld [vmem:[#allocation81_spill] sm:$0xff] }
 0x52c   :  { %v24451_v18 = vmul.f32 %v7301_v51, %v29037_v17  ;;  %v24454_v15 = vmul.f32 %v7301_v51, %v29038_v32  ;;  %v24458_v53 = vmul.f32 %v24413_v52, %v29039_v49  ;;  %v24462_v2 = vmul.f32 %v24413_v52, %v29040_v36  ;;  %v29062_v17 = vld [vmem:[#allocation79_spill] sm:$0xff]  ;;  %v29063_v49 = vld [vmem:[#allocation89_spill] sm:$0xff] }
 0x52d   :  { %v24465_v23 = vmul.f32 %v7301_v51, %v29041_v56  ;;  %v24468_v48 = vmul.f32 %v7301_v51, %v29042_v12  ;;  %v24472_v55 = vmul.f32 %v24413_v52, %v29043_v38  ;;  %v24476_v30 = vmul.f32 %v24413_v52, %v29044_v61  ;;  %v29064_v56 = vld [vmem:[#allocation97_spill] sm:$0xff]  ;;  %v29065_v38 = vld [vmem:[#allocation87_spill] sm:$0xff] }
 0x52e   :  { %v24480_v6 = vmul.f32 %v24420_v11, %v29045_v35  ;;  %v24484_v24 = vmul.f32 %v24420_v11, %v29046_v42  ;;  %v24488_v7 = vmul.f32 %v24416_v57, %v29047_v41  ;;  %v24492_v10 = vmul.f32 %v24416_v57, %v29048_v14  ;;  %v29066_v35 = vld [vmem:[#allocation95_spill] sm:$0xff]  ;;  %v29067_v41 = vld [vmem:[#allocation105_spill] sm:$0xff] }
 0x52f   :  { %v24496_v16 = vmul.f32 %v24420_v11, %v29049_v44  ;;  %v24500_v28 = vmul.f32 %v24420_v11, %v29050_v4  ;;  %v24504_v20 = vmul.f32 %v24416_v57, %v29051_v29  ;;  %v24508_v60 = vmul.f32 %v24416_v57, %v29052_v21  ;;  %v29068_v44 = vld [vmem:[#allocation113_spill] sm:$0xff]  ;;  %v29069_v29 = vld [vmem:[#allocation103_spill] sm:$0xff] }
 0x530   :  { %v24512_v8 = vmul.f32 %v24420_v11, %v29053_v27  ;;  %v24516_v31 = vmul.f32 %v24420_v11, %v29054_v19  ;;  %v24520_v26 = vmul.f32 %v24416_v57, %v29055_v25  ;;  %v24524_v58 = vmul.f32 %v24416_v57, %v29056_v9  ;;  %v29070_v27 = vld [vmem:[#allocation111_spill] sm:$0xff]  ;;  %v29071_v25 = vld [vmem:[#allocation121_spill] sm:$0xff] }
 0x531   :  { %v24528_v63 = vmul.f32 %v24420_v11, %v29057_v46  ;;  %v24532_v34 = vmul.f32 %v24420_v11, %v29058_v54  ;;  %v24536_v22 = vmul.f32 %v24416_v57, %v29059_v39  ;;  %v24540_v59 = vmul.f32 %v24416_v57, %v29060_v3  ;;  %v29072_v46 = vld [vmem:[#allocation129_spill] sm:$0xff]  ;;  %v29073_v39 = vld [vmem:[#allocation119_spill] sm:$0xff] }
 0x532   :  { %v24543_v40 = vmul.f32 %v7301_v51, %v29061_v13  ;;  %v24547_v32 = vmul.f32 %v24413_v52, %v29062_v17  ;;  %v24550_v36 = vmul.f32 %v7301_v51, %v29063_v49  ;;  %v24553_v12 = vmul.f32 %v7301_v51, %v29064_v56  ;;  %v29074_v13 = vld [vmem:[#allocation127_spill] sm:$0xff]  ;;  %v29075_v49 = vld [vmem:[#allocation82_spill] sm:$0xff] }
 0x533   :  { %v24557_v61 = vmul.f32 %v24413_v52, %v29065_v38  ;;  %v24561_v42 = vmul.f32 %v24413_v52, %v29066_v35  ;;  %v24564_v14 = vmul.f32 %v7301_v51, %v29067_v41  ;;  %v24567_v4 = vmul.f32 %v7301_v51, %v29068_v44  ;;  %v29076_v38 = vld [vmem:[#allocation80_spill] sm:$0xff]  ;;  %v29078_v41 = vld [vmem:[#allocation90_spill] sm:$0xff] }
 0x534   :  { %v24571_v21 = vmul.f32 %v24413_v52, %v29069_v29  ;;  %v24575_v19 = vmul.f32 %v24413_v52, %v29070_v27  ;;  %v24578_v9 = vmul.f32 %v7301_v51, %v29071_v25  ;;  %v24581_v54 = vmul.f32 %v7301_v51, %v29072_v46  ;;  %v29080_v29 = vld [vmem:[#allocation98_spill] sm:$0xff]  ;;  %v29082_v25 = vld [vmem:[#allocation88_spill] sm:$0xff] }
 0x535   :  { %v24585_v3 = vmul.f32 %v24413_v52, %v29073_v39  ;;  %v24589_v17 = vmul.f32 %v24413_v52, %v29074_v13  ;;  %v24593_v56 = vmul.f32 %v24420_v11, %v29075_v49  ;;  %v24597_v35 = vmul.f32 %v24416_v57, %v29076_v38  ;;  %v29084_v39 = vld [vmem:[#allocation96_spill] sm:$0xff]  ;;  %v29086_v49 = vld [vmem:[#allocation106_spill] sm:$0xff] }
 0x536   :  { %v24601_v44 = vmul.f32 %v24420_v11, %v29078_v41  ;;  %v24605_v27 = vmul.f32 %v24420_v11, %v29080_v29  ;;  %v24609_v46 = vmul.f32 %v24416_v57, %v29082_v25  ;;  %v24613_v13 = vmul.f32 %v24416_v57, %v29084_v39 }
 0x537   :  { %29077 = vst [vmem:[#allocation151_spill] sm:$0xff] %v24597_v35  ;;  %v24617_v38 = vmul.f32 %v24420_v11, %v29086_v49  ;;  %v24621_v41 = vmul.f32 %v24420_v11, %v29088_v33 }
 0x538   :  { %29079 = vst [vmem:[#allocation164_spill] sm:$0xff] %v24601_v44  ;;  %29081 = vst [vmem:[#allocation158_spill] sm:$0xff] %v24605_v27  ;;  %v29090_v44 = vld [vmem:[#allocation104_spill] sm:$0xff] }
 0x539   :  { %29083 = vst [vmem:[#allocation161_spill] sm:$0xff] %v24609_v46  ;;  %29085 = vst [vmem:[#allocation170_spill] sm:$0xff] %v24613_v13  ;;  %v24625_v29 = vmul.f32 %v24416_v57, %v29090_v44  ;;  %v29092_v27 = vld [vmem:[#allocation112_spill] sm:$0xff]  ;;  %v29094_v46 = vld [vmem:[#allocation122_spill] sm:$0xff] }
 0x53a   :  { %29087 = vst [vmem:[#allocation168_spill] sm:$0xff] %v24617_v38  ;;  %29089 = vst [vmem:[#allocation169_spill] sm:$0xff] %v24621_v41  ;;  %v24629_v25 = vmul.f32 %v24416_v57, %v29092_v27  ;;  %v24633_v39 = vmul.f32 %v24420_v11, %v29094_v46  ;;  %v29096_v13 = vld [vmem:[#allocation130_spill] sm:$0xff]  ;;  %v29098_v38 = vld [vmem:[#allocation120_spill] sm:$0xff] }
 0x53b   :  { %29091 = vst [vmem:[#allocation171_spill] sm:$0xff] %v24625_v29  ;;  %v24637_v49 = vmul.f32 %v24420_v11, %v29096_v13  ;;  %v24641_v33 = vmul.f32 %v24416_v57, %v29098_v38  ;;  %v29100_v41 = vld [vmem:[#allocation128_spill] sm:$0xff]  ;;  %v29102_v29 = vld [vmem:[#allocation137_spill] sm:$0xff]  ;;  %v29103_v27 = vld [vmem:[#allocation135_spill] sm:$0xff] }
 0x53c   :  { %29093 = vst [vmem:[#allocation172_spill] sm:$0xff] %v24629_v25  ;;  %29095 = vst [vmem:[#allocation173_spill] sm:$0xff] %v24633_v39  ;;  %v24645_v44 = vmul.f32 %v24416_v57, %v29100_v41  ;;  %v24648_v35 = vmul.f32 %v7301_v51, %v29102_v29  ;;  %v24652_v25 = vmul.f32 %v24413_v52, %v29103_v27  ;;  %v29105_v46 = vld [vmem:[#allocation138_spill] sm:$0xff]  ;;  %v29107_v13 = vld [vmem:[#allocation136_spill] sm:$0xff] }
 0x53d   :  { %29097 = vst [vmem:[#allocation174_spill] sm:$0xff] %v24637_v49  ;;  %29099 = vst [vmem:[#allocation175_spill] sm:$0xff] %v24641_v33  ;;  %v24656_v39 = vmul.f32 %v24420_v11, %v29105_v46  ;;  %v24660_v49 = vmul.f32 %v24416_v57, %v29107_v13 }
 0x53e   :  { %29101 = vst [vmem:[#allocation176_spill] sm:$0xff] %v24645_v44  ;;  %29104 = vst [vmem:[#allocation16_spill] sm:$0xff] %v24652_v25 }
 0x53f   :  { %29106 = vst [vmem:[#allocation191_spill] sm:$0xff] %v24656_v39  ;;  %29108 = vst [vmem:[#allocation19_spill] sm:$0xff] %v24660_v49 }
 0x557   :  { %v6746_v38 = vpop.f32.mrb[58].mxu0  ;;  %v7289_v33 = vpop.f32.mrb[58].mxu1 }
 0x558   :  { %v24663_v41 = vrot.slane %v6746_v38, %v24410_v50  ;;  %v6748_v44 = vpop.f32.mrb[59].mxu0  ;;  %v7291_v51 = vpop.f32.mrb[59].mxu1  ;;  %v24666_v29 = vrot.slane %v7289_v33, %v24410_v50 }
 0x559   :  { %v24669_v52 = vrot.slane %v6748_v44, %v24410_v50  ;;  %v24672_v11 = vrot.slane %v7291_v51, %v24410_v50 }
 0x55a   :  { %v7390_v57 = vadd.f32 %v24663_v41, %v24424_v0  ;;  %v7398_v27 = vadd.f32 %v24663_v41, %v24428_v43  ;;  %v7406_v46 = vadd.f32 %v24663_v41, %v24432_v62  ;;  %v7414_v13 = vadd.f32 %v24663_v41, %v24436_v1 }
 0x55b   :  { %v7391_v33 = vadd.f32 %v24669_v52, %v24439_v45  ;;  %v7399_v44 = vadd.f32 %v24669_v52, %v24442_v37  ;;  %v7407_v38 = vadd.f32 %v24669_v52, %v24445_v5  ;;  %v7415_v0 = vadd.f32 %v24669_v52, %v24448_v47 }
 0x55c   :  { %v7454_v51 = vmax.f32 %v7390_v57, 0.0  ;;  %v7462_v43 = vmax.f32 %v7398_v27, 0.0  ;;  %v7470_v50 = vmax.f32 %v7406_v46, 0.0  ;;  %v7478_v49 = vmax.f32 %v7414_v13, 0.0 }
 0x55d   :  { %v7455_v62 = vmax.f32 %v7391_v33, 0.0  ;;  %v7463_v39 = vmax.f32 %v7399_v44, 0.0  ;;  %v7471_v25 = vmax.f32 %v7407_v38, 0.0  ;;  %v7479_v1 = vmax.f32 %v7415_v0, 0.0 }
 0x55e   :  { %7518 = vst [vmem:[%s28024_s10] sm:$0xff] %v7454_v51  ;;  %7526 = vst [vmem:[%s28024_s10 + $0x40] sm:$0xff] %v7462_v43  ;;  %v7662_v45 = vpack.c.bf16 %v7462_v43, %v7454_v51  ;;  %v24702_v37 = vpack.c.bf16 %v7478_v49, %v7470_v50  ;;  %v7423_v5 = vadd.f32 %v24669_v52, %v24451_v18 }
 0x55f   :  { %7534 = vst [vmem:[%s28024_s10 + $0x80] sm:$0xff] %v7470_v50  ;;  %7542 = vst [vmem:[%s28024_s10 + $0xc0] sm:$0xff] %v7478_v49  ;;  %v7431_v47 = vadd.f32 %v24669_v52, %v24454_v15  ;;  %v7663_v57 = vpack.c.bf16 %v7463_v39, %v7455_v62  ;;  %v20896_v50 = vld [vmem:[%s28016_s2 + $0x300] ss:$8 sps:$4 sm:$0xff]   ;;  %v7667_v18 = vpack.c.bf16 %v7479_v1, %v7471_v25 }
 0x560   :  { %7519 = vst [vmem:[%s28024_s10 + $0x8] sm:$0xff] %v7455_v62  ;;  %7527 = vst [vmem:[%s28024_s10 + $0x48] sm:$0xff] %v7463_v39  ;;  %v7422_v15 = vadd.f32 %v24663_v41, %v24458_v53  ;;  %v7430_v49 = vadd.f32 %v24663_v41, %v24462_v2  ;;  %v20901_v39 = vld [vmem:[%s28016_s2 + $0x314] ss:$8 sps:$4 sm:$0xff]   ;;  %v7487_v27 = vmax.f32 %v7423_v5, 0.0  ;;  %v7439_v13 = vadd.f32 %v24669_v52, %v24465_v23 }
 0x561   :  { %7535 = vst [vmem:[%s28024_s10 + $0x88] sm:$0xff] %v7471_v25  ;;  %7543 = vst [vmem:[%s28024_s10 + $0xc8] sm:$0xff] %v7479_v1  ;;  %v7495_v46 = vmax.f32 %v7431_v47, 0.0  ;;  %v7447_v33 = vadd.f32 %v24669_v52, %v24468_v48  ;;  %8095 = vmatprep.mubr.bf16.mxu0 %v7663_v57  ;;  %v7438_v53 = vadd.f32 %v24663_v41, %v24472_v55  ;;  %v20899_v55 = vld [vmem:[%s28016_s2 + $0x310] ss:$8 sps:$4 sm:$0xff]  }
 0x562   :  { %v7486_v25 = vmax.f32 %v7422_v15, 0.0  ;;  %v7494_v44 = vmax.f32 %v7430_v49, 0.0  ;;  %v7446_v2 = vadd.f32 %v24663_v41, %v24476_v30  ;;  %8096 = vmatmul.mubr.bf16.vlgmr.msra.gmra.mrb[60].mxu0 %v7662_v45  ;;  %7551 = vst [vmem:[%s28024_s10 + $0x108] sm:$0xff] %v7487_v27  ;;  %v7503_v48 = vmax.f32 %v7439_v13, 0.0  ;;  %v20904_v62 = vld [vmem:[%s28016_s2 + $0x324] ss:$8 sps:$4 sm:$0xff]  }
 0x563   :  { %7559 = vst [vmem:[%s28024_s10 + $0x148] sm:$0xff] %v7495_v46  ;;  %v7671_v23 = vpack.c.bf16 %v7495_v46, %v7487_v27  ;;  %v7511_v38 = vmax.f32 %v7447_v33, 0.0  ;;  %v7393_v0 = vadd.f32 %v24672_v11, %v24480_v6  ;;  %8137 = vmatpush1.bf16.msra.mxu0 %v20896_v50  ;;  %8105 = vmatprep.mubr.bf16.mxu0 %v7667_v18  ;;  %v7502_v51 = vmax.f32 %v7438_v53, 0.0 }
 0x564   :  { %7550 = vst [vmem:[%s28024_s10 + $0x100] sm:$0xff] %v7486_v25  ;;  %7558 = vst [vmem:[%s28024_s10 + $0x140] sm:$0xff] %v7494_v44  ;;  %v24755_v30 = vpack.c.bf16 %v7494_v44, %v7486_v25  ;;  %v7510_v43 = vmax.f32 %v7446_v2, 0.0  ;;  %v7401_v6 = vadd.f32 %v24672_v11, %v24484_v24  ;;  %8138 = vmatprep.subr.bf16.mxu0 %v20901_v39 }
 0x565   :  { %7567 = vst [vmem:[%s28024_s10 + $0x188] sm:$0xff] %v7503_v48  ;;  %7575 = vst [vmem:[%s28024_s10 + $0x1c8] sm:$0xff] %v7511_v38  ;;  %v24768_v1 = vpack.c.bf16 %v7511_v38, %v7503_v48  ;;  %v7457_v45 = vmax.f32 %v7393_v0, 0.0  ;;  %v7392_v5 = vadd.f32 %v24666_v29, %v24488_v7  ;;  %v7400_v24 = vadd.f32 %v24666_v29, %v24492_v10 }
 0x566   :  { %7566 = vst [vmem:[%s28024_s10 + $0x180] sm:$0xff] %v7502_v51  ;;  %7574 = vst [vmem:[%s28024_s10 + $0x1c0] sm:$0xff] %v7510_v43  ;;  %v24780_v47 = vpack.c.bf16 %v7510_v43, %v7502_v51  ;;  %v7465_v57 = vmax.f32 %v7401_v6, 0.0  ;;  %v7409_v50 = vadd.f32 %v24672_v11, %v24496_v16  ;;  %v7417_v7 = vadd.f32 %v24672_v11, %v24500_v28  ;;  %v20902_v16 = vld [vmem:[%s28016_s2 + $0x320] ss:$8 sps:$4 sm:$0xff]  }
 0x567   :  { %7521 = vst [vmem:[%s28024_s10 + $0x18] sm:$0xff] %v7457_v45  ;;  %v7456_v10 = vmax.f32 %v7392_v5, 0.0  ;;  %v7464_v18 = vmax.f32 %v7400_v24, 0.0  ;;  %v7408_v15 = vadd.f32 %v24666_v29, %v24504_v20  ;;  %v7416_v49 = vadd.f32 %v24666_v29, %v24508_v60  ;;  %8139 = vmatpush1.bf16.msra.mxu0 %v20899_v55  ;;  %v20907_v20 = vld [vmem:[%s28016_s2 + $0x334] ss:$8 sps:$4 sm:$0xff]  }
 0x568   :  { %7529 = vst [vmem:[%s28024_s10 + $0x58] sm:$0xff] %v7465_v57  ;;  %v24799_v28 = vpack.c.bf16 %v7465_v57, %v7457_v45  ;;  %v7473_v39 = vmax.f32 %v7409_v50, 0.0  ;;  %v7481_v27 = vmax.f32 %v7417_v7, 0.0  ;;  %v7425_v46 = vadd.f32 %v24672_v11, %v24512_v8  ;;  %8140 = vmatprep.subr.bf16.mxu0 %v20904_v62 }
 0x569   :  { %7520 = vst [vmem:[%s28024_s10 + $0x10] sm:$0xff] %v7456_v10  ;;  %7528 = vst [vmem:[%s28024_s10 + $0x50] sm:$0xff] %v7464_v18  ;;  %v24812_v60 = vpack.c.bf16 %v7464_v18, %v7456_v10  ;;  %v7472_v13 = vmax.f32 %v7408_v15, 0.0  ;;  %v7480_v33 = vmax.f32 %v7416_v49, 0.0  ;;  %v7433_v8 = vadd.f32 %v24672_v11, %v24516_v31  ;;  %v20913_v10 = vld [vmem:[%s28016_s2 + $0x354] ss:$8 sps:$4 sm:$0xff]  }
 0x56a   :  { %7537 = vst [vmem:[%s28024_s10 + $0x98] sm:$0xff] %v7473_v39  ;;  %7545 = vst [vmem:[%s28024_s10 + $0xd8] sm:$0xff] %v7481_v27  ;;  %v24822_v25 = vpack.c.bf16 %v7481_v27, %v7473_v39  ;;  %v7489_v44 = vmax.f32 %v7425_v46, 0.0  ;;  %v7424_v53 = vadd.f32 %v24666_v29, %v24520_v26  ;;  %v7432_v2 = vadd.f32 %v24666_v29, %v24524_v58  ;;  %v20905_v58 = vld [vmem:[%s28016_s2 + $0x330] ss:$8 sps:$4 sm:$0xff]  }
 0x56b   :  { %8106 = vmatmul.mubr.bf16.gmra.mrb[64].mxu0 %v24702_v37  ;;  %7536 = vst [vmem:[%s28024_s10 + $0x90] sm:$0xff] %v7472_v13  ;;  %7544 = vst [vmem:[%s28024_s10 + $0xd0] sm:$0xff] %v7480_v33  ;;  %v24835_v31 = vpack.c.bf16 %v7480_v33, %v7472_v13  ;;  %v7497_v48 = vmax.f32 %v7433_v8, 0.0  ;;  %v7441_v38 = vadd.f32 %v24672_v11, %v24528_v63  ;;  %v20911_v27 = vld [vmem:[%s28016_s2 + $0x350] ss:$8 sps:$4 sm:$0xff]  }
 0x56c   :  { %v7449_v26 = vadd.f32 %v24672_v11, %v24532_v34  ;;  %8141 = vmatpush1.bf16.msra.mxu0 %v20902_v16  ;;  %8115 = vmatprep.mubr.bf16.mxu0 %v7671_v23  ;;  %7553 = vst [vmem:[%s28024_s10 + $0x118] sm:$0xff] %v7489_v44  ;;  %v7488_v37 = vmax.f32 %v7424_v53, 0.0  ;;  %v7496_v0 = vmax.f32 %v7432_v2, 0.0  ;;  %v7440_v55 = vadd.f32 %v24666_v29, %v24536_v22  ;;  %v20910_v34 = vld [vmem:[%s28016_s2 + $0x344] ss:$8 sps:$4 sm:$0xff]  }
 0x56d   :  { %v7448_v63 = vadd.f32 %v24666_v29, %v24540_v59  ;;  %8142 = vmatprep.subr.bf16.mxu0 %v20907_v20  ;;  %7561 = vst [vmem:[%s28024_s10 + $0x158] sm:$0xff] %v7497_v48  ;;  %v24857_v23 = vpack.c.bf16 %v7497_v48, %v7489_v44  ;;  %v7505_v51 = vmax.f32 %v7441_v38, 0.0  ;;  %v7395_v6 = vadd.f32 %v24669_v52, %v24543_v40  ;;  %v20916_v20 = vld [vmem:[%s28016_s2 + $0x364] ss:$8 sps:$4 sm:$0xff]   ;;  %v29109_v38 = vld [vmem:[#allocation151_spill] sm:$0xff] }
 0x56e   :  { %v7513_v43 = vmax.f32 %v7449_v26, 0.0  ;;  %7552 = vst [vmem:[%s28024_s10 + $0x110] sm:$0xff] %v7488_v37  ;;  %7560 = vst [vmem:[%s28024_s10 + $0x150] sm:$0xff] %v7496_v0  ;;  %v24867_v22 = vpack.c.bf16 %v7496_v0, %v7488_v37  ;;  %v7504_v59 = vmax.f32 %v7440_v55, 0.0  ;;  %v7394_v45 = vadd.f32 %v24663_v41, %v24547_v32  ;;  %v20908_v32 = vld [vmem:[%s28016_s2 + $0x340] ss:$8 sps:$4 sm:$0xff]  }
 0x56f   :  { %v7512_v62 = vmax.f32 %v7448_v63, 0.0  ;;  %7569 = vst [vmem:[%s28024_s10 + $0x198] sm:$0xff] %v7505_v51  ;;  %v24879_v5 = vmax.f32 %v7395_v6, 0.0  ;;  %v7403_v24 = vadd.f32 %v24669_v52, %v24550_v36  ;;  %v7411_v57 = vadd.f32 %v24669_v52, %v24553_v12  ;;  %v20914_v26 = vld [vmem:[%s28016_s2 + $0x360] ss:$8 sps:$4 sm:$0xff]   ;;  %v29111_v63 = vld [vmem:[#allocation158_spill] sm:$0xff] }
 0x570   :  { %7577 = vst [vmem:[%s28024_s10 + $0x1d8] sm:$0xff] %v7513_v43  ;;  %v24877_v40 = vpack.c.bf16 %v7513_v43, %v7505_v51  ;;  %8143 = vmatpush1.bf16.msra.mxu0 %v20905_v58  ;;  %7568 = vst [vmem:[%s28024_s10 + $0x190] sm:$0xff] %v7504_v59  ;;  %v24896_v7 = vmax.f32 %v7394_v45, 0.0  ;;  %v7402_v36 = vadd.f32 %v24663_v41, %v24557_v61  ;;  %v29110_v0 = vld [vmem:[#allocation164_spill] sm:$0xff]  ;;  %v20919_v51 = vld [vmem:[%s28016_s2 + $0x374] ss:$8 sps:$4 sm:$0xff]  }
 0x571   :  { %7576 = vst [vmem:[%s28024_s10 + $0x1d0] sm:$0xff] %v7512_v62  ;;  %v24894_v50 = vpack.c.bf16 %v7512_v62, %v7504_v59  ;;  %v7410_v12 = vadd.f32 %v24663_v41, %v24561_v42  ;;  %8144 = vmatprep.subr.bf16.mxu0 %v20910_v34  ;;  %7523 = vst [vmem:[%s28024_s10 + $0x28] sm:$0xff] %v24879_v5  ;;  %v24909_v18 = vmax.f32 %v7403_v24, 0.0  ;;  %v24911_v15 = vmax.f32 %v7411_v57, 0.0  ;;  %v29112_v59 = vld [vmem:[#allocation161_spill] sm:$0xff]  ;;  %v29113_v45 = vld [vmem:[#allocation170_spill] sm:$0xff] }
 0x572   :  { %v7419_v61 = vadd.f32 %v24669_v52, %v24564_v14  ;;  %7522 = vst [vmem:[%s28024_s10 + $0x20] sm:$0xff] %v24896_v7  ;;  %v24919_v42 = vmax.f32 %v7402_v36, 0.0  ;;  %v7427_v16 = vadd.f32 %v24669_v52, %v24567_v4  ;;  %v7418_v4 = vadd.f32 %v24663_v41, %v24571_v21  ;;  %v29114_v36 = vld [vmem:[#allocation168_spill] sm:$0xff] }
 0x573   :  { %v24921_v49 = vmax.f32 %v7410_v12, 0.0  ;;  %8116 = vmatmul.mubr.bf16.gmra.mrb[68].mxu0 %v24755_v30  ;;  %7531 = vst [vmem:[%s28024_s10 + $0x68] sm:$0xff] %v24909_v18  ;;  %7539 = vst [vmem:[%s28024_s10 + $0xa8] sm:$0xff] %v24911_v15  ;;  %v7587_v14 = vpack.c.bf16 %v24911_v15, %v24909_v18  ;;  %v7426_v30 = vadd.f32 %v24663_v41, %v24575_v19 }
 0x574   :  { %v24936_v39 = vmax.f32 %v7419_v61, 0.0  ;;  %8145 = vmatpush1.bf16.msra.mxu0 %v20908_v32  ;;  %8125 = vmatprep.mubr.bf16.mxu0 %v24768_v1  ;;  %7530 = vst [vmem:[%s28024_s10 + $0x60] sm:$0xff] %v24919_v42  ;;  %v24956_v19 = vmax.f32 %v7427_v16, 0.0  ;;  %v7435_v1 = vadd.f32 %v24669_v52, %v24578_v9  ;;  %v7443_v46 = vadd.f32 %v24669_v52, %v24581_v54  ;;  %v29115_v16 = vld [vmem:[#allocation169_spill] sm:$0xff] }
 0x575   :  { %7538 = vst [vmem:[%s28024_s10 + $0xa0] sm:$0xff] %v24921_v49  ;;  %v7586_v21 = vpack.c.bf16 %v24921_v49, %v24919_v42  ;;  %8146 = vmatprep.subr.bf16.mxu0 %v20913_v10  ;;  %v24969_v13 = vmax.f32 %v7418_v4, 0.0  ;;  %v24971_v33 = vmax.f32 %v7426_v30, 0.0  ;;  %v7434_v9 = vadd.f32 %v24663_v41, %v24585_v3  ;;  %v20917_v30 = vld [vmem:[%s28016_s2 + $0x370] ss:$8 sps:$4 sm:$0xff]  }
 0x576   :  { %7547 = vst [vmem:[%s28024_s10 + $0xe8] sm:$0xff] %v24936_v39  ;;  %v7442_v54 = vadd.f32 %v24663_v41, %v24589_v17  ;;  %7555 = vst [vmem:[%s28024_s10 + $0x128] sm:$0xff] %v24956_v19  ;;  %v7591_v8 = vpack.c.bf16 %v24956_v19, %v24936_v39  ;;  %v24983_v44 = vmax.f32 %v7435_v1, 0.0  ;;  %v24985_v53 = vmax.f32 %v7443_v46, 0.0  ;;  %v29117_v46 = vld [vmem:[#allocation172_spill] sm:$0xff] }
 0x577   :  { %v7397_v2 = vadd.f32 %v24672_v11, %v24593_v56  ;;  %7546 = vst [vmem:[%s28024_s10 + $0xe0] sm:$0xff] %v24969_v13  ;;  %7554 = vst [vmem:[%s28024_s10 + $0x120] sm:$0xff] %v24971_v33  ;;  %v7590_v3 = vpack.c.bf16 %v24971_v33, %v24969_v13  ;;  %v24999_v17 = vmax.f32 %v7434_v9, 0.0  ;;  %v7396_v56 = vadd.f32 %v24666_v29, %v29109_v38  ;;  %v20922_v9 = vld [vmem:[%s28016_s2 + $0x384] ss:$8 sps:$4 sm:$0xff]  }
 0x578   :  { %v25001_v48 = vmax.f32 %v7442_v54, 0.0  ;;  %8147 = vmatpush1.bf16.msra.mxu0 %v20911_v27  ;;  %7563 = vst [vmem:[%s28024_s10 + $0x168] sm:$0xff] %v24983_v44  ;;  %7571 = vst [vmem:[%s28024_s10 + $0x1a8] sm:$0xff] %v24985_v53  ;;  %v7595_v58 = vpack.c.bf16 %v24985_v53, %v24983_v44  ;;  %v7405_v55 = vadd.f32 %v24672_v11, %v29110_v0  ;;  %v29118_v38 = vld [vmem:[#allocation173_spill] sm:$0xff] }
 0x579   :  { %v25018_v37 = vmax.f32 %v7397_v2, 0.0  ;;  %v7413_v34 = vadd.f32 %v24672_v11, %v29111_v63  ;;  %8148 = vmatprep.subr.bf16.mxu0 %v20916_v20  ;;  %7562 = vst [vmem:[%s28024_s10 + $0x160] sm:$0xff] %v24999_v17  ;;  %v25037_v6 = vmax.f32 %v7396_v56, 0.0  ;;  %v7404_v62 = vadd.f32 %v24666_v29, %v29112_v59  ;;  %v29121_v59 = vld [vmem:[#allocation176_spill] sm:$0xff] }
 0x57a   :  { %7570 = vst [vmem:[%s28024_s10 + $0x1a0] sm:$0xff] %v25001_v48  ;;  %v7594_v43 = vpack.c.bf16 %v25001_v48, %v24999_v17  ;;  %v7412_v24 = vadd.f32 %v24666_v29, %v29113_v45  ;;  %v25047_v57 = vmax.f32 %v7405_v55, 0.0  ;;  %v7421_v12 = vadd.f32 %v24672_v11, %v29114_v36 }
 0x57b   :  { %7525 = vst [vmem:[%s28024_s10 + $0x38] sm:$0xff] %v25018_v37  ;;  %v25049_v32 = vmax.f32 %v7413_v34, 0.0  ;;  %8126 = vmatmul.mubr.bf16.gmra.mrb[72].mxu0 %v24780_v47  ;;  %7524 = vst [vmem:[%s28024_s10 + $0x30] sm:$0xff] %v25037_v6  ;;  %v25058_v10 = vmax.f32 %v7404_v62, 0.0  ;;  %v7429_v4 = vadd.f32 %v24672_v11, %v29115_v16  ;;  %v7428_v20 = vadd.f32 %v24666_v29, %v29117_v46  ;;  %v29120_v34 = vld [vmem:[#allocation175_spill] sm:$0xff] }
 0x57c   :  { %v25060_v61 = vmax.f32 %v7412_v24, 0.0  ;;  %8149 = vmatpush1.bf16.msra.mxu0 %v20914_v26  ;;  %8168 = vmatprep.mubr.bf16.mxu0 %v24799_v28  ;;  %7533 = vst [vmem:[%s28024_s10 + $0x78] sm:$0xff] %v25047_v57  ;;  %v25078_v27 = vmax.f32 %v7421_v12, 0.0  ;;  %v29116_v28 = vld [vmem:[#allocation171_spill] sm:$0xff]  ;;  %v7437_v56 = vadd.f32 %v24672_v11, %v29118_v38  ;;  %v29119_v26 = vld [vmem:[#allocation174_spill] sm:$0xff]  ;;  %v7444_v62 = vadd.f32 %v24666_v29, %v29121_v59 }
 0x57d   :  { %7541 = vst [vmem:[%s28024_s10 + $0xb8] sm:$0xff] %v25049_v32  ;;  %v7589_v47 = vpack.c.bf16 %v25049_v32, %v25047_v57  ;;  %v7420_v1 = vadd.f32 %v24666_v29, %v29116_v28  ;;  %8150 = vmatprep.subr.bf16.mxu0 %v20919_v51  ;;  %7532 = vst [vmem:[%s28024_s10 + $0x70] sm:$0xff] %v25058_v10  ;;  %v25097_v2 = vmax.f32 %v7429_v4, 0.0  ;;  %v25109_v63 = vmax.f32 %v7428_v20, 0.0  ;;  %v20920_v16 = vld [vmem:[%s28016_s2 + $0x380] ss:$8 sps:$4 sm:$0xff]  }
 0x57e   :  { %7540 = vst [vmem:[%s28024_s10 + $0xb0] sm:$0xff] %v25060_v61  ;;  %v7588_v54 = vpack.c.bf16 %v25060_v61, %v25058_v10  ;;  %v7445_v0 = vadd.f32 %v24672_v11, %v29119_v26  ;;  %7549 = vst [vmem:[%s28024_s10 + $0xf8] sm:$0xff] %v25078_v27  ;;  %v7436_v51 = vadd.f32 %v24666_v29, %v29120_v34  ;;  %v25121_v24 = vmax.f32 %v7437_v56, 0.0  ;;  %v20925_v46 = vld [vmem:[%s28016_s2 + $0x394] ss:$8 sps:$4 sm:$0xff]  }
 0x57f   :  { %v25107_v55 = vmax.f32 %v7420_v1, 0.0  ;;  %7557 = vst [vmem:[%s28024_s10 + $0x138] sm:$0xff] %v25097_v2  ;;  %v7593_v45 = vpack.c.bf16 %v25097_v2, %v25078_v27  ;;  %v8676_v12 = vpack.c.bf16 %v24909_v18, %v24879_v5  ;;  %7556 = vst [vmem:[%s28024_s10 + $0x130] sm:$0xff] %v25109_v63  ;;  %v8675_v1 = vpack.c.bf16 %v24919_v42, %v24896_v7  ;;  %v20928_v38 = vld [vmem:[%s28016_s2 + $0x3a4] ss:$8 sps:$4 sm:$0xff]   ;;  %v29123_v56 = vld [vmem:[#allocation191_spill] sm:$0xff] }
 0x580   :  { %v25123_v36 = vmax.f32 %v7445_v0, 0.0  ;;  %8151 = vmatpush1.bf16.msra.mxu0 %v20917_v30  ;;  %v25140_v28 = vmax.f32 %v7436_v51, 0.0  ;;  %v25142_v30 = vmax.f32 %v7444_v62, 0.0  ;;  %7565 = vst [vmem:[%s28024_s10 + $0x178] sm:$0xff] %v25121_v24  ;;  %v7451_v34 = vadd.f32 %v24669_v52, %v24648_v35  ;;  %v29122_v51 = vld [vmem:[#allocation16_spill] sm:$0xff] }
 0x581   :  { %7548 = vst [vmem:[%s28024_s10 + $0xf0] sm:$0xff] %v25107_v55  ;;  %v7592_v4 = vpack.c.bf16 %v25109_v63, %v25107_v55  ;;  %8152 = vmatprep.subr.bf16.mxu0 %v20922_v9  ;;  %v7450_v59 = vadd.f32 %v24663_v41, %v29122_v51  ;;  %v20923_v35 = vld [vmem:[%s28016_s2 + $0x390] ss:$8 sps:$4 sm:$0xff]   ;;  %v8686_v41 = vpack.c.bf16 %v25121_v24, %v25097_v2  ;;  %v25756_v2 = vld [vmem:[%s28018_s4 + $0x208] sm:$0xff] }
 0x582   :  { %7573 = vst [vmem:[%s28024_s10 + $0x1b8] sm:$0xff] %v25123_v36  ;;  %v7597_v20 = vpack.c.bf16 %v25123_v36, %v25121_v24  ;;  %7564 = vst [vmem:[%s28024_s10 + $0x170] sm:$0xff] %v25140_v28  ;;  %v7596_v26 = vpack.c.bf16 %v25142_v30, %v25140_v28  ;;  %v7515_v52 = vmax.f32 %v7451_v34, 0.0  ;;  %v29124_v9 = vld [vmem:[#allocation19_spill] sm:$0xff]  ;;  %v29127_v42 = vpack.c.bf16 %v24969_v13, %v24921_v49  ;;  %v21100_v49 = vld [vmem:[%s28016_s2 + $0x540] ss:$8 sps:$4 sm:$0xff]  }
 0x583   :  { %7572 = vst [vmem:[%s28024_s10 + $0x1b0] sm:$0xff] %v25142_v30  ;;  %v7514_v0 = vmax.f32 %v7450_v59, 0.0  ;;  %v7452_v62 = vadd.f32 %v24666_v29, %v29124_v9  ;;  %v20926_v29 = vld [vmem:[%s28016_s2 + $0x3a0] ss:$8 sps:$4 sm:$0xff]   ;;  %v21067_v18 = vld [vmem:[%s28016_s2 + $0x490] ss:$8 sps:$4 sm:$0xff]   ;;  %v29129_v13 = vpack.c.bf16 %v24999_v17, %v24971_v33  ;;  %v29130_v17 = vpack.c.bf16 %v25047_v57, %v25018_v37 }
 0x584   :  { %8153 = vmatpush1.bf16.msra.mxu0 %v20920_v16  ;;  %v7453_v16 = vadd.f32 %v24672_v11, %v29123_v56  ;;  %7579 = vst [vmem:[%s28024_s10 + $0x1e8] sm:$0xff] %v7515_v52  ;;  %v25207_v34 = vpack.c.bf16 %v7515_v52, %v24985_v53  ;;  %v20931_v11 = vld [vmem:[%s28016_s2 + $0x3b4] ss:$8 sps:$4 sm:$0xff]   ;;  %v20935_v52 = vld [vmem:[%s28016_s2 + $0x3d0] ss:$8 sps:$4 sm:$0xff]  }
 0x585   :  { %8154 = vmatprep.subr.bf16.mxu0 %v20925_v46  ;;  %7578 = vst [vmem:[%s28024_s10 + $0x1e0] sm:$0xff] %v7514_v0  ;;  %v25213_v46 = vpack.c.bf16 %v7514_v0, %v25001_v48  ;;  %v7516_v51 = vmax.f32 %v7452_v62, 0.0  ;;  %v20934_v0 = vld [vmem:[%s28016_s2 + $0x3c4] ss:$8 sps:$4 sm:$0xff]   ;;  %v20932_v62 = vld [vmem:[%s28016_s2 + $0x3c0] ss:$8 sps:$4 sm:$0xff]  }
 0x586   :  { %v7517_v59 = vmax.f32 %v7453_v16, 0.0  ;;  %v20938_v16 = vld [vmem:[%s28016_s2 + $0x3e0] ss:$8 sps:$4 sm:$0xff]   ;;  %v21015_v53 = vld [vmem:[%s28016_s2 + $0x174] ss:$8 sps:$4 sm:$0xff]  }
 0x587   :  { %7580 = vst [vmem:[%s28024_s10 + $0x1f0] sm:$0xff] %v7516_v51  ;;  %v25231_v56 = vpack.c.bf16 %v7516_v51, %v25142_v30  ;;  %v20940_v51 = vld [vmem:[%s28016_s2 + $0x3e4] ss:$8 sps:$4 sm:$0xff]   ;;  %v21021_v48 = vld [vmem:[%s28016_s2 + $0x194] ss:$8 sps:$4 sm:$0xff]  }
 0x588   :  { %8155 = vmatpush1.bf16.msra.mxu0 %v20923_v35  ;;  %7581 = vst [vmem:[%s28024_s10 + $0x1f8] sm:$0xff] %v7517_v59  ;;  %v25225_v9 = vpack.c.bf16 %v7517_v59, %v25123_v36  ;;  %v20937_v35 = vld [vmem:[%s28016_s2 + $0x3d4] ss:$8 sps:$4 sm:$0xff]   ;;  %v21064_v30 = vld [vmem:[%s28016_s2 + $0x480] ss:$8 sps:$4 sm:$0xff]  }
 0x589   :  { %8156 = vmatprep.subr.bf16.mxu0 %v20928_v38  ;;  %v20929_v38 = vld [vmem:[%s28016_s2 + $0x3b0] ss:$8 sps:$4 sm:$0xff]   ;;  %v20943_v59 = vld [vmem:[%s28016_s2 + $0x3f4] ss:$8 sps:$4 sm:$0xff]  }
 0x58a   :  { %v21063_v36 = vld [vmem:[%s28016_s2 + $0x474] ss:$8 sps:$4 sm:$0xff]   ;;  %v21115_v57 = vld [vmem:[%s28016_s2 + $0x590] ss:$8 sps:$4 sm:$0xff]  }
 0x58b   :  { %v21111_v33 = vld [vmem:[%s28016_s2 + $0x574] ss:$8 sps:$4 sm:$0xff]  }
 0x58c   :  { %8157 = vmatpush1.bf16.msra.mxu0 %v20926_v29  ;;  %v20941_v29 = vld [vmem:[%s28016_s2 + $0x3f0] ss:$8 sps:$4 sm:$0xff]  }
 0x58d   :  { %8158 = vmatprep.subr.bf16.mxu0 %v20931_v11  ;;  %v20946_v11 = vld [vmem:[%s28016_s2 + $0x4] ss:$8 sps:$4 sm:$0xff]  }
 0x590   :  { %8159 = vmatpush1.bf16.msra.mxu0 %v20929_v38  ;;  %v20944_v38 = vld [vmem:[%s28016_s2] ss:$8 sps:$4 sm:$0xff]  }
 0x591   :  { %8160 = vmatprep.subr.bf16.mxu0 %v20934_v0  ;;  %v20949_v0 = vld [vmem:[%s28016_s2 + $0x14] ss:$8 sps:$4 sm:$0xff]  }
 0x594   :  { %8161 = vmatpush1.bf16.msra.mxu0 %v20932_v62  ;;  %v20947_v62 = vld [vmem:[%s28016_s2 + $0x10] ss:$8 sps:$4 sm:$0xff]  }
 0x595   :  { %8162 = vmatprep.subr.bf16.mxu0 %v20937_v35  ;;  %v20952_v35 = vld [vmem:[%s28016_s2 + $0x24] ss:$8 sps:$4 sm:$0xff]  }
 0x598   :  { %8163 = vmatpush1.bf16.msra.mxu0 %v20935_v52  ;;  %v20950_v52 = vld [vmem:[%s28016_s2 + $0x20] ss:$8 sps:$4 sm:$0xff]  }
 0x599   :  { %8164 = vmatprep.subr.bf16.mxu0 %v20940_v51  ;;  %v20958_v51 = vld [vmem:[%s28016_s2 + $0x44] ss:$8 sps:$4 sm:$0xff]  }
 0x59c   :  { %8165 = vmatpush1.bf16.msra.mxu0 %v20938_v16  ;;  %v20956_v16 = vld [vmem:[%s28016_s2 + $0x40] ss:$8 sps:$4 sm:$0xff]  }
 0x59d   :  { %8166 = vmatprep.subr.bf16.mxu0 %v20943_v59  ;;  %v20964_v59 = vld [vmem:[%s28016_s2 + $0x64] ss:$8 sps:$4 sm:$0xff]  }
 0x5a0   :  { %8167 = vmatpush1.bf16.msra.mxu0 %v20941_v29  ;;  %v20962_v29 = vld [vmem:[%s28016_s2 + $0x60] ss:$8 sps:$4 sm:$0xff]  }
 0x5a1   :  { %8529 = vmatprep.subr.bf16.mxu0 %v20946_v11 }
 0x5a3   :  { %8169 = vmatmul.mubr.bf16.vlgmr.msra.gmra.mrb[60].mxu0 %v24812_v60  ;;  %v20955_v60 = vld [vmem:[%s28016_s2 + $0x34] ss:$8 sps:$4 sm:$0xff]  }
 0x5a4   :  { %8178 = vmatprep.mubr.bf16.mxu0 %v24822_v25  ;;  %8530 = vmatpush1.bf16.msra.mxu0 %v20944_v38  ;;  %v20953_v25 = vld [vmem:[%s28016_s2 + $0x30] ss:$8 sps:$4 sm:$0xff]  }
 0x5a5   :  { %8531 = vmatprep.subr.bf16.mxu0 %v20949_v0  ;;  %v20965_v38 = vld [vmem:[%s28016_s2 + $0x70] ss:$8 sps:$4 sm:$0xff]   ;;  %v20970_v0 = vld [vmem:[%s28016_s2 + $0x84] ss:$8 sps:$4 sm:$0xff]  }
 0x5a8   :  { %8532 = vmatpush1.bf16.msra.mxu0 %v20947_v62  ;;  %v20968_v62 = vld [vmem:[%s28016_s2 + $0x80] ss:$8 sps:$4 sm:$0xff]  }
 0x5a9   :  { %8533 = vmatprep.subr.bf16.mxu0 %v20952_v35  ;;  %v20971_v35 = vld [vmem:[%s28016_s2 + $0x90] ss:$8 sps:$4 sm:$0xff]  }
 0x5ab   :  { %8179 = vmatmul.mubr.bf16.gmra.mrb[64].mxu0 %v24835_v31  ;;  %v20961_v31 = vld [vmem:[%s28016_s2 + $0x54] ss:$8 sps:$4 sm:$0xff]  }
 0x5ac   :  { %8188 = vmatprep.mubr.bf16.mxu0 %v24857_v23  ;;  %8534 = vmatpush1.bf16.msra.mxu0 %v20950_v52  ;;  %v20959_v23 = vld [vmem:[%s28016_s2 + $0x50] ss:$8 sps:$4 sm:$0xff]   ;;  %v20976_v52 = vld [vmem:[%s28016_s2 + $0xa4] ss:$8 sps:$4 sm:$0xff]  }
 0x5ad   :  { %8535 = vmatprep.subr.bf16.mxu0 %v20955_v60  ;;  %v20974_v60 = vld [vmem:[%s28016_s2 + $0xa0] ss:$8 sps:$4 sm:$0xff]  }
 0x5b0   :  { %8536 = vmatpush1.bf16.msra.mxu0 %v20953_v25  ;;  %v20979_v25 = vld [vmem:[%s28016_s2 + $0xb4] ss:$8 sps:$4 sm:$0xff]  }
 0x5b1   :  { %8537 = vmatprep.subr.bf16.mxu0 %v20958_v51  ;;  %v20977_v51 = vld [vmem:[%s28016_s2 + $0xb0] ss:$8 sps:$4 sm:$0xff]  }
 0x5b3   :  { %8189 = vmatmul.mubr.bf16.gmra.mrb[68].mxu0 %v24867_v22  ;;  %v20967_v22 = vld [vmem:[%s28016_s2 + $0x74] ss:$8 sps:$4 sm:$0xff]  }
 0x5b4   :  { %8198 = vmatprep.mubr.bf16.mxu0 %v24877_v40  ;;  %8538 = vmatpush1.bf16.msra.mxu0 %v20956_v16  ;;  %v29125_v40 = vmov 0.0   ;;  %v20982_v16 = vld [vmem:[%s28016_s2 + $0xc4] ss:$8 sps:$4 sm:$0xff]  }
 0x5b5   :  { %8539 = vmatprep.subr.bf16.mxu0 %v20961_v31  ;;  %v7583_v11 = vpack.c.bf16 %v24879_v5, %v29125_v40  ;;  %v20980_v31 = vld [vmem:[%s28016_s2 + $0xc0] ss:$8 sps:$4 sm:$0xff]   ;;  %v21069_v5 = vld [vmem:[%s28016_s2 + $0x494] ss:$8 sps:$4 sm:$0xff]  }
 0x5b8   :  { %8540 = vmatpush1.bf16.msra.mxu0 %v20959_v23  ;;  %v20985_v23 = vld [vmem:[%s28016_s2 + $0xd4] ss:$8 sps:$4 sm:$0xff]  }
 0x5b9   :  { %8541 = vmatprep.subr.bf16.mxu0 %v20964_v59  ;;  %v20983_v59 = vld [vmem:[%s28016_s2 + $0xd0] ss:$8 sps:$4 sm:$0xff]  }
 0x5bb   :  { %8199 = vmatmul.mubr.bf16.gmra.mrb[72].mxu0 %v24894_v50  ;;  %v20973_v50 = vld [vmem:[%s28016_s2 + $0x94] ss:$8 sps:$4 sm:$0xff]  }
 0x5bc   :  { %8542 = vmatpush1.bf16.msra.mxu0 %v20962_v29  ;;  %8561 = vmatprep.mubr.bf16.mxu0 %v7583_v11  ;;  %v20988_v29 = vld [vmem:[%s28016_s2 + $0xe4] ss:$8 sps:$4 sm:$0xff]   ;;  %v20991_v11 = vld [vmem:[%s28016_s2 + $0xf4] ss:$8 sps:$4 sm:$0xff]  }
 0x5bd   :  { %8543 = vmatprep.subr.bf16.mxu0 %v20967_v22  ;;  %v20986_v22 = vld [vmem:[%s28016_s2 + $0xe0] ss:$8 sps:$4 sm:$0xff]  }
 0x5c0   :  { %8544 = vmatpush1.bf16.msra.mxu0 %v20965_v38  ;;  %v20989_v38 = vld [vmem:[%s28016_s2 + $0xf0] ss:$8 sps:$4 sm:$0xff]  }
 0x5c1   :  { %8545 = vmatprep.subr.bf16.mxu0 %v20970_v0  ;;  %v20994_v0 = vld [vmem:[%s28016_s2 + $0x104] ss:$8 sps:$4 sm:$0xff]  }
 0x5c4   :  { %8546 = vmatpush1.bf16.msra.mxu0 %v20968_v62  ;;  %v20992_v62 = vld [vmem:[%s28016_s2 + $0x100] ss:$8 sps:$4 sm:$0xff]  }
 0x5c5   :  { %8547 = vmatprep.subr.bf16.mxu0 %v20973_v50  ;;  %v7582_v50 = vpack.c.bf16 %v24896_v7, %v29125_v40  ;;  %v21094_v7 = vld [vmem:[%s28016_s2 + $0x520] ss:$8 sps:$4 sm:$0xff]  }
 0x5c8   :  { %8548 = vmatpush1.bf16.msra.mxu0 %v20971_v35  ;;  %v20997_v35 = vld [vmem:[%s28016_s2 + $0x114] ss:$8 sps:$4 sm:$0xff]  }
 0x5c9   :  { %8549 = vmatprep.subr.bf16.mxu0 %v20976_v52  ;;  %v20995_v52 = vld [vmem:[%s28016_s2 + $0x110] ss:$8 sps:$4 sm:$0xff]  }
 0x5cc   :  { %8550 = vmatpush1.bf16.msra.mxu0 %v20974_v60  ;;  %v21000_v60 = vld [vmem:[%s28016_s2 + $0x124] ss:$8 sps:$4 sm:$0xff]  }
 0x5cd   :  { %8551 = vmatprep.subr.bf16.mxu0 %v20979_v25  ;;  %v20998_v25 = vld [vmem:[%s28016_s2 + $0x120] ss:$8 sps:$4 sm:$0xff]  }
 0x5d0   :  { %8552 = vmatpush1.bf16.msra.mxu0 %v20977_v51  ;;  %v21001_v51 = vld [vmem:[%s28016_s2 + $0x130] ss:$8 sps:$4 sm:$0xff]  }
 0x5d1   :  { %8553 = vmatprep.subr.bf16.mxu0 %v20982_v16  ;;  %v21006_v16 = vld [vmem:[%s28016_s2 + $0x144] ss:$8 sps:$4 sm:$0xff]  }
 0x5d4   :  { %8554 = vmatpush1.bf16.msra.mxu0 %v20980_v31  ;;  %v21004_v31 = vld [vmem:[%s28016_s2 + $0x140] ss:$8 sps:$4 sm:$0xff]  }
 0x5d5   :  { %8555 = vmatprep.subr.bf16.mxu0 %v20985_v23  ;;  %v21012_v23 = vld [vmem:[%s28016_s2 + $0x164] ss:$8 sps:$4 sm:$0xff]  }
 0x5d8   :  { %8556 = vmatpush1.bf16.msra.mxu0 %v20983_v59  ;;  %v21010_v59 = vld [vmem:[%s28016_s2 + $0x160] ss:$8 sps:$4 sm:$0xff]  }
 0x5d9   :  { %8557 = vmatprep.subr.bf16.mxu0 %v20988_v29  ;;  %v21018_v29 = vld [vmem:[%s28016_s2 + $0x184] ss:$8 sps:$4 sm:$0xff]  }
 0x5dc   :  { %8558 = vmatpush1.bf16.msra.mxu0 %v20986_v22  ;;  %v21016_v22 = vld [vmem:[%s28016_s2 + $0x180] ss:$8 sps:$4 sm:$0xff]  }
 0x5dd   :  { %8559 = vmatprep.subr.bf16.mxu0 %v20991_v11  ;;  %v21024_v11 = vld [vmem:[%s28016_s2 + $0x1a4] ss:$8 sps:$4 sm:$0xff]  }
 0x5e0   :  { %8560 = vmatpush1.bf16.msra.mxu0 %v20989_v38  ;;  %v21022_v38 = vld [vmem:[%s28016_s2 + $0x1a0] ss:$8 sps:$4 sm:$0xff]  }
 0x5e1   :  { %8602 = vmatprep.subr.bf16.mxu0 %v20994_v0  ;;  %v21027_v0 = vld [vmem:[%s28016_s2 + $0x1b4] ss:$8 sps:$4 sm:$0xff]  }
 0x5e3   :  { %8562 = vmatmul.mubr.bf16.vlgmr.msra.gmra.mrb[60].mxu0 %v7582_v50  ;;  %v21030_v50 = vld [vmem:[%s28016_s2 + $0x1c4] ss:$8 sps:$4 sm:$0xff]  }
 0x5e4   :  { %8571 = vmatprep.mubr.bf16.mxu0 %v7587_v14  ;;  %8603 = vmatpush1.bf16.msra.mxu0 %v20992_v62  ;;  %v21003_v14 = vld [vmem:[%s28016_s2 + $0x134] ss:$8 sps:$4 sm:$0xff]   ;;  %v21025_v62 = vld [vmem:[%s28016_s2 + $0x1b0] ss:$8 sps:$4 sm:$0xff]  }
 0x5e5   :  { %8604 = vmatprep.subr.bf16.mxu0 %v20997_v35  ;;  %v21028_v35 = vld [vmem:[%s28016_s2 + $0x1c0] ss:$8 sps:$4 sm:$0xff]  }
 0x5e8   :  { %8605 = vmatpush1.bf16.msra.mxu0 %v20995_v52  ;;  %v21033_v52 = vld [vmem:[%s28016_s2 + $0x1d4] ss:$8 sps:$4 sm:$0xff]  }
 0x5e9   :  { %8606 = vmatprep.subr.bf16.mxu0 %v21000_v60  ;;  %v21031_v60 = vld [vmem:[%s28016_s2 + $0x1d0] ss:$8 sps:$4 sm:$0xff]  }
 0x5eb   :  { %8572 = vmatmul.mubr.bf16.gmra.mrb[64].mxu0 %v7586_v21  ;;  %v21009_v21 = vld [vmem:[%s28016_s2 + $0x154] ss:$8 sps:$4 sm:$0xff]  }
 0x5ec   :  { %8581 = vmatprep.mubr.bf16.mxu0 %v7591_v8  ;;  %8607 = vmatpush1.bf16.msra.mxu0 %v20998_v25  ;;  %v21007_v8 = vld [vmem:[%s28016_s2 + $0x150] ss:$8 sps:$4 sm:$0xff]   ;;  %v21036_v25 = vld [vmem:[%s28016_s2 + $0x1e4] ss:$8 sps:$4 sm:$0xff]  }
 0x5ed   :  { %8608 = vmatprep.subr.bf16.mxu0 %v21003_v14  ;;  %v21034_v14 = vld [vmem:[%s28016_s2 + $0x1e0] ss:$8 sps:$4 sm:$0xff]  }
 0x5f0   :  { %8609 = vmatpush1.bf16.msra.mxu0 %v21001_v51  ;;  %v21039_v51 = vld [vmem:[%s28016_s2 + $0x1f4] ss:$8 sps:$4 sm:$0xff]  }
 0x5f1   :  { %8610 = vmatprep.subr.bf16.mxu0 %v21006_v16  ;;  %v21037_v16 = vld [vmem:[%s28016_s2 + $0x1f0] ss:$8 sps:$4 sm:$0xff]  }
 0x5f3   :  { %8582 = vmatmul.mubr.bf16.gmra.mrb[68].mxu0 %v7590_v3  ;;  %v7585_v3 = vpack.c.bf16 %v25018_v37, %v29125_v40  ;;  %v21117_v37 = vld [vmem:[%s28016_s2 + $0x594] ss:$8 sps:$4 sm:$0xff]  }
 0x5f4   :  { %8591 = vmatprep.mubr.bf16.mxu0 %v7595_v58  ;;  %8611 = vmatpush1.bf16.msra.mxu0 %v21004_v31  ;;  %v21013_v58 = vld [vmem:[%s28016_s2 + $0x170] ss:$8 sps:$4 sm:$0xff]   ;;  %v21042_v31 = vld [vmem:[%s28016_s2 + $0x404] ss:$8 sps:$4 sm:$0xff]  }
 0x5f5   :  { %8612 = vmatprep.subr.bf16.mxu0 %v21009_v21  ;;  %v21040_v21 = vld [vmem:[%s28016_s2 + $0x400] ss:$8 sps:$4 sm:$0xff]  }
 0x5f8   :  { %8613 = vmatpush1.bf16.msra.mxu0 %v21007_v8  ;;  %v7584_v8 = vpack.c.bf16 %v25037_v6, %v29125_v40 }
 0x5f9   :  { %8614 = vmatprep.subr.bf16.mxu0 %v21012_v23  ;;  %v21045_v23 = vld [vmem:[%s28016_s2 + $0x414] ss:$8 sps:$4 sm:$0xff]  }
 0x5fb   :  { %8592 = vmatmul.mubr.bf16.gmra.mrb[72].mxu0 %v7594_v43  ;;  %v21019_v43 = vld [vmem:[%s28016_s2 + $0x190] ss:$8 sps:$4 sm:$0xff]  }
 0x5fc   :  { %8615 = vmatpush1.bf16.msra.mxu0 %v21010_v59  ;;  %8634 = vmatprep.mubr.bf16.mxu0 %v7585_v3  ;;  %v21043_v59 = vld [vmem:[%s28016_s2 + $0x410] ss:$8 sps:$4 sm:$0xff]   ;;  %v21046_v3 = vld [vmem:[%s28016_s2 + $0x420] ss:$8 sps:$4 sm:$0xff]  }
 0x5fd   :  { %8616 = vmatprep.subr.bf16.mxu0 %v21015_v53  ;;  %v21048_v53 = vld [vmem:[%s28016_s2 + $0x424] ss:$8 sps:$4 sm:$0xff]  }
 0x600   :  { %8617 = vmatpush1.bf16.msra.mxu0 %v21013_v58  ;;  %v21049_v58 = vld [vmem:[%s28016_s2 + $0x430] ss:$8 sps:$4 sm:$0xff]  }
 0x601   :  { %8618 = vmatprep.subr.bf16.mxu0 %v21018_v29  ;;  %v21054_v29 = vld [vmem:[%s28016_s2 + $0x444] ss:$8 sps:$4 sm:$0xff]  }
 0x604   :  { %8619 = vmatpush1.bf16.msra.mxu0 %v21016_v22  ;;  %v21052_v22 = vld [vmem:[%s28016_s2 + $0x440] ss:$8 sps:$4 sm:$0xff]  }
 0x605   :  { %8620 = vmatprep.subr.bf16.mxu0 %v21021_v48  ;;  %v21060_v48 = vld [vmem:[%s28016_s2 + $0x464] ss:$8 sps:$4 sm:$0xff]  }
 0x608   :  { %8621 = vmatpush1.bf16.msra.mxu0 %v21019_v43  ;;  %v21058_v43 = vld [vmem:[%s28016_s2 + $0x460] ss:$8 sps:$4 sm:$0xff]  }
 0x609   :  { %8622 = vmatprep.subr.bf16.mxu0 %v21024_v11  ;;  %v21075_v11 = vld [vmem:[%s28016_s2 + $0x4b4] ss:$8 sps:$4 sm:$0xff]  }
 0x60c   :  { %8623 = vmatpush1.bf16.msra.mxu0 %v21022_v38  ;;  %v21073_v38 = vld [vmem:[%s28016_s2 + $0x4b0] ss:$8 sps:$4 sm:$0xff]  }
 0x60d   :  { %8624 = vmatprep.subr.bf16.mxu0 %v21027_v0  ;;  %v21078_v0 = vld [vmem:[%s28016_s2 + $0x4c4] ss:$8 sps:$4 sm:$0xff]  }
 0x610   :  { %8625 = vmatpush1.bf16.msra.mxu0 %v21025_v62  ;;  %v21076_v62 = vld [vmem:[%s28016_s2 + $0x4c0] ss:$8 sps:$4 sm:$0xff]  }
 0x611   :  { %8626 = vmatprep.subr.bf16.mxu0 %v21030_v50  ;;  %v21081_v50 = vld [vmem:[%s28016_s2 + $0x4d4] ss:$8 sps:$4 sm:$0xff]  }
 0x614   :  { %8627 = vmatpush1.bf16.msra.mxu0 %v21028_v35  ;;  %v21079_v35 = vld [vmem:[%s28016_s2 + $0x4d0] ss:$8 sps:$4 sm:$0xff]  }
 0x615   :  { %8628 = vmatprep.subr.bf16.mxu0 %v21033_v52  ;;  %v21084_v52 = vld [vmem:[%s28016_s2 + $0x4e4] ss:$8 sps:$4 sm:$0xff]  }
 0x618   :  { %8629 = vmatpush1.bf16.msra.mxu0 %v21031_v60  ;;  %v21082_v60 = vld [vmem:[%s28016_s2 + $0x4e0] ss:$8 sps:$4 sm:$0xff]  }
 0x619   :  { %8630 = vmatprep.subr.bf16.mxu0 %v21036_v25  ;;  %v21087_v25 = vld [vmem:[%s28016_s2 + $0x4f4] ss:$8 sps:$4 sm:$0xff]  }
 0x61c   :  { %8631 = vmatpush1.bf16.msra.mxu0 %v21034_v14  ;;  %v21085_v14 = vld [vmem:[%s28016_s2 + $0x4f0] ss:$8 sps:$4 sm:$0xff]  }
 0x61d   :  { %8632 = vmatprep.subr.bf16.mxu0 %v21039_v51  ;;  %v21090_v51 = vld [vmem:[%s28016_s2 + $0x504] ss:$8 sps:$4 sm:$0xff]  }
 0x620   :  { %8633 = vmatpush1.bf16.msra.mxu0 %v21037_v16  ;;  %v21088_v16 = vld [vmem:[%s28016_s2 + $0x500] ss:$8 sps:$4 sm:$0xff]  }
 0x621   :  { %9076 = vmatprep.subr.bf16.mxu0 %v21042_v31  ;;  %v21093_v31 = vld [vmem:[%s28016_s2 + $0x514] ss:$8 sps:$4 sm:$0xff]  }
 0x623   :  { %8635 = vmatmul.mubr.bf16.vlgmr.msra.gmra.mrb[60].mxu0 %v7584_v8  ;;  %v21091_v8 = vld [vmem:[%s28016_s2 + $0x510] ss:$8 sps:$4 sm:$0xff]  }
 0x624   :  { %8644 = vmatprep.mubr.bf16.mxu0 %v7589_v47  ;;  %9077 = vmatpush1.bf16.msra.mxu0 %v21040_v21  ;;  %v21051_v47 = vld [vmem:[%s28016_s2 + $0x434] ss:$8 sps:$4 sm:$0xff]   ;;  %v29126_v21 = vpack.c.bf16 %v24936_v39, %v24911_v15  ;;  %v29128_v39 = vpack.c.bf16 %v24983_v44, %v24956_v19  ;;  %v21103_v44 = vld [vmem:[%s28016_s2 + $0x550] ss:$8 sps:$4 sm:$0xff]  }
 0x625   :  { %9078 = vmatprep.subr.bf16.mxu0 %v21045_v23  ;;  %v21096_v23 = vld [vmem:[%s28016_s2 + $0x524] ss:$8 sps:$4 sm:$0xff]   ;;  %v21099_v15 = vld [vmem:[%s28016_s2 + $0x534] ss:$8 sps:$4 sm:$0xff]  }
 0x626   :  { %v21105_v19 = vld [vmem:[%s28016_s2 + $0x554] ss:$8 sps:$4 sm:$0xff]  }
 0x628   :  { %9079 = vmatpush1.bf16.msra.mxu0 %v21043_v59  ;;  %v21102_v59 = vld [vmem:[%s28016_s2 + $0x544] ss:$8 sps:$4 sm:$0xff]  }
 0x629   :  { %9080 = vmatprep.subr.bf16.mxu0 %v21048_v53  ;;  %v21108_v53 = vld [vmem:[%s28016_s2 + $0x564] ss:$8 sps:$4 sm:$0xff]  }
 0x62b   :  { %8645 = vmatmul.mubr.bf16.gmra.mrb[64].mxu0 %v7588_v54  ;;  %v21057_v54 = vld [vmem:[%s28016_s2 + $0x454] ss:$8 sps:$4 sm:$0xff]  }
 0x62c   :  { %8654 = vmatprep.mubr.bf16.mxu0 %v7593_v45  ;;  %9081 = vmatpush1.bf16.msra.mxu0 %v21046_v3  ;;  %v21055_v45 = vld [vmem:[%s28016_s2 + $0x450] ss:$8 sps:$4 sm:$0xff]   ;;  %v21106_v3 = vld [vmem:[%s28016_s2 + $0x560] ss:$8 sps:$4 sm:$0xff]  }
 0x62d   :  { %9082 = vmatprep.subr.bf16.mxu0 %v21051_v47  ;;  %v21114_v47 = vld [vmem:[%s28016_s2 + $0x584] ss:$8 sps:$4 sm:$0xff]  }
 0x630   :  { %9083 = vmatpush1.bf16.msra.mxu0 %v21049_v58  ;;  %v21112_v58 = vld [vmem:[%s28016_s2 + $0x580] ss:$8 sps:$4 sm:$0xff]  }
 0x631   :  { %9084 = vmatprep.subr.bf16.mxu0 %v21054_v29  ;;  %v21118_v29 = vld [vmem:[%s28016_s2 + $0x5a0] ss:$8 sps:$4 sm:$0xff]  }
 0x633   :  { %8655 = vmatmul.mubr.bf16.gmra.mrb[68].mxu0 %v7592_v4  ;;  %v21061_v4 = vld [vmem:[%s28016_s2 + $0x470] ss:$8 sps:$4 sm:$0xff]  }
 0x634   :  { %8664 = vmatprep.mubr.bf16.mxu0 %v7597_v20  ;;  %9085 = vmatpush1.bf16.msra.mxu0 %v21052_v22  ;;  %v21066_v20 = vld [vmem:[%s28016_s2 + $0x484] ss:$8 sps:$4 sm:$0xff]   ;;  %v21123_v22 = vld [vmem:[%s28016_s2 + $0x5b4] ss:$8 sps:$4 sm:$0xff]  }
 0x635   :  { %9086 = vmatprep.subr.bf16.mxu0 %v21057_v54  ;;  %v21121_v54 = vld [vmem:[%s28016_s2 + $0x5b0] ss:$8 sps:$4 sm:$0xff]  }
 0x638   :  { %9087 = vmatpush1.bf16.msra.mxu0 %v21055_v45  ;;  %v21126_v45 = vld [vmem:[%s28016_s2 + $0x5c4] ss:$8 sps:$4 sm:$0xff]  }
 0x639   :  { %9088 = vmatprep.subr.bf16.mxu0 %v21060_v48  ;;  %v21124_v48 = vld [vmem:[%s28016_s2 + $0x5c0] ss:$8 sps:$4 sm:$0xff]  }
 0x63b   :  { %8665 = vmatmul.mubr.bf16.gmra.mrb[72].mxu0 %v7596_v26  ;;  %v21070_v26 = vld [vmem:[%s28016_s2 + $0x4a0] ss:$8 sps:$4 sm:$0xff]  }
 0x63c   :  { %9089 = vmatpush1.bf16.msra.mxu0 %v21058_v43  ;;  %9108 = vmatprep.mubr.bf16.mxu0 %v8676_v12  ;;  %v21072_v12 = vld [vmem:[%s28016_s2 + $0x4a4] ss:$8 sps:$4 sm:$0xff]   ;;  %v21129_v43 = vld [vmem:[%s28016_s2 + $0x5d4] ss:$8 sps:$4 sm:$0xff]  }
 0x63d   :  { %9090 = vmatprep.subr.bf16.mxu0 %v21063_v36  ;;  %v21127_v36 = vld [vmem:[%s28016_s2 + $0x5d0] ss:$8 sps:$4 sm:$0xff]  }
 0x640   :  { %9091 = vmatpush1.bf16.msra.mxu0 %v21061_v4  ;;  %v21132_v4 = vld [vmem:[%s28016_s2 + $0x5e4] ss:$8 sps:$4 sm:$0xff]  }
 0x641   :  { %9092 = vmatprep.subr.bf16.mxu0 %v21066_v20  ;;  %v21130_v20 = vld [vmem:[%s28016_s2 + $0x5e0] ss:$8 sps:$4 sm:$0xff]  }
 0x644   :  { %9093 = vmatpush1.bf16.msra.mxu0 %v21064_v30  ;;  %v21135_v30 = vld [vmem:[%s28016_s2 + $0x5f4] ss:$8 sps:$4 sm:$0xff]  }
 0x645   :  { %9094 = vmatprep.subr.bf16.mxu0 %v21069_v5  ;;  %v21133_v5 = vld [vmem:[%s28016_s2 + $0x5f0] ss:$8 sps:$4 sm:$0xff]  }
 0x648   :  { %9095 = vmatpush1.bf16.msra.mxu0 %v21067_v18  ;;  %v29131_v18 = vpack.c.bf16 %v25058_v10, %v25037_v6  ;;  %v25739_v6 = vld [vmem:[%s28018_s4 + $0x280] sm:$0xff] }
 0x649   :  { %9096 = vmatprep.subr.bf16.mxu0 %v21072_v12  ;;  %v29132_v12 = vpack.c.bf16 %v25078_v27, %v25049_v32  ;;  %v25744_v32 = vld [vmem:[%s28018_s4 + $0x288] sm:$0xff]  ;;  %v25749_v10 = vld [vmem:[%s28018_s4 + $0x200] sm:$0xff] }
 0x64a   :  { %v9400_v27 = vand.u32 4294901760, %v25744_v32 }
 0x64c   :  { %9097 = vmatpush1.bf16.msra.mxu0 %v21070_v26  ;;  %v29133_v26 = vpack.c.bf16 %v25107_v55, %v25060_v61  ;;  %v9397_v61 = vand.u32 4294901760, %v25739_v6  ;;  %v9349_v55 = vand.u32 4294901760, %v25749_v10 }
 0x64d   :  { %9098 = vmatprep.subr.bf16.mxu0 %v21075_v11  ;;  %v29134_v11 = vpack.c.bf16 %v25140_v28, %v25109_v63  ;;  %v9352_v63 = vand.u32 4294901760, %v25756_v2 }
 0x64e   :  { %v25764_v24 = vpack.c.bf16 %v9400_v27, %v9397_v61 }
 0x64f   :  { %v25770_v28 = vpack.c.bf16 %v9352_v63, %v9349_v55 }
 0x650   :  { %9099 = vmatpush1.bf16.msra.mxu0 %v21073_v38  ;;  %19588 = vmatprep.subr.bf16.mxu1 %v25764_v24 }
 0x651   :  { %9100 = vmatprep.subr.bf16.mxu0 %v21078_v0  ;;  %19590 = vmatpush3.bf16.msra.mxu1 %v25770_v28  ;;  %v25789_v0 = vld [vmem:[%s28018_s4 + $0x210] sm:$0xff] }
 0x654   :  { %9101 = vmatpush1.bf16.msra.mxu0 %v21076_v62  ;;  %v25794_v62 = vld [vmem:[%s28018_s4 + $0x218] sm:$0xff] }
 0x655   :  { %9102 = vmatprep.subr.bf16.mxu0 %v21081_v50  ;;  %v9355_v50 = vand.u32 4294901760, %v25789_v0 }
 0x658   :  { %9103 = vmatpush1.bf16.msra.mxu0 %v21079_v35  ;;  %v9358_v35 = vand.u32 4294901760, %v25794_v62 }
 0x659   :  { %9104 = vmatprep.subr.bf16.mxu0 %v21084_v52 }
 0x65c   :  { %9105 = vmatpush1.bf16.msra.mxu0 %v21082_v60  ;;  %v25808_v60 = vpack.c.bf16 %v9358_v35, %v9355_v50 }
 0x65d   :  { %9106 = vmatprep.subr.bf16.mxu0 %v21087_v25  ;;  %v25815_v25 = vld [vmem:[%s28018_s4 + $0x2a0] sm:$0xff] }
 0x660   :  { %9107 = vmatpush1.bf16.msra.mxu0 %v21085_v14  ;;  %v25820_v14 = vld [vmem:[%s28018_s4 + $0x2a8] sm:$0xff] }
 0x661   :  { %9149 = vmatprep.subr.bf16.mxu0 %v21090_v51  ;;  %v25825_v51 = vld [vmem:[%s28018_s4 + $0x220] sm:$0xff] }
 0x663   :  { %9109 = vmatmul.mubr.bf16.vlgmr.msra.gmra.mrb[60].mxu0 %v8675_v1  ;;  %v21097_v1 = vld [vmem:[%s28016_s2 + $0x530] ss:$8 sps:$4 sm:$0xff]  }
 0x664   :  { %9118 = vmatprep.mubr.bf16.mxu0 %v29126_v21  ;;  %9150 = vmatpush1.bf16.msra.mxu0 %v21088_v16  ;;  %v28322_v16 = vand.u32 4294901760, %v25815_v25  ;;  %v25832_v21 = vld [vmem:[%s28018_s4 + $0x228] sm:$0xff] }
 0x665   :  { %9151 = vmatprep.subr.bf16.mxu0 %v21093_v31  ;;  %v28321_v31 = vand.u32 4294901760, %v25820_v14 }
 0x668   :  { %9152 = vmatpush1.bf16.msra.mxu0 %v21091_v8  ;;  %v28320_v8 = vand.u32 4294901760, %v25825_v51 }
 0x669   :  { %9153 = vmatprep.subr.bf16.mxu0 %v21096_v23  ;;  %v25838_v23 = vld [vmem:[%s28018_s4 + $0x2b0] sm:$0xff] }
 0x66b   :  { %9119 = vmatmul.mubr.bf16.gmra.mrb[64].mxu0 %v29127_v42  ;;  %v28318_v42 = vand.u32 4294901760, %v25838_v23 }
 0x66c   :  { %9128 = vmatprep.mubr.bf16.mxu0 %v29128_v39  ;;  %9154 = vmatpush1.bf16.msra.mxu0 %v21094_v7  ;;  %v25843_v7 = vld [vmem:[%s28018_s4 + $0x2b8] sm:$0xff] }
 0x66d   :  { %9155 = vmatprep.subr.bf16.mxu0 %v21099_v15  ;;  %v28319_v15 = vand.u32 4294901760, %v25832_v21  ;;  %v28313_v39 = vand.u32 4294901760, %v25843_v7 }
 0x670   :  { %9156 = vmatpush1.bf16.msra.mxu0 %v21097_v1  ;;  %v25851_v1 = vld [vmem:[%s28018_s4 + $0x230] sm:$0xff] }
 0x671   :  { %9157 = vmatprep.subr.bf16.mxu0 %v21102_v59  ;;  %v25856_v59 = vld [vmem:[%s28018_s4 + $0x238] sm:$0xff] }
 0x673   :  { %9129 = vmatmul.mubr.bf16.gmra.mrb[68].mxu0 %v29129_v13  ;;  %v28312_v13 = vand.u32 4294901760, %v25851_v1 }
 0x674   :  { %9138 = vmatprep.mubr.bf16.mxu0 %v25207_v34  ;;  %9158 = vmatpush1.bf16.msra.mxu0 %v21100_v49  ;;  %v21109_v34 = vld [vmem:[%s28016_s2 + $0x570] ss:$8 sps:$4 sm:$0xff]   ;;  %v25861_v49 = vld [vmem:[%s28018_s4 + $0x2c0] sm:$0xff] }
 0x675   :  { %9159 = vmatprep.subr.bf16.mxu0 %v21105_v19  ;;  %v25867_v19 = vpack.c.bf16 %v28321_v31, %v28322_v16 }
 0x678   :  { %9160 = vmatpush1.bf16.msra.mxu0 %v21103_v44  ;;  %v28311_v44 = vand.u32 4294901760, %v25856_v59 }
 0x679   :  { %9161 = vmatprep.subr.bf16.mxu0 %v21108_v53  ;;  %v25874_v53 = vld [vmem:[%s28018_s4 + $0x2c8] sm:$0xff] }
 0x67b   :  { %9139 = vmatmul.mubr.bf16.gmra.mrb[72].mxu0 %v25213_v46  ;;  %v21120_v46 = vld [vmem:[%s28016_s2 + $0x5a4] ss:$8 sps:$4 sm:$0xff]   ;;  %s21250_s2 = smov [#allocation2]  }
 0x67c   :  { %9162 = vmatpush1.bf16.msra.mxu0 %v21106_v3  ;;  %9181 = vmatprep.mubr.bf16.mxu0 %v29130_v17  ;;  %v28310_v3 = vand.u32 4294901760, %v25861_v49  ;;  %v25885_v17 = vld [vmem:[%s28018_s4 + $0x248] sm:$0xff]  ;;  %s15586_s15 = sshll.u32 %s21250_s2, 4  ;;  %s15587_s15 = int_to_ptr.vmem [resolvable:$true] %s15586_s15 }
 0x67d   :  { %9163 = vmatprep.subr.bf16.mxu0 %v21111_v33  ;;  %v25880_v33 = vld [vmem:[%s28018_s4 + $0x240] sm:$0xff]  ;;  %p21227_p1 = scmp.lt.s32.totalorder %s15587_s15, %s15587_s15 }
 0x680   :  { %9164 = vmatpush1.bf16.msra.mxu0 %v21109_v34  ;;  %v25891_v34 = vpack.c.bf16 %v28319_v15, %v28320_v8 }
 0x681   :  { %9165 = vmatprep.subr.bf16.mxu0 %v21114_v47  ;;  %v25897_v47 = vpack.c.bf16 %v28313_v39, %v28318_v42  ;;  %v25984_v39 = vld [vmem:[%s28018_s4 + $0x2f8] sm:$0xff] }
 0x682   :  { %29135 = vst [vmem:[#allocation162_spill] sm:$0xff] %v25891_v34  ;;  %v28327_v15 = vand.u32 4294901760, %v25984_v39 }
 0x683   :  { %29136 = vst [vmem:[#allocation163_spill] sm:$0xff] %v25897_v47 }
 0x684   :  { %9166 = vmatpush1.bf16.msra.mxu0 %v21112_v58  ;;  %v28309_v58 = vand.u32 4294901760, %v25874_v53 }
 0x685   :  { %9167 = vmatprep.subr.bf16.mxu0 %v21117_v37  ;;  %v28315_v37 = vand.u32 4294901760, %v25880_v33 }
 0x688   :  { %9168 = vmatpush1.bf16.msra.mxu0 %v21115_v57  ;;  %v25904_v57 = vld [vmem:[%s28018_s4 + $0x2d0] sm:$0xff] }
 0x689   :  { %9169 = vmatprep.subr.bf16.mxu0 %v21120_v46  ;;  %v25909_v46 = vld [vmem:[%s28018_s4 + $0x2d8] sm:$0xff] }
 0x68c   :  { %9170 = vmatpush1.bf16.msra.mxu0 %v21118_v29  ;;  %v25914_v29 = vld [vmem:[%s28018_s4 + $0x250] sm:$0xff] }
 0x68d   :  { %9171 = vmatprep.subr.bf16.mxu0 %v21123_v22  ;;  %v25921_v22 = vpack.c.bf16 %v28311_v44, %v28312_v13 }
 0x68f   :  { %29137 = vst [vmem:[#allocation165_spill] sm:$0xff] %v25921_v22 }
 0x690   :  { %9172 = vmatpush1.bf16.msra.mxu0 %v21121_v54  ;;  %v28314_v54 = vand.u32 4294901760, %v25885_v17 }
 0x691   :  { %9173 = vmatprep.subr.bf16.mxu0 %v21126_v45  ;;  %v28317_v45 = vand.u32 4294901760, %v25904_v57 }
 0x694   :  { %9174 = vmatpush1.bf16.msra.mxu0 %v21124_v48  ;;  %v28316_v48 = vand.u32 4294901760, %v25909_v46 }
 0x695   :  { %9175 = vmatprep.subr.bf16.mxu0 %v21129_v43  ;;  %v25929_v43 = vld [vmem:[%s28018_s4 + $0x258] sm:$0xff] }
 0x698   :  { %9176 = vmatpush1.bf16.msra.mxu0 %v21127_v36  ;;  %v25934_v36 = vld [vmem:[%s28018_s4 + $0x2e0] sm:$0xff] }
 0x699   :  { %9177 = vmatprep.subr.bf16.mxu0 %v21132_v4  ;;  %v25939_v4 = vld [vmem:[%s28018_s4 + $0x2e8] sm:$0xff] }
 0x69a   :  { %v28325_v44 = vand.u32 4294901760, %v25939_v4 }
 0x69c   :  { %9178 = vmatpush1.bf16.msra.mxu0 %v21130_v20  ;;  %v25946_v20 = vpack.c.bf16 %v28309_v58, %v28310_v3  ;;  %v25971_v58 = vpack.c.bf16 %v28314_v54, %v28315_v37  ;;  %v25977_v3 = vpack.c.bf16 %v28316_v48, %v28317_v45  ;;  %v25989_v54 = vld [vmem:[%s28018_s4 + $0x270] sm:$0xff]  ;;  %v25994_v37 = vld [vmem:[%s28018_s4 + $0x278] sm:$0xff] }
 0x69d   :  { %9179 = vmatprep.subr.bf16.mxu0 %v21135_v30  ;;  %v28324_v30 = vand.u32 4294901760, %v25914_v29  ;;  %v28329_v31 = vand.u32 4294901760, %v25989_v54  ;;  %v28328_v16 = vand.u32 4294901760, %v25994_v37 }
 0x69e   :  { %29138 = vst [vmem:[#allocation166_spill] sm:$0xff] %v25946_v20  ;;  %29139 = vst [vmem:[#allocation167_spill] sm:$0xff] %v25971_v58 }
 0x69f   :  { %29140 = vst [vmem:[#allocation177_spill] sm:$0xff] %v25977_v3 }
 0x6a0   :  { %9180 = vmatpush1.bf16.msra.mxu0 %v21133_v5  ;;  %v28323_v5 = vand.u32 4294901760, %v25929_v43 }
 0x6a2   :  { %v26000_v48 = vpack.c.bf16 %v28323_v5, %v28324_v30  ;;  %v26016_v5 = vsub.f32 %v25739_v6, %v9397_v61  ;;  %v26039_v6 = vsub.f32 %v25749_v10, %v9349_v55  ;;  %v26046_v61 = vpack.c.bf16 %v28328_v16, %v28329_v31 }
 0x6a3   :  { %9182 = vmatmul.mubr.bf16.vlgmr.msra.gmra.mrb[60].mxu0 %v29131_v18  ;;  %v28326_v18 = vand.u32 4294901760, %v25934_v36  ;;  %v26069_v31 = vsub.f32 %v25789_v0, %v9355_v50 }
 0x6a4   :  { %9191 = vmatprep.mubr.bf16.mxu0 %v29132_v12  ;;  %v25954_v12 = vld [vmem:[%s28018_s4 + $0x260] sm:$0xff]  ;;  %29141 = vst [vmem:[#allocation142_spill] sm:$0xff] %v26000_v48  ;;  %29146 = vst [vmem:[#allocation11_spill] sm:$0xff] %v26046_v61  ;;  %v28334_v55 = vand.u32 4294901760, %v26039_v6 }
 0x6a5   :  { %v28335_v13 = vand.u32 4294901760, %v25954_v12  ;;  %v26009_v8 = vpack.c.bf16 %v28325_v44, %v28326_v18  ;;  %v26034_v18 = vsub.f32 %v25744_v32, %v9400_v27  ;;  %v26052_v32 = vsub.f32 %v25756_v2, %v9352_v63 }
 0x6a6   :  { %v28345_v50 = vand.u32 4294901760, %v26069_v31 }
 0x6a7   :  { %29142 = vst [vmem:[#allocation29_spill] sm:$0xff] %v26009_v8  ;;  %29145 = vst [vmem:[#allocation8_spill] sm:$0xff] %v26034_v18  ;;  %v28331_v27 = vand.u32 4294901760, %v26034_v18  ;;  %v28337_v63 = vand.u32 4294901760, %v26052_v32 }
 0x6ab   :  { %9192 = vmatmul.mubr.bf16.gmra.mrb[64].mxu0 %v29133_v26  ;;  %v25959_v26 = vld [vmem:[%s28018_s4 + $0x268] sm:$0xff] }
 0x6ac   :  { %9201 = vmatprep.mubr.bf16.mxu0 %v8686_v41  ;;  %v25776_v41 = vld [vmem:[%s28018_s4 + $0x290] sm:$0xff]  ;;  %v28333_v45 = vand.u32 4294901760, %v25959_v26 }
 0x6ae   :  { %v26023_v30 = vpack.c.bf16 %v28333_v45, %v28335_v13 }
 0x6b0   :  { %29143 = vst [vmem:[#allocation140_spill] sm:$0xff] %v26023_v30 }
 0x6b3   :  { %9202 = vmatmul.mubr.bf16.gmra.mrb[68].mxu0 %v29134_v11  ;;  %v25964_v11 = vld [vmem:[%s28018_s4 + $0x2f0] sm:$0xff] }
 0x6b4   :  { %9211 = vmatprep.mubr.bf16.mxu0 %v25225_v9  ;;  %v25781_v9 = vld [vmem:[%s28018_s4 + $0x298] sm:$0xff]  ;;  %v28332_v42 = vand.u32 4294901760, %v25964_v11 }
 0x6b5   :  { %v9406_v38 = vand.u32 4294901760, %v25781_v9 }
 0x6b6   :  { %v26029_v44 = vpack.c.bf16 %v28327_v15, %v28332_v42  ;;  %v28330_v15 = vand.u32 4294901760, %v26016_v5 }
 0x6b7   :  { %v26064_v16 = vsub.f32 %v25781_v9, %v9406_v38  ;;  %v9583_v9 = vsub.f32 %v26034_v18, %v28331_v27 }
 0x6b8   :  { %29144 = vst [vmem:[#allocation7_spill] sm:$0xff] %v26029_v44  ;;  %v9576_v2 = vsub.f32 %v26016_v5, %v28330_v15 }
 0x6b9   :  { %29147 = vst [vmem:[#allocation14_spill] sm:$0xff] %v26064_v16  ;;  %v28341_v0 = vand.u32 4294901760, %v26064_v16  ;;  %v9584_v42 = vand.u32 4294901760, %v9583_v9 }
 0x6ba   :  { %v9577_v15 = vand.u32 4294901760, %v9576_v2  ;;  %v9478_v2 = vsub.f32 %v26069_v31, %v28345_v50 }
 0x6bb   :  { %9212 = vmatmul.mubr.bf16.gmra.mrb[72].mxu0 %v25231_v56  ;;  %v9403_v56 = vand.u32 4294901760, %v25776_v41 }
 0x6bc   :  { %11706 = vmatprep.mubr.f32.mxu0 %v29125_v40  ;;  %v26113_v9 = vpack.c.bf16 %v9584_v42, %v9577_v15 }
 0x6bd   :  { %v25802_v52 = vpack.c.bf16 %v9406_v38, %v9403_v56  ;;  %v26057_v10 = vsub.f32 %v25776_v41, %v9403_v56  ;;  %v26079_v56 = vsub.f32 %v25794_v62, %v9358_v35  ;;  %v9464_v38 = vsub.f32 %v26039_v6, %v28334_v55 }
 0x6be   :  { %v9471_v62 = vsub.f32 %v26052_v32, %v28337_v63  ;;  %v9597_v55 = vsub.f32 %v26064_v16, %v28341_v0  ;;  %29151 = vst [vmem:[#allocation6_spill] sm:$0xff] %v26113_v9  ;;  %v9479_v0 = vand.u32 4294901760, %v9478_v2 }
 0x6bf   :  { %19592 = vmatprep.subr.bf16.mxu1 %v25802_v52  ;;  %v28338_v41 = vand.u32 4294901760, %v26057_v10  ;;  %29148 = vst [vmem:[#allocation5_spill] sm:$0xff] %v26079_v56  ;;  %v28344_v27 = vand.u32 4294901760, %v26079_v56  ;;  %v9465_v45 = vand.u32 4294901760, %v9464_v38 }
 0x6c0   :  { %19594 = vmatpush3.bf16.msra.mxu1 %v25808_v60  ;;  %v9472_v13 = vand.u32 4294901760, %v9471_v62  ;;  %v9598_v38 = vand.u32 4294901760, %v9597_v55  ;;  %v29156_v55 = vand.u32 4294901760, %v25832_v21 }
 0x6c1   :  { %19596 = vmatprep.subr.bf16.mxu1 %v25867_v19  ;;  %v9590_v35 = vsub.f32 %v26057_v10, %v28338_v41  ;;  %v9485_v63 = vsub.f32 %v26079_v56, %v28344_v27  ;;  %v29149_v41 = vand.u32 4294901760, %v25815_v25 }
 0x6c3   :  { %v9591_v40 = vand.u32 4294901760, %v9590_v35  ;;  %v26121_v35 = vpack.c.bf16 %v9472_v13, %v9465_v45  ;;  %v9486_v27 = vand.u32 4294901760, %v9485_v63  ;;  %v29158_v13 = vand.u32 4294901760, %v25838_v23 }
 0x6c4   :  { %19598 = vmatpush3.bf16.msra.mxu1 %v25891_v34  ;;  %v29160_v63 = vand.u32 4294901760, %v25843_v7 }
 0x6c5   :  { %19600 = vmatprep.subr.bf16.mxu1 %v25897_v47  ;;  %v26129_v15 = vpack.c.bf16 %v9598_v38, %v9591_v40  ;;  %v26142_v45 = vpack.c.bf16 %v9486_v27, %v9479_v0  ;;  %v29162_v0 = vand.u32 4294901760, %v25851_v1 }
 0x6c6   :  { %v26151_v2 = vsub.f32 %v25843_v7, %v29160_v63 }
 0x6c7   :  { %v26162_v38 = vsub.f32 %v25851_v1, %v29162_v0 }
 0x6c8   :  { %19602 = vmatpush3.bf16.msra.mxu1 %v25921_v22  ;;  %29161 = vst [vmem:[#allocation32_spill] sm:$0xff] %v26151_v2 }
 0x6c9   :  { %19604 = vmatprep.subr.bf16.mxu1 %v25946_v20  ;;  %29163 = vst [vmem:[#allocation12_spill] sm:$0xff] %v26162_v38  ;;  %v28356_v0 = vand.u32 4294901760, %v26162_v38 }
 0x6cc   :  { %19606 = vmatpush3.bf16.msra.mxu1 %v25971_v58  ;;  %v29152_v58 = vand.u32 4294901760, %v25820_v14 }
 0x6cd   :  { %19608 = vmatprep.subr.bf16.mxu1 %v25977_v3  ;;  %v26110_v3 = vsub.f32 %v25815_v25, %v29149_v41  ;;  %v29154_v25 = vand.u32 4294901760, %v25825_v51 }
 0x6ce   :  { %v26118_v62 = vsub.f32 %v25820_v14, %v29152_v58  ;;  %v26135_v14 = vsub.f32 %v25832_v21, %v29156_v55  ;;  %v26140_v58 = vsub.f32 %v25838_v23, %v29158_v13  ;;  %v28353_v55 = vand.u32 4294901760, %v26151_v2 }
 0x6cf   :  { %29150 = vst [vmem:[#allocation23_spill] sm:$0xff] %v26110_v3  ;;  %v28347_v50 = vand.u32 4294901760, %v26110_v3  ;;  %v26127_v41 = vsub.f32 %v25825_v51, %v29154_v25  ;;  %v29164_v13 = vand.u32 4294901760, %v25856_v59 }
 0x6d0   :  { %19610 = vmatpush3.bf16.msra.mxu1 %v26000_v48  ;;  %29153 = vst [vmem:[#allocation24_spill] sm:$0xff] %v26118_v62  ;;  %v28346_v42 = vand.u32 4294901760, %v26118_v62  ;;  %29157 = vst [vmem:[#allocation30_spill] sm:$0xff] %v26135_v14  ;;  %v28351_v23 = vand.u32 4294901760, %v26135_v14  ;;  %v28352_v27 = vand.u32 4294901760, %v26140_v58 }
 0x6d1   :  { %19612 = vmatprep.subr.bf16.mxu1 %v26009_v8  ;;  %29155 = vst [vmem:[#allocation9_spill] sm:$0xff] %v26127_v41  ;;  %29159 = vst [vmem:[#allocation10_spill] sm:$0xff] %v26140_v58  ;;  %v9604_v51 = vsub.f32 %v26110_v3, %v28347_v50  ;;  %v28348_v40 = vand.u32 4294901760, %v26127_v41  ;;  %v26172_v63 = vsub.f32 %v25856_v59, %v29164_v13  ;;  %v29166_v59 = vand.u32 4294901760, %v25861_v49 }
 0x6d2   :  { %v9611_v21 = vsub.f32 %v26118_v62, %v28346_v42  ;;  %v9499_v1 = vsub.f32 %v26135_v14, %v28351_v23 }
 0x6d3   :  { %v9605_v25 = vand.u32 4294901760, %v9604_v51  ;;  %v9492_v7 = vsub.f32 %v26127_v41, %v28348_v40  ;;  %29165 = vst [vmem:[#allocation37_spill] sm:$0xff] %v26172_v63  ;;  %v9618_v51 = vsub.f32 %v26140_v58, %v28352_v27  ;;  %v9625_v40 = vsub.f32 %v26151_v2, %v28353_v55 }
 0x6d4   :  { %19614 = vmatpush3.bf16.msra.mxu1 %v26023_v30  ;;  %v9612_v42 = vand.u32 4294901760, %v9611_v21  ;;  %v26188_v21 = vsub.f32 %v25861_v49, %v29166_v59  ;;  %v9500_v23 = vand.u32 4294901760, %v9499_v1  ;;  %v29168_v59 = vand.u32 4294901760, %v25874_v53 }
 0x6d5   :  { %19616 = vmatprep.subr.bf16.mxu1 %v26029_v44  ;;  %v9493_v50 = vand.u32 4294901760, %v9492_v7  ;;  %v28358_v44 = vand.u32 4294901760, %v26172_v63  ;;  %v9619_v27 = vand.u32 4294901760, %v9618_v51  ;;  %v9506_v7 = vsub.f32 %v26162_v38, %v28356_v0 }
 0x6d6   :  { %29167 = vst [vmem:[#allocation13_spill] sm:$0xff] %v26188_v21  ;;  %v26191_v13 = vpack.c.bf16 %v9612_v42, %v9605_v25  ;;  %v9626_v55 = vand.u32 4294901760, %v9625_v40  ;;  %v26204_v42 = vsub.f32 %v25874_v53, %v29168_v59  ;;  %v29170_v51 = vand.u32 4294901760, %v25880_v33 }
 0x6d7   :  { %v9513_v30 = vsub.f32 %v26172_v63, %v28358_v44  ;;  %v26206_v25 = vpack.c.bf16 %v9500_v23, %v9493_v50  ;;  %v9507_v1 = vand.u32 4294901760, %v9506_v7  ;;  %v29172_v40 = vand.u32 4294901760, %v25885_v17 }
 0x6d8   :  { %19618 = vmatpush3.bf16.msra.mxu1 %v26046_v61  ;;  %29169 = vst [vmem:[#allocation39_spill] sm:$0xff] %v26204_v42  ;;  %v26211_v0 = vsub.f32 %v25880_v33, %v29170_v51  ;;  %v26218_v44 = vpack.c.bf16 %v9626_v55, %v9619_v27  ;;  %v29174_v61 = vand.u32 4294901760, %v26188_v21  ;;  %v28362_v50 = vand.u32 4294901760, %v26204_v42 }
 0x6d9   :  { %19620 = vmatprep.subr.bf16.mxu1 %v26113_v9  ;;  %v26216_v9 = vsub.f32 %v25885_v17, %v29172_v40  ;;  %v9514_v49 = vand.u32 4294901760, %v9513_v30  ;;  %v29175_v33 = vand.u32 4294901760, %v25904_v57  ;;  %v29177_v17 = vand.u32 4294901760, %v25909_v46 }
 0x6da   :  { %29171 = vst [vmem:[#allocation17_spill] sm:$0xff] %v26211_v0  ;;  %v9632_v53 = vsub.f32 %v26188_v21, %v29174_v61  ;;  %v28361_v23 = vand.u32 4294901760, %v26211_v0  ;;  %v9639_v61 = vsub.f32 %v26204_v42, %v28362_v50  ;;  %v29179_v51 = vand.u32 4294901760, %v25914_v29 }
 0x6db   :  { %29173 = vst [vmem:[#allocation42_spill] sm:$0xff] %v26216_v9  ;;  %v28365_v7 = vand.u32 4294901760, %v26216_v9  ;;  %v26229_v59 = vsub.f32 %v25904_v57, %v29175_v33  ;;  %v26234_v27 = vsub.f32 %v25909_v46, %v29177_v17  ;;  %v26236_v30 = vpack.c.bf16 %v9514_v49, %v9507_v1 }
 0x6dc   :  { %v9633_v55 = vand.u32 4294901760, %v9632_v53  ;;  %v26244_v40 = vsub.f32 %v25914_v29, %v29179_v51  ;;  %v9520_v57 = vsub.f32 %v26211_v0, %v28361_v23  ;;  %v9640_v53 = vand.u32 4294901760, %v9639_v61 }
 0x6dd   :  { %29176 = vst [vmem:[#allocation20_spill] sm:$0xff] %v26229_v59  ;;  %29178 = vst [vmem:[#allocation44_spill] sm:$0xff] %v26234_v27  ;;  %v9527_v46 = vsub.f32 %v26216_v9, %v28365_v7  ;;  %v28368_v49 = vand.u32 4294901760, %v26229_v59  ;;  %v28371_v1 = vand.u32 4294901760, %v26234_v27  ;;  %v29181_v17 = vand.u32 4294901760, %v25929_v43 }
 0x6de   :  { %29180 = vst [vmem:[#allocation27_spill] sm:$0xff] %v26244_v40  ;;  %v29183_v51 = vand.u32 4294901760, %v25934_v36  ;;  %v9521_v50 = vand.u32 4294901760, %v9520_v57  ;;  %v26271_v33 = vpack.c.bf16 %v9640_v53, %v9633_v55 }
 0x6df   :  { %v26258_v29 = vsub.f32 %v25929_v43, %v29181_v17  ;;  %v9528_v8 = vand.u32 4294901760, %v9527_v46  ;;  %v9646_v7 = vsub.f32 %v26229_v59, %v28368_v49  ;;  %v9653_v61 = vsub.f32 %v26234_v27, %v28371_v1 }
 0x6e0   :  { %v26263_v23 = vsub.f32 %v25934_v36, %v29183_v51  ;;  %v29185_v43 = vand.u32 4294901760, %v26244_v40  ;;  %v29186_v49 = vand.u32 4294901760, %v25939_v4 }
 0x6e1   :  { %29182 = vst [vmem:[#allocation49_spill] sm:$0xff] %v26258_v29  ;;  %v28373_v48 = vand.u32 4294901760, %v26258_v29  ;;  %v26278_v57 = vpack.c.bf16 %v9528_v8, %v9521_v50  ;;  %v9647_v46 = vand.u32 4294901760, %v9646_v7  ;;  %v9654_v51 = vand.u32 4294901760, %v9653_v61 }
 0x6e2   :  { %29184 = vst [vmem:[#allocation28_spill] sm:$0xff] %v26263_v23  ;;  %v9534_v17 = vsub.f32 %v26244_v40, %v29185_v43  ;;  %v28372_v36 = vand.u32 4294901760, %v26263_v23  ;;  %v26283_v20 = vsub.f32 %v25939_v4, %v29186_v49  ;;  %v29188_v43 = vand.u32 4294901760, %v25954_v12 }
 0x6e3   :  { %v9541_v55 = vsub.f32 %v26258_v29, %v28373_v48  ;;  %v26296_v50 = vpack.c.bf16 %v9654_v51, %v9647_v46  ;;  %v29190_v4 = vand.u32 4294901760, %v25959_v26  ;;  %v29192_v61 = vand.u32 4294901760, %v25964_v11 }
 0x6e4   :  { %29187 = vst [vmem:[#allocation55_spill] sm:$0xff] %v26283_v20  ;;  %v9535_v1 = vand.u32 4294901760, %v9534_v17  ;;  %v9660_v53 = vsub.f32 %v26263_v23, %v28372_v36  ;;  %v26294_v8 = vsub.f32 %v25954_v12, %v29188_v43  ;;  %v28376_v7 = vand.u32 4294901760, %v26283_v20 }
 0x6e5   :  { %v26302_v49 = vsub.f32 %v25959_v26, %v29190_v4  ;;  %v26307_v17 = vsub.f32 %v25964_v11, %v29192_v61  ;;  %v9542_v36 = vand.u32 4294901760, %v9541_v55  ;;  %v29194_v12 = vand.u32 4294901760, %v25984_v39 }
 0x6e6   :  { %29189 = vst [vmem:[#allocation47_spill] sm:$0xff] %v26294_v8  ;;  %v9661_v48 = vand.u32 4294901760, %v9660_v53  ;;  %v28377_v22 = vand.u32 4294901760, %v26294_v8  ;;  %v9667_v51 = vsub.f32 %v26283_v20, %v28376_v7  ;;  %v29196_v11 = vand.u32 4294901760, %v25989_v54 }
 0x6e7   :  { %29191 = vst [vmem:[#allocation57_spill] sm:$0xff] %v26302_v49  ;;  %29193 = vst [vmem:[#allocation48_spill] sm:$0xff] %v26307_v17  ;;  %v26313_v46 = vsub.f32 %v25984_v39, %v29194_v12  ;;  %v28380_v26 = vand.u32 4294901760, %v26302_v49  ;;  %v26325_v53 = vpack.c.bf16 %v9542_v36, %v9535_v1  ;;  %v29198_v61 = vand.u32 4294901760, %v25994_v37 }
 0x6e8   :  { %v26323_v55 = vsub.f32 %v25989_v54, %v29196_v11  ;;  %v9548_v39 = vsub.f32 %v26294_v8, %v28377_v22  ;;  %v9668_v7 = vand.u32 4294901760, %v9667_v51  ;;  %v29200_v54 = vand.u32 4294901760, %v26307_v17 }
 0x6e9   :  { %29195 = vst [vmem:[#allocation58_spill] sm:$0xff] %v26313_v46  ;;  %v28383_v4 = vand.u32 4294901760, %v26313_v46  ;;  %v26334_v12 = vsub.f32 %v25994_v37, %v29198_v61  ;;  %v9555_v43 = vsub.f32 %v26302_v49, %v28380_v26  ;;  %v26349_v37 = vpack.c.bf16 %v26034_v18, %v26016_v5 }
 0x6ea   :  { %29197 = vst [vmem:[#allocation51_spill] sm:$0xff] %v26323_v55  ;;  %v9674_v1 = vsub.f32 %v26307_v17, %v29200_v54  ;;  %v28386_v36 = vand.u32 4294901760, %v26323_v55  ;;  %v9549_v11 = vand.u32 4294901760, %v9548_v39  ;;  %v26351_v51 = vpack.c.bf16 %v9668_v7, %v9661_v48 }
 0x6eb   :  { %29199 = vst [vmem:[#allocation52_spill] sm:$0xff] %v26334_v12  ;;  %v9681_v22 = vsub.f32 %v26313_v46, %v28383_v4  ;;  %v28385_v47 = vand.u32 4294901760, %v26334_v12  ;;  %v9556_v61 = vand.u32 4294901760, %v9555_v43  ;;  %v26361_v4 = vpack.c.bf16 %v26052_v32, %v26039_v6 }
 0x6ec   :  { %v9675_v26 = vand.u32 4294901760, %v9674_v1  ;;  %v9562_v54 = vsub.f32 %v26323_v55, %v28386_v36  ;;  %v26365_v18 = vpack.c.bf16 %v26064_v16, %v26057_v10  ;;  %v26371_v43 = vpack.c.bf16 %v26079_v56, %v26069_v31 }
 0x6ed   :  { %v9682_v34 = vand.u32 4294901760, %v9681_v22  ;;  %v9569_v39 = vsub.f32 %v26334_v12, %v28385_v47  ;;  %v26367_v48 = vpack.c.bf16 %v9556_v61, %v9549_v11  ;;  %v26377_v47 = vpack.c.bf16 %v26118_v62, %v26110_v3 }
 0x6ee   :  { %v9563_v7 = vand.u32 4294901760, %v9562_v54  ;;  %v26381_v36 = vpack.c.bf16 %v26135_v14, %v26127_v41  ;;  %v26387_v11 = vpack.c.bf16 %v26151_v2, %v26140_v58  ;;  %v26391_v61 = vpack.c.bf16 %v26172_v63, %v26162_v38 }
 0x6ef   :  { %v26373_v22 = vpack.c.bf16 %v9682_v34, %v9675_v26  ;;  %v9570_v1 = vand.u32 4294901760, %v9569_v39  ;;  %v26395_v34 = vpack.c.bf16 %v26204_v42, %v26188_v21  ;;  %v26399_v26 = vpack.c.bf16 %v26216_v9, %v26211_v0 }
 0x6f0   :  { %v26403_v54 = vpack.c.bf16 %v26234_v27, %v26229_v59  ;;  %v26407_v39 = vpack.c.bf16 %v26258_v29, %v26244_v40  ;;  %v26419_v9 = vpack.c.bf16 %v26313_v46, %v26307_v17  ;;  %v26423_v27 = vpack.c.bf16 %v26334_v12, %v26323_v55 }
 0x6f1   :  { %v26383_v16 = vpack.c.bf16 %v9570_v1, %v9563_v7  ;;  %v26411_v7 = vpack.c.bf16 %v26283_v20, %v26263_v23  ;;  %v26415_v1 = vpack.c.bf16 %v26302_v49, %v26294_v8 }
 0x6f2   :  { %29203 = vst [vmem:[#allocation59_spill] sm:$0xff] %v26419_v9  ;;  %29204 = vst [vmem:[#allocation60_spill] sm:$0xff] %v26423_v27 }
 0x6f3   :  { %29201 = vst [vmem:[#allocation53_spill] sm:$0xff] %v26411_v7  ;;  %29202 = vst [vmem:[#allocation56_spill] sm:$0xff] %v26415_v1 }
 0x776   :  { %v26425_v59 = vpop.f32.mrb[60].mxu0 }
 0x777   :  { %29205 = vst [vmem:[#allocation61_spill] sm:$0xff] %v26425_v59  ;;  %v26427_v29 = vpop.f32.mrb[61].mxu0  ;;  %v9306_v20 = vmul.f32 %v26425_v59, %v26425_v59 }
 0x778   :  { %29206 = vst [vmem:[#allocation62_spill] sm:$0xff] %v26427_v29  ;;  %v26429_v40 = vpop.f32.mrb[62].mxu0  ;;  %v9307_v12 = vmul.f32 %v26427_v29, %v26427_v29 }
 0x779   :  { %29207 = vst [vmem:[#allocation63_spill] sm:$0xff] %v26429_v40  ;;  %v9280_v49 = vadd.f32 %v26429_v40, %v26425_v59  ;;  %v9308_v46 = vmul.f32 %v26429_v40, %v26429_v40  ;;  %v26437_v17 = vpop.f32.mrb[63].mxu0 }
 0x77a   :  { %29208 = vst [vmem:[#allocation64_spill] sm:$0xff] %v26437_v17  ;;  %v9293_v55 = vadd.f32 %v26437_v17, %v26427_v29  ;;  %v9309_v8 = vmul.f32 %v26437_v17, %v26437_v17 }
 0x77b   :  { %v9322_v23 = vadd.f32 %v9308_v46, %v9306_v20 }
 0x77c   :  { %v9335_v0 = vadd.f32 %v9309_v8, %v9307_v12 }
 0x77e   :  { %v26445_v42 = vpop.f32.mrb[64].mxu0 }
 0x77f   :  { %29209 = vst [vmem:[#allocation65_spill] sm:$0xff] %v26445_v42  ;;  %v9281_v59 = vadd.f32 %v9280_v49, %v26445_v42  ;;  %v9310_v40 = vmul.f32 %v26445_v42, %v26445_v42  ;;  %v26450_v21 = vpop.f32.mrb[65].mxu0 }
 0x780   :  { %29210 = vst [vmem:[#allocation66_spill] sm:$0xff] %v26450_v21  ;;  %v9294_v63 = vadd.f32 %v9293_v55, %v26450_v21  ;;  %v9311_v38 = vmul.f32 %v26450_v21, %v26450_v21  ;;  %v26455_v29 = vpop.f32.mrb[66].mxu0 }
 0x781   :  { %29211 = vst [vmem:[#allocation67_spill] sm:$0xff] %v26455_v29  ;;  %v9323_v2 = vadd.f32 %v9322_v23, %v9310_v40  ;;  %v9282_v20 = vadd.f32 %v9281_v59, %v26455_v29  ;;  %v9312_v8 = vmul.f32 %v26455_v29, %v26455_v29  ;;  %v26460_v46 = vpop.f32.mrb[67].mxu0 }
 0x782   :  { %29212 = vst [vmem:[#allocation68_spill] sm:$0xff] %v26460_v46  ;;  %v9336_v49 = vadd.f32 %v9335_v0, %v9311_v38  ;;  %v9295_v12 = vadd.f32 %v9294_v63, %v26460_v46  ;;  %v9313_v17 = vmul.f32 %v26460_v46, %v26460_v46 }
 0x783   :  { %v9324_v55 = vadd.f32 %v9323_v2, %v9312_v8 }
 0x784   :  { %v9337_v42 = vadd.f32 %v9336_v49, %v9313_v17 }
 0x786   :  { %v26465_v58 = vpop.f32.mrb[68].mxu0 }
 0x787   :  { %29213 = vst [vmem:[#allocation69_spill] sm:$0xff] %v26465_v58  ;;  %v9283_v21 = vadd.f32 %v9282_v20, %v26465_v58  ;;  %v9314_v23 = vmul.f32 %v26465_v58, %v26465_v58  ;;  %v26470_v59 = vpop.f32.mrb[69].mxu0 }
 0x788   :  { %29214 = vst [vmem:[#allocation70_spill] sm:$0xff] %v26470_v59  ;;  %v9296_v40 = vadd.f32 %v9295_v12, %v26470_v59  ;;  %v9315_v38 = vmul.f32 %v26470_v59, %v26470_v59  ;;  %v26475_v63 = vpop.f32.mrb[70].mxu0 }
 0x789   :  { %29215 = vst [vmem:[#allocation71_spill] sm:$0xff] %v26475_v63  ;;  %v9325_v0 = vadd.f32 %v9324_v55, %v9314_v23  ;;  %v9284_v2 = vadd.f32 %v9283_v21, %v26475_v63  ;;  %v9316_v17 = vmul.f32 %v26475_v63, %v26475_v63  ;;  %v26480_v8 = vpop.f32.mrb[71].mxu0 }
 0x78a   :  { %29216 = vst [vmem:[#allocation143_spill] sm:$0xff] %v26480_v8  ;;  %v9338_v20 = vadd.f32 %v9337_v42, %v9315_v38  ;;  %v9297_v49 = vadd.f32 %v9296_v40, %v26480_v8  ;;  %v9317_v29 = vmul.f32 %v26480_v8, %v26480_v8 }
 0x78b   :  { %v9326_v12 = vadd.f32 %v9325_v0, %v9316_v17 }
 0x78c   :  { %v9339_v46 = vadd.f32 %v9338_v20, %v9317_v29 }
 0x78e   :  { %v26485_v58 = vpop.f32.mrb[72].mxu0 }
 0x78f   :  { %29217 = vst [vmem:[#allocation72_spill] sm:$0xff] %v26485_v58  ;;  %v9285_v59 = vadd.f32 %v9284_v2, %v26485_v58  ;;  %v9318_v21 = vmul.f32 %v26485_v58, %v26485_v58  ;;  %v26490_v55 = vpop.f32.mrb[73].mxu0 }
 0x790   :  { %29218 = vst [vmem:[#allocation73_spill] sm:$0xff] %v26490_v55  ;;  %v9298_v23 = vadd.f32 %v9297_v49, %v26490_v55  ;;  %v9319_v42 = vmul.f32 %v26490_v55, %v26490_v55  ;;  %v26495_v40 = vpop.f32.mrb[74].mxu0 }
 0x791   :  { %29219 = vst [vmem:[#allocation74_spill] sm:$0xff] %v26495_v40  ;;  %v9327_v38 = vadd.f32 %v9326_v12, %v9318_v21  ;;  %v9286_v0 = vadd.f32 %v9285_v59, %v26495_v40  ;;  %v9320_v29 = vmul.f32 %v26495_v40, %v26495_v40  ;;  %v26500_v17 = vpop.f32.mrb[75].mxu0 }
 0x792   :  { %29220 = vst [vmem:[#allocation150_spill] sm:$0xff] %v26500_v17  ;;  %v9340_v2 = vadd.f32 %v9339_v46, %v9319_v42  ;;  %v9299_v20 = vadd.f32 %v9298_v23, %v26500_v17  ;;  %v9321_v63 = vmul.f32 %v26500_v17, %v26500_v17 }
 0x793   :  { %v9287_v49 = vrot.slane %v9286_v0, 4  ;;  %v26505_v58 = vadd.f32 %v9327_v38, %v9320_v29 }
 0x794   :  { %v9300_v8 = vrot.slane %v9299_v20, 4  ;;  %v26507_v55 = vadd.f32 %v9340_v2, %v9321_v63 }
 0x795   :  { %v9288_v12 = vadd.f32 %v9287_v49, %v9286_v0  ;;  %v29225_v49 = vld [vmem:[#allocation167_spill] sm:$0xff] }
 0x796   :  { %v9301_v21 = vadd.f32 %v9300_v8, %v9299_v20  ;;  %v29224_v20 = vld [vmem:[#allocation166_spill] sm:$0xff] }
 0x797   :  { %v9289_v59 = vrot.slane %v9288_v12, 2 }
 0x798   :  { %v9302_v14 = vrot.slane %v9301_v21, 2 }
 0x799   :  { %v9290_v41 = vadd.f32 %v9289_v59, %v9288_v12  ;;  %v29226_v12 = vld [vmem:[#allocation177_spill] sm:$0xff] }
 0x79a   :  { %v9303_v40 = vadd.f32 %v9302_v14, %v9301_v21  ;;  %v29227_v21 = vld [vmem:[#allocation142_spill] sm:$0xff]  ;;  %v29228_v59 = vld [vmem:[#allocation29_spill] sm:$0xff] }
 0x79b   :  { %v9291_v62 = vrot.slane %v9290_v41, 1 }
 0x79c   :  { %v9304_v3 = vrot.slane %v9303_v40, 1 }
 0x79d   :  { %v9292_v46 = vadd.f32 %v9291_v62, %v9290_v41  ;;  %v29222_v41 = vld [vmem:[#allocation163_spill] sm:$0xff] }
 0x79e   :  { %v9305_v42 = vadd.f32 %v9304_v3, %v9303_v40  ;;  %v29221_v3 = vld [vmem:[#allocation162_spill] sm:$0xff]  ;;  %v29223_v40 = vld [vmem:[#allocation165_spill] sm:$0xff] }
 0x79f   :  { %v26509_v23 = vand.u32 4294901760, %v9292_v46 }
 0x7a0   :  { %v26511_v56 = vand.u32 4294901760, %v9305_v42 }
 0x7a1   :  { %v26514_v38 = vsub.f32 %v9292_v46, %v26509_v23  ;;  %v29229_v46 = vld [vmem:[#allocation140_spill] sm:$0xff] }
 0x7a2   :  { %v9445_v63 = vsub.f32 %v9305_v42, %v26511_v56  ;;  %v29230_v42 = vld [vmem:[#allocation7_spill] sm:$0xff] }
 0x7a3   :  { %v28428_v0 = vand.u32 4294901760, %v26514_v38 }
 0x7a4   :  { %v9446_v8 = vand.u32 4294901760, %v9445_v63 }
 0x7a5   :  { %v9453_v14 = vsub.f32 %v26514_v38, %v28428_v0  ;;  %v29236_v0 = vand.u32 4294901760, %v26052_v32  ;;  %v29244_v32 = vld [vmem:[#allocation5_spill] sm:$0xff] }
 0x7a6   :  { %v9447_v29 = vsub.f32 %v9445_v63, %v9446_v8 }
 0x7a7   :  { %v9454_v62 = vand.u32 4294901760, %v9453_v14 }
 0x7a8   :  { %v9448_v2 = vand.u32 4294901760, %v9447_v29 }
 0x7aa   :  { %9449 = vmatprep.mubr.f32.mxu1 %v9448_v2  ;;  %v29234_v2 = vld [vmem:[#allocation11_spill] sm:$0xff] }
 0x7ab   :  { %9455 = vmatmul.mubr.f32.vlgmr.msra.gmra.mrb[60].mxu1 %v9454_v62  ;;  %v29235_v62 = vand.u32 4294901760, %v26039_v6  ;;  %v29243_v6 = vand.u32 4294901760, %v26069_v31  ;;  %v29257_v31 = vld [vmem:[#allocation10_spill] sm:$0xff] }
 0x7ac   :  { %19622 = vmatpush3.bf16.msra.mxu1 %v26121_v35  ;;  %9685 = vmatprep.mubr.f32.mxu1 %v26511_v56 }
 0x7ad   :  { %19624 = vmatprep.subr.bf16.mxu1 %v26129_v15  ;;  %v26581_v17 = vpack.c.bf16 %v29236_v0, %v29235_v62  ;;  %v29245_v0 = vand.u32 4294901760, %v29244_v32  ;;  %v29254_v62 = vld [vmem:[#allocation30_spill] sm:$0xff]  ;;  %v29259_v32 = vld [vmem:[#allocation32_spill] sm:$0xff] }
 0x7af   :  { %29237 = vst [vmem:[#allocation154_spill] sm:$0xff] %v26581_v17 }
 0x7b0   :  { %19626 = vmatpush3.bf16.msra.mxu1 %v26142_v45 }
 0x7b1   :  { %19628 = vmatprep.subr.bf16.mxu1 %v26191_v13 }
 0x7b4   :  { %19630 = vmatpush3.bf16.msra.mxu1 %v26206_v25 }
 0x7b5   :  { %19632 = vmatprep.subr.bf16.mxu1 %v26218_v44 }
 0x7b8   :  { %19634 = vmatpush3.bf16.msra.mxu1 %v26236_v30 }
 0x7b9   :  { %19636 = vmatprep.subr.bf16.mxu1 %v26271_v33 }
 0x7bc   :  { %19638 = vmatpush3.bf16.msra.mxu1 %v26278_v57 }
 0x7bd   :  { %19640 = vmatprep.subr.bf16.mxu1 %v26296_v50 }
 0x7c0   :  { %19642 = vmatpush3.bf16.msra.mxu1 %v26325_v53 }
 0x7c1   :  { %19644 = vmatprep.subr.bf16.mxu1 %v26351_v51 }
 0x7c4   :  { %19646 = vmatpush3.bf16.msra.mxu1 %v26367_v48 }
 0x7c5   :  { %19648 = vmatprep.subr.bf16.mxu1 %v26373_v22 }
 0x7c8   :  { %19650 = vmatpush3.bf16.msra.mxu1 %v26383_v16 }
 0x7c9   :  { %19652 = vmatprep.subr.bf16.mxu1 %v26349_v37 }
 0x7cb   :  { %9687 = vmatmul.mubr.f32.vlgmr.msra.gmra.mrb[62].mxu1 %v26509_v23 }
 0x7cc   :  { %19654 = vmatpush3.bf16.msra.mxu1 %v26361_v4  ;;  %9822 = vmatprep.mubr.f32.mxu1 %v9445_v63  ;;  %v29231_v63 = vand.u32 4294901760, %v26016_v5  ;;  %v29242_v5 = vand.u32 4294901760, %v26514_v38 }
 0x7cd   :  { %19656 = vmatprep.subr.bf16.mxu1 %v26365_v18 }
 0x7d0   :  { %19658 = vmatpush3.bf16.msra.mxu1 %v26371_v43 }
 0x7d1   :  { %19660 = vmatprep.subr.bf16.mxu1 %v26377_v47 }
 0x7d4   :  { %19662 = vmatpush3.bf16.msra.mxu1 %v26381_v36 }
 0x7d5   :  { %19664 = vmatprep.subr.bf16.mxu1 %v26387_v11 }
 0x7d8   :  { %19666 = vmatpush3.bf16.msra.mxu1 %v26391_v61 }
 0x7d9   :  { %19668 = vmatprep.subr.bf16.mxu1 %v26395_v34 }
 0x7dc   :  { %19670 = vmatpush3.bf16.msra.mxu1 %v26399_v26 }
 0x7dd   :  { %19672 = vmatprep.subr.bf16.mxu1 %v26403_v54 }
 0x7e0   :  { %19674 = vmatpush3.bf16.msra.mxu1 %v26407_v39 }
 0x7e1   :  { %19676 = vmatprep.subr.bf16.mxu1 %v26411_v7 }
 0x7e4   :  { %19678 = vmatpush3.bf16.msra.mxu1 %v26415_v1 }
 0x7e5   :  { %19680 = vmatprep.subr.bf16.mxu1 %v26419_v9  ;;  %v29239_v9 = vld [vmem:[#allocation14_spill] sm:$0xff] }
 0x7e6   :  { %v29240_v1 = vand.u32 4294901760, %v29239_v9  ;;  %v29249_v9 = vld [vmem:[#allocation24_spill] sm:$0xff] }
 0x7e8   :  { %19682 = vmatpush3.bf16.msra.mxu1 %v26423_v27  ;;  %v29238_v27 = vand.u32 4294901760, %v26057_v10  ;;  %v29247_v10 = vld [vmem:[#allocation23_spill] sm:$0xff] }
 0x7e9   :  { %19684 = vmatprep.subr.bf16.mxu1 %v25764_v24 }
 0x7ea   :  { %v26588_v7 = vpack.c.bf16 %v29240_v1, %v29238_v27  ;;  %v29250_v27 = vand.u32 4294901760, %v29249_v9  ;;  %v29264_v9 = vld [vmem:[#allocation37_spill] sm:$0xff] }
 0x7eb   :  { %9825 = vmatmul.mubr.f32.vlgmr.msra.gmra.mrb[64].mxu1 %v26514_v38  ;;  %v29252_v38 = vld [vmem:[#allocation9_spill] sm:$0xff] }
 0x7ec   :  { %19686 = vmatpush3.bf16.msra.mxu1 %v25770_v28  ;;  %9929 = vmatprep.mubr.f32.mxu1 %v9446_v8  ;;  %v29232_v8 = vld [vmem:[#allocation8_spill] sm:$0xff]  ;;  %29241 = vst [vmem:[#allocation155_spill] sm:$0xff] %v26588_v7 }
 0x7ed   :  { %19688 = vmatprep.subr.bf16.mxu1 %v25802_v52  ;;  %v29233_v14 = vand.u32 4294901760, %v29232_v8  ;;  %v29248_v8 = vand.u32 4294901760, %v29247_v10  ;;  %v29262_v10 = vld [vmem:[#allocation12_spill] sm:$0xff] }
 0x7ef   :  { %v26574_v29 = vpack.c.bf16 %v29233_v14, %v29231_v63  ;;  %v26598_v63 = vpack.c.bf16 %v29245_v0, %v29243_v6  ;;  %v26605_v1 = vpack.c.bf16 %v29250_v27, %v29248_v8  ;;  %v29253_v14 = vand.u32 4294901760, %v29252_v38  ;;  %v29267_v38 = vld [vmem:[#allocation13_spill] sm:$0xff] }
 0x7f0   :  { %19690 = vmatpush3.bf16.msra.mxu1 %v25808_v60  ;;  %v29258_v6 = vand.u32 4294901760, %v29257_v31  ;;  %v29260_v0 = vand.u32 4294901760, %v29259_v32  ;;  %v29263_v8 = vand.u32 4294901760, %v29262_v10  ;;  %v29265_v27 = vand.u32 4294901760, %v29264_v9  ;;  %v29272_v31 = vld [vmem:[#allocation17_spill] sm:$0xff]  ;;  %v29274_v32 = vld [vmem:[#allocation42_spill] sm:$0xff] }
 0x7f1   :  { %19692 = vmatprep.subr.bf16.mxu1 %v25867_v19  ;;  %29246 = vst [vmem:[#allocation159_spill] sm:$0xff] %v26598_v63  ;;  %29251 = vst [vmem:[#allocation160_spill] sm:$0xff] %v26605_v1  ;;  %v29277_v10 = vld [vmem:[#allocation20_spill] sm:$0xff] }
 0x7f2   :  { %v29279_v9 = vld [vmem:[#allocation44_spill] sm:$0xff] }
 0x7f4   :  { %19694 = vmatpush3.bf16.msra.mxu1 %v29221_v3 }
 0x7f5   :  { %19696 = vmatprep.subr.bf16.mxu1 %v29222_v41 }
 0x7f8   :  { %19698 = vmatpush3.bf16.msra.mxu1 %v29223_v40 }
 0x7f9   :  { %19700 = vmatprep.subr.bf16.mxu1 %v29224_v20 }
 0x7fc   :  { %19702 = vmatpush3.bf16.msra.mxu1 %v29225_v49 }
 0x7fd   :  { %19704 = vmatprep.subr.bf16.mxu1 %v29226_v12 }
 0x800   :  { %19706 = vmatpush3.bf16.msra.mxu1 %v29227_v21 }
 0x801   :  { %19708 = vmatprep.subr.bf16.mxu1 %v29228_v59 }
 0x804   :  { %19710 = vmatpush3.bf16.msra.mxu1 %v29229_v46 }
 0x805   :  { %19712 = vmatprep.subr.bf16.mxu1 %v29230_v42 }
 0x808   :  { %19714 = vmatpush3.bf16.msra.mxu1 %v29234_v2 }
 0x809   :  { %19716 = vmatprep.subr.bf16.mxu1 %v26574_v29 }
 0x80b   :  { %9933 = vmatmul.mubr.f32.vlgmr.msra.gmra.mrb[66].mxu1 %v29242_v5  ;;  %v29255_v5 = vand.u32 4294901760, %v29254_v62  ;;  %v29269_v62 = vld [vmem:[#allocation39_spill] sm:$0xff] }
 0x80c   :  { %19718 = vmatpush3.bf16.msra.mxu1 %v26581_v17  ;;  %10099 = vmatprep.mubr.f32.mxu1 %v26511_v56 }
 0x80d   :  { %19720 = vmatprep.subr.bf16.mxu1 %v26588_v7  ;;  %v26612_v17 = vpack.c.bf16 %v29255_v5, %v29253_v14  ;;  %v26619_v7 = vpack.c.bf16 %v29260_v0, %v29258_v6  ;;  %v29268_v14 = vand.u32 4294901760, %v29267_v38  ;;  %v29270_v5 = vand.u32 4294901760, %v29269_v62  ;;  %v29282_v38 = vld [vmem:[#allocation27_spill] sm:$0xff]  ;;  %v29284_v62 = vld [vmem:[#allocation49_spill] sm:$0xff] }
 0x80e   :  { %v29273_v6 = vand.u32 4294901760, %v29272_v31  ;;  %v29275_v0 = vand.u32 4294901760, %v29274_v32  ;;  %v29287_v31 = vld [vmem:[#allocation28_spill] sm:$0xff]  ;;  %v29289_v32 = vld [vmem:[#allocation55_spill] sm:$0xff] }
 0x80f   :  { %29256 = vst [vmem:[#allocation15_spill] sm:$0xff] %v26612_v17  ;;  %29261 = vst [vmem:[#allocation18_spill] sm:$0xff] %v26619_v7 }
 0x810   :  { %19722 = vmatpush3.bf16.msra.mxu1 %v26598_v63  ;;  %v26626_v63 = vpack.c.bf16 %v29265_v27, %v29263_v8  ;;  %v29278_v8 = vand.u32 4294901760, %v29277_v10  ;;  %v29280_v27 = vand.u32 4294901760, %v29279_v9  ;;  %v29291_v10 = vld [vmem:[#allocation47_spill] sm:$0xff]  ;;  %v29293_v9 = vld [vmem:[#allocation57_spill] sm:$0xff] }
 0x811   :  { %19724 = vmatprep.subr.bf16.mxu1 %v26605_v1  ;;  %v26633_v1 = vpack.c.bf16 %v29270_v5, %v29268_v14  ;;  %v29283_v14 = vand.u32 4294901760, %v29282_v38  ;;  %v29285_v5 = vand.u32 4294901760, %v29284_v62  ;;  %v29295_v38 = vld [vmem:[#allocation48_spill] sm:$0xff]  ;;  %v29297_v62 = vld [vmem:[#allocation58_spill] sm:$0xff] }
 0x812   :  { %29266 = vst [vmem:[#allocation21_spill] sm:$0xff] %v26626_v63 }
 0x813   :  { %29271 = vst [vmem:[#allocation22_spill] sm:$0xff] %v26633_v1 }
 0x814   :  { %19726 = vmatpush3.bf16.msra.mxu1 %v26612_v17  ;;  %v26640_v17 = vpack.c.bf16 %v29275_v0, %v29273_v6  ;;  %v29288_v6 = vand.u32 4294901760, %v29287_v31  ;;  %v29290_v0 = vand.u32 4294901760, %v29289_v32  ;;  %v9342_v31 = vrot.slane %v26507_v55, 4 }
 0x815   :  { %19728 = vmatprep.subr.bf16.mxu1 %v26619_v7  ;;  %v26647_v7 = vpack.c.bf16 %v29280_v27, %v29278_v8  ;;  %v29292_v8 = vand.u32 4294901760, %v29291_v10  ;;  %v29294_v27 = vand.u32 4294901760, %v29293_v9 }
 0x816   :  { %29276 = vst [vmem:[#allocation25_spill] sm:$0xff] %v26640_v17 }
 0x817   :  { %29281 = vst [vmem:[#allocation26_spill] sm:$0xff] %v26647_v7 }
 0x818   :  { %19730 = vmatpush3.bf16.msra.mxu1 %v26626_v63  ;;  %v26654_v63 = vpack.c.bf16 %v29285_v5, %v29283_v14  ;;  %v29296_v14 = vand.u32 4294901760, %v29295_v38  ;;  %v29298_v5 = vand.u32 4294901760, %v29297_v62  ;;  %v9329_v62 = vrot.slane %v26505_v58, 4 }
 0x819   :  { %19732 = vmatprep.subr.bf16.mxu1 %v26633_v1  ;;  %v26661_v1 = vpack.c.bf16 %v29290_v0, %v29288_v6  ;;  %v29299_v6 = vld [vmem:[#allocation51_spill] sm:$0xff]  ;;  %v29301_v0 = vld [vmem:[#allocation52_spill] sm:$0xff] }
 0x81a   :  { %29286 = vst [vmem:[#allocation31_spill] sm:$0xff] %v26654_v63  ;;  %v29300_v32 = vand.u32 4294901760, %v29299_v6  ;;  %v29302_v10 = vand.u32 4294901760, %v29301_v0 }
 0x81c   :  { %19734 = vmatpush3.bf16.msra.mxu1 %v26640_v17  ;;  %v26668_v17 = vpack.c.bf16 %v29294_v27, %v29292_v8  ;;  %v9343_v8 = vadd.f32 %v9342_v31, %v26507_v55  ;;  %v9330_v31 = vadd.f32 %v9329_v62, %v26505_v58  ;;  %v29303_v62 = vld [vmem:[#allocation6_spill] sm:$0xff] }
 0x81d   :  { %19736 = vmatprep.subr.bf16.mxu1 %v26647_v7  ;;  %v26675_v7 = vpack.c.bf16 %v29298_v5, %v29296_v14 }
 0x81e   :  { %v9344_v9 = vrot.slane %v9343_v8, 2 }
 0x820   :  { %19738 = vmatpush3.bf16.msra.mxu1 %v26654_v63  ;;  %v26683_v63 = vpack.c.bf16 %v29302_v10, %v29300_v32  ;;  %v9345_v27 = vadd.f32 %v9344_v9, %v9343_v8  ;;  %v9331_v32 = vrot.slane %v9330_v31, 2 }
 0x821   :  { %19740 = vmatprep.subr.bf16.mxu1 %v26661_v1 }
 0x822   :  { %v9346_v38 = vrot.slane %v9345_v27, 1  ;;  %v9332_v10 = vadd.f32 %v9331_v32, %v9330_v31  ;;  %v16131_v32 = vld [vmem:[%s28019_s5 + $0xc8] sm:$0xff] }
 0x824   :  { %19742 = vmatpush3.bf16.msra.mxu1 %v26668_v17  ;;  %v9347_v55 = vadd.f32 %v9346_v38, %v9345_v27  ;;  %v9333_v58 = vrot.slane %v9332_v10, 1 }
 0x825   :  { %19744 = vmatprep.subr.bf16.mxu1 %v26675_v7 }
 0x826   :  { %v26699_v14 = vand.u32 4294901760, %v9347_v55  ;;  %v9334_v8 = vadd.f32 %v9333_v58, %v9332_v10  ;;  %v11096_v58 = vand.u32 4294901760, %v16131_v32 }
 0x828   :  { %19746 = vmatpush3.bf16.msra.mxu1 %v26683_v63  ;;  %v26726_v9 = vand.u32 4294901760, %v9334_v8 }
 0x829   :  { %19748 = vmatprep.subr.bf16.mxu1 %v25764_v24 }
 0x82b   :  { %10101 = vmatmul.mubr.f32.vlgmr.msra.gmra.mrb[68].mxu1 %v26509_v23 }
 0x82c   :  { %19750 = vmatpush3.bf16.msra.mxu1 %v25770_v28  ;;  %10203 = vmatprep.mubr.f32.mxu1 %v26511_v56  ;;  %v26704_v56 = vsub.f32 %v9347_v55, %v26699_v14 }
 0x82d   :  { %19752 = vmatprep.subr.bf16.mxu1 %v25802_v52 }
 0x82e   :  { %v10308_v5 = vand.u32 4294901760, %v26704_v56 }
 0x830   :  { %19754 = vmatpush3.bf16.msra.mxu1 %v25808_v60  ;;  %v10309_v6 = vsub.f32 %v26704_v56, %v10308_v5 }
 0x831   :  { %19756 = vmatprep.subr.bf16.mxu1 %v25867_v19 }
 0x832   :  { %v10310_v0 = vand.u32 4294901760, %v10309_v6 }
 0x834   :  { %19758 = vmatpush3.bf16.msra.mxu1 %v29221_v3 }
 0x835   :  { %19760 = vmatprep.subr.bf16.mxu1 %v29222_v41 }
 0x838   :  { %19762 = vmatpush3.bf16.msra.mxu1 %v29223_v40 }
 0x839   :  { %19764 = vmatprep.subr.bf16.mxu1 %v29224_v20 }
 0x83c   :  { %19766 = vmatpush3.bf16.msra.mxu1 %v29225_v49 }
 0x83d   :  { %19768 = vmatprep.subr.bf16.mxu1 %v29226_v12 }
 0x840   :  { %19770 = vmatpush3.bf16.msra.mxu1 %v29227_v21 }
 0x841   :  { %19772 = vmatprep.subr.bf16.mxu1 %v29228_v59 }
 0x844   :  { %19774 = vmatpush3.bf16.msra.mxu1 %v29229_v46 }
 0x845   :  { %19776 = vmatprep.subr.bf16.mxu1 %v29230_v42 }
 0x848   :  { %19778 = vmatpush3.bf16.msra.mxu1 %v29234_v2 }
 0x849   :  { %19780 = vmatprep.subr.bf16.mxu1 %v25764_v24 }
 0x84b   :  { %10205 = vmatmul.mubr.f32.vlgmr.msra.gmra.mrb[70].mxu1 %v26509_v23  ;;  %v26732_v23 = vsub.f32 %v9334_v8, %v26726_v9 }
 0x84c   :  { %19782 = vmatpush3.bf16.msra.mxu1 %v25770_v28  ;;  %10311 = vmatprep.mubr.f32.mxu1 %v10310_v0  ;;  %v16133_v0 = vld [vmem:[%s28019_s5 + $0xe8] sm:$0xff] }
 0x84d   :  { %19784 = vmatprep.subr.bf16.mxu1 %v25802_v52  ;;  %v10314_v27 = vand.u32 4294901760, %v26732_v23  ;;  %v11100_v8 = vand.u32 4294901760, %v16133_v0 }
 0x84f   :  { %v10315_v38 = vsub.f32 %v26732_v23, %v10314_v27 }
 0x850   :  { %19786 = vmatpush3.bf16.msra.mxu1 %v25808_v60 }
 0x851   :  { %19788 = vmatprep.subr.bf16.mxu1 %v25867_v19  ;;  %v10316_v55 = vand.u32 4294901760, %v10315_v38 }
 0x854   :  { %19790 = vmatpush3.bf16.msra.mxu1 %v29221_v3 }
 0x855   :  { %19792 = vmatprep.subr.bf16.mxu1 %v29222_v41 }
 0x858   :  { %19794 = vmatpush3.bf16.msra.mxu1 %v29223_v40 }
 0x859   :  { %19796 = vmatprep.subr.bf16.mxu1 %v29224_v20 }
 0x85c   :  { %19798 = vmatpush3.bf16.msra.mxu1 %v29225_v49 }
 0x85d   :  { %19800 = vmatprep.subr.bf16.mxu1 %v29226_v12 }
 0x860   :  { %19802 = vmatpush3.bf16.msra.mxu1 %v29227_v21 }
 0x861   :  { %19804 = vmatprep.subr.bf16.mxu1 %v29228_v59 }
 0x864   :  { %19806 = vmatpush3.bf16.msra.mxu1 %v29229_v46 }
 0x865   :  { %19808 = vmatprep.subr.bf16.mxu1 %v29230_v42 }
 0x868   :  { %19810 = vmatpush3.bf16.msra.mxu1 %v29234_v2 }
 0x869   :  { %19812 = vmatprep.subr.bf16.mxu1 %v29303_v62 }
 0x86b   :  { %10317 = vmatmul.mubr.f32.vlgmr.msra.gmra.mrb[72].mxu1 %v10316_v55 }
 0x86c   :  { %19814 = vmatpush3.bf16.msra.mxu1 %v26121_v35  ;;  %10547 = vmatprep.mubr.f32.mxu1 %v26699_v14 }
 0x86d   :  { %19816 = vmatprep.subr.bf16.mxu1 %v26129_v15 }
 0x870   :  { %19818 = vmatpush3.bf16.msra.mxu1 %v26142_v45  ;;  %v29305_v45 = vld [vmem:[#allocation56_spill] sm:$0xff] }
 0x871   :  { %19820 = vmatprep.subr.bf16.mxu1 %v26191_v13  ;;  %v29306_v13 = vld [vmem:[#allocation59_spill] sm:$0xff] }
 0x874   :  { %19822 = vmatpush3.bf16.msra.mxu1 %v26206_v25  ;;  %v29307_v25 = vld [vmem:[#allocation60_spill] sm:$0xff] }
 0x875   :  { %19824 = vmatprep.subr.bf16.mxu1 %v26218_v44 }
 0x878   :  { %19826 = vmatpush3.bf16.msra.mxu1 %v26236_v30 }
 0x879   :  { %19828 = vmatprep.subr.bf16.mxu1 %v26271_v33 }
 0x87c   :  { %19830 = vmatpush3.bf16.msra.mxu1 %v26278_v57 }
 0x87d   :  { %19832 = vmatprep.subr.bf16.mxu1 %v26296_v50 }
 0x87e   :  { %v17223_v35 = vpop.f32.mrb[60].mxu1 }
 0x87f   :  { %v17224_v31 = vpop.f32.mrb[61].mxu1 }
 0x880   :  { %v17225_v6 = vadd.f32 %v17224_v31, %v17223_v35  ;;  %19834 = vmatpush3.bf16.msra.mxu1 %v26325_v53  ;;  %v29308_v53 = vld [vmem:[#allocation154_spill] sm:$0xff]  ;;  %v26866_v35 = vpack.c.bf16 %v11100_v8, %v11096_v58 }
 0x881   :  { %19836 = vmatprep.subr.bf16.mxu1 %v26351_v51  ;;  %v29312_v51 = vld [vmem:[#allocation15_spill] sm:$0xff] }
 0x884   :  { %19838 = vmatpush3.bf16.msra.mxu1 %v26367_v48  ;;  %v29313_v48 = vld [vmem:[#allocation18_spill] sm:$0xff] }
 0x885   :  { %19840 = vmatprep.subr.bf16.mxu1 %v26373_v22  ;;  %v29315_v22 = vld [vmem:[#allocation22_spill] sm:$0xff] }
 0x888   :  { %19842 = vmatpush3.bf16.msra.mxu1 %v26383_v16 }
 0x889   :  { %19844 = vmatprep.subr.bf16.mxu1 %v26349_v37  ;;  %v29311_v37 = vld [vmem:[#allocation160_spill] sm:$0xff] }
 0x88b   :  { %10549 = vmatmul.mubr.f32.vlgmr.msra.gmra.mrb[74].mxu1 %v26726_v9 }
 0x88c   :  { %19846 = vmatpush3.bf16.msra.mxu1 %v26361_v4  ;;  %10684 = vmatprep.mubr.f32.mxu1 %v26704_v56  ;;  %v29309_v4 = vld [vmem:[#allocation155_spill] sm:$0xff]  ;;  %v16128_v56 = vld [vmem:[%s28019_s5 + $0xa0] sm:$0xff] }
 0x88d   :  { %19848 = vmatprep.subr.bf16.mxu1 %v26365_v18  ;;  %v29304_v18 = vld [vmem:[#allocation53_spill] sm:$0xff]  ;;  %v11094_v10 = vand.u32 4294901760, %v16128_v56 }
 0x890   :  { %19850 = vmatpush3.bf16.msra.mxu1 %v26371_v43  ;;  %v29314_v43 = vld [vmem:[#allocation21_spill] sm:$0xff] }
 0x891   :  { %19852 = vmatprep.subr.bf16.mxu1 %v26377_v47 }
 0x894   :  { %19854 = vmatpush3.bf16.msra.mxu1 %v26381_v36  ;;  %v29310_v36 = vld [vmem:[#allocation159_spill] sm:$0xff] }
 0x895   :  { %19856 = vmatprep.subr.bf16.mxu1 %v26387_v11  ;;  %v29316_v11 = vld [vmem:[#allocation25_spill] sm:$0xff] }
 0x898   :  { %19858 = vmatpush3.bf16.msra.mxu1 %v26391_v61  ;;  %v29317_v61 = vld [vmem:[#allocation26_spill] sm:$0xff] }
 0x899   :  { %19860 = vmatprep.subr.bf16.mxu1 %v26395_v34 }
 0x89c   :  { %19862 = vmatpush3.bf16.msra.mxu1 %v26399_v26 }
 0x89d   :  { %19864 = vmatprep.subr.bf16.mxu1 %v26403_v54 }
 0x89e   :  { %v17258_v16 = vpop.f32.mrb[62].mxu1 }
 0x89f   :  { %v17259_v44 = vpop.f32.mrb[63].mxu1 }
 0x8a0   :  { %v17260_v15 = vadd.f32 %v17259_v44, %v17258_v16  ;;  %19866 = vmatpush3.bf16.msra.mxu1 %v26407_v39  ;;  %v29318_v39 = vld [vmem:[#allocation31_spill] sm:$0xff] }
 0x8a1   :  { %19868 = vmatprep.subr.bf16.mxu1 %v29304_v18 }
 0x8a2   :  { %v9689_v47 = vadd.f32 %v17260_v15, %v17225_v6 }
 0x8a4   :  { %19870 = vmatpush3.bf16.msra.mxu1 %v29305_v45 }
 0x8a5   :  { %19872 = vmatprep.subr.bf16.mxu1 %v29306_v13  ;;  %v11191_v13 = vsub.f32 %v16128_v56, %v11094_v10 }
 0x8a8   :  { %19874 = vmatpush3.bf16.msra.mxu1 %v29307_v25  ;;  %v11197_v25 = vsub.f32 %v16131_v32, %v11096_v58 }
 0x8a9   :  { %19876 = vmatprep.subr.bf16.mxu1 %v25764_v24 }
 0x8ab   :  { %10687 = vmatmul.mubr.f32.vlgmr.msra.gmra.mrb[76].mxu1 %v26732_v23  ;;  %v16132_v23 = vld [vmem:[%s28019_s5 + $0xe0] sm:$0xff] }
 0x8ac   :  { %19878 = vmatpush3.bf16.msra.mxu1 %v25770_v28  ;;  %10791 = vmatprep.mubr.f32.mxu1 %v10308_v5  ;;  %v11102_v55 = vand.u32 4294901760, %v16132_v23 }
 0x8ad   :  { %19880 = vmatprep.subr.bf16.mxu1 %v25802_v52 }
 0x8b0   :  { %19882 = vmatpush3.bf16.msra.mxu1 %v25808_v60 }
 0x8b1   :  { %19884 = vmatprep.subr.bf16.mxu1 %v25867_v19 }
 0x8b4   :  { %19886 = vmatpush3.bf16.msra.mxu1 %v29221_v3 }
 0x8b5   :  { %19888 = vmatprep.subr.bf16.mxu1 %v29222_v41 }
 0x8b8   :  { %19890 = vmatpush3.bf16.msra.mxu1 %v29223_v40 }
 0x8b9   :  { %19892 = vmatprep.subr.bf16.mxu1 %v29224_v20 }
 0x8bc   :  { %19894 = vmatpush3.bf16.msra.mxu1 %v29225_v49 }
 0x8bd   :  { %19896 = vmatprep.subr.bf16.mxu1 %v29226_v12 }
 0x8be   :  { %v17293_v30 = vpop.f32.mrb[64].mxu1 }
 0x8bf   :  { %v17294_v33 = vpop.f32.mrb[65].mxu1 }
 0x8c0   :  { %v17295_v57 = vadd.f32 %v17294_v33, %v17293_v30  ;;  %19898 = vmatpush3.bf16.msra.mxu1 %v29227_v21  ;;  %v11209_v30 = vsub.f32 %v16133_v0, %v11100_v8 }
 0x8c1   :  { %19900 = vmatprep.subr.bf16.mxu1 %v29228_v59 }
 0x8c2   :  { %v9827_v50 = vadd.f32 %v17295_v57, %v9689_v47 }
 0x8c4   :  { %19902 = vmatpush3.bf16.msra.mxu1 %v29229_v46 }
 0x8c5   :  { %19904 = vmatprep.subr.bf16.mxu1 %v29230_v42 }
 0x8c8   :  { %19906 = vmatpush3.bf16.msra.mxu1 %v29234_v2 }
 0x8c9   :  { %19908 = vmatprep.subr.bf16.mxu1 %v26574_v29 }
 0x8cb   :  { %10795 = vmatmul.mubr.f32.vlgmr.msra.gmra.mrb[78].mxu1 %v10314_v27 }
 0x8cc   :  { %19910 = vmatpush3.bf16.msra.mxu1 %v29308_v53  ;;  %10961 = vmatprep.mubr.f32.mxu1 %v26699_v14  ;;  %v11192_v53 = vand.u32 4294901760, %v11191_v13 }
 0x8cd   :  { %19912 = vmatprep.subr.bf16.mxu1 %v29309_v4  ;;  %v11198_v4 = vand.u32 4294901760, %v11197_v25 }
 0x8d0   :  { %19914 = vmatpush3.bf16.msra.mxu1 %v29310_v36  ;;  %v11210_v36 = vand.u32 4294901760, %v11209_v30 }
 0x8d1   :  { %19916 = vmatprep.subr.bf16.mxu1 %v29311_v37 }
 0x8d4   :  { %19918 = vmatpush3.bf16.msra.mxu1 %v29312_v51 }
 0x8d5   :  { %19920 = vmatprep.subr.bf16.mxu1 %v29313_v48 }
 0x8d8   :  { %19922 = vmatpush3.bf16.msra.mxu1 %v29314_v43 }
 0x8d9   :  { %19924 = vmatprep.subr.bf16.mxu1 %v29315_v22  ;;  %v11193_v22 = vsub.f32 %v11191_v13, %v11192_v53 }
 0x8dc   :  { %19926 = vmatpush3.bf16.msra.mxu1 %v29316_v11  ;;  %v11199_v11 = vsub.f32 %v11197_v25, %v11198_v4 }
 0x8dd   :  { %19928 = vmatprep.subr.bf16.mxu1 %v29317_v61  ;;  %v11211_v61 = vsub.f32 %v11209_v30, %v11210_v36 }
 0x8de   :  { %v17328_v34 = vpop.f32.mrb[66].mxu1 }
 0x8df   :  { %v17329_v26 = vpop.f32.mrb[67].mxu1 }
 0x8e0   :  { %v17330_v54 = vadd.f32 %v17329_v26, %v17328_v34  ;;  %19930 = vmatpush3.bf16.msra.mxu1 %v29318_v39  ;;  %v11215_v34 = vsub.f32 %v16132_v23, %v11102_v55 }
 0x8e1   :  { %19932 = vmatprep.subr.bf16.mxu1 %v26661_v1 }
 0x8e2   :  { %v9935_v29 = vadd.f32 %v17330_v54, %v9827_v50 }
 0x8e4   :  { %19934 = vmatpush3.bf16.msra.mxu1 %v26668_v17 }
 0x8e5   :  { %19936 = vmatprep.subr.bf16.mxu1 %v26675_v7 }
 0x8e8   :  { %19938 = vmatpush3.bf16.msra.mxu1 %v26683_v63  ;;  %v16126_v63 = vld [vmem:[%s28019_s5 + $0x80] sm:$0xff] }
 0x8e9   :  { %19940 = vmatprep.subr.bf16.mxu1 %v25764_v24  ;;  %v11090_v5 = vand.u32 4294901760, %v16126_v63 }
 0x8eb   :  { %10963 = vmatmul.mubr.f32.vlgmr.msra.gmra.mrb[80].mxu1 %v26726_v9  ;;  %v26864_v62 = vpack.c.bf16 %v11094_v10, %v11090_v5  ;;  %v11179_v45 = vsub.f32 %v16126_v63, %v11090_v5 }
 0x8ec   :  { %19942 = vmatpush3.bf16.msra.mxu1 %v25770_v28  ;;  %11065 = vmatprep.mubr.f32.mxu1 %v26699_v14 }
 0x8ed   :  { %19944 = vmatprep.subr.bf16.mxu1 %v25802_v52  ;;  %v11180_v50 = vand.u32 4294901760, %v11179_v45 }
 0x8ef   :  { %v11181_v48 = vsub.f32 %v11179_v45, %v11180_v50 }
 0x8f0   :  { %19946 = vmatpush3.bf16.msra.mxu1 %v25808_v60  ;;  %v29319_v60 = vmov 0.0  }
 0x8f1   :  { %19948 = vmatprep.subr.bf16.mxu1 %v25867_v19  ;;  %v11182_v39 = vand.u32 4294901760, %v11181_v48 }
 0x8f4   :  { %19950 = vmatpush3.bf16.msra.mxu1 %v29221_v3 }
 0x8f5   :  { %19952 = vmatprep.subr.bf16.mxu1 %v29222_v41 }
 0x8f8   :  { %19954 = vmatpush3.bf16.msra.mxu1 %v29223_v40 }
 0x8f9   :  { %19956 = vmatprep.subr.bf16.mxu1 %v29224_v20 }
 0x8fc   :  { %19958 = vmatpush3.bf16.msra.mxu1 %v29225_v49 }
 0x8fd   :  { %19960 = vmatprep.subr.bf16.mxu1 %v29226_v12 }
 0x8fe   :  { %v17363_v24 = vpop.f32.mrb[68].mxu1 }
 0x8ff   :  { %v17364_v28 = vpop.f32.mrb[69].mxu1 }
 0x900   :  { %v17365_v7 = vadd.f32 %v17364_v28, %v17363_v24  ;;  %19962 = vmatpush3.bf16.msra.mxu1 %v29227_v21  ;;  %v11194_v24 = vand.u32 4294901760, %v11193_v22  ;;  %v11200_v28 = vand.u32 4294901760, %v11199_v11 }
 0x901   :  { %19964 = vmatprep.subr.bf16.mxu1 %v29228_v59 }
 0x902   :  { %v10103_v52 = vadd.f32 %v17365_v7, %v9935_v29  ;;  %v11212_v7 = vand.u32 4294901760, %v11211_v61 }
 0x904   :  { %19966 = vmatpush3.bf16.msra.mxu1 %v29229_v46 }
 0x905   :  { %19968 = vmatprep.subr.bf16.mxu1 %v29230_v42  ;;  %v16127_v42 = vld [vmem:[%s28019_s5 + $0x88] sm:$0xff] }
 0x906   :  { %v11088_v1 = vand.u32 4294901760, %v16127_v42 }
 0x908   :  { %19970 = vmatpush3.bf16.msra.mxu1 %v29234_v2  ;;  %v16129_v2 = vld [vmem:[%s28019_s5 + $0xa8] sm:$0xff]  ;;  %v11173_v18 = vsub.f32 %v16127_v42, %v11088_v1 }
 0x909   :  { %v11092_v14 = vand.u32 4294901760, %v16129_v2 }
 0x90a   :  { %v11174_v33 = vand.u32 4294901760, %v11173_v18 }
 0x90b   :  { %11067 = vmatmul.mubr.f32.vlgmr.msra.gmra.mrb[82].mxu1 %v26726_v9  ;;  %v16130_v9 = vld [vmem:[%s28019_s5 + $0xc0] sm:$0xff]  ;;  %v26862_v27 = vpack.c.bf16 %v11092_v14, %v11088_v1  ;;  %v11185_v47 = vsub.f32 %v16129_v2, %v11092_v14  ;;  %v26888_v1 = vpack.c.bf16 %v11192_v53, %v11180_v50  ;;  %v26890_v14 = vpack.c.bf16 %v11210_v36, %v11198_v4 }
 0x90c   :  { %11160 = vmatprep.mubr.f32.mxu1 %v29319_v60  ;;  %v11098_v38 = vand.u32 4294901760, %v16130_v9  ;;  %v11175_v37 = vsub.f32 %v11173_v18, %v11174_v33 }
 0x90d   :  { %20020 = vmatprep.subr.bf16.mxu0 %v26862_v27  ;;  %19972 = vmatprep.subr.bf16.mxu1 %v26862_v27  ;;  %v11186_v57 = vand.u32 4294901760, %v11185_v47 }
 0x90e   :  { %20022 = vmatpush1.bf16.msra.mxu0 %v26864_v62  ;;  %v26871_v31 = vpack.c.bf16 %v11102_v55, %v11098_v38  ;;  %19974 = vmatpush1.bf16.msra.mxu1 %v26864_v62  ;;  %v11203_v43 = vsub.f32 %v16130_v9, %v11098_v38  ;;  %v11176_v26 = vand.u32 4294901760, %v11175_v37 }
 0x90f   :  { %20024 = vmatprep.subr.bf16.mxu0 %v26866_v35  ;;  %19976 = vmatprep.subr.bf16.mxu1 %v26866_v35  ;;  %v11187_v51 = vsub.f32 %v11185_v47, %v11186_v57  ;;  %v26886_v63 = vpack.c.bf16 %v11186_v57, %v11174_v33  ;;  %v16135_v33 = vld [vmem:[%s28020_s6 + $0x3] sm:$0x1] }
 0x910   :  { %v11204_v29 = vand.u32 4294901760, %v11203_v43  ;;  %v26884_v42 = vpack.c.bf16 %v11215_v34, %v11203_v43 }
 0x911   :  { %v11188_v54 = vand.u32 4294901760, %v11187_v51 }
 0x912   :  { %20026 = vmatpush1.bf16.msra.mxu0 %v26871_v31  ;;  %19978 = vmatpush1.bf16.msra.mxu1 %v26871_v31 }
 0x91e   :  { %v17398_v19 = vpop.f32.mrb[70].mxu1 }
 0x91f   :  { %v17399_v17 = vpop.f32.mrb[71].mxu1 }
 0x920   :  { %v17400_v3 = vadd.f32 %v17399_v17, %v17398_v19  ;;  %v19979_v19 = vpack.c.bf16 %v11188_v54, %v11176_v26  ;;  %v11205_v17 = vsub.f32 %v11203_v43, %v11204_v29  ;;  %v21136_v26 = vld [vmem:[%s28017_s3 + $0xc0] sm:$0xff]  }
 0x921   :  { %v21137_v54 = vld [vmem:[%s28017_s3 + $0x80] sm:$0xff]  }
 0x922   :  { %v26836_v41 = vadd.f32 %v17400_v3, %v10103_v52  ;;  %v11216_v52 = vand.u32 4294901760, %v11215_v34  ;;  %v26878_v3 = vpack.c.bf16 %v11185_v47, %v11173_v18  ;;  %19980 = vmatprep.subr.bf16.mxu1 %v19979_v19  ;;  %20028 = vmatprep.subr.bf16.mxu0 %v19979_v19  ;;  %v21147_v19 = vld [vmem:[%s28017_s3 + $0x10] sm:$0xff]  }
 0x924   :  { %v26892_v5 = vpack.c.bf16 %v11216_v52, %v11204_v29  ;;  %v21142_v29 = vld [vmem:[%s28017_s3 + $0x48] sm:$0xff]  }
 0x93e   :  { %v17433_v40 = vpop.f32.mrb[72].mxu1 }
 0x93f   :  { %v17434_v20 = vpop.f32.mrb[73].mxu1 }
 0x940   :  { %v17435_v49 = vadd.f32 %v17434_v20, %v17433_v40  ;;  %v26880_v40 = vpack.c.bf16 %v11191_v13, %v11179_v45  ;;  %v19981_v20 = vpack.c.bf16 %v11194_v24, %v11182_v39  ;;  %v21140_v39 = vld [vmem:[%s28017_s3 + $0xc8] sm:$0xff]   ;;  %v21144_v24 = vld [vmem:[%s28017_s3 + $0xd0] sm:$0xff]  }
 0x95e   :  { %v17468_v12 = vpop.f32.mrb[74].mxu1 }
 0x95f   :  { %v17469_v21 = vpop.f32.mrb[75].mxu1 }
 0x960   :  { %v17470_v59 = vadd.f32 %v17469_v21, %v17468_v12  ;;  %v11217_v12 = vsub.f32 %v11215_v34, %v11216_v52  ;;  %v26882_v21 = vpack.c.bf16 %v11209_v30, %v11197_v25  ;;  %v16134_v25 = vld [vmem:[%s28020_s6 + $0x2] sm:$0x1]  ;;  %v21148_v52 = vld [vmem:[%s28017_s3 + $0xd8] sm:$0xff]  }
 0x962   :  { %v10551_v46 = vadd.f32 %v17470_v59, %v17435_v49  ;;  %v19983_v49 = vpack.c.bf16 %v11212_v7, %v11200_v28  ;;  %v11206_v59 = vand.u32 4294901760, %v11205_v17  ;;  %v21145_v28 = vld [vmem:[%s28017_s3 + $0x90] sm:$0xff]   ;;  %v21149_v17 = vld [vmem:[%s28017_s3 + $0x98] sm:$0xff]  }
 0x963   :  { %v21146_v7 = vld [vmem:[%s28017_s3 + $0x50] sm:$0xff]  }
 0x97e   :  { %v17503_v6 = vpop.f32.mrb[76].mxu1 }
 0x97f   :  { %v17504_v16 = vpop.f32.mrb[77].mxu1 }
 0x980   :  { %v17505_v44 = vadd.f32 %v17504_v16, %v17503_v6  ;;  %v11073_v6 = vmul.f32 0.001953125, %v26836_v41 }
 0x982   :  { %v10689_v15 = vadd.f32 %v17505_v44, %v10551_v46  ;;  %v11218_v46 = vand.u32 4294901760, %v11217_v12  ;;  %v11075_v18 = vmul.f32 %v11073_v6, %v11073_v6  ;;  %v21154_v12 = vld [vmem:[%s28017_s3 + $0x60] sm:$0xff]  }
 0x984   :  { %v19985_v2 = vpack.c.bf16 %v11218_v46, %v11206_v59  ;;  %v21156_v59 = vld [vmem:[%s28017_s3 + $0xe8] sm:$0xff]  }
 0x985   :  { %v21157_v46 = vld [vmem:[%s28017_s3 + $0xa8] sm:$0xff]  }
 0x99e   :  { %v17538_v56 = vpop.f32.mrb[78].mxu1 }
 0x99f   :  { %v17539_v32 = vpop.f32.mrb[79].mxu1 }
 0x9a0   :  { %v17540_v0 = vadd.f32 %v17539_v32, %v17538_v56  ;;  %v21163_v56 = vld [vmem:[%s28017_s3 + $0x30] sm:$0xff]   ;;  %v21166_v32 = vld [vmem:[%s28017_s3 + $0x78] sm:$0xff]  }
 0x9a2   :  { %v10797_v10 = vadd.f32 %v17540_v0, %v10689_v15  ;;  %v21165_v0 = vld [vmem:[%s28017_s3 + $0xb8] sm:$0xff]  }
 0x9be   :  { %v17573_v58 = vpop.f32.mrb[80].mxu1 }
 0x9bf   :  { %v17574_v8 = vpop.f32.mrb[81].mxu1 }
 0x9c0   :  { %v17575_v9 = vadd.f32 %v17574_v8, %v17573_v58  ;;  %v21168_v58 = vld [vmem:[%s28017_s3 + $0x140] sm:$0xff]  }
 0x9c2   :  { %v10965_v23 = vadd.f32 %v17575_v9, %v10797_v10  ;;  %v21167_v10 = vld [vmem:[%s28017_s3 + $0x38] sm:$0xff]   ;;  %v29320_v9 = vld [vmem:[#allocation149_spill] sm:$0xff] }
 0x9de   :  { %v17608_v38 = vpop.f32.mrb[82].mxu1 }
 0x9df   :  { %v17609_v55 = vpop.f32.mrb[83].mxu1 }
 0x9e0   :  { %v17610_v16 = vadd.f32 %v17609_v55, %v17608_v38 }
 0x9e2   :  { %v11069_v44 = vadd.f32 %v17610_v16, %v10965_v23 }
 0x9e4   :  { %v11074_v47 = vmul.f32 0.001953125, %v11069_v44  ;;  %v29322_v44 = vld [vmem:[#allocation65_spill] sm:$0xff] }
 0x9e6   :  { %v11076_v45 = vsub.f32 %v11074_v47, %v11075_v18  ;;  %v29323_v47 = vld [vmem:[#allocation63_spill] sm:$0xff] }
 0x9e8   :  { %v11080_v13 = vadd.f32 1e-05, %v11076_v45 }
 0x9ea   :  { %21218 = vrsqrt.f32 %v11080_v13  ;;  %v29324_v13 = vld [vmem:[#allocation69_spill] sm:$0xff] }
 0x9f4   :  { %v21219_v15 = vpop.eup %21218 }
 0x9f5   :  { %v11082_v30 = vmul.f32 %v21219_v15, %v16134_v25 }
 0x9f7   :  { %v11083_v57 = vmul.f32 %v11082_v30, %v11073_v6  ;;  %v11086_v41 = vsel %vm5115_vm1, %v11082_v30, 0  ;;  %v29321_v6 = vld [vmem:[#allocation61_spill] sm:$0xff]  ;;  %v29325_v30 = vld [vmem:[#allocation62_spill] sm:$0xff] }
 0x9f8   :  { %v26902_v50 = vand.u32 4294901760, %v11086_v41 }
 0x9f9   :  { %v11084_v53 = vsub.f32 %v16135_v33, %v11083_v57  ;;  %v29326_v57 = vld [vmem:[#allocation66_spill] sm:$0xff] }
 0x9fa   :  { %v11162_v4 = vsub.f32 %v11086_v41, %v26902_v50 }
 0x9fb   :  { %v11632_v36 = vsel %vm5115_vm1, %v11084_v53, 0 }
 0x9fc   :  { %v11163_v37 = vand.u32 4294901760, %v11162_v4  ;;  %v26906_v51 = vand.u32 4294901760, %v11632_v36 }
 0x9fe   :  { %v11164_v48 = vsub.f32 %v11162_v4, %v11163_v37  ;;  %v11708_v43 = vsub.f32 %v11632_v36, %v26906_v51 }
 0xa00   :  { %v11165_v22 = vand.u32 4294901760, %v11164_v48  ;;  %v11709_v11 = vand.u32 4294901760, %v11708_v43  ;;  %v29329_v48 = vld [vmem:[#allocation73_spill] sm:$0xff] }
 0xa02   :  { %11166 = vmatmul.mubr.f32.vlgmr.msra.gmra.mrb[84].mxu1 %v11165_v22  ;;  %v11710_v61 = vsub.f32 %v11708_v43, %v11709_v11  ;;  %v29330_v22 = vld [vmem:[#allocation68_spill] sm:$0xff] }
 0xa03   :  { %19982 = vmatpush1.bf16.msra.mxu1 %v19981_v20  ;;  %11276 = vmatprep.mubr.f32.mxu1 %v29319_v60 }
 0xa04   :  { %19984 = vmatprep.subr.bf16.mxu1 %v19983_v49  ;;  %v11711_v34 = vand.u32 4294901760, %v11710_v61  ;;  %v29331_v61 = vld [vmem:[#allocation143_spill] sm:$0xff] }
 0xa06   :  { %11712 = vmatmul.mubr.f32.vlgmr.msra.gmra.mrb[76].mxu0 %v11711_v34 }
 0xa07   :  { %19986 = vmatpush1.bf16.msra.mxu1 %v19985_v2  ;;  %20030 = vmatpush1.bf16.msra.mxu0 %v19981_v20  ;;  %v21151_v20 = vld [vmem:[%s28017_s3 + $0x18] sm:$0xff]  }
 0xa08   :  { %19988 = vmatprep.subr.bf16.mxu1 %v26878_v3  ;;  %20032 = vmatprep.subr.bf16.mxu0 %v19983_v49  ;;  %v21153_v49 = vld [vmem:[%s28017_s3 + $0xa0] sm:$0xff]  }
 0xa09   :  { %11822 = vmatprep.mubr.f32.mxu0 %v29319_v60 }
 0xa0a   :  { %11278 = vmatmul.mubr.f32.vlgmr.msra.gmra.mrb[84].mxu1 %v26902_v50 }
 0xa0b   :  { %19990 = vmatpush1.bf16.msra.mxu1 %v26880_v40  ;;  %20034 = vmatpush1.bf16.msra.mxu0 %v19985_v2  ;;  %v21159_v2 = vld [vmem:[%s28017_s3 + $0x28] sm:$0xff]  }
 0xa0c   :  { %19992 = vmatprep.subr.bf16.mxu1 %v26882_v21  ;;  %20036 = vmatprep.subr.bf16.mxu0 %v26878_v3  ;;  %v21150_v3 = vld [vmem:[%s28017_s3 + $0x58] sm:$0xff]  }
 0xa0d   :  { %11364 = vmatprep.mubr.f32.mxu1 %v29319_v60 }
 0xa0e   :  { %11824 = vmatmul.mubr.f32.vlgmr.msra.gmra.mrb[76].mxu0 %v26906_v51 }
 0xa0f   :  { %19994 = vmatpush1.bf16.msra.mxu1 %v26884_v42  ;;  %20038 = vmatpush1.bf16.msra.mxu0 %v26880_v40  ;;  %v21152_v40 = vld [vmem:[%s28017_s3 + $0xe0] sm:$0xff]  }
 0xa10   :  { %19996 = vmatprep.subr.bf16.mxu1 %v26862_v27  ;;  %20040 = vmatprep.subr.bf16.mxu0 %v26882_v21  ;;  %v21155_v21 = vld [vmem:[%s28017_s3 + $0x20] sm:$0xff]  }
 0xa11   :  { %11910 = vmatprep.mubr.f32.mxu0 %v29319_v60 }
 0xa12   :  { %11367 = vmatmul.mubr.f32.vlgmr.msra.gmra.mrb[84].mxu1 %v11162_v4  ;;  %v29328_v4 = vld [vmem:[#allocation70_spill] sm:$0xff] }
 0xa13   :  { %19998 = vmatpush1.bf16.msra.mxu1 %v26864_v62  ;;  %20042 = vmatpush1.bf16.msra.mxu0 %v26884_v42  ;;  %v21158_v42 = vld [vmem:[%s28017_s3 + $0x68] sm:$0xff]  }
 0xa14   :  { %20000 = vmatprep.subr.bf16.mxu1 %v26866_v35  ;;  %20044 = vmatprep.subr.bf16.mxu0 %v26862_v27 }
 0xa15   :  { %11445 = vmatprep.mubr.f32.mxu1 %v29319_v60 }
 0xa16   :  { %11913 = vmatmul.mubr.f32.vlgmr.msra.gmra.mrb[76].mxu0 %v11708_v43 }
 0xa17   :  { %20002 = vmatpush1.bf16.msra.mxu1 %v26871_v31  ;;  %20046 = vmatpush1.bf16.msra.mxu0 %v26864_v62 }
 0xa18   :  { %20004 = vmatprep.subr.bf16.mxu1 %v26886_v63  ;;  %20048 = vmatprep.subr.bf16.mxu0 %v26866_v35 }
 0xa19   :  { %11991 = vmatprep.mubr.f32.mxu0 %v29319_v60 }
 0xa1a   :  { %11449 = vmatmul.mubr.f32.vlgmr.msra.gmra.mrb[84].mxu1 %v11163_v37 }
 0xa1b   :  { %20006 = vmatpush1.bf16.msra.mxu1 %v26888_v1  ;;  %20050 = vmatpush1.bf16.msra.mxu0 %v26871_v31 }
 0xa1c   :  { %20008 = vmatprep.subr.bf16.mxu1 %v26890_v14  ;;  %20052 = vmatprep.subr.bf16.mxu0 %v26886_v63  ;;  %v21160_v63 = vld [vmem:[%s28017_s3 + $0xf0] sm:$0xff]  }
 0xa1d   :  { %11543 = vmatprep.mubr.f32.mxu1 %v29319_v60 }
 0xa1e   :  { %11995 = vmatmul.mubr.f32.vlgmr.msra.gmra.mrb[76].mxu0 %v11709_v11 }
 0xa1f   :  { %20010 = vmatpush1.bf16.msra.mxu1 %v26892_v5  ;;  %20054 = vmatpush1.bf16.msra.mxu0 %v26888_v1  ;;  %v21161_v1 = vld [vmem:[%s28017_s3 + $0xb0] sm:$0xff]  }
 0xa20   :  { %20012 = vmatprep.subr.bf16.mxu1 %v26862_v27  ;;  %20056 = vmatprep.subr.bf16.mxu0 %v26890_v14  ;;  %v21162_v14 = vld [vmem:[%s28017_s3 + $0x70] sm:$0xff]  }
 0xa21   :  { %12089 = vmatprep.mubr.f32.mxu0 %v29319_v60 }
 0xa22   :  { %11545 = vmatmul.mubr.f32.vlgmr.msra.gmra.mrb[84].mxu1 %v26902_v50 }
 0xa23   :  { %20014 = vmatpush1.bf16.msra.mxu1 %v26864_v62  ;;  %20058 = vmatpush1.bf16.msra.mxu0 %v26892_v5  ;;  %v21164_v5 = vld [vmem:[%s28017_s3 + $0xf8] sm:$0xff]  }
 0xa24   :  { %20016 = vmatprep.subr.bf16.mxu1 %v26866_v35  ;;  %20060 = vmatprep.subr.bf16.mxu0 %v26862_v27  ;;  %v21138_v27 = vld [vmem:[%s28017_s3 + $0x40] sm:$0xff]  }
 0xa25   :  { %11623 = vmatprep.mubr.f32.mxu1 %v29319_v60 }
 0xa26   :  { %12091 = vmatmul.mubr.f32.vlgmr.msra.gmra.mrb[76].mxu0 %v26906_v51 }
 0xa27   :  { %20018 = vmatpush1.bf16.msra.mxu1 %v26871_v31  ;;  %20062 = vmatpush1.bf16.msra.mxu0 %v26864_v62  ;;  %v21139_v62 = vld [vmem:[%s28017_s3] sm:$0xff]  }
 0xa28   :  { %20064 = vmatprep.subr.bf16.mxu0 %v26866_v35  ;;  %12169 = vmatprep.mubr.f32.mxu0 %v29319_v60  ;;  %v21141_v35 = vld [vmem:[%s28017_s3 + $0x88] sm:$0xff]  }
 0xa29   :  { %17611 = vmatprep.subr.bf16.mxu1 %v21136_v26 }
 0xa2a   :  { %11625 = vmatmul.mubr.f32.vlgmr.msra.gmra.mrb[84].mxu1 %v26902_v50  ;;  %v29327_v50 = vld [vmem:[#allocation64_spill] sm:$0xff] }
 0xa2b   :  { %20066 = vmatpush1.bf16.msra.mxu0 %v26871_v31  ;;  %17612 = vmatpush3.bf16.msra.mxu1 %v21137_v54  ;;  %v21143_v31 = vld [vmem:[%s28017_s3 + $0x8] sm:$0xff]   ;;  %v29332_v54 = vld [vmem:[#allocation72_spill] sm:$0xff] }
 0xa2c   :  { %17639 = vmatprep.subr.bf16.mxu0 %v21138_v27  ;;  %17613 = vmatprep.subr.bf16.mxu1 %v21140_v39  ;;  %v29333_v39 = vld [vmem:[#allocation67_spill] sm:$0xff] }
 0xa2e   :  { %12171 = vmatmul.mubr.f32.vlgmr.msra.gmra.mrb[76].mxu0 %v26906_v51 }
 0xa2f   :  { %17640 = vmatpush3.bf16.msra.mxu0 %v21139_v62  ;;  %17614 = vmatpush3.bf16.msra.mxu1 %v21141_v35  ;;  %v29334_v35 = vld [vmem:[#allocation71_spill] sm:$0xff] }
 0xa30   :  { %17641 = vmatprep.subr.bf16.mxu0 %v21142_v29  ;;  %17615 = vmatprep.subr.bf16.mxu1 %v21144_v24 }
 0xa33   :  { %17642 = vmatpush3.bf16.msra.mxu0 %v21143_v31  ;;  %17616 = vmatpush3.bf16.msra.mxu1 %v21145_v28 }
 0xa34   :  { %17643 = vmatprep.subr.bf16.mxu0 %v21146_v7  ;;  %17617 = vmatprep.subr.bf16.mxu1 %v21148_v52 }
 0xa37   :  { %17644 = vmatpush3.bf16.msra.mxu0 %v21147_v19  ;;  %17618 = vmatpush3.bf16.msra.mxu1 %v21149_v17 }
 0xa38   :  { %17645 = vmatprep.subr.bf16.mxu0 %v21150_v3  ;;  %17619 = vmatprep.subr.bf16.mxu1 %v21152_v40 }
 0xa3b   :  { %17646 = vmatpush3.bf16.msra.mxu0 %v21151_v20  ;;  %17620 = vmatpush3.bf16.msra.mxu1 %v21153_v49 }
 0xa3c   :  { %17647 = vmatprep.subr.bf16.mxu0 %v21154_v12  ;;  %17621 = vmatprep.subr.bf16.mxu1 %v21156_v59 }
 0xa3f   :  { %17648 = vmatpush3.bf16.msra.mxu0 %v21155_v21  ;;  %17622 = vmatpush3.bf16.msra.mxu1 %v21157_v46 }
 0xa40   :  { %17649 = vmatprep.subr.bf16.mxu0 %v21158_v42  ;;  %17623 = vmatprep.subr.bf16.mxu1 %v21160_v63 }
 0xa43   :  { %17650 = vmatpush3.bf16.msra.mxu0 %v21159_v2  ;;  %17624 = vmatpush3.bf16.msra.mxu1 %v21161_v1 }
 0xa44   :  { %17651 = vmatprep.subr.bf16.mxu0 %v21162_v14  ;;  %17625 = vmatprep.subr.bf16.mxu1 %v21164_v5 }
 0xa47   :  { %17652 = vmatpush3.bf16.msra.mxu0 %v21163_v56  ;;  %17626 = vmatpush3.bf16.msra.mxu1 %v21165_v0 }
 0xa48   :  { %17653 = vmatprep.subr.bf16.mxu0 %v21166_v32  ;;  %17667 = vmatprep.subr.bf16.mxu1 %v21168_v58  ;;  %v21169_v32 = vld [vmem:[%s28017_s3 + $0x100] sm:$0xff]  }
 0xa4b   :  { %17654 = vmatpush3.bf16.msra.mxu0 %v21167_v10 }
 0xafd   :  { %v11626_v8 = vpop.f32.mrb[84].mxu1 }
 0xafe   :  { %v27057_v23 = vrot.slane %v11626_v8, %v29320_v9  ;;  %v11628_v38 = vpop.f32.mrb[85].mxu1 }
 0xaff   :  { %v12184_v55 = vrot.slane %v11628_v38, %v29320_v9  ;;  %v21170_v38 = vld [vmem:[%s28017_s3 + $0x148] sm:$0xff]  }
 0xb00   :  { %v12185_v16 = vmul.f32 %v27057_v23, %v29321_v6  ;;  %v12189_v18 = vmul.f32 %v27057_v23, %v29322_v44  ;;  %v12187_v45 = vmul.f32 %v27057_v23, %v29323_v47  ;;  %v12193_v25 = vmul.f32 %v27057_v23, %v29324_v13 }
 0xb01   :  { %v12172_v15 = vpop.f32.mrb[76].mxu0  ;;  %v12186_v33 = vmul.f32 %v12184_v55, %v29325_v30  ;;  %v12190_v41 = vmul.f32 %v12184_v55, %v29326_v57  ;;  %v12188_v53 = vmul.f32 %v12184_v55, %v29327_v50  ;;  %v12194_v36 = vmul.f32 %v12184_v55, %v29328_v4  ;;  %v29336_v30 = vld [vmem:[#allocation74_spill] sm:$0xff]  ;;  %v21171_v57 = vld [vmem:[%s28017_s3 + $0x108] sm:$0xff]  }
 0xb02   :  { %v27073_v37 = vrot.slane %v12172_v15, %v29320_v9  ;;  %v12174_v51 = vpop.f32.mrb[77].mxu0  ;;  %v12198_v43 = vmul.f32 %v12184_v55, %v29329_v48  ;;  %v12192_v11 = vmul.f32 %v12184_v55, %v29330_v22  ;;  %v12196_v34 = vmul.f32 %v12184_v55, %v29331_v61  ;;  %v21173_v22 = vld [vmem:[%s28017_s3 + $0x110] sm:$0xff]  }
 0xb03   :  { %v27079_v26 = vrot.slane %v12174_v51, %v29320_v9  ;;  %v12197_v27 = vmul.f32 %v27057_v23, %v29332_v54  ;;  %v12191_v62 = vmul.f32 %v27057_v23, %v29333_v39  ;;  %v12195_v29 = vmul.f32 %v27057_v23, %v29334_v35  ;;  %v21177_v54 = vld [vmem:[%s28017_s3 + $0x120] sm:$0xff]   ;;  %v21179_v39 = vld [vmem:[%s28017_s3 + $0x128] sm:$0xff]   ;;  %v21181_v35 = vld [vmem:[%s28017_s3 + $0x130] sm:$0xff]  }
 0xb04   :  { %v12209_v24 = vadd.f32 %v27073_v37, %v12185_v16  ;;  %v12213_v31 = vadd.f32 %v27073_v37, %v12189_v18  ;;  %v12211_v28 = vadd.f32 %v27073_v37, %v12187_v45  ;;  %v12217_v7 = vadd.f32 %v27073_v37, %v12193_v25  ;;  %v29335_v45 = vld [vmem:[#allocation150_spill] sm:$0xff] }
 0xb05   :  { %v12210_v52 = vadd.f32 %v27079_v26, %v12186_v33  ;;  %v12214_v19 = vadd.f32 %v27079_v26, %v12190_v41  ;;  %v12212_v17 = vadd.f32 %v27079_v26, %v12188_v53  ;;  %v12218_v3 = vadd.f32 %v27079_v26, %v12194_v36 }
 0xb06   :  { %v12225_v40 = vmax.f32 %v12209_v24, 0.0  ;;  %v12229_v20 = vmax.f32 %v12213_v31, 0.0  ;;  %v27095_v49 = vmax.f32 %v12211_v28, 0.0  ;;  %v12222_v12 = vadd.f32 %v27079_v26, %v12198_v43  ;;  %v21183_v24 = vld [vmem:[%s28017_s3 + $0x138] sm:$0xff]   ;;  %v16248_v31 = vld [vmem:[%s28018_s4 + $0x400] sm:$0xff]  ;;  %v16249_v28 = vld [vmem:[%s28018_s4 + $0x408] sm:$0xff] }
 0xb07   :  { %v12226_v21 = vmax.f32 %v12210_v52, 0.0  ;;  %v12230_v59 = vmax.f32 %v12214_v19, 0.0  ;;  %v27098_v46 = vmax.f32 %v12212_v17, 0.0  ;;  %v12234_v42 = vmax.f32 %v12218_v3, 0.0  ;;  %v16250_v3 = vld [vmem:[%s28018_s4 + $0x410] sm:$0xff] }
 0xb08   :  { %12241 = vst [vmem:[%s28025_s11] sm:$0xff] %v12225_v40  ;;  %12245 = vst [vmem:[%s28025_s11 + $0x20] sm:$0xff] %v12229_v20  ;;  %v12293_v2 = vpack.c.bf16 %v12229_v20, %v12225_v40  ;;  %v12257_v63 = vpack.c.bf16 %v27095_v49, %v29319_v60  ;;  %v12238_v1 = vmax.f32 %v12222_v12, 0.0  ;;  %v12216_v14 = vadd.f32 %v27079_v26, %v12192_v11  ;;  %v16251_v40 = vld [vmem:[%s28018_s4 + $0x418] sm:$0xff]  ;;  %v16252_v20 = vld [vmem:[%s28018_s4 + $0x420] sm:$0xff] }
 0xb09   :  { %12243 = vst [vmem:[%s28025_s11 + $0x10] sm:$0xff] %v27095_v49  ;;  %12242 = vst [vmem:[%s28025_s11 + $0x8] sm:$0xff] %v12226_v21  ;;  %v12294_v56 = vpack.c.bf16 %v12230_v59, %v12226_v21  ;;  %v12258_v5 = vpack.c.bf16 %v27098_v46, %v29319_v60  ;;  %v12220_v0 = vadd.f32 %v27079_v26, %v12196_v34  ;;  %v12233_v6 = vmax.f32 %v12217_v7, 0.0  ;;  %v21175_v34 = vld [vmem:[%s28017_s3 + $0x118] sm:$0xff]   ;;  %v16253_v21 = vld [vmem:[%s28018_s4 + $0x428] sm:$0xff] }
 0xb0a   :  { %12246 = vst [vmem:[%s28025_s11 + $0x28] sm:$0xff] %v12230_v59  ;;  %12244 = vst [vmem:[%s28025_s11 + $0x18] sm:$0xff] %v27098_v46  ;;  %v12221_v10 = vadd.f32 %v27073_v37, %v12197_v27  ;;  %v12296_v58 = vpack.c.bf16 %v12238_v1, %v12234_v42  ;;  %v12232_v8 = vmax.f32 %v12216_v14, 0.0  ;;  %v12215_v16 = vadd.f32 %v27073_v37, %v12191_v62  ;;  %v21178_v27 = vld [vmem:[%s28017_s3 + $0x168] sm:$0xff]   ;;  %v21180_v62 = vld [vmem:[%s28017_s3 + $0x170] sm:$0xff]  }
 0xb0b   :  { %12250 = vst [vmem:[%s28025_s11 + $0x48] sm:$0xff] %v12234_v42  ;;  %12254 = vst [vmem:[%s28025_s11 + $0x68] sm:$0xff] %v12238_v1  ;;  %12458 = vmatprep.mubr.bf16.mxu1 %v12294_v56  ;;  %12603 = vmatprep.mubr.bf16.mxu0 %v12258_v5  ;;  %v12236_v44 = vmax.f32 %v12220_v0, 0.0  ;;  %v12219_v47 = vadd.f32 %v27073_v37, %v12195_v29  ;;  %v12200_v13 = vmul.f32 %v12184_v55, %v29335_v45  ;;  %v21182_v29 = vld [vmem:[%s28017_s3 + $0x178] sm:$0xff]   ;;  %v28461_v7 = vmov 0.0|0.0   ;;  %v27244_v42 = vld [vmem:[%s28018_s4 + $0x430] sm:$0xff] }
 0xb0c   :  { %v12237_v18 = vmax.f32 %v12221_v10, 0.0  ;;  %12459 = vmatmul.mubr.bf16.vlgmr.msra.gmra.mrb[88].mxu1 %v12293_v2  ;;  %12604 = vmatmul.mubr.bf16.vlgmr.msra.gmra.mrb[80].mxu0 %v12257_v63  ;;  %12248 = vst [vmem:[%s28025_s11 + $0x38] sm:$0xff] %v12232_v8  ;;  %12249 = vst [vmem:[%s28025_s11 + $0x40] sm:$0xff] %v12233_v6  ;;  %v12231_v25 = vmax.f32 %v12215_v16, 0.0  ;;  %v12621_v15 = vpack.c.bf16 %v12232_v8, %v27098_v46  ;;  %v12851_v52 = vand.u32 4294901760, %v16248_v31  ;;  %v27249_v2 = vld [vmem:[%s28018_s4 + $0x438] sm:$0xff] }
 0xb0d   :  { %v12199_v33 = vmul.f32 %v27057_v23, %v29336_v30  ;;  %17668 = vmatpush3.bf16.msra.mxu1 %v21169_v32  ;;  %12466 = vmatprep.mubr.bf16.mxu1 %v12296_v58  ;;  %12252 = vst [vmem:[%s28025_s11 + $0x58] sm:$0xff] %v12236_v44  ;;  %v12260_v55 = vpack.c.bf16 %v12236_v44, %v12232_v8  ;;  %v12235_v50 = vmax.f32 %v12219_v47, 0.0  ;;  %v21172_v23 = vld [vmem:[%s28017_s3 + $0x150] sm:$0xff]   ;;  %v12854_v19 = vand.u32 4294901760, %v16249_v28  ;;  %v27264_v5 = vld [vmem:[%s28018_s4 + $0x440] sm:$0xff]  ;;  %v27269_v32 = vld [vmem:[%s28018_s4 + $0x448] sm:$0xff] }
 0xb0e   :  { %12253 = vst [vmem:[%s28025_s11 + $0x60] sm:$0xff] %v12237_v18  ;;  %v12295_v41 = vpack.c.bf16 %v12237_v18, %v12233_v6  ;;  %v12224_v53 = vadd.f32 %v27079_v26, %v12200_v13  ;;  %17669 = vmatprep.subr.bf16.mxu1 %v21170_v38  ;;  %12247 = vst [vmem:[%s28025_s11 + $0x30] sm:$0xff] %v12231_v25  ;;  %v12620_v4 = vpack.c.bf16 %v12231_v25, %v27095_v49  ;;  %v21176_v26 = vld [vmem:[%s28017_s3 + $0x160] sm:$0xff]   ;;  %v27284_v6 = vld [vmem:[%s28018_s4 + $0x450] sm:$0xff] }
 0xb0f   :  { %v12223_v36 = vadd.f32 %v27073_v37, %v12199_v33  ;;  %12611 = vmatprep.mubr.bf16.mxu0 %v12260_v55  ;;  %12251 = vst [vmem:[%s28025_s11 + $0x50] sm:$0xff] %v12235_v50  ;;  %v12259_v51 = vpack.c.bf16 %v12235_v50, %v12231_v25  ;;  %v21174_v37 = vld [vmem:[%s28017_s3 + $0x158] sm:$0xff]   ;;  %20067 = vmatprep.subr.bf16.mxu0 %v28461_v7  ;;  %v12857_v49 = vand.u32 4294901760, %v16250_v3  ;;  %v12860_v12 = vand.u32 4294901760, %v16251_v40  ;;  %v27314_v55 = vld [vmem:[%s28018_s4 + $0x460] sm:$0xff] }
 0xb10   :  { %v12240_v48 = vmax.f32 %v12224_v53, 0.0  ;;  %v27219_v17 = vpack.c.bf16 %v12854_v19, %v12851_v52  ;;  %v12863_v59 = vand.u32 4294901760, %v16252_v20  ;;  %v12866_v46 = vand.u32 4294901760, %v16253_v21  ;;  %v27289_v16 = vld [vmem:[%s28018_s4 + $0x458] sm:$0xff] }
 0xb11   :  { %v12239_v43 = vmax.f32 %v12223_v36, 0.0  ;;  %17670 = vmatpush3.bf16.msra.mxu1 %v21171_v57  ;;  %v27251_v63 = vpack.c.bf16 %v12860_v12, %v12857_v49  ;;  %v12869_v14 = vand.u32 4294901760, %v27244_v42  ;;  %v12872_v56 = vand.u32 4294901760, %v27249_v2  ;;  %v27319_v57 = vld [vmem:[%s28018_s4 + $0x468] sm:$0xff] }
 0xb12   :  { %12256 = vst [vmem:[%s28025_s11 + $0x78] sm:$0xff] %v12240_v48  ;;  %v12623_v11 = vpack.c.bf16 %v12240_v48, %v12236_v44  ;;  %17671 = vmatprep.subr.bf16.mxu1 %v21172_v23  ;;  %20069 = vmatpush3.bf16.msra.mxu0 %v27219_v17  ;;  %v27255_v1 = vpack.c.bf16 %v12866_v46, %v12863_v59  ;;  %v12875_v8 = vand.u32 4294901760, %v27264_v5  ;;  %v12878_v38 = vand.u32 4294901760, %v27269_v32 }
 0xb13   :  { %12255 = vst [vmem:[%s28025_s11 + $0x70] sm:$0xff] %v12239_v43  ;;  %v12622_v61 = vpack.c.bf16 %v12239_v43, %v12235_v50  ;;  %20070 = vmatprep.subr.bf16.mxu0 %v28461_v7  ;;  %v27271_v0 = vsub.f32 %v16248_v31, %v12851_v52  ;;  %v27273_v10 = vsub.f32 %v16249_v28, %v12854_v19  ;;  %v12881_v13 = vand.u32 4294901760, %v27284_v6  ;;  %s21222_s11 = scalar_lea.vmem %s15587_s15, 128 }
 0xb14   :  { %12467 = vmatmul.mubr.bf16.gmra.mrb[92].mxu1 %v12295_v41  ;;  %12612 = vmatmul.mubr.bf16.gmra.mrb[84].mxu0 %v12259_v51  ;;  %v27277_v58 = vpack.c.bf16 %v12872_v56, %v12869_v14  ;;  %v27295_v47 = vsub.f32 %v16250_v3, %v12857_v49  ;;  %v27297_v45 = vsub.f32 %v16251_v40, %v12860_v12  ;;  %v12884_v25 = vand.u32 4294901760, %v27289_v16  ;;  %p21223_p0 = scmp.ne.s32.totalorder %s15587_s15, %s21222_s11  ;;  %p21228_p2 = scmp.lt.s32.totalorder %s21222_s11, %s21222_s11 }
 0xb15   :  { %17672 = vmatpush3.bf16.msra.mxu1 %v21173_v22  ;;  %12785 = vmatprep.mubr.bf16.mxu1 %v12621_v15  ;;  %v28460_v44 = vand.u32 4294901760, %v27271_v0  ;;  %v28459_v18 = vand.u32 4294901760, %v27273_v10  ;;  %v27309_v33 = vpack.c.bf16 %v12878_v38, %v12875_v8  ;;  %v27331_v51 = vsub.f32 %v16252_v20, %v12863_v59 }
 0xb16   :  { %17673 = vmatprep.subr.bf16.mxu1 %v21174_v37  ;;  %18027 = vmatprep.mubr.msk.f32.mxu0 %vm21249_vm2, %v29319_v60  ;;  %v28458_v41 = vand.u32 4294901760, %v27295_v47  ;;  %v28457_v50 = vand.u32 4294901760, %v27297_v45  ;;  %v27333_v48 = vsub.f32 %v16253_v21, %v12866_v46  ;;  %v27339_v43 = vpack.c.bf16 %v12884_v25, %v12881_v13  ;;  %p21229_p3 = por %p21228_p2, %p21227_p1 }
 0xb17   :  { %20072 = vmatpush3.bf16.msra.mxu0 %v27251_v63  ;;  %v12945_v15 = vsub.f32 %v27271_v0, %v28460_v44  ;;  %v12952_v30 = vsub.f32 %v27273_v10, %v28459_v18  ;;  %v12887_v22 = vand.u32 4294901760, %v27314_v55  ;;  %v27369_v52 = vsub.f32 %v27249_v2, %v12872_v56 }
 0xb18   :  { %20073 = vmatprep.subr.bf16.mxu0 %v28461_v7  ;;  %v12966_v36 = vsub.f32 %v27297_v45, %v28457_v50  ;;  %v27385_v59 = vsub.f32 %v27264_v5, %v12875_v8  ;;  %v27388_v46 = vsub.f32 %v27269_v32, %v12878_v38  ;;  %v27410_v38 = vsub.f32 %v27284_v6, %v12881_v13  ;;  %p21230_p4 = pnand %p21229_p3, %p21223_p0 }
 0xb19   :  { %17674 = vmatpush3.bf16.msra.mxu1 %v21175_v34  ;;  %v12946_v53 = vand.u32 4294901760, %v12945_v15  ;;  %v12953_v23 = vand.u32 4294901760, %v12952_v30  ;;  %v16263_v34 = vld [vmem:[%s28018_s4 + $0x478] sm:$0xff]  ;;  %v28453_v49 = vand.u32 4294901760, %v27369_v52  ;;  %v27415_v30 = vsub.f32 %v27289_v16, %v12884_v25 }
 0xb1a   :  { %17675 = vmatprep.subr.bf16.mxu1 %v21176_v26  ;;  %v12896_v28 = vand.u32 4294901760, %v16263_v34  ;;  %v28452_v56 = vand.u32 4294901760, %v27385_v59  ;;  %v28451_v15 = vand.u32 4294901760, %v27388_v46  ;;  %v27434_v25 = vsub.f32 %v27314_v55, %v12887_v22 }
 0xb1b   :  { %20075 = vmatpush3.bf16.msra.mxu0 %v27255_v1  ;;  %v27343_v37 = vpack.c.bf16 %v12953_v23, %v12946_v53 }
 0xb1c   :  { %20076 = vmatprep.subr.bf16.mxu0 %v28461_v7  ;;  %v13001_v32 = vsub.f32 %v27385_v59, %v28452_v56  ;;  %v13008_v8 = vsub.f32 %v27388_v46, %v28451_v15 }
 0xb1d   :  { %17676 = vmatpush3.bf16.msra.mxu1 %v21177_v54  ;;  %v12967_v54 = vand.u32 4294901760, %v12966_v36  ;;  %v28450_v36 = vand.u32 4294901760, %v27410_v38 }
 0xb1e   :  { %17677 = vmatprep.subr.bf16.mxu1 %v21178_v27  ;;  %v28456_v27 = vand.u32 4294901760, %v27331_v51  ;;  %v13002_v23 = vand.u32 4294901760, %v13001_v32 }
 0xb1f   :  { %20078 = vmatpush3.bf16.msra.mxu0 %v27277_v58  ;;  %v13015_v16 = vsub.f32 %v27410_v38, %v28450_v36 }
 0xb20   :  { %20079 = vmatprep.subr.bf16.mxu0 %v28461_v7 }
 0xb21   :  { %17678 = vmatpush3.bf16.msra.mxu1 %v21179_v39  ;;  %v28455_v39 = vand.u32 4294901760, %v27333_v48 }
 0xb22   :  { %17679 = vmatprep.subr.bf16.mxu1 %v21180_v62 }
 0xb23   :  { %20081 = vmatpush3.bf16.msra.mxu0 %v27309_v33 }
 0xb24   :  { %20082 = vmatprep.subr.bf16.mxu0 %v28461_v7 }
 0xb25   :  { %17680 = vmatpush3.bf16.msra.mxu1 %v21181_v35  ;;  %v12973_v35 = vsub.f32 %v27331_v51, %v28456_v27 }
 0xb26   :  { %17681 = vmatprep.subr.bf16.mxu1 %v21182_v29  ;;  %v12980_v29 = vsub.f32 %v27333_v48, %v28455_v39 }
 0xb27   :  { %20084 = vmatpush3.bf16.msra.mxu0 %v27339_v43  ;;  %v12974_v3 = vand.u32 4294901760, %v12973_v35  ;;  %v13016_v35 = vand.u32 4294901760, %v13015_v16  ;;  %v27471_v16 = vpack.c.bf16 %v27297_v45, %v27295_v47 }
 0xb28   :  { %v12981_v40 = vand.u32 4294901760, %v12980_v29  ;;  %20085 = vmatprep.subr.bf16.mxu0 %v28461_v7 }
 0xb29   :  { %17682 = vmatpush3.bf16.msra.mxu1 %v21183_v24  ;;  %v27366_v24 = vsub.f32 %v27244_v42, %v12869_v14  ;;  %v12994_v42 = vsub.f32 %v27369_v52, %v28453_v49 }
 0xb2a   :  { %20211 = vmatprep.subr.bf16.mxu1 %v28461_v7  ;;  %v27379_v12 = vpack.c.bf16 %v12981_v40, %v12974_v3  ;;  %v28448_v3 = vand.u32 4294901760, %v27434_v25 }
 0xb2b   :  { %v28454_v20 = vand.u32 4294901760, %v27366_v24  ;;  %v12995_v5 = vand.u32 4294901760, %v12994_v42 }
 0xb2c   :  { %12786 = vmatmul.mubr.bf16.vlgmr.msra.gmra.mrb[96].mxu1 %v12620_v4  ;;  %v12959_v4 = vsub.f32 %v27295_v47, %v28458_v41  ;;  %v13029_v42 = vsub.f32 %v27434_v25, %v28448_v3 }
 0xb2d   :  { %12793 = vmatprep.mubr.bf16.mxu1 %v12623_v11  ;;  %20213 = vmatpush3.bf16.msra.mxu1 %v27219_v17  ;;  %v12890_v11 = vand.u32 4294901760, %v27319_v57  ;;  %v12987_v21 = vsub.f32 %v27366_v24, %v28454_v20 }
 0xb2e   :  { %20214 = vmatprep.subr.bf16.mxu1 %v28461_v7  ;;  %v12960_v26 = vand.u32 4294901760, %v12959_v4  ;;  %v13009_v4 = vand.u32 4294901760, %v13008_v8 }
 0xb2f   :  { %v27373_v19 = vpack.c.bf16 %v12890_v11, %v12887_v22  ;;  %v12988_v14 = vand.u32 4294901760, %v12987_v21 }
 0xb30   :  { %v27357_v62 = vpack.c.bf16 %v12967_v54, %v12960_v26  ;;  %v28449_v26 = vand.u32 4294901760, %v27415_v30  ;;  %v27425_v6 = vpack.c.bf16 %v13009_v4, %v13002_v23  ;;  %v27437_v54 = vsub.f32 %v27319_v57, %v12890_v11 }
 0xb31   :  { %20216 = vmatpush3.bf16.msra.mxu1 %v27251_v63  ;;  %20087 = vmatpush3.bf16.msra.mxu0 %v27373_v19  ;;  %v27417_v53 = vpack.c.bf16 %v12995_v5, %v12988_v14  ;;  %v27448_v5 = vsub.f32 %v16263_v34, %v12896_v28  ;;  %v13030_v57 = vand.u32 4294901760, %v13029_v42  ;;  %v27487_v42 = vpack.c.bf16 %v27415_v30, %v27410_v38 }
 0xb32   :  { %20217 = vmatprep.subr.bf16.mxu1 %v28461_v7  ;;  %20088 = vmatprep.subr.bf16.mxu0 %v28461_v7  ;;  %v13022_v13 = vsub.f32 %v27415_v30, %v28449_v26  ;;  %29337 = vst [vmem:[#allocation141_spill] sm:$0xff] %v27437_v54  ;;  %v28447_v40 = vand.u32 4294901760, %v27437_v54 }
 0xb33   :  { %29339 = vst [vmem:[#allocation34_spill] sm:$0xff] %v27448_v5  ;;  %v28445_v11 = vand.u32 4294901760, %v27448_v5 }
 0xb34   :  { %12794 = vmatmul.mubr.bf16.gmra.mrb[100].mxu1 %v12622_v61  ;;  %v16262_v61 = vld [vmem:[%s28018_s4 + $0x470] sm:$0xff]  ;;  %v13023_v29 = vand.u32 4294901760, %v13022_v13  ;;  %v13036_v55 = vsub.f32 %v27437_v54, %v28447_v40  ;;  %v27475_v13 = vpack.c.bf16 %v27333_v48, %v27331_v51 }
 0xb35   :  { %18237 = vmatprep.mubr.msk.f32.mxu1 %vm21249_vm2, %v29319_v60  ;;  %20219 = vmatpush3.bf16.msra.mxu1 %v27255_v1  ;;  %v12893_v31 = vand.u32 4294901760, %v16262_v61 }
 0xb36   :  { %20220 = vmatprep.subr.bf16.mxu1 %v28461_v7  ;;  %v27441_v21 = vpack.c.bf16 %v13023_v29, %v13016_v35  ;;  %v13037_v32 = vand.u32 4294901760, %v13036_v55  ;;  %v27479_v35 = vpack.c.bf16 %v27369_v52, %v27366_v24  ;;  %v27483_v29 = vpack.c.bf16 %v27388_v46, %v27385_v59 }
 0xb37   :  { %v27395_v2 = vpack.c.bf16 %v12896_v28, %v12893_v31  ;;  %v27446_v14 = vsub.f32 %v16262_v61, %v12893_v31  ;;  %v13050_v61 = vsub.f32 %v27448_v5, %v28445_v11  ;;  %v27465_v31 = vpack.c.bf16 %v27273_v10, %v27271_v0 }
 0xb38   :  { %v27461_v34 = vpack.c.bf16 %v13037_v32, %v13030_v57  ;;  %v27491_v55 = vpack.c.bf16 %v27437_v54, %v27434_v25 }
 0xb39   :  { %20222 = vmatpush3.bf16.msra.mxu1 %v27277_v58  ;;  %20090 = vmatpush3.bf16.msra.mxu0 %v27395_v2  ;;  %29338 = vst [vmem:[#allocation33_spill] sm:$0xff] %v27446_v14  ;;  %v28446_v22 = vand.u32 4294901760, %v27446_v14  ;;  %v13051_v23 = vand.u32 4294901760, %v13050_v61  ;;  %v27495_v26 = vpack.c.bf16 %v27448_v5, %v27446_v14 }
 0xb3a   :  { %20223 = vmatprep.subr.bf16.mxu1 %v28461_v7  ;;  %20091 = vmatprep.subr.bf16.mxu0 %v28461_v7 }
 0xb3b   :  { %v13043_v8 = vsub.f32 %v27446_v14, %v28446_v22 }
 0xb3d   :  { %20225 = vmatpush3.bf16.msra.mxu1 %v27309_v33  ;;  %v13044_v28 = vand.u32 4294901760, %v13043_v8 }
 0xb3e   :  { %20226 = vmatprep.subr.bf16.mxu1 %v28461_v7 }
 0xb3f   :  { %v27467_v4 = vpack.c.bf16 %v13051_v23, %v13044_v28 }
 0xb41   :  { %20228 = vmatpush3.bf16.msra.mxu1 %v27339_v43 }
 0xb42   :  { %20229 = vmatprep.subr.bf16.mxu1 %v28461_v7 }
 0xb45   :  { %20231 = vmatpush3.bf16.msra.mxu1 %v27373_v19 }
 0xb46   :  { %20232 = vmatprep.subr.bf16.mxu1 %v28461_v7 }
 0xb49   :  { %20234 = vmatpush3.bf16.msra.mxu1 %v27395_v2 }
 0xb4a   :  { %20235 = vmatprep.subr.bf16.mxu1 %v28461_v7 }
 0xbdf   :  { %v17627_v57 = vpop.f32.mrb[88].mxu1  ;;  %v17655_v32 = vpop.f32.mrb[80].mxu0 }
 0xbe0   :  { %v17628_v8 = vpop.f32.mrb[89].mxu1  ;;  %v17656_v61 = vpop.f32.mrb[81].mxu0 }
 0xbe1   :  { %v17629_v28 = vadd.f32 %v17628_v8, %v17627_v57  ;;  %v17657_v23 = vadd.f32 %v17656_v61, %v17655_v32  ;;  %v17630_v11 = vpop.f32.mrb[90].mxu1  ;;  %v17658_v22 = vpop.f32.mrb[82].mxu0 }
 0xbe2   :  { %v17631_v40 = vpop.f32.mrb[91].mxu1  ;;  %v17659_v3 = vpop.f32.mrb[83].mxu0 }
 0xbe3   :  { %v12606_v36 = vadd.f32 %v17657_v23, %v17629_v28  ;;  %v17632_v15 = vadd.f32 %v17631_v40, %v17630_v11  ;;  %v17660_v56 = vadd.f32 %v17659_v3, %v17658_v22 }
 0xbe5   :  { %v12609_v49 = vadd.f32 %v17660_v56, %v17632_v15 }
 0xbe7   :  { %v17633_v20 = vpop.f32.mrb[92].mxu1  ;;  %v17661_v39 = vpop.f32.mrb[84].mxu0 }
 0xbe8   :  { %v17634_v27 = vpop.f32.mrb[93].mxu1  ;;  %v17662_v50 = vpop.f32.mrb[85].mxu0 }
 0xbe9   :  { %v17635_v41 = vadd.f32 %v17634_v27, %v17633_v20  ;;  %v17663_v18 = vadd.f32 %v17662_v50, %v17661_v39  ;;  %v17636_v57 = vpop.f32.mrb[94].mxu1  ;;  %v17664_v32 = vpop.f32.mrb[86].mxu0 }
 0xbea   :  { %v17637_v8 = vpop.f32.mrb[95].mxu1  ;;  %v17665_v61 = vpop.f32.mrb[87].mxu0 }
 0xbeb   :  { %v12614_v44 = vadd.f32 %v17663_v18, %v17635_v41  ;;  %v17638_v7 = vadd.f32 %v17637_v8, %v17636_v57  ;;  %v17666_v9 = vadd.f32 %v17665_v61, %v17664_v32 }
 0xbed   :  { %v12617_v54 = vadd.f32 %v17666_v9, %v17638_v7 }
 0xbff   :  { %v17683_v5 = vpop.f32.mrb[96].mxu1 }
 0xc00   :  { %v17684_v14 = vpop.f32.mrb[97].mxu1 }
 0xc01   :  { %v17685_v28 = vadd.f32 %v17684_v14, %v17683_v5  ;;  %v17686_v40 = vpop.f32.mrb[98].mxu1 }
 0xc02   :  { %v17687_v3 = vpop.f32.mrb[99].mxu1 }
 0xc03   :  { %v27497_v56 = vadd.f32 %v17685_v28, %v12606_v36  ;;  %v17688_v15 = vadd.f32 %v17687_v3, %v17686_v40 }
 0xc05   :  { %v27499_v22 = vadd.f32 %v17688_v15, %v12609_v49  ;;  %v12837_v9 = vmul.f32 %v27497_v56, %v27497_v56 }
 0xc07   :  { %v17689_v27 = vpop.f32.mrb[100].mxu1  ;;  %v12838_v39 = vmul.f32 %v27499_v22, %v27499_v22  ;;  %v12828_v7 = vadd.f32 %v27499_v22, %v27497_v56 }
 0xc08   :  { %v17690_v50 = vpop.f32.mrb[101].mxu1 }
 0xc09   :  { %v17691_v20 = vadd.f32 %v17690_v50, %v17689_v27  ;;  %v17692_v18 = vpop.f32.mrb[102].mxu1  ;;  %v12841_v5 = vadd.f32 %v12838_v39, %v12837_v9 }
 0xc0a   :  { %v17693_v41 = vpop.f32.mrb[103].mxu1 }
 0xc0b   :  { %v27507_v14 = vadd.f32 %v17691_v20, %v12614_v44  ;;  %v17694_v36 = vadd.f32 %v17693_v41, %v17692_v18 }
 0xc0d   :  { %v12829_v49 = vadd.f32 %v12828_v7, %v27507_v14  ;;  %v12839_v11 = vmul.f32 %v27507_v14, %v27507_v14  ;;  %v27512_v23 = vadd.f32 %v17694_v36, %v12617_v54 }
 0xc0f   :  { %v12842_v57 = vadd.f32 %v12841_v5, %v12839_v11  ;;  %v12830_v32 = vadd.f32 %v12829_v49, %v27512_v23  ;;  %v12840_v8 = vmul.f32 %v27512_v23, %v27512_v23 }
 0xc11   :  { %v12831_v61 = vrot.slane %v12830_v32, 4  ;;  %v12843_v28 = vadd.f32 %v12842_v57, %v12840_v8 }
 0xc13   :  { %v12832_v40 = vadd.f32 %v12831_v61, %v12830_v32  ;;  %v12844_v44 = vrot.slane %v12843_v28, 4 }
 0xc15   :  { %v12833_v3 = vrot.slane %v12832_v40, 2  ;;  %v12845_v15 = vadd.f32 %v12844_v44, %v12843_v28  ;;  %v29340_v28 = vmov 0.0|0.0  }
 0xc17   :  { %v12834_v27 = vadd.f32 %v12833_v3, %v12832_v40  ;;  %v12846_v50 = vrot.slane %v12845_v15, 2 }
 0xc19   :  { %v12835_v39 = vrot.slane %v12834_v27, 1  ;;  %v12847_v20 = vadd.f32 %v12846_v50, %v12845_v15 }
 0xc1b   :  { %v12836_v18 = vadd.f32 %v12835_v39, %v12834_v27  ;;  %v12848_v41 = vrot.slane %v12847_v20, 1 }
 0xc1d   :  { %v12849_v54 = vadd.f32 %v12848_v41, %v12847_v20  ;;  %v27517_v9 = vand.u32 4294901760, %v12836_v18 }
 0xc1f   :  { %v27520_v7 = vsub.f32 %v12836_v18, %v27517_v9  ;;  %v27522_v36 = vand.u32 4294901760, %v12849_v54 }
 0xc21   :  { %v12933_v5 = vand.u32 4294901760, %v27520_v7  ;;  %v27526_v49 = vsub.f32 %v12849_v54, %v27522_v36 }
 0xc23   :  { %v12934_v11 = vsub.f32 %v27520_v7, %v12933_v5  ;;  %v13574_v57 = vand.u32 4294901760, %v27526_v49 }
 0xc25   :  { %v12935_v32 = vand.u32 4294901760, %v12934_v11  ;;  %v13575_v8 = vsub.f32 %v27526_v49, %v13574_v57 }
 0xc27   :  { %18028 = vmatmul.mubr.f32.vlgmr.msra.gmra.mrb[78].mxu0 %v12935_v32  ;;  %v13576_v61 = vand.u32 4294901760, %v13575_v8 }
 0xc28   :  { %20093 = vmatpush3.bf16.msra.mxu0 %v27343_v37  ;;  %18062 = vmatprep.mubr.msk.f32.mxu0 %vm21249_vm2, %v29319_v60 }
 0xc29   :  { %18238 = vmatmul.mubr.f32.vlgmr.msra.gmra.mrb[86].mxu1 %v13576_v61  ;;  %20094 = vmatprep.subr.bf16.mxu0 %v29340_v28 }
 0xc2a   :  { %20237 = vmatpush3.bf16.msra.mxu1 %v27343_v37  ;;  %18272 = vmatprep.mubr.msk.f32.mxu1 %vm21249_vm2, %v29319_v60  ;;  %v29341_v37 = vand.u32 4294901760, %v27271_v0  ;;  %v29345_v0 = vand.u32 4294901760, %v27331_v51  ;;  %v29349_v51 = vand.u32 4294901760, %v27385_v59  ;;  %v29353_v59 = vand.u32 4294901760, %v27434_v25 }
 0xc2b   :  { %20238 = vmatprep.subr.bf16.mxu1 %v29340_v28 }
 0xc2c   :  { %20096 = vmatpush3.bf16.msra.mxu0 %v27357_v62 }
 0xc2d   :  { %20097 = vmatprep.subr.bf16.mxu0 %v29340_v28 }
 0xc2e   :  { %20240 = vmatpush3.bf16.msra.mxu1 %v27357_v62  ;;  %v29342_v62 = vand.u32 4294901760, %v27273_v10  ;;  %v29346_v10 = vand.u32 4294901760, %v27333_v48  ;;  %v29350_v48 = vand.u32 4294901760, %v27388_v46  ;;  %v29354_v46 = vld [vmem:[#allocation141_spill] sm:$0xff] }
 0xc2f   :  { %20241 = vmatprep.subr.bf16.mxu1 %v29340_v28 }
 0xc30   :  { %20099 = vmatpush3.bf16.msra.mxu0 %v27379_v12 }
 0xc31   :  { %20100 = vmatprep.subr.bf16.mxu0 %v29340_v28 }
 0xc32   :  { %20243 = vmatpush3.bf16.msra.mxu1 %v27379_v12  ;;  %v20164_v12 = vpack.c.bf16 %v29342_v62, %v29341_v37 }
 0xc33   :  { %20244 = vmatprep.subr.bf16.mxu1 %v29340_v28 }
 0xc34   :  { %20102 = vmatpush3.bf16.msra.mxu0 %v27417_v53 }
 0xc35   :  { %20103 = vmatprep.subr.bf16.mxu0 %v29340_v28 }
 0xc36   :  { %20246 = vmatpush3.bf16.msra.mxu1 %v27417_v53  ;;  %v29343_v53 = vand.u32 4294901760, %v27295_v47  ;;  %v20170_v47 = vpack.c.bf16 %v29346_v10, %v29345_v0 }
 0xc37   :  { %20247 = vmatprep.subr.bf16.mxu1 %v29340_v28 }
 0xc38   :  { %20105 = vmatpush3.bf16.msra.mxu0 %v27425_v6 }
 0xc39   :  { %20106 = vmatprep.subr.bf16.mxu0 %v29340_v28 }
 0xc3a   :  { %20249 = vmatpush3.bf16.msra.mxu1 %v27425_v6 }
 0xc3b   :  { %20250 = vmatprep.subr.bf16.mxu1 %v29340_v28 }
 0xc3c   :  { %20108 = vmatpush3.bf16.msra.mxu0 %v27441_v21 }
 0xc3d   :  { %20109 = vmatprep.subr.bf16.mxu0 %v29340_v28 }
 0xc3e   :  { %20252 = vmatpush3.bf16.msra.mxu1 %v27441_v21  ;;  %v29348_v21 = vand.u32 4294901760, %v27369_v52  ;;  %v29352_v52 = vand.u32 4294901760, %v27415_v30 }
 0xc3f   :  { %20253 = vmatprep.subr.bf16.mxu1 %v29340_v28 }
 0xc40   :  { %20111 = vmatpush3.bf16.msra.mxu0 %v27461_v34 }
 0xc41   :  { %20112 = vmatprep.subr.bf16.mxu0 %v29340_v28 }
 0xc42   :  { %20255 = vmatpush3.bf16.msra.mxu1 %v27461_v34 }
 0xc43   :  { %20256 = vmatprep.subr.bf16.mxu1 %v29340_v28 }
 0xc44   :  { %20114 = vmatpush3.bf16.msra.mxu0 %v27467_v4 }
 0xc45   :  { %20115 = vmatprep.subr.bf16.mxu0 %v29340_v28 }
 0xc46   :  { %20258 = vmatpush3.bf16.msra.mxu1 %v27467_v4 }
 0xc47   :  { %18063 = vmatmul.mubr.f32.vlgmr.msra.gmra.mrb[78].mxu0 %v27517_v9  ;;  %20259 = vmatprep.subr.bf16.mxu1 %v29340_v28 }
 0xc48   :  { %20117 = vmatpush3.bf16.msra.mxu0 %v27465_v31  ;;  %18097 = vmatprep.mubr.msk.f32.mxu0 %vm21249_vm2, %v29319_v60 }
 0xc49   :  { %18273 = vmatmul.mubr.f32.vlgmr.msra.gmra.mrb[86].mxu1 %v27522_v36  ;;  %20118 = vmatprep.subr.bf16.mxu0 %v29340_v28 }
 0xc4a   :  { %20261 = vmatpush3.bf16.msra.mxu1 %v27465_v31  ;;  %18307 = vmatprep.mubr.msk.f32.mxu1 %vm21249_vm2, %v29319_v60  ;;  %v20176_v31 = vpack.c.bf16 %v29350_v48, %v29349_v51  ;;  %v16269_v48 = vld [vmem:[%s28020_s6 + $0x5] sm:$0x1] }
 0xc4b   :  { %20262 = vmatprep.subr.bf16.mxu1 %v29340_v28 }
 0xc4c   :  { %20120 = vmatpush3.bf16.msra.mxu0 %v27471_v16 }
 0xc4d   :  { %20121 = vmatprep.subr.bf16.mxu0 %v29340_v28 }
 0xc4e   :  { %20264 = vmatpush3.bf16.msra.mxu1 %v27471_v16  ;;  %v29355_v16 = vand.u32 4294901760, %v29354_v46 }
 0xc4f   :  { %20265 = vmatprep.subr.bf16.mxu1 %v29340_v28 }
 0xc50   :  { %20123 = vmatpush3.bf16.msra.mxu0 %v27475_v13 }
 0xc51   :  { %20124 = vmatprep.subr.bf16.mxu0 %v29340_v28 }
 0xc52   :  { %20267 = vmatpush3.bf16.msra.mxu1 %v27475_v13  ;;  %v20182_v13 = vpack.c.bf16 %v29355_v16, %v29353_v59 }
 0xc53   :  { %20268 = vmatprep.subr.bf16.mxu1 %v29340_v28 }
 0xc54   :  { %20126 = vmatpush3.bf16.msra.mxu0 %v27479_v35 }
 0xc55   :  { %20127 = vmatprep.subr.bf16.mxu0 %v29340_v28 }
 0xc56   :  { %20270 = vmatpush3.bf16.msra.mxu1 %v27479_v35  ;;  %v29358_v35 = vld [vmem:[#allocation34_spill] sm:$0xff] }
 0xc57   :  { %20271 = vmatprep.subr.bf16.mxu1 %v29340_v28 }
 0xc58   :  { %20129 = vmatpush3.bf16.msra.mxu0 %v27483_v29 }
 0xc59   :  { %20130 = vmatprep.subr.bf16.mxu0 %v29340_v28 }
 0xc5a   :  { %20273 = vmatpush3.bf16.msra.mxu1 %v27483_v29  ;;  %v29359_v29 = vand.u32 4294901760, %v29358_v35 }
 0xc5b   :  { %20274 = vmatprep.subr.bf16.mxu1 %v29340_v28 }
 0xc5c   :  { %20132 = vmatpush3.bf16.msra.mxu0 %v27487_v42 }
 0xc5d   :  { %20133 = vmatprep.subr.bf16.mxu0 %v29340_v28 }
 0xc5e   :  { %20276 = vmatpush3.bf16.msra.mxu1 %v27487_v42 }
 0xc5f   :  { %20277 = vmatprep.subr.bf16.mxu1 %v29340_v28 }
 0xc60   :  { %20135 = vmatpush3.bf16.msra.mxu0 %v27491_v55 }
 0xc61   :  { %20136 = vmatprep.subr.bf16.mxu0 %v29340_v28 }
 0xc62   :  { %20279 = vmatpush3.bf16.msra.mxu1 %v27491_v55 }
 0xc63   :  { %20280 = vmatprep.subr.bf16.mxu1 %v29340_v28 }
 0xc64   :  { %20138 = vmatpush3.bf16.msra.mxu0 %v27495_v26 }
 0xc65   :  { %20139 = vmatprep.subr.bf16.mxu0 %v29340_v28 }
 0xc66   :  { %20282 = vmatpush3.bf16.msra.mxu1 %v27495_v26  ;;  %v29344_v26 = vand.u32 4294901760, %v27297_v45  ;;  %v29347_v45 = vand.u32 4294901760, %v27366_v24  ;;  %v29351_v24 = vand.u32 4294901760, %v27410_v38  ;;  %v29356_v38 = vld [vmem:[#allocation33_spill] sm:$0xff] }
 0xc67   :  { %18098 = vmatmul.mubr.f32.vlgmr.msra.gmra.mrb[78].mxu0 %v27520_v7  ;;  %20283 = vmatprep.subr.bf16.mxu1 %v29340_v28  ;;  %v29357_v30 = vand.u32 4294901760, %v29356_v38 }
 0xc68   :  { %20141 = vmatpush3.bf16.msra.mxu0 %v27219_v17  ;;  %18132 = vmatprep.mubr.msk.f32.mxu0 %vm21249_vm2, %v29319_v60  ;;  %v20167_v6 = vpack.c.bf16 %v29344_v26, %v29343_v53  ;;  %v20173_v34 = vpack.c.bf16 %v29348_v21, %v29347_v45  ;;  %v20179_v4 = vpack.c.bf16 %v29352_v52, %v29351_v24  ;;  %v16268_v21 = vld [vmem:[%s28020_s6 + $0x4] sm:$0x1] }
 0xc69   :  { %18308 = vmatmul.mubr.f32.vlgmr.msra.gmra.mrb[86].mxu1 %v27526_v49  ;;  %20142 = vmatprep.subr.bf16.mxu0 %v29340_v28  ;;  %v20185_v42 = vpack.c.bf16 %v29359_v29, %v29357_v30 }
 0xc6a   :  { %20285 = vmatpush3.bf16.msra.mxu1 %v27219_v17  ;;  %18342 = vmatprep.mubr.msk.f32.mxu1 %vm21249_vm2, %v29319_v60 }
 0xc6b   :  { %20286 = vmatprep.subr.bf16.mxu1 %v29340_v28 }
 0xc6c   :  { %20144 = vmatpush3.bf16.msra.mxu0 %v27251_v63 }
 0xc6d   :  { %20145 = vmatprep.subr.bf16.mxu0 %v29340_v28 }
 0xc6e   :  { %20288 = vmatpush3.bf16.msra.mxu1 %v27251_v63 }
 0xc6f   :  { %20289 = vmatprep.subr.bf16.mxu1 %v29340_v28 }
 0xc70   :  { %20147 = vmatpush3.bf16.msra.mxu0 %v27255_v1 }
 0xc71   :  { %20148 = vmatprep.subr.bf16.mxu0 %v29340_v28 }
 0xc72   :  { %20291 = vmatpush3.bf16.msra.mxu1 %v27255_v1 }
 0xc73   :  { %20292 = vmatprep.subr.bf16.mxu1 %v29340_v28 }
 0xc74   :  { %20150 = vmatpush3.bf16.msra.mxu0 %v27277_v58 }
 0xc75   :  { %20151 = vmatprep.subr.bf16.mxu0 %v29340_v28 }
 0xc76   :  { %20294 = vmatpush3.bf16.msra.mxu1 %v27277_v58 }
 0xc77   :  { %20295 = vmatprep.subr.bf16.mxu1 %v29340_v28 }
 0xc78   :  { %20153 = vmatpush3.bf16.msra.mxu0 %v27309_v33 }
 0xc79   :  { %20154 = vmatprep.subr.bf16.mxu0 %v29340_v28 }
 0xc7a   :  { %20297 = vmatpush3.bf16.msra.mxu1 %v27309_v33 }
 0xc7b   :  { %20298 = vmatprep.subr.bf16.mxu1 %v29340_v28 }
 0xc7c   :  { %20156 = vmatpush3.bf16.msra.mxu0 %v27339_v43 }
 0xc7d   :  { %20157 = vmatprep.subr.bf16.mxu0 %v29340_v28 }
 0xc7e   :  { %20300 = vmatpush3.bf16.msra.mxu1 %v27339_v43 }
 0xc7f   :  { %20301 = vmatprep.subr.bf16.mxu1 %v29340_v28 }
 0xc80   :  { %20159 = vmatpush3.bf16.msra.mxu0 %v27373_v19 }
 0xc81   :  { %20160 = vmatprep.subr.bf16.mxu0 %v29340_v28 }
 0xc82   :  { %20303 = vmatpush3.bf16.msra.mxu1 %v27373_v19 }
 0xc83   :  { %20304 = vmatprep.subr.bf16.mxu1 %v29340_v28 }
 0xc84   :  { %20162 = vmatpush3.bf16.msra.mxu0 %v27395_v2 }
 0xc85   :  { %20163 = vmatprep.subr.bf16.mxu0 %v29340_v28 }
 0xc86   :  { %20306 = vmatpush3.bf16.msra.mxu1 %v27395_v2 }
 0xc87   :  { %18133 = vmatmul.mubr.f32.vlgmr.msra.gmra.mrb[78].mxu0 %v12933_v5  ;;  %20307 = vmatprep.subr.bf16.mxu1 %v29340_v28 }
 0xc88   :  { %20165 = vmatpush3.bf16.msra.mxu0 %v20164_v12  ;;  %18167 = vmatprep.mubr.msk.f32.mxu0 %vm21249_vm2, %v29319_v60 }
 0xc89   :  { %18343 = vmatmul.mubr.f32.vlgmr.msra.gmra.mrb[86].mxu1 %v13574_v57  ;;  %20166 = vmatprep.subr.bf16.mxu0 %v29340_v28 }
 0xc8a   :  { %20309 = vmatpush3.bf16.msra.mxu1 %v20164_v12  ;;  %18377 = vmatprep.mubr.msk.f32.mxu1 %vm21249_vm2, %v29319_v60 }
 0xc8b   :  { %20310 = vmatprep.subr.bf16.mxu1 %v29340_v28 }
 0xc8c   :  { %20168 = vmatpush3.bf16.msra.mxu0 %v20167_v6 }
 0xc8d   :  { %20169 = vmatprep.subr.bf16.mxu0 %v29340_v28 }
 0xc8e   :  { %20312 = vmatpush3.bf16.msra.mxu1 %v20167_v6 }
 0xc8f   :  { %20313 = vmatprep.subr.bf16.mxu1 %v29340_v28 }
 0xc90   :  { %20171 = vmatpush3.bf16.msra.mxu0 %v20170_v47 }
 0xc91   :  { %20172 = vmatprep.subr.bf16.mxu0 %v29340_v28 }
 0xc92   :  { %20315 = vmatpush3.bf16.msra.mxu1 %v20170_v47 }
 0xc93   :  { %20316 = vmatprep.subr.bf16.mxu1 %v29340_v28 }
 0xc94   :  { %20174 = vmatpush3.bf16.msra.mxu0 %v20173_v34 }
 0xc95   :  { %20175 = vmatprep.subr.bf16.mxu0 %v29340_v28 }
 0xc96   :  { %20318 = vmatpush3.bf16.msra.mxu1 %v20173_v34 }
 0xc97   :  { %20319 = vmatprep.subr.bf16.mxu1 %v29340_v28 }
 0xc98   :  { %20177 = vmatpush3.bf16.msra.mxu0 %v20176_v31 }
 0xc99   :  { %20178 = vmatprep.subr.bf16.mxu0 %v29340_v28 }
 0xc9a   :  { %20321 = vmatpush3.bf16.msra.mxu1 %v20176_v31 }
 0xc9b   :  { %20322 = vmatprep.subr.bf16.mxu1 %v29340_v28 }
 0xc9c   :  { %20180 = vmatpush3.bf16.msra.mxu0 %v20179_v4 }
 0xc9d   :  { %20181 = vmatprep.subr.bf16.mxu0 %v29340_v28 }
 0xc9e   :  { %20324 = vmatpush3.bf16.msra.mxu1 %v20179_v4 }
 0xc9f   :  { %20325 = vmatprep.subr.bf16.mxu1 %v29340_v28 }
 0xca0   :  { %20183 = vmatpush3.bf16.msra.mxu0 %v20182_v13 }
 0xca1   :  { %20184 = vmatprep.subr.bf16.mxu0 %v29340_v28 }
 0xca2   :  { %20327 = vmatpush3.bf16.msra.mxu1 %v20182_v13 }
 0xca3   :  { %20328 = vmatprep.subr.bf16.mxu1 %v29340_v28 }
 0xca4   :  { %20186 = vmatpush3.bf16.msra.mxu0 %v20185_v42 }
 0xca5   :  { %20187 = vmatprep.subr.bf16.mxu0 %v29340_v28 }
 0xca6   :  { %20330 = vmatpush3.bf16.msra.mxu1 %v20185_v42 }
 0xca7   :  { %18168 = vmatmul.mubr.f32.vlgmr.msra.gmra.mrb[78].mxu0 %v27517_v9  ;;  %20331 = vmatprep.subr.bf16.mxu1 %v29340_v28 }
 0xca8   :  { %20189 = vmatpush3.bf16.msra.mxu0 %v27219_v17  ;;  %18202 = vmatprep.mubr.msk.f32.mxu0 %vm21249_vm2, %v29319_v60 }
 0xca9   :  { %18378 = vmatmul.mubr.f32.vlgmr.msra.gmra.mrb[86].mxu1 %v27522_v36  ;;  %20190 = vmatprep.subr.bf16.mxu0 %v29340_v28 }
 0xcaa   :  { %20333 = vmatpush3.bf16.msra.mxu1 %v27219_v17  ;;  %18412 = vmatprep.mubr.msk.f32.mxu1 %vm21249_vm2, %v29319_v60  ;;  %v16264_v17 = vld [vmem:[%s28019_s5 + $0x100] sm:$0xff] }
 0xcab   :  { %20334 = vmatprep.subr.bf16.mxu1 %v29340_v28 }
 0xcac   :  { %20192 = vmatpush3.bf16.msra.mxu0 %v27251_v63 }
 0xcad   :  { %20193 = vmatprep.subr.bf16.mxu0 %v29340_v28 }
 0xcae   :  { %20336 = vmatpush3.bf16.msra.mxu1 %v27251_v63  ;;  %v16265_v63 = vld [vmem:[%s28019_s5 + $0x120] sm:$0xff] }
 0xcaf   :  { %20337 = vmatprep.subr.bf16.mxu1 %v29340_v28 }
 0xcb0   :  { %20195 = vmatpush3.bf16.msra.mxu0 %v27255_v1 }
 0xcb1   :  { %20196 = vmatprep.subr.bf16.mxu0 %v29340_v28 }
 0xcb2   :  { %20339 = vmatpush3.bf16.msra.mxu1 %v27255_v1  ;;  %v16266_v1 = vld [vmem:[%s28019_s5 + $0x140] sm:$0xff] }
 0xcb3   :  { %20340 = vmatprep.subr.bf16.mxu1 %v29340_v28 }
 0xcb4   :  { %20198 = vmatpush3.bf16.msra.mxu0 %v27277_v58 }
 0xcb5   :  { %20199 = vmatprep.subr.bf16.mxu0 %v29340_v28 }
 0xcb6   :  { %20342 = vmatpush3.bf16.msra.mxu1 %v27277_v58  ;;  %v14149_v58 = vand.u32 4294901760, %v16264_v17 }
 0xcb7   :  { %20343 = vmatprep.subr.bf16.mxu1 %v29340_v28 }
 0xcb8   :  { %20201 = vmatpush3.bf16.msra.mxu0 %v27309_v33  ;;  %v14229_v40 = vsub.f32 %v16264_v17, %v14149_v58 }
 0xcb9   :  { %20202 = vmatprep.subr.bf16.mxu0 %v29340_v28 }
 0xcba   :  { %20345 = vmatpush3.bf16.msra.mxu1 %v27309_v33  ;;  %v14152_v33 = vand.u32 4294901760, %v16265_v63  ;;  %v14230_v3 = vand.u32 4294901760, %v14229_v40 }
 0xcbb   :  { %20346 = vmatprep.subr.bf16.mxu1 %v29340_v28 }
 0xcbc   :  { %20204 = vmatpush3.bf16.msra.mxu0 %v27339_v43  ;;  %v27759_v25 = vpack.c.bf16 %v14152_v33, %v14149_v58  ;;  %v14236_v44 = vsub.f32 %v16265_v63, %v14152_v33  ;;  %v14231_v27 = vsub.f32 %v14229_v40, %v14230_v3  ;;  %v21184_v63 = vld [vmem:[%s28021_s7 + $0x40] sm:$0xff]   ;;  %v21186_v58 = vld [vmem:[%s28021_s7 + $0x48] sm:$0xff]   ;;  %v21188_v33 = vld [vmem:[%s28021_s7 + $0x50] sm:$0xff]  }
 0xcbd   :  { %20205 = vmatprep.subr.bf16.mxu0 %v29340_v28 }
 0xcbe   :  { %20348 = vmatpush3.bf16.msra.mxu1 %v27339_v43  ;;  %v16267_v43 = vld [vmem:[%s28019_s5 + $0x160] sm:$0xff]  ;;  %v14237_v15 = vand.u32 4294901760, %v14236_v44  ;;  %v14232_v18 = vand.u32 4294901760, %v14231_v27  ;;  %v20368_v49 = vpack.c.bf16 %v14236_v44, %v14229_v40  ;;  %v21194_v40 = vld [vmem:[%s28021_s7 + $0x68] sm:$0xff]   ;;  %v21198_v27 = vld [vmem:[%s28021_s7 + $0x78] sm:$0xff]  }
 0xcbf   :  { %20349 = vmatprep.subr.bf16.mxu1 %v29340_v28 }
 0xcc0   :  { %20207 = vmatpush3.bf16.msra.mxu0 %v27373_v19  ;;  %v14238_v50 = vsub.f32 %v14236_v44, %v14237_v15  ;;  %v27771_v61 = vpack.c.bf16 %v14237_v15, %v14230_v3  ;;  %v21195_v44 = vld [vmem:[%s28021_s7 + $0x28] sm:$0xff]   ;;  %v21196_v3 = vld [vmem:[%s28021_s7 + $0x70] sm:$0xff]  }
 0xcc1   :  { %20208 = vmatprep.subr.bf16.mxu0 %v29340_v28  ;;  %v21197_v15 = vld [vmem:[%s28021_s7 + $0x30] sm:$0xff]  }
 0xcc2   :  { %20351 = vmatpush3.bf16.msra.mxu1 %v27373_v19  ;;  %v14155_v19 = vand.u32 4294901760, %v16266_v1  ;;  %v14239_v41 = vand.u32 4294901760, %v14238_v50  ;;  %v21199_v50 = vld [vmem:[%s28021_s7 + $0x38] sm:$0xff]  }
 0xcc3   :  { %20352 = vmatprep.subr.bf16.mxu1 %v29340_v28 }
 0xcc4   :  { %20210 = vmatpush3.bf16.msra.mxu0 %v27395_v2  ;;  %v14243_v39 = vsub.f32 %v16266_v1, %v14155_v19  ;;  %v20362_v7 = vpack.c.bf16 %v14239_v41, %v14232_v18  ;;  %v21185_v1 = vld [vmem:[%s28021_s7] sm:$0xff]  }
 0xcc5   :  { %20355 = vmatprep.subr.bf16.mxu0 %v29340_v28 }
 0xcc6   :  { %20354 = vmatpush3.bf16.msra.mxu1 %v27395_v2  ;;  %v14158_v2 = vand.u32 4294901760, %v16267_v43  ;;  %v14244_v54 = vand.u32 4294901760, %v14243_v39 }
 0xcc7   :  { %18203 = vmatmul.mubr.f32.vlgmr.msra.gmra.mrb[78].mxu0 %v27517_v9  ;;  %20391 = vmatprep.subr.bf16.mxu1 %v29340_v28 }
 0xcc8   :  { %18423 = vmatprep.mubr.msk.f32.mxu0 %vm21249_vm2, %v29319_v60  ;;  %20357 = vmatpush3.bf16.msra.mxu0 %v27759_v25  ;;  %v27762_v55 = vpack.c.bf16 %v14158_v2, %v14155_v19  ;;  %v14250_v20 = vsub.f32 %v16267_v43, %v14158_v2  ;;  %v21189_v43 = vld [vmem:[%s28021_s7 + $0x10] sm:$0xff]   ;;  %v21190_v19 = vld [vmem:[%s28021_s7 + $0x58] sm:$0xff]  }
 0xcc9   :  { %18413 = vmatmul.mubr.f32.vlgmr.msra.gmra.mrb[86].mxu1 %v27522_v36  ;;  %20358 = vmatprep.subr.bf16.mxu0 %v29340_v28  ;;  %v14245_v36 = vsub.f32 %v14243_v39, %v14244_v54  ;;  %v21191_v2 = vld [vmem:[%s28021_s7 + $0x18] sm:$0xff]  }
 0xcca   :  { %18489 = vmatprep.mubr.msk.f32.mxu1 %vm21249_vm2, %v29319_v60  ;;  %20393 = vmatpush3.bf16.msra.mxu1 %v27759_v25  ;;  %v14251_v9 = vand.u32 4294901760, %v14250_v20  ;;  %v20371_v8 = vpack.c.bf16 %v14250_v20, %v14243_v39 }
 0xccb   :  { %20394 = vmatprep.subr.bf16.mxu1 %v29340_v28  ;;  %v14246_v11 = vand.u32 4294901760, %v14245_v36 }
 0xccc   :  { %20360 = vmatpush3.bf16.msra.mxu0 %v27762_v55  ;;  %v14252_v5 = vsub.f32 %v14250_v20, %v14251_v9  ;;  %v27773_v37 = vpack.c.bf16 %v14251_v9, %v14244_v54  ;;  %v29360_v20 = vld [vmem:[#allocation149_spill] sm:$0xff] }
 0xccd   :  { %20361 = vmatprep.subr.bf16.mxu0 %v29340_v28 }
 0xcce   :  { %20396 = vmatpush3.bf16.msra.mxu1 %v27762_v55  ;;  %v14253_v57 = vand.u32 4294901760, %v14252_v5 }
 0xccf   :  { %20397 = vmatprep.subr.bf16.mxu1 %v29340_v28 }
 0xcd0   :  { %v20365_v32 = vpack.c.bf16 %v14253_v57, %v14246_v11 }
 0xd9a   :  { %v13487_v62 = vpop.f32.mrb[78].mxu0 }
 0xd9b   :  { %v14133_v12 = vmul.f32 0.0078125, %v13487_v62  ;;  %v18204_v53 = vpop.f32.mrb[79].mxu0 }
 0xd9c   :  { %v14128_v26 = vpop.f32.mrb[86].mxu1 }
 0xd9d   :  { %v14135_v6 = vmul.f32 %v14133_v12, %v14133_v12  ;;  %v14134_v0 = vmul.f32 0.0078125, %v14128_v26  ;;  %v18414_v10 = vpop.f32.mrb[87].mxu1  ;;  %v21202_v26 = vld [vmem:[%s28021_s7 + $0x88] sm:$0xff]  }
 0xd9e   :  { %v21205_v10 = vld [vmem:[%s28021_s7 + $0xd0] sm:$0xff]  }
 0xd9f   :  { %v14136_v47 = vsub.f32 %v14134_v0, %v14135_v6  ;;  %v21203_v6 = vld [vmem:[%s28021_s7 + $0xc8] sm:$0xff]   ;;  %v21204_v0 = vld [vmem:[%s28021_s7 + $0x90] sm:$0xff]  }
 0xda1   :  { %v14140_v45 = vadd.f32 1e-05, %v14136_v47  ;;  %v21206_v47 = vld [vmem:[%s28021_s7 + $0x98] sm:$0xff]  }
 0xda3   :  { %21220 = vrsqrt.f32 %v14140_v45  ;;  %v21207_v45 = vld [vmem:[%s28021_s7 + $0xd8] sm:$0xff]  }
 0xdad   :  { %v21221_v34 = vpop.eup %21220 }
 0xdae   :  { %v14142_v51 = vmul.f32 %v21221_v34, %v16268_v21  ;;  %v21208_v21 = vld [vmem:[%s28021_s7 + $0xa0] sm:$0xff]  }
 0xdaf   :  { %v21209_v34 = vld [vmem:[%s28021_s7 + $0xe0] sm:$0xff]  }
 0xdb0   :  { %v14143_v31 = vmul.f32 %v14142_v51, %v14133_v12  ;;  %v14146_v24 = vsel %vm5115_vm1, %v14142_v51, 0  ;;  %v21210_v51 = vld [vmem:[%s28021_s7 + $0xa8] sm:$0xff]  }
 0xdb1   :  { %v27782_v52 = vand.u32 4294901760, %v14146_v24 }
 0xdb2   :  { %v14144_v4 = vsub.f32 %v16269_v48, %v14143_v31  ;;  %v21211_v48 = vld [vmem:[%s28021_s7 + $0xe8] sm:$0xff]   ;;  %v21212_v31 = vld [vmem:[%s28021_s7 + $0xb0] sm:$0xff]  }
 0xdb3   :  { %v14218_v59 = vsub.f32 %v14146_v24, %v27782_v52  ;;  %v21213_v24 = vld [vmem:[%s28021_s7 + $0xf0] sm:$0xff]  }
 0xdb4   :  { %v14634_v46 = vsel %vm5115_vm1, %v14144_v4, 0  ;;  %v21215_v4 = vld [vmem:[%s28021_s7 + $0xf8] sm:$0xff]  }
 0xdb5   :  { %v14219_v16 = vand.u32 4294901760, %v14218_v59  ;;  %v27786_v13 = vand.u32 4294901760, %v14634_v46 }
 0xdb7   :  { %v14220_v38 = vsub.f32 %v14218_v59, %v14219_v16  ;;  %v14706_v30 = vsub.f32 %v14634_v46, %v27786_v13 }
 0xdb9   :  { %v14221_v35 = vand.u32 4294901760, %v14220_v38  ;;  %v14707_v29 = vand.u32 4294901760, %v14706_v30 }
 0xdbb   :  { %18424 = vmatmul.mubr.f32.vlgmr.msra.gmra.mrb[88].mxu0 %v14221_v35  ;;  %v14708_v42 = vsub.f32 %v14706_v30, %v14707_v29 }
 0xdbc   :  { %20363 = vmatpush3.bf16.msra.mxu0 %v20362_v7  ;;  %18434 = vmatprep.mubr.msk.f32.mxu0 %vm21249_vm2, %v29319_v60 }
 0xdbd   :  { %20364 = vmatprep.subr.bf16.mxu0 %v29340_v28  ;;  %v14709_v17 = vand.u32 4294901760, %v14708_v42 }
 0xdbf   :  { %18490 = vmatmul.mubr.f32.vlgmr.msra.gmra.mrb[104].mxu1 %v14709_v17 }
 0xdc0   :  { %20366 = vmatpush3.bf16.msra.mxu0 %v20365_v32  ;;  %20399 = vmatpush3.bf16.msra.mxu1 %v20362_v7 }
 0xdc1   :  { %20367 = vmatprep.subr.bf16.mxu0 %v29340_v28  ;;  %20400 = vmatprep.subr.bf16.mxu1 %v29340_v28 }
 0xdc2   :  { %18500 = vmatprep.mubr.msk.f32.mxu1 %vm21249_vm2, %v29319_v60 }
 0xdc3   :  { %18435 = vmatmul.mubr.f32.vlgmr.msra.gmra.mrb[88].mxu0 %v27782_v52 }
 0xdc4   :  { %20369 = vmatpush3.bf16.msra.mxu0 %v20368_v49  ;;  %20402 = vmatpush3.bf16.msra.mxu1 %v20365_v32 }
 0xdc5   :  { %20370 = vmatprep.subr.bf16.mxu0 %v29340_v28  ;;  %20403 = vmatprep.subr.bf16.mxu1 %v29340_v28 }
 0xdc6   :  { %18445 = vmatprep.mubr.msk.f32.mxu0 %vm21249_vm2, %v29319_v60 }
 0xdc7   :  { %18501 = vmatmul.mubr.f32.vlgmr.msra.gmra.mrb[104].mxu1 %v27786_v13 }
 0xdc8   :  { %20372 = vmatpush3.bf16.msra.mxu0 %v20371_v8  ;;  %20405 = vmatpush3.bf16.msra.mxu1 %v20368_v49 }
 0xdc9   :  { %20373 = vmatprep.subr.bf16.mxu0 %v29340_v28  ;;  %20406 = vmatprep.subr.bf16.mxu1 %v29340_v28 }
 0xdca   :  { %18511 = vmatprep.mubr.msk.f32.mxu1 %vm21249_vm2, %v29319_v60 }
 0xdcb   :  { %18446 = vmatmul.mubr.f32.vlgmr.msra.gmra.mrb[88].mxu0 %v14218_v59 }
 0xdcc   :  { %20375 = vmatpush3.bf16.msra.mxu0 %v27759_v25  ;;  %20408 = vmatpush3.bf16.msra.mxu1 %v20371_v8 }
 0xdcd   :  { %20376 = vmatprep.subr.bf16.mxu0 %v29340_v28  ;;  %20409 = vmatprep.subr.bf16.mxu1 %v29340_v28 }
 0xdce   :  { %18456 = vmatprep.mubr.msk.f32.mxu0 %vm21249_vm2, %v29319_v60 }
 0xdcf   :  { %18512 = vmatmul.mubr.f32.vlgmr.msra.gmra.mrb[104].mxu1 %v14706_v30 }
 0xdd0   :  { %20378 = vmatpush3.bf16.msra.mxu0 %v27762_v55  ;;  %20411 = vmatpush3.bf16.msra.mxu1 %v27759_v25 }
 0xdd1   :  { %20379 = vmatprep.subr.bf16.mxu0 %v29340_v28  ;;  %20412 = vmatprep.subr.bf16.mxu1 %v29340_v28 }
 0xdd2   :  { %18522 = vmatprep.mubr.msk.f32.mxu1 %vm21249_vm2, %v29319_v60 }
 0xdd3   :  { %18457 = vmatmul.mubr.f32.vlgmr.msra.gmra.mrb[88].mxu0 %v14219_v16 }
 0xdd4   :  { %20381 = vmatpush3.bf16.msra.mxu0 %v27771_v61  ;;  %20414 = vmatpush3.bf16.msra.mxu1 %v27762_v55 }
 0xdd5   :  { %20382 = vmatprep.subr.bf16.mxu0 %v29340_v28  ;;  %20415 = vmatprep.subr.bf16.mxu1 %v29340_v28 }
 0xdd6   :  { %18467 = vmatprep.mubr.msk.f32.mxu0 %vm21249_vm2, %v29319_v60 }
 0xdd7   :  { %18523 = vmatmul.mubr.f32.vlgmr.msra.gmra.mrb[104].mxu1 %v14707_v29 }
 0xdd8   :  { %20384 = vmatpush3.bf16.msra.mxu0 %v27773_v37  ;;  %20417 = vmatpush3.bf16.msra.mxu1 %v27771_v61 }
 0xdd9   :  { %20385 = vmatprep.subr.bf16.mxu0 %v29340_v28  ;;  %20418 = vmatprep.subr.bf16.mxu1 %v29340_v28 }
 0xdda   :  { %18533 = vmatprep.mubr.msk.f32.mxu1 %vm21249_vm2, %v29319_v60 }
 0xddb   :  { %18468 = vmatmul.mubr.f32.vlgmr.msra.gmra.mrb[88].mxu0 %v27782_v52 }
 0xddc   :  { %20387 = vmatpush3.bf16.msra.mxu0 %v27759_v25  ;;  %20420 = vmatpush3.bf16.msra.mxu1 %v27773_v37 }
 0xddd   :  { %20388 = vmatprep.subr.bf16.mxu0 %v29340_v28  ;;  %20421 = vmatprep.subr.bf16.mxu1 %v29340_v28 }
 0xdde   :  { %18478 = vmatprep.mubr.msk.f32.mxu0 %vm21249_vm2, %v29319_v60 }
 0xddf   :  { %18534 = vmatmul.mubr.f32.vlgmr.msra.gmra.mrb[104].mxu1 %v27786_v13 }
 0xde0   :  { %20390 = vmatpush3.bf16.msra.mxu0 %v27762_v55  ;;  %20423 = vmatpush3.bf16.msra.mxu1 %v27759_v25  ;;  %v21192_v25 = vld [vmem:[%s28021_s7 + $0x60] sm:$0xff]  }
 0xde1   :  { %20424 = vmatprep.subr.bf16.mxu1 %v29340_v28  ;;  %18544 = vmatprep.mubr.msk.f32.mxu1 %vm21249_vm2, %v29319_v60  ;;  %v21187_v28 = vld [vmem:[%s28021_s7 + $0x8] sm:$0xff]  }
 0xde2   :  { %18547 = vmatprep.subr.bf16.mxu0 %v29319_v60 }
 0xde3   :  { %18479 = vmatmul.mubr.f32.vlgmr.msra.gmra.mrb[88].mxu0 %v27782_v52  ;;  %v21214_v52 = vld [vmem:[%s28021_s7 + $0xb8] sm:$0xff]  }
 0xde4   :  { %20426 = vmatpush3.bf16.msra.mxu1 %v27762_v55  ;;  %18548 = vmatpush3.bf16.msra.mxu0 %v21184_v63  ;;  %v21193_v55 = vld [vmem:[%s28021_s7 + $0x20] sm:$0xff]  }
 0xde5   :  { %18567 = vmatprep.subr.bf16.mxu1 %v29319_v60  ;;  %18549 = vmatprep.subr.bf16.mxu0 %v29319_v60 }
 0xde6   :  { %18563 = vmatprep.mubr.msk.bf16.mxu0 %vm21249_vm2, %v29319_v60 }
 0xde7   :  { %18545 = vmatmul.mubr.f32.vlgmr.msra.gmra.mrb[104].mxu1 %v27786_v13 }
 0xde8   :  { %18568 = vmatpush3.bf16.msra.mxu1 %v21185_v1  ;;  %18550 = vmatpush3.bf16.msra.mxu0 %v21186_v58 }
 0xde9   :  { %18569 = vmatprep.subr.bf16.mxu1 %v29319_v60  ;;  %18551 = vmatprep.subr.bf16.mxu0 %v29319_v60 }
 0xdea   :  { %18583 = vmatprep.mubr.msk.bf16.mxu1 %vm21249_vm2, %v29319_v60 }
 0xdec   :  { %18570 = vmatpush3.bf16.msra.mxu1 %v21187_v28  ;;  %18552 = vmatpush3.bf16.msra.mxu0 %v21188_v33 }
 0xded   :  { %18571 = vmatprep.subr.bf16.mxu1 %v29319_v60  ;;  %18553 = vmatprep.subr.bf16.mxu0 %v29319_v60 }
 0xdf0   :  { %18572 = vmatpush3.bf16.msra.mxu1 %v21189_v43  ;;  %18554 = vmatpush3.bf16.msra.mxu0 %v21190_v19  ;;  %v16350_v43 = vld [vmem:[%s28022_s8] ss:$0 sm:$0xff] }
 0xdf1   :  { %18573 = vmatprep.subr.bf16.mxu1 %v29319_v60  ;;  %18555 = vmatprep.subr.bf16.mxu0 %v29319_v60 }
 0xdf4   :  { %18574 = vmatpush3.bf16.msra.mxu1 %v21191_v2  ;;  %18556 = vmatpush3.bf16.msra.mxu0 %v21192_v25 }
 0xdf5   :  { %18575 = vmatprep.subr.bf16.mxu1 %v29319_v60  ;;  %18557 = vmatprep.subr.bf16.mxu0 %v29319_v60 }
 0xdf8   :  { %18576 = vmatpush3.bf16.msra.mxu1 %v21193_v55  ;;  %18558 = vmatpush3.bf16.msra.mxu0 %v21194_v40 }
 0xdf9   :  { %18577 = vmatprep.subr.bf16.mxu1 %v29319_v60  ;;  %18559 = vmatprep.subr.bf16.mxu0 %v29319_v60 }
 0xdfc   :  { %18578 = vmatpush3.bf16.msra.mxu1 %v21195_v44  ;;  %18560 = vmatpush3.bf16.msra.mxu0 %v21196_v3 }
 0xdfd   :  { %18579 = vmatprep.subr.bf16.mxu1 %v29319_v60  ;;  %18561 = vmatprep.subr.bf16.mxu0 %v29319_v60 }
 0xe00   :  { %18580 = vmatpush3.bf16.msra.mxu1 %v21197_v15  ;;  %18562 = vmatpush3.bf16.msra.mxu0 %v21198_v27 }
 0xe01   :  { %18581 = vmatprep.subr.bf16.mxu1 %v29319_v60  ;;  %18587 = vmatprep.subr.bf16.mxu0 %v29319_v60 }
 0xe04   :  { %18582 = vmatpush3.bf16.msra.mxu1 %v21199_v50 }
 0xe05   :  { %18607 = vmatprep.subr.bf16.mxu1 %v29319_v60 }
 0xeb6   :  { %v14629_v39 = vpop.f32.mrb[88].mxu0 }
 0xeb7   :  { %v15124_v18 = vrot.slane %v14629_v39, %v29360_v20  ;;  %v18480_v41 = vpop.f32.mrb[89].mxu0 }
 0xeb9   :  { %v15125_v54 = vmul.f32 %v15124_v18, %v27497_v56  ;;  %v15126_v7 = vmul.f32 %v15124_v18, %v27499_v22  ;;  %v15127_v36 = vmul.f32 %v15124_v18, %v27507_v14  ;;  %v15128_v5 = vmul.f32 %v15124_v18, %v27512_v23  ;;  %v21200_v56 = vld [vmem:[%s28021_s7 + $0x80] sm:$0xff]  }
 0xeba   :  { %v15117_v9 = vpop.f32.mrb[104].mxu1  ;;  %v21201_v22 = vld [vmem:[%s28021_s7 + $0xc0] sm:$0xff]  }
 0xebb   :  { %v15132_v49 = vrot.slane %v15117_v9, %v29360_v20  ;;  %v18546_v11 = vpop.f32.mrb[105].mxu1 }
 0xebd   :  { %v15133_v57 = vadd.f32 %v15132_v49, %v15125_v54  ;;  %v15134_v32 = vadd.f32 %v15132_v49, %v15126_v7  ;;  %v15135_v8 = vadd.f32 %v15132_v49, %v15127_v36  ;;  %v15136_v61 = vadd.f32 %v15132_v49, %v15128_v5 }
 0xebf   :  { %v15137_v37 = vmax.f32 %v15133_v57, 0.0  ;;  %v15138_v62 = vmax.f32 %v15134_v32, 0.0  ;;  %v15139_v12 = vmax.f32 %v15135_v8, 0.0  ;;  %v15140_v53 = vmax.f32 %v15136_v61, 0.0 }
 0xec1   :  { %15141 = vst [vmem:[%s28026_s12] sm:$0xff] %v15137_v37  ;;  %15142 = vst [vmem:[%s28026_s12 + $0x8] sm:$0xff] %v15138_v62  ;;  %v15162_v14 = vpack.c.bf16 %v15138_v62, %v15138_v62  ;;  %v15145_v23 = vpack.c.bf16 %v15137_v37, %v15137_v37  ;;  %v15356_v59 = vpack.c.bf16 %v15139_v12, %v15139_v12 }
 0xec2   :  { %15143 = vst [vmem:[%s28026_s12 + $0x10] sm:$0xff] %v15139_v12  ;;  %15144 = vst [vmem:[%s28026_s12 + $0x18] sm:$0xff] %v15140_v53  ;;  %v15463_v46 = vpack.c.bf16 %v15140_v53, %v15140_v53 }
 0xec3   :  { %18564 = vmatmul.mubr.bf16.vlgmr.msra.gmra.mrb[92].mxu0 %v15162_v14  ;;  %18584 = vmatmul.mubr.bf16.vlgmr.msra.gmra.mrb[108].mxu1 %v15145_v23 }
 0xec4   :  { %18588 = vmatpush3.bf16.msra.mxu0 %v21200_v56  ;;  %18608 = vmatpush3.bf16.msra.mxu1 %v21201_v22 }
 0xec5   :  { %18589 = vmatprep.subr.bf16.mxu0 %v29319_v60  ;;  %18609 = vmatprep.subr.bf16.mxu1 %v29319_v60 }
 0xec6   :  { %18603 = vmatprep.mubr.msk.bf16.mxu0 %vm21249_vm2, %v29319_v60  ;;  %18623 = vmatprep.mubr.msk.bf16.mxu1 %vm21249_vm2, %v29319_v60 }
 0xec8   :  { %18590 = vmatpush3.bf16.msra.mxu0 %v21202_v26  ;;  %18610 = vmatpush3.bf16.msra.mxu1 %v21203_v6 }
 0xec9   :  { %18591 = vmatprep.subr.bf16.mxu0 %v29319_v60  ;;  %18611 = vmatprep.subr.bf16.mxu1 %v29319_v60 }
 0xecc   :  { %18592 = vmatpush3.bf16.msra.mxu0 %v21204_v0  ;;  %18612 = vmatpush3.bf16.msra.mxu1 %v21205_v10 }
 0xecd   :  { %18593 = vmatprep.subr.bf16.mxu0 %v29319_v60  ;;  %18613 = vmatprep.subr.bf16.mxu1 %v29319_v60 }
 0xed0   :  { %18594 = vmatpush3.bf16.msra.mxu0 %v21206_v47  ;;  %18614 = vmatpush3.bf16.msra.mxu1 %v21207_v45 }
 0xed1   :  { %18595 = vmatprep.subr.bf16.mxu0 %v29319_v60  ;;  %18615 = vmatprep.subr.bf16.mxu1 %v29319_v60 }
 0xed4   :  { %18596 = vmatpush3.bf16.msra.mxu0 %v21208_v21  ;;  %18616 = vmatpush3.bf16.msra.mxu1 %v21209_v34 }
 0xed5   :  { %18597 = vmatprep.subr.bf16.mxu0 %v29319_v60  ;;  %18617 = vmatprep.subr.bf16.mxu1 %v29319_v60 }
 0xed8   :  { %18598 = vmatpush3.bf16.msra.mxu0 %v21210_v51  ;;  %18618 = vmatpush3.bf16.msra.mxu1 %v21211_v48 }
 0xed9   :  { %18599 = vmatprep.subr.bf16.mxu0 %v29319_v60  ;;  %18619 = vmatprep.subr.bf16.mxu1 %v29319_v60 }
 0xedc   :  { %18600 = vmatpush3.bf16.msra.mxu0 %v21212_v31  ;;  %18620 = vmatpush3.bf16.msra.mxu1 %v21213_v24 }
 0xedd   :  { %18601 = vmatprep.subr.bf16.mxu0 %v29319_v60  ;;  %18621 = vmatprep.subr.bf16.mxu1 %v29319_v60 }
 0xee0   :  { %18602 = vmatpush3.bf16.msra.mxu0 %v21214_v52  ;;  %18622 = vmatpush3.bf16.msra.mxu1 %v21215_v4 }
 0xee3   :  { %18604 = vmatmul.mubr.bf16.vlgmr.msra.gmra.mrb[96].mxu0 %v15356_v59  ;;  %18624 = vmatmul.mubr.bf16.vlgmr.msra.gmra.mrb[112].mxu1 %v15463_v46 }
 0xf96   :  { %v15262_v16 = vpop.f32.mrb[92].mxu0  ;;  %v15350_v13 = vpop.f32.mrb[108].mxu1 }
 0xf97   :  { %v15351_v38 = vadd.f32 %v15350_v13, %v15262_v16  ;;  %v18565_v30 = vpop.f32.mrb[93].mxu0  ;;  %v18585_v35 = vpop.f32.mrb[109].mxu1 }
 0xf98   :  { %v15265_v29 = vpop.f32.mrb[94].mxu0  ;;  %v15353_v42 = vpop.f32.mrb[110].mxu1 }
 0xf99   :  { %v18566_v17 = vpop.f32.mrb[95].mxu0  ;;  %v18586_v63 = vpop.f32.mrb[111].mxu1 }
 0xfb6   :  { %v15456_v1 = vpop.f32.mrb[96].mxu0  ;;  %v15563_v58 = vpop.f32.mrb[112].mxu1 }
 0xfb7   :  { %v15462_v28 = vadd.f32 %v15456_v1, %v15351_v38  ;;  %v18605_v33 = vpop.f32.mrb[97].mxu0  ;;  %v18625_v60 = vpop.f32.mrb[113].mxu1 }
 0xfb8   :  { %v15459_v19 = vpop.f32.mrb[98].mxu0  ;;  %v15566_v2 = vpop.f32.mrb[114].mxu1 }
 0xfb9   :  { %v15569_v25 = vadd.f32 %v15563_v58, %v15462_v28  ;;  %v18606_v55 = vpop.f32.mrb[99].mxu0  ;;  %v18626_v40 = vpop.f32.mrb[115].mxu1 }
 0xfbb   :  { %v15577_v44 = vadd.f32 %v16350_v43, %v15569_v25 }
 0xfbd   :  { %15579 = vst.msk [vmem:[#allocation2] sm:$0xff] %vm15578_vm3, %v15577_v44 }
 0xfbe   :  { %21233 = shalt.err (!%p21230_p4)
}
 0xfbf   :  { %s21234_s16 = scalar_lea.hbm %s28023_s9, 128 }
 0xfc0   :  { %p21235_p5 = scmp.ne.s32.totalorder %s28023_s9, %s21234_s16  ;;  %p21238_p6 = scmp.lt.u32.totalorder %s21234_s16, %s28023_s9 }
 0xfc2   :  { %p21240_p7 = pnand %p21238_p6, %p21235_p5 }
 0xfc4   :  { %21243 = shalt.err (!%p21240_p7)
}
 0xfc5   :  { %15589 = dma.vmem_to_hbm [thread:$0]  %s15587_s15, 128, %s28023_s9, [#allocation3]  }
 0xfc6   :  { %21244 = dma.done.wait [#allocation3], 128  }
 0xfc7   :  { %21245 = vsyncadd [#allocation3], 4294967168 }
 0xfc8   :  { %15605 = vsyncpa [#allocation3], 1 }

</bundles_post_ra>
